<compile_context>
chip_gen: v6e
topology: v6e:2x2x1
jax: 0.10.0
libtpu: 0.0.40
codegen_flags: <defaults>
</compile_context>

<pallas_src>
import numpy as np
import jax
import jax.numpy as jnp
from jax.experimental import pallas as pl
from jax.experimental.pallas import tpu as pltpu

# ----------------------------- model config ---------------------------------
# Real config: seq_len=64, audio feature dim 2048, 256x256 id/pose images.
# The __main__ below uses a scaled-down config so the script runs quickly.
SEQ_LEN = 8
BLOCK_EXP = 4
NUM_BLOCKS = 2
MAX_FEAT = 32
NUM_KP = 2
IN_CH = 6          # forward builds 2 (audio) + 3 (id) + 1 (pose) channels
# TODO(synk): the PyTorch __init__ hardcodes num_channels=5, inconsistent with the
# 6-channel embedding built in forward(); parameters are sized for 6 so it runs.
BN_EPS = 1e-5
# TODO(synk): BatchNorm3d folded assuming eval mode with default running stats
# (mean=0, var=1, gamma=1, beta=0); derive alpha/beta from real BN state if present.
TEMPERATURE = 0.1

# 13-tap Gaussian of AntiAliasInterpolation2d(scale=0.25): sigma=1.5, ksize=13, pad=6
_SIGMA, _KSIZE = 1.5, 13
_e = np.exp(-(np.arange(_KSIZE, dtype=np.float32) - (_KSIZE - 1) / 2.0) ** 2
            / (2.0 * _SIGMA ** 2))
BLUR_TAPS = (_e / _e.sum()).astype(np.float32)


# ------------------- fused im2col Conv3d (+BN+ReLU) kernel -------------------
def _make_conv3d_kernel(kh, kw, Ho, Wo, Cin, Cout, relu):
    def kernel(x_ref, w_ref, a_ref, b_ref, o_ref):
        t = pl.program_id(2)                       # temporal tap (reduction axis)

        @pl.when(t == 0)
        def _():
            o_ref[...] = jnp.zeros_like(o_ref)

        xs = x_ref[...]                            # (Hp, Wp, Cin) bf16
        acc = jnp.zeros((Ho * Wo, Cout), jnp.float32)
        for dy in range(kh):
            for dx in range(kw):
                win = xs[dy:dy + Ho, dx:dx + Wo, :].reshape(Ho * Wo, Cin)
                acc = acc + jnp.dot(win, w_ref[dy, dx],
                                    preferred_element_type=jnp.float32)
        o_ref[...] += acc.reshape(Ho, Wo, Cout)

        @pl.when(t == pl.num_programs(2) - 1)
        def _():
            y = (o_ref[...] * a_ref[...].reshape(1, 1, Cout)
                 + b_ref[...].reshape(1, 1, Cout))
            if relu:
                y = jnp.maximum(y, 0.0)
            o_ref[...] = y
    return kernel


def conv3d_nhwc(x, w, alpha, beta, padding, relu=False):
    """x: (N, D, H, W, Cin) f32 channels-last; w: (Cout, Cin, kt, kh, kw) torch layout.
    Returns (N, Do, Ho, Wo, Cout) f32 with fused alpha/beta (+ReLU) epilogue."""
    N, D, H, W, Cin = x.shape
    Cout, Cin_w, kt, kh, kw = w.shape
    assert Cin_w == Cin
    pt, ph, pw = padding
    Do = D + 2 * pt - kt + 1
    Ho = H + 2 * ph - kh + 1
    Wo = W + 2 * pw - kw + 1
    Hp, Wp = H + 2 * ph, W + 2 * pw

    # pad the (small, un-expanded) activation once; bf16 operands for the MXU
    xp = jnp.pad(x, ((0, 0), (pt, pt), (ph, ph), (pw, pw), (0, 0))).astype(jnp.bfloat16)
    wf = jnp.transpose(w, (2, 3, 4, 1, 0)).astype(jnp.bfloat16)   # (kt,kh,kw,Cin,Cout)
    al = alpha.reshape(1, Cout).astype(jnp.float32)
    be = beta.reshape(1, Cout).astype(jnp.float32)

    return pl.pallas_call(
        _make_conv3d_kernel(kh, kw, Ho, Wo, Cin, Cout, relu),
        out_shape=jax.ShapeDtypeStruct((N, Do, Ho, Wo, Cout), jnp.float32),
        grid=(N, Do, kt),
        in_specs=[
            # shifted depth slab per temporal tap: fused im2col over depth
            pl.BlockSpec((None, None, Hp, Wp, Cin),
                         lambda n, d, t: (n, d + t, 0, 0, 0)),
            pl.BlockSpec((None, kh, kw, Cin, Cout),
                         lambda n, d, t: (t, 0, 0, 0, 0)),
            pl.BlockSpec((1, Cout), lambda n, d, t: (0, 0)),
            pl.BlockSpec((1, Cout), lambda n, d, t: (0, 0)),
        ],
        out_specs=pl.BlockSpec((None, None, Ho, Wo, Cout),
                               lambda n, d, t: (n, d, 0, 0, 0)),
        compiler_params=pltpu.CompilerParams(
            dimension_semantics=("parallel", "parallel", "arbitrary")),
    )(xp, wf, al, be)


# ------------- AntiAliasInterpolation2d: fused blur + /4 decimation ----------
def _blur_matrices(H, W):
    taps = BLUR_TAPS
    K = len(taps)
    Hq, Wq = H // 4, W // 4
    Br = np.zeros((Hq, H + K - 1), np.float32)
    for r in range(Hq):
        Br[r, 4 * r: 4 * r + K] = taps
    Bc = np.zeros((W + K - 1, Wq), np.float32)
    for c in range(Wq):
        Bc[4 * c: 4 * c + K, c] = taps
    return jnp.asarray(Br), jnp.asarray(Bc)


def _make_blur_kernel(G):
    def kernel(x_ref, br_ref, bc_ref, o_ref):
        bc = bc_ref[...]                            # (Wp, Wq)
        br = br_ref[...]                            # (Hq, Hp)
        for g in range(G):
            t = jnp.dot(x_ref[g], bc, preferred_element_type=jnp.float32)
            o_ref[g] = jnp.dot(br, t, preferred_element_type=jnp.float32)
    return kernel


def antialias_down(x):
    """Depthwise 13x13 Gaussian (pad 6) + stride-4 decimation, fused in-kernel."""
    B, C, H, W = x.shape
    assert H % 4 == 0 and W % 4 == 0
    ka = _KSIZE // 2
    Hq, Wq = H // 4, W // 4
    Hp, Wp = H + 2 * ka, W + 2 * ka
    P = B * C
    G = 8                                           # planes per grid step
    Pp = pl.cdiv(P, G) * G
    xpl = jnp.pad(x.reshape(P, H, W), ((0, Pp - P), (ka, ka), (ka, ka)))
    Br, Bc = _blur_matrices(H, W)
    out = pl.pallas_call(
        _make_blur_kernel(G),
        out_shape=jax.ShapeDtypeStruct((Pp, Hq, Wq), jnp.float32),
        grid=(Pp // G,),
        in_specs=[pl.BlockSpec((G, Hp, Wp), lambda i: (i, 0, 0)),
                  pl.BlockSpec((Hq, Hp), lambda i: (0, 0)),
                  pl.BlockSpec((Wp, Wq), lambda i: (0, 0))],
        out_specs=pl.BlockSpec((G, Hq, Wq), lambda i: (i, 0, 0)),
        compiler_params=pltpu.CompilerParams(dimension_semantics=("parallel",)),
    )(xpl, Br, Bc)
    return out[:P].reshape(B, C, Hq, Wq)


# -------------- softmax(T) + gaussian2kp + jacobian reduction ----------------
def _kp_reduce_kernel(pred_ref, grid_ref, jm_ref, val_ref, jac_ref):
    p = pred_ref[...] * (1.0 / TEMPERATURE)          # (M, K, S)
    m = jnp.max(p, axis=-1, keepdims=True)
    e = jnp.exp(p - m)
    s = jnp.sum(e, axis=-1, keepdims=True)
    h = e / s                                        # softmax heatmap
    Sp = p.shape[-1]
    gx = grid_ref[0:1, :].reshape(1, 1, Sp)
    gy = grid_ref[1:2, :].reshape(1, 1, Sp)
    vx = jnp.sum(h * gx, axis=-1)                    # (M, K)
    vy = jnp.sum(h * gy, axis=-1)
    val_ref[...] = jnp.stack([vx, vy], axis=-1)      # (M, K, 2)
    cols = [jnp.sum(h * jm_ref[:, :, j, :], axis=-1) for j in range(4)]
    jac_ref[...] = jnp.stack(cols, axis=-1)          # (M, K, 4)


def kp_reduce(pred, grid_t, jm):
    M, K, _ = pred.shape
    return pl.pallas_call(
        _kp_reduce_kernel,
        out_shape=(jax.ShapeDtypeStruct((M, K, 2), jnp.float32),
                   jax.ShapeDtypeStruct((M, K, 4), jnp.float32)),
    )(pred, grid_t, jm)


def _coordinate_grid_t(h, w):
    xs = 2.0 * (jnp.arange(w, dtype=jnp.float32) / (w - 1)) - 1.0
    ys = 2.0 * (jnp.arange(h, dtype=jnp.float32) / (h - 1)) - 1.0
    xx = jnp.tile(xs[None, :], (h, 1)).reshape(-1)
    yy = jnp.tile(ys[:, None], (1, w)).reshape(-1)
    return jnp.stack([xx, yy], axis=0)               # (2, h*w): row0=x, row1=y


def _nearest_idx(out_size, in_size):
    # PyTorch F.interpolate(mode='nearest'): src = floor(dst * in/out)
    return (jnp.arange(out_size, dtype=jnp.float32) * (in_size / out_size)).astype(jnp.int32)


# ------------------------------ forward pass ---------------------------------
def forward(params, audio, id_img, pose):
    bs, _, t_in, dim = audio.shape
    S = SEQ_LEN
    assert dim % S == 0, "audio feature dim must be divisible by seq_len"

    # audio preprocessing (nearest interp / reshape / flip) -- XLA glue
    a = jnp.transpose(audio[:, 0], (0, 2, 1))               # (bs, dim, t_in)
    a = a[:, :, _nearest_idx(S, t_in)]                      # (bs, dim, S)
    a = a.reshape(bs, dim // S, S, S)
    a = jnp.transpose(a, (0, 3, 1, 2))                      # (bs, S, dim//S, S)
    a = a[:, :, _nearest_idx(S, dim // S), :]               # (bs, D=S, H=S, W=S)
    zheng = a
    fan = jnp.flip(a, axis=(1, 2))                          # torch flip dims [2,3]

    # anti-alias downsample (fused blur + decimation kernel)
    id_feat = antialias_down(id_img)                        # (bs, 3, S, S)
    pose_feat = antialias_down(pose)                        # (bs, S, S, S)

    # channels-last embedding (bs, D, H, W, 6): [audio x2, id x3, pose x1]
    id_rep = jnp.broadcast_to(
        jnp.transpose(id_feat, (0, 2, 3, 1))[:, None], (bs, S, S, S, 3))
    emb = jnp.concatenate(
        [zheng[..., None], fan[..., None], id_rep, pose_feat[..., None]], axis=-1)

    # Hourglass3D predictor (fused Pallas convs, channels-last throughout)
    outs = [emb]
    h = emb
    for blk in params['down_blocks']:
        h = conv3d_nhwc(h, blk['w'], blk['alpha'], blk['beta'], (1, 1, 1), relu=True)
        n_, d_, hh, ww, c_ = h.shape
        h = h.reshape(n_, d_, hh // 2, 2, ww // 2, 2, c_).mean(axis=(3, 5))  # AvgPool3d (1,2,2)
        outs.append(h)
    out = outs.pop()
    for blk in params['up_blocks']:
        out = jnp.repeat(jnp.repeat(out, 2, axis=2), 2, axis=3)  # nearest upsample (1,2,2)
        out = conv3d_nhwc(out, blk['w'], blk['alpha'], blk['beta'], (1, 1, 1), relu=True)
        out = jnp.concatenate([out, outs.pop()], axis=-1)
    feature_map = out                                       # (bs, S, S, S, 10)
    Cf = feature_map.shape[-1]

    # kp head (7x7x7, pad (3,0,0)) fused with the jacobian head (7x7, pad 0):
    # the jac weights occupy only the center temporal tap of a combined conv.
    kp_w = params['kp_w']                                   # (K, Cf, 7, 7, 7)
    kt = kp_w.shape[2]
    jac_w3 = jnp.zeros((4 * NUM_KP, Cf, kt, kt, kt), jnp.float32)
    jac_w3 = jac_w3.at[:, :, kt // 2, :, :].set(params['jac_w'])
    w_comb = jnp.concatenate([kp_w, jac_w3], axis=0)        # (K+4K, Cf, 7, 7, 7)
    b_comb = jnp.concatenate([params['kp_b'], params['jac_b']])
    head = conv3d_nhwc(feature_map, w_comb,
                       jnp.ones((NUM_KP + 4 * NUM_KP,), jnp.float32), b_comb,
                       (3, 0, 0), relu=False)               # (bs, S, Ho, Wo, 10)
    Ho, Wo = head.shape[2], head.shape[3]

    prediction = jnp.transpose(head[..., :NUM_KP], (0, 1, 4, 2, 3))
    prediction = prediction.reshape(bs * S, NUM_KP, Ho, Wo)
    jacobian_map = jnp.transpose(head[..., NUM_KP:], (0, 1, 4, 2, 3))
    jacobian_map = jacobian_map.reshape(bs * S, NUM_KP, 4, Ho, Wo)

    # softmax(T=0.1) + gaussian2kp + heatmap*jacobian reductions (Pallas)
    M, Sp = bs * S, Ho * Wo
    value, jac = kp_reduce(prediction.reshape(M, NUM_KP, Sp),
                           _coordinate_grid_t(Ho, Wo),
                           jacobian_map.reshape(M, NUM_KP, 4, Sp))

    return {
        'value': value.reshape(-1, S, NUM_KP, 2),
        'jacobian_map': jacobian_map,
        'jacobian': jac.reshape(-1, S, NUM_KP, 2, 2),
        'pred_fature': prediction,
    }


# ------------------------------ parameters -----------------------------------
def init_params(key):
    bn_scale = float(1.0 / np.sqrt(1.0 + BN_EPS))
    keys = iter(jax.random.split(key, 32))

    def conv_init(cin, cout, ksz, scale=0.05):
        w = scale * jax.random.normal(next(keys), (cout, cin) + ksz, jnp.float32)
        b = scale * jax.random.normal(next(keys), (cout,), jnp.float32)
        return w, b

    params = {'down_blocks': [], 'up_blocks': []}
    for i in range(NUM_BLOCKS):                              # Encoder3D
        cin = IN_CH if i == 0 else min(MAX_FEAT, BLOCK_EXP * (2 ** i))
        cout = min(MAX_FEAT, BLOCK_EXP * (2 ** (i + 1)))
        w, b = conv_init(cin, cout, (3, 3, 3))
        params['down_blocks'].append(
            {'w': w, 'alpha': jnp.full((cout,), bn_scale, jnp.float32),
             'beta': b * bn_scale})
    for i in reversed(range(NUM_BLOCKS)):                    # Decoder3D
        cin = (1 if i == NUM_BLOCKS - 1 else 2) * min(MAX_FEAT, BLOCK_EXP * (2 ** (i + 1)))
        cout = min(MAX_FEAT, BLOCK_EXP * (2 ** i))
        w, b = conv_init(cin, cout, (3, 3, 3))
        params['up_blocks'].append(
            {'w': w, 'alpha': jnp.full((cout,), bn_scale, jnp.float32),
             'beta': b * bn_scale})
    out_filters = min(MAX_FEAT, BLOCK_EXP) + IN_CH           # 10
    params['kp_w'], params['kp_b'] = conv_init(out_filters, NUM_KP, (7, 7, 7))
    params['jac_w'] = jnp.zeros((4 * NUM_KP, out_filters, 7, 7), jnp.float32)
    params['jac_b'] = jnp.array([1.0, 0.0, 0.0, 1.0] * NUM_KP, jnp.float32)
    return params


# --------------------------------- main --------------------------------------
if __name__ == "__main__":
    key = jax.random.PRNGKey(0)
    k_par, k_aud, k_id, k_pose = jax.random.split(key, 4)
    params = init_params(k_par)

    bs, t_in = 1, 5
    dim = SEQ_LEN * 4                                        # audio feature dim (real: 2048)
    audio = jax.random.normal(k_aud, (bs, 1, t_in, dim), jnp.float32)
    id_img = jax.random.normal(k_id, (bs, 3, 4 * SEQ_LEN, 4 * SEQ_LEN), jnp.float32)
    pose = jax.random.normal(k_pose, (bs, SEQ_LEN, 4 * SEQ_LEN, 4 * SEQ_LEN), jnp.float32)

    fwd = jax.jit(forward)
    out = jax.block_until_ready(fwd(params, audio, id_img, pose))

    Hh = SEQ_LEN - 6                                         # head spatial output
    assert out['value'].shape == (bs, SEQ_LEN, NUM_KP, 2)
    assert out['jacobian'].shape == (bs, SEQ_LEN, NUM_KP, 2, 2)
    assert out['jacobian_map'].shape == (bs * SEQ_LEN, NUM_KP, 4, Hh, Hh)
    assert out['pred_fature'].shape == (bs * SEQ_LEN, NUM_KP, Hh, Hh)
    # keypoints are softmax-weighted means over a [-1, 1] grid
    assert float(jnp.max(jnp.abs(out['value']))) <= 1.0 + 1e-3
    # jacobian head has zero weight + identity bias -> jacobians must be ~identity
    eye = jnp.broadcast_to(jnp.eye(2, dtype=jnp.float32), out['jacobian'].shape)
    assert bool(jnp.allclose(out['jacobian'], eye, atol=1e-3))
    print("KERNEL_OK")
</pallas_src>

<mosaic_0001>
module attributes {stable_mosaic.version = 11 : i64} {
  func.func @kernel(%arg0: i32, %arg1: memref<8x44x44xf32, #tpu.memory_space<vmem>>, %arg2: memref<8x44xf32, #tpu.memory_space<vmem>>, %arg3: memref<44x8xf32, #tpu.memory_space<vmem>>, %arg4: memref<8x8x8xf32, #tpu.memory_space<vmem>>) attributes {dimension_semantics = [#tpu.dimension_semantics<parallel>], iteration_bounds = array<i64: 1>, scalar_prefetch = 0 : i64, scratch_operands = 0 : i64, tpu.core_type = #tpu.core_type<tc>, window_params = [{transform_indices = @transform_0, window_bounds = array<i64: 8, 44, 44>}, {pipeline_mode = #tpu.pipeline_mode<synchronous>, transform_indices = @transform_1, window_bounds = array<i64: 8, 44>}, {pipeline_mode = #tpu.pipeline_mode<synchronous>, transform_indices = @transform_2, window_bounds = array<i64: 44, 8>}, {transform_indices = @transform_3, window_bounds = array<i64: 8, 8, 8>}]} {
    %c0 = arith.constant 0 : index
    %c0_0 = arith.constant 0 : index
    %0 = vector.load %arg3[%c0, %c0_0] : memref<44x8xf32, #tpu.memory_space<vmem>>, vector<44x8xf32>
    %c0_1 = arith.constant 0 : index
    %c0_2 = arith.constant 0 : index
    %1 = vector.load %arg2[%c0_1, %c0_2] : memref<8x44xf32, #tpu.memory_space<vmem>>, vector<8x44xf32>
    %c0_3 = arith.constant 0 : index
    %c0_4 = arith.constant 0 : index
    %c0_5 = arith.constant 0 : index
    %2 = vector.load %arg1[%c0_3, %c0_4, %c0_5] : memref<8x44x44xf32, #tpu.memory_space<vmem>>, vector<1x44x44xf32>
    %3 = vector.shape_cast %2 : vector<1x44x44xf32> to vector<44x44xf32>
    %cst = arith.constant dense<0.000000e+00> : vector<44x8xf32>
    %4 = tpu.matmul %3, %0, %cst {dimension_numbers = #tpu.dot_dimension_numbers<[1], [0], [0], [1], [0, 0, 1, 1], [], []>} : vector<44x44xf32>, vector<44x8xf32>, vector<44x8xf32> -> vector<44x8xf32>
    %cst_6 = arith.constant dense<0.000000e+00> : vector<8x8xf32>
    %5 = tpu.matmul %1, %4, %cst_6 {dimension_numbers = #tpu.dot_dimension_numbers<[1], [0], [0], [1], [0, 0, 1, 1], [], []>} : vector<8x44xf32>, vector<44x8xf32>, vector<8x8xf32> -> vector<8x8xf32>
    %c0_7 = arith.constant 0 : index
    %c0_8 = arith.constant 0 : index
    %c0_9 = arith.constant 0 : index
    %6 = vector.load %arg4[%c0_7, %c0_8, %c0_9] : memref<8x8x8xf32, #tpu.memory_space<vmem>>, vector<1x8x8xf32>
    %7 = vector.shape_cast %6 : vector<1x8x8xf32> to vector<8x8xf32>
    %8 = vector.shape_cast %5 : vector<8x8xf32> to vector<1x8x8xf32>
    tpu.vector_store %arg4[%c0_7, %c0_8, %c0_9], %8 {strides = array<i32>} : memref<8x8x8xf32, #tpu.memory_space<vmem>>, vector<1x8x8xf32>,
    %c1 = arith.constant 1 : index
    %c0_10 = arith.constant 0 : index
    %c0_11 = arith.constant 0 : index
    %9 = vector.load %arg1[%c1, %c0_10, %c0_11] : memref<8x44x44xf32, #tpu.memory_space<vmem>>, vector<1x44x44xf32>
    %10 = vector.shape_cast %9 : vector<1x44x44xf32> to vector<44x44xf32>
    %cst_12 = arith.constant dense<0.000000e+00> : vector<44x8xf32>
    %11 = tpu.matmul %10, %0, %cst_12 {dimension_numbers = #tpu.dot_dimension_numbers<[1], [0], [0], [1], [0, 0, 1, 1], [], []>} : vector<44x44xf32>, vector<44x8xf32>, vector<44x8xf32> -> vector<44x8xf32>
    %cst_13 = arith.constant dense<0.000000e+00> : vector<8x8xf32>
    %12 = tpu.matmul %1, %11, %cst_13 {dimension_numbers = #tpu.dot_dimension_numbers<[1], [0], [0], [1], [0, 0, 1, 1], [], []>} : vector<8x44xf32>, vector<44x8xf32>, vector<8x8xf32> -> vector<8x8xf32>
    %c1_14 = arith.constant 1 : index
    %c0_15 = arith.constant 0 : index
    %c0_16 = arith.constant 0 : index
    %13 = vector.load %arg4[%c1_14, %c0_15, %c0_16] : memref<8x8x8xf32, #tpu.memory_space<vmem>>, vector<1x8x8xf32>
    %14 = vector.shape_cast %13 : vector<1x8x8xf32> to vector<8x8xf32>
    %15 = vector.shape_cast %12 : vector<8x8xf32> to vector<1x8x8xf32>
    tpu.vector_store %arg4[%c1_14, %c0_15, %c0_16], %15 {strides = array<i32>} : memref<8x8x8xf32, #tpu.memory_space<vmem>>, vector<1x8x8xf32>,
    %c2 = arith.constant 2 : index
    %c0_17 = arith.constant 0 : index
    %c0_18 = arith.constant 0 : index
    %16 = vector.load %arg1[%c2, %c0_17, %c0_18] : memref<8x44x44xf32, #tpu.memory_space<vmem>>, vector<1x44x44xf32>
    %17 = vector.shape_cast %16 : vector<1x44x44xf32> to vector<44x44xf32>
    %cst_19 = arith.constant dense<0.000000e+00> : vector<44x8xf32>
    %18 = tpu.matmul %17, %0, %cst_19 {dimension_numbers = #tpu.dot_dimension_numbers<[1], [0], [0], [1], [0, 0, 1, 1], [], []>} : vector<44x44xf32>, vector<44x8xf32>, vector<44x8xf32> -> vector<44x8xf32>
    %cst_20 = arith.constant dense<0.000000e+00> : vector<8x8xf32>
    %19 = tpu.matmul %1, %18, %cst_20 {dimension_numbers = #tpu.dot_dimension_numbers<[1], [0], [0], [1], [0, 0, 1, 1], [], []>} : vector<8x44xf32>, vector<44x8xf32>, vector<8x8xf32> -> vector<8x8xf32>
    %c2_21 = arith.constant 2 : index
    %c0_22 = arith.constant 0 : index
    %c0_23 = arith.constant 0 : index
    %20 = vector.load %arg4[%c2_21, %c0_22, %c0_23] : memref<8x8x8xf32, #tpu.memory_space<vmem>>, vector<1x8x8xf32>
    %21 = vector.shape_cast %20 : vector<1x8x8xf32> to vector<8x8xf32>
    %22 = vector.shape_cast %19 : vector<8x8xf32> to vector<1x8x8xf32>
    tpu.vector_store %arg4[%c2_21, %c0_22, %c0_23], %22 {strides = array<i32>} : memref<8x8x8xf32, #tpu.memory_space<vmem>>, vector<1x8x8xf32>,
    %c3 = arith.constant 3 : index
    %c0_24 = arith.constant 0 : index
    %c0_25 = arith.constant 0 : index
    %23 = vector.load %arg1[%c3, %c0_24, %c0_25] : memref<8x44x44xf32, #tpu.memory_space<vmem>>, vector<1x44x44xf32>
    %24 = vector.shape_cast %23 : vector<1x44x44xf32> to vector<44x44xf32>
    %cst_26 = arith.constant dense<0.000000e+00> : vector<44x8xf32>
    %25 = tpu.matmul %24, %0, %cst_26 {dimension_numbers = #tpu.dot_dimension_numbers<[1], [0], [0], [1], [0, 0, 1, 1], [], []>} : vector<44x44xf32>, vector<44x8xf32>, vector<44x8xf32> -> vector<44x8xf32>
    %cst_27 = arith.constant dense<0.000000e+00> : vector<8x8xf32>
    %26 = tpu.matmul %1, %25, %cst_27 {dimension_numbers = #tpu.dot_dimension_numbers<[1], [0], [0], [1], [0, 0, 1, 1], [], []>} : vector<8x44xf32>, vector<44x8xf32>, vector<8x8xf32> -> vector<8x8xf32>
    %c3_28 = arith.constant 3 : index
    %c0_29 = arith.constant 0 : index
    %c0_30 = arith.constant 0 : index
    %27 = vector.load %arg4[%c3_28, %c0_29, %c0_30] : memref<8x8x8xf32, #tpu.memory_space<vmem>>, vector<1x8x8xf32>
    %28 = vector.shape_cast %27 : vector<1x8x8xf32> to vector<8x8xf32>
    %29 = vector.shape_cast %26 : vector<8x8xf32> to vector<1x8x8xf32>
    tpu.vector_store %arg4[%c3_28, %c0_29, %c0_30], %29 {strides = array<i32>} : memref<8x8x8xf32, #tpu.memory_space<vmem>>, vector<1x8x8xf32>,
    %c4 = arith.constant 4 : index
    %c0_31 = arith.constant 0 : index
    %c0_32 = arith.constant 0 : index
    %30 = vector.load %arg1[%c4, %c0_31, %c0_32] : memref<8x44x44xf32, #tpu.memory_space<vmem>>, vector<1x44x44xf32>
    %31 = vector.shape_cast %30 : vector<1x44x44xf32> to vector<44x44xf32>
    %cst_33 = arith.constant dense<0.000000e+00> : vector<44x8xf32>
    %32 = tpu.matmul %31, %0, %cst_33 {dimension_numbers = #tpu.dot_dimension_numbers<[1], [0], [0], [1], [0, 0, 1, 1], [], []>} : vector<44x44xf32>, vector<44x8xf32>, vector<44x8xf32> -> vector<44x8xf32>
    %cst_34 = arith.constant dense<0.000000e+00> : vector<8x8xf32>
    %33 = tpu.matmul %1, %32, %cst_34 {dimension_numbers = #tpu.dot_dimension_numbers<[1], [0], [0], [1], [0, 0, 1, 1], [], []>} : vector<8x44xf32>, vector<44x8xf32>, vector<8x8xf32> -> vector<8x8xf32>
    %c4_35 = arith.constant 4 : index
    %c0_36 = arith.constant 0 : index
    %c0_37 = arith.constant 0 : index
    %34 = vector.load %arg4[%c4_35, %c0_36, %c0_37] : memref<8x8x8xf32, #tpu.memory_space<vmem>>, vector<1x8x8xf32>
    %35 = vector.shape_cast %34 : vector<1x8x8xf32> to vector<8x8xf32>
    %36 = vector.shape_cast %33 : vector<8x8xf32> to vector<1x8x8xf32>
    tpu.vector_store %arg4[%c4_35, %c0_36, %c0_37], %36 {strides = array<i32>} : memref<8x8x8xf32, #tpu.memory_space<vmem>>, vector<1x8x8xf32>,
    %c5 = arith.constant 5 : index
    %c0_38 = arith.constant 0 : index
    %c0_39 = arith.constant 0 : index
    %37 = vector.load %arg1[%c5, %c0_38, %c0_39] : memref<8x44x44xf32, #tpu.memory_space<vmem>>, vector<1x44x44xf32>
    %38 = vector.shape_cast %37 : vector<1x44x44xf32> to vector<44x44xf32>
    %cst_40 = arith.constant dense<0.000000e+00> : vector<44x8xf32>
    %39 = tpu.matmul %38, %0, %cst_40 {dimension_numbers = #tpu.dot_dimension_numbers<[1], [0], [0], [1], [0, 0, 1, 1], [], []>} : vector<44x44xf32>, vector<44x8xf32>, vector<44x8xf32> -> vector<44x8xf32>
    %cst_41 = arith.constant dense<0.000000e+00> : vector<8x8xf32>
    %40 = tpu.matmul %1, %39, %cst_41 {dimension_numbers = #tpu.dot_dimension_numbers<[1], [0], [0], [1], [0, 0, 1, 1], [], []>} : vector<8x44xf32>, vector<44x8xf32>, vector<8x8xf32> -> vector<8x8xf32>
    %c5_42 = arith.constant 5 : index
    %c0_43 = arith.constant 0 : index
    %c0_44 = arith.constant 0 : index
    %41 = vector.load %arg4[%c5_42, %c0_43, %c0_44] : memref<8x8x8xf32, #tpu.memory_space<vmem>>, vector<1x8x8xf32>
    %42 = vector.shape_cast %41 : vector<1x8x8xf32> to vector<8x8xf32>
    %43 = vector.shape_cast %40 : vector<8x8xf32> to vector<1x8x8xf32>
    tpu.vector_store %arg4[%c5_42, %c0_43, %c0_44], %43 {strides = array<i32>} : memref<8x8x8xf32, #tpu.memory_space<vmem>>, vector<1x8x8xf32>,
    %c6 = arith.constant 6 : index
    %c0_45 = arith.constant 0 : index
    %c0_46 = arith.constant 0 : index
    %44 = vector.load %arg1[%c6, %c0_45, %c0_46] : memref<8x44x44xf32, #tpu.memory_space<vmem>>, vector<1x44x44xf32>
    %45 = vector.shape_cast %44 : vector<1x44x44xf32> to vector<44x44xf32>
    %cst_47 = arith.constant dense<0.000000e+00> : vector<44x8xf32>
    %46 = tpu.matmul %45, %0, %cst_47 {dimension_numbers = #tpu.dot_dimension_numbers<[1], [0], [0], [1], [0, 0, 1, 1], [], []>} : vector<44x44xf32>, vector<44x8xf32>, vector<44x8xf32> -> vector<44x8xf32>
    %cst_48 = arith.constant dense<0.000000e+00> : vector<8x8xf32>
    %47 = tpu.matmul %1, %46, %cst_48 {dimension_numbers = #tpu.dot_dimension_numbers<[1], [0], [0], [1], [0, 0, 1, 1], [], []>} : vector<8x44xf32>, vector<44x8xf32>, vector<8x8xf32> -> vector<8x8xf32>
    %c6_49 = arith.constant 6 : index
    %c0_50 = arith.constant 0 : index
    %c0_51 = arith.constant 0 : index
    %48 = vector.load %arg4[%c6_49, %c0_50, %c0_51] : memref<8x8x8xf32, #tpu.memory_space<vmem>>, vector<1x8x8xf32>
    %49 = vector.shape_cast %48 : vector<1x8x8xf32> to vector<8x8xf32>
    %50 = vector.shape_cast %47 : vector<8x8xf32> to vector<1x8x8xf32>
    tpu.vector_store %arg4[%c6_49, %c0_50, %c0_51], %50 {strides = array<i32>} : memref<8x8x8xf32, #tpu.memory_space<vmem>>, vector<1x8x8xf32>,
    %c7 = arith.constant 7 : index
    %c0_52 = arith.constant 0 : index
    %c0_53 = arith.constant 0 : index
    %51 = vector.load %arg1[%c7, %c0_52, %c0_53] : memref<8x44x44xf32, #tpu.memory_space<vmem>>, vector<1x44x44xf32>
    %52 = vector.shape_cast %51 : vector<1x44x44xf32> to vector<44x44xf32>
    %cst_54 = arith.constant dense<0.000000e+00> : vector<44x8xf32>
    %53 = tpu.matmul %52, %0, %cst_54 {dimension_numbers = #tpu.dot_dimension_numbers<[1], [0], [0], [1], [0, 0, 1, 1], [], []>} : vector<44x44xf32>, vector<44x8xf32>, vector<44x8xf32> -> vector<44x8xf32>
    %cst_55 = arith.constant dense<0.000000e+00> : vector<8x8xf32>
    %54 = tpu.matmul %1, %53, %cst_55 {dimension_numbers = #tpu.dot_dimension_numbers<[1], [0], [0], [1], [0, 0, 1, 1], [], []>} : vector<8x44xf32>, vector<44x8xf32>, vector<8x8xf32> -> vector<8x8xf32>
    %c7_56 = arith.constant 7 : index
    %c0_57 = arith.constant 0 : index
    %c0_58 = arith.constant 0 : index
    %55 = vector.load %arg4[%c7_56, %c0_57, %c0_58] : memref<8x8x8xf32, #tpu.memory_space<vmem>>, vector<1x8x8xf32>
    %56 = vector.shape_cast %55 : vector<1x8x8xf32> to vector<8x8xf32>
    %57 = vector.shape_cast %54 : vector<8x8xf32> to vector<1x8x8xf32>
    tpu.vector_store %arg4[%c7_56, %c0_57, %c0_58], %57 {strides = array<i32>} : memref<8x8x8xf32, #tpu.memory_space<vmem>>, vector<1x8x8xf32>,
    return
  }
  func.func @transform_0(%arg0: i32) -> (i32, i32, i32) {
    %c0_i32 = arith.constant 0 : i32
    %c0_i32_0 = arith.constant 0 : i32
    %c0_i32_1 = arith.constant 0 : i32
    return %arg0, %c0_i32, %c0_i32_0 : i32, i32, i32
  }
  func.func @transform_1(%arg0: i32) -> (i32, i32) {
    %c0_i32 = arith.constant 0 : i32
    %c0_i32_0 = arith.constant 0 : i32
    %c0_i32_1 = arith.constant 0 : i32
    return %c0_i32, %c0_i32_0 : i32, i32
  }
  func.func @transform_2(%arg0: i32) -> (i32, i32) {
    %c0_i32 = arith.constant 0 : i32
    %c0_i32_0 = arith.constant 0 : i32
    %c0_i32_1 = arith.constant 0 : i32
    return %c0_i32, %c0_i32_0 : i32, i32
  }
  func.func @transform_3(%arg0: i32) -> (i32, i32, i32) {
    %c0_i32 = arith.constant 0 : i32
    %c0_i32_0 = arith.constant 0 : i32
    %c0_i32_1 = arith.constant 0 : i32
    return %arg0, %c0_i32, %c0_i32_0 : i32, i32, i32
  }
}

module attributes {stable_mosaic.version = 11 : i64} {
  func.func @kernel(%arg0: i32, %arg1: memref<8x44x44xf32, #tpu.memory_space<vmem>>, %arg2: memref<8x44xf32, #tpu.memory_space<vmem>>, %arg3: memref<44x8xf32, #tpu.memory_space<vmem>>, %arg4: memref<8x8x8xf32, #tpu.memory_space<vmem>>) attributes {dimension_semantics = [#tpu.dimension_semantics<parallel>], iteration_bounds = array<i64: 1>, scalar_prefetch = 0 : i64, scratch_operands = 0 : i64, tpu.core_type = #tpu.core_type<tc>, window_params = [{transform_indices = @transform_0, window_bounds = array<i64: 8, 44, 44>}, {pipeline_mode = #tpu.pipeline_mode<synchronous>, transform_indices = @transform_1, window_bounds = array<i64: 8, 44>}, {pipeline_mode = #tpu.pipeline_mode<synchronous>, transform_indices = @transform_2, window_bounds = array<i64: 44, 8>}, {transform_indices = @transform_3, window_bounds = array<i64: 8, 8, 8>}]} {
    %c0 = arith.constant 0 : index
    %c0_0 = arith.constant 0 : index
    %0 = vector.load %arg3[%c0, %c0_0] : memref<44x8xf32, #tpu.memory_space<vmem>>, vector<44x8xf32>
    %c0_1 = arith.constant 0 : index
    %c0_2 = arith.constant 0 : index
    %1 = vector.load %arg2[%c0_1, %c0_2] : memref<8x44xf32, #tpu.memory_space<vmem>>, vector<8x44xf32>
    %c0_3 = arith.constant 0 : index
    %c0_4 = arith.constant 0 : index
    %c0_5 = arith.constant 0 : index
    %2 = vector.load %arg1[%c0_3, %c0_4, %c0_5] : memref<8x44x44xf32, #tpu.memory_space<vmem>>, vector<1x44x44xf32>
    %3 = vector.shape_cast %2 : vector<1x44x44xf32> to vector<44x44xf32>
    %cst = arith.constant dense<0.000000e+00> : vector<44x8xf32>
    %4 = tpu.matmul %3, %0, %cst {dimension_numbers = #tpu.dot_dimension_numbers<[1], [0], [0], [1], [0, 0, 1, 1], [], []>} : vector<44x44xf32>, vector<44x8xf32>, vector<44x8xf32> -> vector<44x8xf32>
    %cst_6 = arith.constant dense<0.000000e+00> : vector<8x8xf32>
    %5 = tpu.matmul %1, %4, %cst_6 {dimension_numbers = #tpu.dot_dimension_numbers<[1], [0], [0], [1], [0, 0, 1, 1], [], []>} : vector<8x44xf32>, vector<44x8xf32>, vector<8x8xf32> -> vector<8x8xf32>
    %c0_7 = arith.constant 0 : index
    %c0_8 = arith.constant 0 : index
    %c0_9 = arith.constant 0 : index
    %6 = vector.load %arg4[%c0_7, %c0_8, %c0_9] : memref<8x8x8xf32, #tpu.memory_space<vmem>>, vector<1x8x8xf32>
    %7 = vector.shape_cast %6 : vector<1x8x8xf32> to vector<8x8xf32>
    %8 = vector.shape_cast %5 : vector<8x8xf32> to vector<1x8x8xf32>
    tpu.vector_store %arg4[%c0_7, %c0_8, %c0_9], %8 {strides = array<i32>} : memref<8x8x8xf32, #tpu.memory_space<vmem>>, vector<1x8x8xf32>,
    %c1 = arith.constant 1 : index
    %c0_10 = arith.constant 0 : index
    %c0_11 = arith.constant 0 : index
    %9 = vector.load %arg1[%c1, %c0_10, %c0_11] : memref<8x44x44xf32, #tpu.memory_space<vmem>>, vector<1x44x44xf32>
    %10 = vector.shape_cast %9 : vector<1x44x44xf32> to vector<44x44xf32>
    %cst_12 = arith.constant dense<0.000000e+00> : vector<44x8xf32>
    %11 = tpu.matmul %10, %0, %cst_12 {dimension_numbers = #tpu.dot_dimension_numbers<[1], [0], [0], [1], [0, 0, 1, 1], [], []>} : vector<44x44xf32>, vector<44x8xf32>, vector<44x8xf32> -> vector<44x8xf32>
    %cst_13 = arith.constant dense<0.000000e+00> : vector<8x8xf32>
    %12 = tpu.matmul %1, %11, %cst_13 {dimension_numbers = #tpu.dot_dimension_numbers<[1], [0], [0], [1], [0, 0, 1, 1], [], []>} : vector<8x44xf32>, vector<44x8xf32>, vector<8x8xf32> -> vector<8x8xf32>
    %c1_14 = arith.constant 1 : index
    %c0_15 = arith.constant 0 : index
    %c0_16 = arith.constant 0 : index
    %13 = vector.load %arg4[%c1_14, %c0_15, %c0_16] : memref<8x8x8xf32, #tpu.memory_space<vmem>>, vector<1x8x8xf32>
    %14 = vector.shape_cast %13 : vector<1x8x8xf32> to vector<8x8xf32>
    %15 = vector.shape_cast %12 : vector<8x8xf32> to vector<1x8x8xf32>
    tpu.vector_store %arg4[%c1_14, %c0_15, %c0_16], %15 {strides = array<i32>} : memref<8x8x8xf32, #tpu.memory_space<vmem>>, vector<1x8x8xf32>,
    %c2 = arith.constant 2 : index
    %c0_17 = arith.constant 0 : index
    %c0_18 = arith.constant 0 : index
    %16 = vector.load %arg1[%c2, %c0_17, %c0_18] : memref<8x44x44xf32, #tpu.memory_space<vmem>>, vector<1x44x44xf32>
    %17 = vector.shape_cast %16 : vector<1x44x44xf32> to vector<44x44xf32>
    %cst_19 = arith.constant dense<0.000000e+00> : vector<44x8xf32>
    %18 = tpu.matmul %17, %0, %cst_19 {dimension_numbers = #tpu.dot_dimension_numbers<[1], [0], [0], [1], [0, 0, 1, 1], [], []>} : vector<44x44xf32>, vector<44x8xf32>, vector<44x8xf32> -> vector<44x8xf32>
    %cst_20 = arith.constant dense<0.000000e+00> : vector<8x8xf32>
    %19 = tpu.matmul %1, %18, %cst_20 {dimension_numbers = #tpu.dot_dimension_numbers<[1], [0], [0], [1], [0, 0, 1, 1], [], []>} : vector<8x44xf32>, vector<44x8xf32>, vector<8x8xf32> -> vector<8x8xf32>
    %c2_21 = arith.constant 2 : index
    %c0_22 = arith.constant 0 : index
    %c0_23 = arith.constant 0 : index
    %20 = vector.load %arg4[%c2_21, %c0_22, %c0_23] : memref<8x8x8xf32, #tpu.memory_space<vmem>>, vector<1x8x8xf32>
    %21 = vector.shape_cast %20 : vector<1x8x8xf32> to vector<8x8xf32>
    %22 = vector.shape_cast %19 : vector<8x8xf32> to vector<1x8x8xf32>
    tpu.vector_store %arg4[%c2_21, %c0_22, %c0_23], %22 {strides = array<i32>} : memref<8x8x8xf32, #tpu.memory_space<vmem>>, vector<1x8x8xf32>,
    %c3 = arith.constant 3 : index
    %c0_24 = arith.constant 0 : index
    %c0_25 = arith.constant 0 : index
    %23 = vector.load %arg1[%c3, %c0_24, %c0_25] : memref<8x44x44xf32, #tpu.memory_space<vmem>>, vector<1x44x44xf32>
    %24 = vector.shape_cast %23 : vector<1x44x44xf32> to vector<44x44xf32>
    %cst_26 = arith.constant dense<0.000000e+00> : vector<44x8xf32>
    %25 = tpu.matmul %24, %0, %cst_26 {dimension_numbers = #tpu.dot_dimension_numbers<[1], [0], [0], [1], [0, 0, 1, 1], [], []>} : vector<44x44xf32>, vector<44x8xf32>, vector<44x8xf32> -> vector<44x8xf32>
    %cst_27 = arith.constant dense<0.000000e+00> : vector<8x8xf32>
    %26 = tpu.matmul %1, %25, %cst_27 {dimension_numbers = #tpu.dot_dimension_numbers<[1], [0], [0], [1], [0, 0, 1, 1], [], []>} : vector<8x44xf32>, vector<44x8xf32>, vector<8x8xf32> -> vector<8x8xf32>
    %c3_28 = arith.constant 3 : index
    %c0_29 = arith.constant 0 : index
    %c0_30 = arith.constant 0 : index
    %27 = vector.load %arg4[%c3_28, %c0_29, %c0_30] : memref<8x8x8xf32, #tpu.memory_space<vmem>>, vector<1x8x8xf32>
    %28 = vector.shape_cast %27 : vector<1x8x8xf32> to vector<8x8xf32>
    %29 = vector.shape_cast %26 : vector<8x8xf32> to vector<1x8x8xf32>
    tpu.vector_store %arg4[%c3_28, %c0_29, %c0_30], %29 {strides = array<i32>} : memref<8x8x8xf32, #tpu.memory_space<vmem>>, vector<1x8x8xf32>,
    %c4 = arith.constant 4 : index
    %c0_31 = arith.constant 0 : index
    %c0_32 = arith.constant 0 : index
    %30 = vector.load %arg1[%c4, %c0_31, %c0_32] : memref<8x44x44xf32, #tpu.memory_space<vmem>>, vector<1x44x44xf32>
    %31 = vector.shape_cast %30 : vector<1x44x44xf32> to vector<44x44xf32>
    %cst_33 = arith.constant dense<0.000000e+00> : vector<44x8xf32>
    %32 = tpu.matmul %31, %0, %cst_33 {dimension_numbers = #tpu.dot_dimension_numbers<[1], [0], [0], [1], [0, 0, 1, 1], [], []>} : vector<44x44xf32>, vector<44x8xf32>, vector<44x8xf32> -> vector<44x8xf32>
    %cst_34 = arith.constant dense<0.000000e+00> : vector<8x8xf32>
    %33 = tpu.matmul %1, %32, %cst_34 {dimension_numbers = #tpu.dot_dimension_numbers<[1], [0], [0], [1], [0, 0, 1, 1], [], []>} : vector<8x44xf32>, vector<44x8xf32>, vector<8x8xf32> -> vector<8x8xf32>
    %c4_35 = arith.constant 4 : index
    %c0_36 = arith.constant 0 : index
    %c0_37 = arith.constant 0 : index
    %34 = vector.load %arg4[%c4_35, %c0_36, %c0_37] : memref<8x8x8xf32, #tpu.memory_space<vmem>>, vector<1x8x8xf32>
    %35 = vector.shape_cast %34 : vector<1x8x8xf32> to vector<8x8xf32>
    %36 = vector.shape_cast %33 : vector<8x8xf32> to vector<1x8x8xf32>
    tpu.vector_store %arg4[%c4_35, %c0_36, %c0_37], %36 {strides = array<i32>} : memref<8x8x8xf32, #tpu.memory_space<vmem>>, vector<1x8x8xf32>,
    %c5 = arith.constant 5 : index
    %c0_38 = arith.constant 0 : index
    %c0_39 = arith.constant 0 : index
    %37 = vector.load %arg1[%c5, %c0_38, %c0_39] : memref<8x44x44xf32, #tpu.memory_space<vmem>>, vector<1x44x44xf32>
    %38 = vector.shape_cast %37 : vector<1x44x44xf32> to vector<44x44xf32>
    %cst_40 = arith.constant dense<0.000000e+00> : vector<44x8xf32>
    %39 = tpu.matmul %38, %0, %cst_40 {dimension_numbers = #tpu.dot_dimension_numbers<[1], [0], [0], [1], [0, 0, 1, 1], [], []>} : vector<44x44xf32>, vector<44x8xf32>, vector<44x8xf32> -> vector<44x8xf32>
    %cst_41 = arith.constant dense<0.000000e+00> : vector<8x8xf32>
    %40 = tpu.matmul %1, %39, %cst_41 {dimension_numbers = #tpu.dot_dimension_numbers<[1], [0], [0], [1], [0, 0, 1, 1], [], []>} : vector<8x44xf32>, vector<44x8xf32>, vector<8x8xf32> -> vector<8x8xf32>
    %c5_42 = arith.constant 5 : index
    %c0_43 = arith.constant 0 : index
    %c0_44 = arith.constant 0 : index
    %41 = vector.load %arg4[%c5_42, %c0_43, %c0_44] : memref<8x8x8xf32, #tpu.memory_space<vmem>>, vector<1x8x8xf32>
    %42 = vector.shape_cast %41 : vector<1x8x8xf32> to vector<8x8xf32>
    %43 = vector.shape_cast %40 : vector<8x8xf32> to vector<1x8x8xf32>
    tpu.vector_store %arg4[%c5_42, %c0_43, %c0_44], %43 {strides = array<i32>} : memref<8x8x8xf32, #tpu.memory_space<vmem>>, vector<1x8x8xf32>,
    %c6 = arith.constant 6 : index
    %c0_45 = arith.constant 0 : index
    %c0_46 = arith.constant 0 : index
    %44 = vector.load %arg1[%c6, %c0_45, %c0_46] : memref<8x44x44xf32, #tpu.memory_space<vmem>>, vector<1x44x44xf32>
    %45 = vector.shape_cast %44 : vector<1x44x44xf32> to vector<44x44xf32>
    %cst_47 = arith.constant dense<0.000000e+00> : vector<44x8xf32>
    %46 = tpu.matmul %45, %0, %cst_47 {dimension_numbers = #tpu.dot_dimension_numbers<[1], [0], [0], [1], [0, 0, 1, 1], [], []>} : vector<44x44xf32>, vector<44x8xf32>, vector<44x8xf32> -> vector<44x8xf32>
    %cst_48 = arith.constant dense<0.000000e+00> : vector<8x8xf32>
    %47 = tpu.matmul %1, %46, %cst_48 {dimension_numbers = #tpu.dot_dimension_numbers<[1], [0], [0], [1], [0, 0, 1, 1], [], []>} : vector<8x44xf32>, vector<44x8xf32>, vector<8x8xf32> -> vector<8x8xf32>
    %c6_49 = arith.constant 6 : index
    %c0_50 = arith.constant 0 : index
    %c0_51 = arith.constant 0 : index
    %48 = vector.load %arg4[%c6_49, %c0_50, %c0_51] : memref<8x8x8xf32, #tpu.memory_space<vmem>>, vector<1x8x8xf32>
    %49 = vector.shape_cast %48 : vector<1x8x8xf32> to vector<8x8xf32>
    %50 = vector.shape_cast %47 : vector<8x8xf32> to vector<1x8x8xf32>
    tpu.vector_store %arg4[%c6_49, %c0_50, %c0_51], %50 {strides = array<i32>} : memref<8x8x8xf32, #tpu.memory_space<vmem>>, vector<1x8x8xf32>,
    %c7 = arith.constant 7 : index
    %c0_52 = arith.constant 0 : index
    %c0_53 = arith.constant 0 : index
    %51 = vector.load %arg1[%c7, %c0_52, %c0_53] : memref<8x44x44xf32, #tpu.memory_space<vmem>>, vector<1x44x44xf32>
    %52 = vector.shape_cast %51 : vector<1x44x44xf32> to vector<44x44xf32>
    %cst_54 = arith.constant dense<0.000000e+00> : vector<44x8xf32>
    %53 = tpu.matmul %52, %0, %cst_54 {dimension_numbers = #tpu.dot_dimension_numbers<[1], [0], [0], [1], [0, 0, 1, 1], [], []>} : vector<44x44xf32>, vector<44x8xf32>, vector<44x8xf32> -> vector<44x8xf32>
    %cst_55 = arith.constant dense<0.000000e+00> : vector<8x8xf32>
    %54 = tpu.matmul %1, %53, %cst_55 {dimension_numbers = #tpu.dot_dimension_numbers<[1], [0], [0], [1], [0, 0, 1, 1], [], []>} : vector<8x44xf32>, vector<44x8xf32>, vector<8x8xf32> -> vector<8x8xf32>
    %c7_56 = arith.constant 7 : index
    %c0_57 = arith.constant 0 : index
    %c0_58 = arith.constant 0 : index
    %55 = vector.load %arg4[%c7_56, %c0_57, %c0_58] : memref<8x8x8xf32, #tpu.memory_space<vmem>>, vector<1x8x8xf32>
    %56 = vector.shape_cast %55 : vector<1x8x8xf32> to vector<8x8xf32>
    %57 = vector.shape_cast %54 : vector<8x8xf32> to vector<1x8x8xf32>
    tpu.vector_store %arg4[%c7_56, %c0_57, %c0_58], %57 {strides = array<i32>} : memref<8x8x8xf32, #tpu.memory_space<vmem>>, vector<1x8x8xf32>,
    return
  }
  func.func @transform_0(%arg0: i32) -> (i32, i32, i32) {
    %c0_i32 = arith.constant 0 : i32
    %c0_i32_0 = arith.constant 0 : i32
    %c0_i32_1 = arith.constant 0 : i32
    return %arg0, %c0_i32, %c0_i32_0 : i32, i32, i32
  }
  func.func @transform_1(%arg0: i32) -> (i32, i32) {
    %c0_i32 = arith.constant 0 : i32
    %c0_i32_0 = arith.constant 0 : i32
    %c0_i32_1 = arith.constant 0 : i32
    return %c0_i32, %c0_i32_0 : i32, i32
  }
  func.func @transform_2(%arg0: i32) -> (i32, i32) {
    %c0_i32 = arith.constant 0 : i32
    %c0_i32_0 = arith.constant 0 : i32
    %c0_i32_1 = arith.constant 0 : i32
    return %c0_i32, %c0_i32_0 : i32, i32
  }
  func.func @transform_3(%arg0: i32) -> (i32, i32, i32) {
    %c0_i32 = arith.constant 0 : i32
    %c0_i32_0 = arith.constant 0 : i32
    %c0_i32_1 = arith.constant 0 : i32
    return %arg0, %c0_i32, %c0_i32_0 : i32, i32, i32
  }
}

module attributes {stable_mosaic.version = 11 : i64} {
  func.func @kernel(%arg0: i32, %arg1: i32, %arg2: i32, %arg3: memref<1x1x10x10x6xbf16, #tpu.memory_space<vmem>>, %arg4: memref<1x3x3x6x8xbf16, #tpu.memory_space<vmem>>, %arg5: memref<1x8xf32, #tpu.memory_space<vmem>>, %arg6: memref<1x8xf32, #tpu.memory_space<vmem>>, %arg7: memref<1x1x8x8x8xf32, #tpu.memory_space<vmem>>) attributes {dimension_semantics = [#tpu.dimension_semantics<parallel>, #tpu.dimension_semantics<parallel>, #tpu.dimension_semantics<arbitrary>], iteration_bounds = array<i64: 1, 8, 3>, scalar_prefetch = 0 : i64, scratch_operands = 0 : i64, tpu.core_type = #tpu.core_type<tc>, window_params = [{transform_indices = @transform_0, window_bounds = array<i64: 1, 1, 10, 10, 6>}, {transform_indices = @transform_1, window_bounds = array<i64: 1, 3, 3, 6, 8>}, {pipeline_mode = #tpu.pipeline_mode<synchronous>, transform_indices = @transform_2, window_bounds = array<i64: 1, 8>}, {pipeline_mode = #tpu.pipeline_mode<synchronous>, transform_indices = @transform_3, window_bounds = array<i64: 1, 8>}, {transform_indices = @transform_4, window_bounds = array<i64: 1, 1, 8, 8, 8>}]} {
    %c0_i32 = arith.constant 0 : i32
    %0 = arith.cmpi eq, %arg2, %c0_i32 : i32
    %1 = arith.extui %0 : i1 to i32
    %c0_i32_0 = arith.constant 0 : i32
    %2 = arith.cmpi ne, %1, %c0_i32_0 : i32
    scf.if %2 {
      %cst_68 = arith.constant 0.000000e+00 : f32
      %70 = vector.broadcast %cst_68 : f32 to vector<8x8x8xf32>
      %c0_69 = arith.constant 0 : index
      %c0_70 = arith.constant 0 : index
      %c0_71 = arith.constant 0 : index
      %c0_72 = arith.constant 0 : index
      %c0_73 = arith.constant 0 : index
      %71 = vector.load %arg7[%c0_69, %c0_70, %c0_71, %c0_72, %c0_73] : memref<1x1x8x8x8xf32, #tpu.memory_space<vmem>>, vector<1x1x8x8x8xf32>
      %72 = vector.shape_cast %71 : vector<1x1x8x8x8xf32> to vector<8x8x8xf32>
      %73 = vector.shape_cast %70 : vector<8x8x8xf32> to vector<1x1x8x8x8xf32>
      tpu.vector_store %arg7[%c0_69, %c0_70, %c0_71, %c0_72, %c0_73], %73 {strides = array<i32>} : memref<1x1x8x8x8xf32, #tpu.memory_space<vmem>>, vector<1x1x8x8x8xf32>,
    } else {
    }
    %c0 = arith.constant 0 : index
    %c0_1 = arith.constant 0 : index
    %c0_2 = arith.constant 0 : index
    %c0_3 = arith.constant 0 : index
    %c0_4 = arith.constant 0 : index
    %3 = vector.load %arg3[%c0, %c0_1, %c0_2, %c0_3, %c0_4] : memref<1x1x10x10x6xbf16, #tpu.memory_space<vmem>>, vector<1x1x10x10x6xbf16>
    %4 = vector.shape_cast %3 : vector<1x1x10x10x6xbf16> to vector<10x10x6xbf16>
    %cst = arith.constant 0.000000e+00 : f32
    %5 = vector.broadcast %cst : f32 to vector<64x8xf32>
    %6 = vector.extract_strided_slice %4 {offsets = [0, 0, 0], sizes = [8, 8, 6], strides = [1, 1, 1]} : vector<10x10x6xbf16> to vector<8x8x6xbf16>
    %7 = vector.shape_cast %6 : vector<8x8x6xbf16> to vector<64x6xbf16>
    %c0_5 = arith.constant 0 : index
    %c0_6 = arith.constant 0 : index
    %c0_7 = arith.constant 0 : index
    %c0_8 = arith.constant 0 : index
    %c0_9 = arith.constant 0 : index
    %8 = vector.load %arg4[%c0_5, %c0_6, %c0_7, %c0_8, %c0_9] : memref<1x3x3x6x8xbf16, #tpu.memory_space<vmem>>, vector<1x1x1x6x8xbf16>
    %9 = vector.shape_cast %8 : vector<1x1x1x6x8xbf16> to vector<6x8xbf16>
    %cst_10 = arith.constant dense<0.000000e+00> : vector<64x8xf32>
    %10 = tpu.matmul %7, %9, %cst_10 {dimension_numbers = #tpu.dot_dimension_numbers<[1], [0], [0], [1], [0, 0, 1, 1], [], []>} : vector<64x6xbf16>, vector<6x8xbf16>, vector<64x8xf32> -> vector<64x8xf32>
    %11 = arith.addf %5, %10 : vector<64x8xf32>
    %12 = vector.extract_strided_slice %4 {offsets = [0, 1, 0], sizes = [8, 8, 6], strides = [1, 1, 1]} : vector<10x10x6xbf16> to vector<8x8x6xbf16>
    %13 = vector.shape_cast %12 : vector<8x8x6xbf16> to vector<64x6xbf16>
    %c0_11 = arith.constant 0 : index
    %c0_12 = arith.constant 0 : index
    %c1 = arith.constant 1 : index
    %c0_13 = arith.constant 0 : index
    %c0_14 = arith.constant 0 : index
    %14 = vector.load %arg4[%c0_11, %c0_12, %c1, %c0_13, %c0_14] : memref<1x3x3x6x8xbf16, #tpu.memory_space<vmem>>, vector<1x1x1x6x8xbf16>
    %15 = vector.shape_cast %14 : vector<1x1x1x6x8xbf16> to vector<6x8xbf16>
    %cst_15 = arith.constant dense<0.000000e+00> : vector<64x8xf32>
    %16 = tpu.matmul %13, %15, %cst_15 {dimension_numbers = #tpu.dot_dimension_numbers<[1], [0], [0], [1], [0, 0, 1, 1], [], []>} : vector<64x6xbf16>, vector<6x8xbf16>, vector<64x8xf32> -> vector<64x8xf32>
    %17 = arith.addf %11, %16 : vector<64x8xf32>
    %18 = vector.extract_strided_slice %4 {offsets = [0, 2, 0], sizes = [8, 8, 6], strides = [1, 1, 1]} : vector<10x10x6xbf16> to vector<8x8x6xbf16>
    %19 = vector.shape_cast %18 : vector<8x8x6xbf16> to vector<64x6xbf16>
    %c0_16 = arith.constant 0 : index
    %c0_17 = arith.constant 0 : index
    %c2 = arith.constant 2 : index
    %c0_18 = arith.constant 0 : index
    %c0_19 = arith.constant 0 : index
    %20 = vector.load %arg4[%c0_16, %c0_17, %c2, %c0_18, %c0_19] : memref<1x3x3x6x8xbf16, #tpu.memory_space<vmem>>, vector<1x1x1x6x8xbf16>
    %21 = vector.shape_cast %20 : vector<1x1x1x6x8xbf16> to vector<6x8xbf16>
    %cst_20 = arith.constant dense<0.000000e+00> : vector<64x8xf32>
    %22 = tpu.matmul %19, %21, %cst_20 {dimension_numbers = #tpu.dot_dimension_numbers<[1], [0], [0], [1], [0, 0, 1, 1], [], []>} : vector<64x6xbf16>, vector<6x8xbf16>, vector<64x8xf32> -> vector<64x8xf32>
    %23 = arith.addf %17, %22 : vector<64x8xf32>
    %24 = vector.extract_strided_slice %4 {offsets = [1, 0, 0], sizes = [8, 8, 6], strides = [1, 1, 1]} : vector<10x10x6xbf16> to vector<8x8x6xbf16>
    %25 = vector.shape_cast %24 : vector<8x8x6xbf16> to vector<64x6xbf16>
    %c0_21 = arith.constant 0 : index
    %c1_22 = arith.constant 1 : index
    %c0_23 = arith.constant 0 : index
    %c0_24 = arith.constant 0 : index
    %c0_25 = arith.constant 0 : index
    %26 = vector.load %arg4[%c0_21, %c1_22, %c0_23, %c0_24, %c0_25] : memref<1x3x3x6x8xbf16, #tpu.memory_space<vmem>>, vector<1x1x1x6x8xbf16>
    %27 = vector.shape_cast %26 : vector<1x1x1x6x8xbf16> to vector<6x8xbf16>
    %cst_26 = arith.constant dense<0.000000e+00> : vector<64x8xf32>
    %28 = tpu.matmul %25, %27, %cst_26 {dimension_numbers = #tpu.dot_dimension_numbers<[1], [0], [0], [1], [0, 0, 1, 1], [], []>} : vector<64x6xbf16>, vector<6x8xbf16>, vector<64x8xf32> -> vector<64x8xf32>
    %29 = arith.addf %23, %28 : vector<64x8xf32>
    %30 = vector.extract_strided_slice %4 {offsets = [1, 1, 0], sizes = [8, 8, 6], strides = [1, 1, 1]} : vector<10x10x6xbf16> to vector<8x8x6xbf16>
    %31 = vector.shape_cast %30 : vector<8x8x6xbf16> to vector<64x6xbf16>
    %c0_27 = arith.constant 0 : index
    %c1_28 = arith.constant 1 : index
    %c1_29 = arith.constant 1 : index
    %c0_30 = arith.constant 0 : index
    %c0_31 = arith.constant 0 : index
    %32 = vector.load %arg4[%c0_27, %c1_28, %c1_29, %c0_30, %c0_31] : memref<1x3x3x6x8xbf16, #tpu.memory_space<vmem>>, vector<1x1x1x6x8xbf16>
    %33 = vector.shape_cast %32 : vector<1x1x1x6x8xbf16> to vector<6x8xbf16>
    %cst_32 = arith.constant dense<0.000000e+00> : vector<64x8xf32>
    %34 = tpu.matmul %31, %33, %cst_32 {dimension_numbers = #tpu.dot_dimension_numbers<[1], [0], [0], [1], [0, 0, 1, 1], [], []>} : vector<64x6xbf16>, vector<6x8xbf16>, vector<64x8xf32> -> vector<64x8xf32>
    %35 = arith.addf %29, %34 : vector<64x8xf32>
    %36 = vector.extract_strided_slice %4 {offsets = [1, 2, 0], sizes = [8, 8, 6], strides = [1, 1, 1]} : vector<10x10x6xbf16> to vector<8x8x6xbf16>
    %37 = vector.shape_cast %36 : vector<8x8x6xbf16> to vector<64x6xbf16>
    %c0_33 = arith.constant 0 : index
    %c1_34 = arith.constant 1 : index
    %c2_35 = arith.constant 2 : index
    %c0_36 = arith.constant 0 : index
    %c0_37 = arith.constant 0 : index
    %38 = vector.load %arg4[%c0_33, %c1_34, %c2_35, %c0_36, %c0_37] : memref<1x3x3x6x8xbf16, #tpu.memory_space<vmem>>, vector<1x1x1x6x8xbf16>
    %39 = vector.shape_cast %38 : vector<1x1x1x6x8xbf16> to vector<6x8xbf16>
    %cst_38 = arith.constant dense<0.000000e+00> : vector<64x8xf32>
    %40 = tpu.matmul %37, %39, %cst_38 {dimension_numbers = #tpu.dot_dimension_numbers<[1], [0], [0], [1], [0, 0, 1, 1], [], []>} : vector<64x6xbf16>, vector<6x8xbf16>, vector<64x8xf32> -> vector<64x8xf32>
    %41 = arith.addf %35, %40 : vector<64x8xf32>
    %42 = vector.extract_strided_slice %4 {offsets = [2, 0, 0], sizes = [8, 8, 6], strides = [1, 1, 1]} : vector<10x10x6xbf16> to vector<8x8x6xbf16>
    %43 = vector.shape_cast %42 : vector<8x8x6xbf16> to vector<64x6xbf16>
    %c0_39 = arith.constant 0 : index
    %c2_40 = arith.constant 2 : index
    %c0_41 = arith.constant 0 : index
    %c0_42 = arith.constant 0 : index
    %c0_43 = arith.constant 0 : index
    %44 = vector.load %arg4[%c0_39, %c2_40, %c0_41, %c0_42, %c0_43] : memref<1x3x3x6x8xbf16, #tpu.memory_space<vmem>>, vector<1x1x1x6x8xbf16>
    %45 = vector.shape_cast %44 : vector<1x1x1x6x8xbf16> to vector<6x8xbf16>
    %cst_44 = arith.constant dense<0.000000e+00> : vector<64x8xf32>
    %46 = tpu.matmul %43, %45, %cst_44 {dimension_numbers = #tpu.dot_dimension_numbers<[1], [0], [0], [1], [0, 0, 1, 1], [], []>} : vector<64x6xbf16>, vector<6x8xbf16>, vector<64x8xf32> -> vector<64x8xf32>
    %47 = arith.addf %41, %46 : vector<64x8xf32>
    %48 = vector.extract_strided_slice %4 {offsets = [2, 1, 0], sizes = [8, 8, 6], strides = [1, 1, 1]} : vector<10x10x6xbf16> to vector<8x8x6xbf16>
    %49 = vector.shape_cast %48 : vector<8x8x6xbf16> to vector<64x6xbf16>
    %c0_45 = arith.constant 0 : index
    %c2_46 = arith.constant 2 : index
    %c1_47 = arith.constant 1 : index
    %c0_48 = arith.constant 0 : index
    %c0_49 = arith.constant 0 : index
    %50 = vector.load %arg4[%c0_45, %c2_46, %c1_47, %c0_48, %c0_49] : memref<1x3x3x6x8xbf16, #tpu.memory_space<vmem>>, vector<1x1x1x6x8xbf16>
    %51 = vector.shape_cast %50 : vector<1x1x1x6x8xbf16> to vector<6x8xbf16>
    %cst_50 = arith.constant dense<0.000000e+00> : vector<64x8xf32>
    %52 = tpu.matmul %49, %51, %cst_50 {dimension_numbers = #tpu.dot_dimension_numbers<[1], [0], [0], [1], [0, 0, 1, 1], [], []>} : vector<64x6xbf16>, vector<6x8xbf16>, vector<64x8xf32> -> vector<64x8xf32>
    %53 = arith.addf %47, %52 : vector<64x8xf32>
    %54 = vector.extract_strided_slice %4 {offsets = [2, 2, 0], sizes = [8, 8, 6], strides = [1, 1, 1]} : vector<10x10x6xbf16> to vector<8x8x6xbf16>
    %55 = vector.shape_cast %54 : vector<8x8x6xbf16> to vector<64x6xbf16>
    %c0_51 = arith.constant 0 : index
    %c2_52 = arith.constant 2 : index
    %c2_53 = arith.constant 2 : index
    %c0_54 = arith.constant 0 : index
    %c0_55 = arith.constant 0 : index
    %56 = vector.load %arg4[%c0_51, %c2_52, %c2_53, %c0_54, %c0_55] : memref<1x3x3x6x8xbf16, #tpu.memory_space<vmem>>, vector<1x1x1x6x8xbf16>
    %57 = vector.shape_cast %56 : vector<1x1x1x6x8xbf16> to vector<6x8xbf16>
    %cst_56 = arith.constant dense<0.000000e+00> : vector<64x8xf32>
    %58 = tpu.matmul %55, %57, %cst_56 {dimension_numbers = #tpu.dot_dimension_numbers<[1], [0], [0], [1], [0, 0, 1, 1], [], []>} : vector<64x6xbf16>, vector<6x8xbf16>, vector<64x8xf32> -> vector<64x8xf32>
    %59 = arith.addf %53, %58 : vector<64x8xf32>
    %c0_57 = arith.constant 0 : index
    %c0_58 = arith.constant 0 : index
    %c0_59 = arith.constant 0 : index
    %c0_60 = arith.constant 0 : index
    %c0_61 = arith.constant 0 : index
    %60 = vector.load %arg7[%c0_57, %c0_58, %c0_59, %c0_60, %c0_61] : memref<1x1x8x8x8xf32, #tpu.memory_space<vmem>>, vector<1x1x8x8x8xf32>
    %61 = vector.shape_cast %60 : vector<1x1x8x8x8xf32> to vector<8x8x8xf32>
    %62 = vector.shape_cast %59 : vector<64x8xf32> to vector<8x8x8xf32>
    %63 = arith.addf %61, %62 : vector<8x8x8xf32>
    %c0_62 = arith.constant 0 : index
    %c0_63 = arith.constant 0 : index
    %c0_64 = arith.constant 0 : index
    %c0_65 = arith.constant 0 : index
    %c0_66 = arith.constant 0 : index
    %64 = vector.load %arg7[%c0_62, %c0_63, %c0_64, %c0_65, %c0_66] : memref<1x1x8x8x8xf32, #tpu.memory_space<vmem>>, vector<1x1x8x8x8xf32>
    %65 = vector.shape_cast %64 : vector<1x1x8x8x8xf32> to vector<8x8x8xf32>
    %66 = vector.shape_cast %63 : vector<8x8x8xf32> to vector<1x1x8x8x8xf32>
    tpu.vector_store %arg7[%c0_62, %c0_63, %c0_64, %c0_65, %c0_66], %66 {strides = array<i32>} : memref<1x1x8x8x8xf32, #tpu.memory_space<vmem>>, vector<1x1x8x8x8xf32>,
    %c2_i32 = arith.constant 2 : i32
    %67 = arith.cmpi eq, %arg2, %c2_i32 : i32
    %68 = arith.extui %67 : i1 to i32
    %c0_i32_67 = arith.constant 0 : i32
    %69 = arith.cmpi ne, %68, %c0_i32_67 : i32
    scf.if %69 {
      %c0_68 = arith.constant 0 : index
      %c0_69 = arith.constant 0 : index
      %c0_70 = arith.constant 0 : index
      %c0_71 = arith.constant 0 : index
      %c0_72 = arith.constant 0 : index
      %70 = vector.load %arg7[%c0_68, %c0_69, %c0_70, %c0_71, %c0_72] : memref<1x1x8x8x8xf32, #tpu.memory_space<vmem>>, vector<1x1x8x8x8xf32>
      %71 = vector.shape_cast %70 : vector<1x1x8x8x8xf32> to vector<8x8x8xf32>
      %c0_73 = arith.constant 0 : index
      %c0_74 = arith.constant 0 : index
      %72 = vector.load %arg5[%c0_73, %c0_74] : memref<1x8xf32, #tpu.memory_space<vmem>>, vector<1x8xf32>
      %73 = vector.shape_cast %72 : vector<1x8xf32> to vector<1x1x8xf32>
      %74 = vector.broadcast %73 : vector<1x1x8xf32> to vector<8x8x8xf32>
      %75 = arith.mulf %71, %74 : vector<8x8x8xf32>
      %c0_75 = arith.constant 0 : index
      %c0_76 = arith.constant 0 : index
      %76 = vector.load %arg6[%c0_75, %c0_76] : memref<1x8xf32, #tpu.memory_space<vmem>>, vector<1x8xf32>
      %77 = vector.shape_cast %76 : vector<1x8xf32> to vector<1x1x8xf32>
      %78 = vector.broadcast %77 : vector<1x1x8xf32> to vector<8x8x8xf32>
      %79 = arith.addf %75, %78 : vector<8x8x8xf32>
      %cst_77 = arith.constant 0.000000e+00 : f32
      %80 = vector.broadcast %cst_77 : f32 to vector<8x8x8xf32>
      %81 = arith.maximumf %79, %80 : vector<8x8x8xf32>
      %c0_78 = arith.constant 0 : index
      %c0_79 = arith.constant 0 : index
      %c0_80 = arith.constant 0 : index
      %c0_81 = arith.constant 0 : index
      %c0_82 = arith.constant 0 : index
      %82 = vector.load %arg7[%c0_78, %c0_79, %c0_80, %c0_81, %c0_82] : memref<1x1x8x8x8xf32, #tpu.memory_space<vmem>>, vector<1x1x8x8x8xf32>
      %83 = vector.shape_cast %82 : vector<1x1x8x8x8xf32> to vector<8x8x8xf32>
      %84 = vector.shape_cast %81 : vector<8x8x8xf32> to vector<1x1x8x8x8xf32>
      tpu.vector_store %arg7[%c0_78, %c0_79, %c0_80, %c0_81, %c0_82], %84 {strides = array<i32>} : memref<1x1x8x8x8xf32, #tpu.memory_space<vmem>>, vector<1x1x8x8x8xf32>,
    } else {
    }
    return
  }
  func.func @transform_0(%arg0: i32, %arg1: i32, %arg2: i32) -> (i32, i32, i32, i32, i32) {
    %0 = arith.addi %arg1, %arg2 : i32
    %c0_i32 = arith.constant 0 : i32
    %c0_i32_0 = arith.constant 0 : i32
    %c0_i32_1 = arith.constant 0 : i32
    %c0_i32_2 = arith.constant 0 : i32
    return %arg0, %0, %c0_i32, %c0_i32_0, %c0_i32_1 : i32, i32, i32, i32, i32
  }
  func.func @transform_1(%arg0: i32, %arg1: i32, %arg2: i32) -> (i32, i32, i32, i32, i32) {
    %c0_i32 = arith.constant 0 : i32
    %c0_i32_0 = arith.constant 0 : i32
    %c0_i32_1 = arith.constant 0 : i32
    %c0_i32_2 = arith.constant 0 : i32
    %c0_i32_3 = arith.constant 0 : i32
    return %arg2, %c0_i32, %c0_i32_0, %c0_i32_1, %c0_i32_2 : i32, i32, i32, i32, i32
  }
  func.func @transform_2(%arg0: i32, %arg1: i32, %arg2: i32) -> (i32, i32) {
    %c0_i32 = arith.constant 0 : i32
    %c0_i32_0 = arith.constant 0 : i32
    %c0_i32_1 = arith.constant 0 : i32
    return %c0_i32, %c0_i32_0 : i32, i32
  }
  func.func @transform_3(%arg0: i32, %arg1: i32, %arg2: i32) -> (i32, i32) {
    %c0_i32 = arith.constant 0 : i32
    %c0_i32_0 = arith.constant 0 : i32
    %c0_i32_1 = arith.constant 0 : i32
    return %c0_i32, %c0_i32_0 : i32, i32
  }
  func.func @transform_4(%arg0: i32, %arg1: i32, %arg2: i32) -> (i32, i32, i32, i32, i32) {
    %c0_i32 = arith.constant 0 : i32
    %c0_i32_0 = arith.constant 0 : i32
    %c0_i32_1 = arith.constant 0 : i32
    %c0_i32_2 = arith.constant 0 : i32
    return %arg0, %arg1, %c0_i32, %c0_i32_0, %c0_i32_1 : i32, i32, i32, i32, i32
  }
}

module attributes {stable_mosaic.version = 11 : i64} {
  func.func @kernel(%arg0: i32, %arg1: i32, %arg2: i32, %arg3: memref<1x1x6x6x8xbf16, #tpu.memory_space<vmem>>, %arg4: memref<1x3x3x8x16xbf16, #tpu.memory_space<vmem>>, %arg5: memref<1x16xf32, #tpu.memory_space<vmem>>, %arg6: memref<1x16xf32, #tpu.memory_space<vmem>>, %arg7: memref<1x1x4x4x16xf32, #tpu.memory_space<vmem>>) attributes {dimension_semantics = [#tpu.dimension_semantics<parallel>, #tpu.dimension_semantics<parallel>, #tpu.dimension_semantics<arbitrary>], iteration_bounds = array<i64: 1, 8, 3>, scalar_prefetch = 0 : i64, scratch_operands = 0 : i64, tpu.core_type = #tpu.core_type<tc>, window_params = [{transform_indices = @transform_0, window_bounds = array<i64: 1, 1, 6, 6, 8>}, {transform_indices = @transform_1, window_bounds = array<i64: 1, 3, 3, 8, 16>}, {pipeline_mode = #tpu.pipeline_mode<synchronous>, transform_indices = @transform_2, window_bounds = array<i64: 1, 16>}, {pipeline_mode = #tpu.pipeline_mode<synchronous>, transform_indices = @transform_3, window_bounds = array<i64: 1, 16>}, {transform_indices = @transform_4, window_bounds = array<i64: 1, 1, 4, 4, 16>}]} {
    %c0_i32 = arith.constant 0 : i32
    %0 = arith.cmpi eq, %arg2, %c0_i32 : i32
    %1 = arith.extui %0 : i1 to i32
    %c0_i32_0 = arith.constant 0 : i32
    %2 = arith.cmpi ne, %1, %c0_i32_0 : i32
    scf.if %2 {
      %cst_68 = arith.constant 0.000000e+00 : f32
      %70 = vector.broadcast %cst_68 : f32 to vector<4x4x16xf32>
      %c0_69 = arith.constant 0 : index
      %c0_70 = arith.constant 0 : index
      %c0_71 = arith.constant 0 : index
      %c0_72 = arith.constant 0 : index
      %c0_73 = arith.constant 0 : index
      %71 = vector.load %arg7[%c0_69, %c0_70, %c0_71, %c0_72, %c0_73] : memref<1x1x4x4x16xf32, #tpu.memory_space<vmem>>, vector<1x1x4x4x16xf32>
      %72 = vector.shape_cast %71 : vector<1x1x4x4x16xf32> to vector<4x4x16xf32>
      %73 = vector.shape_cast %70 : vector<4x4x16xf32> to vector<1x1x4x4x16xf32>
      tpu.vector_store %arg7[%c0_69, %c0_70, %c0_71, %c0_72, %c0_73], %73 {strides = array<i32>} : memref<1x1x4x4x16xf32, #tpu.memory_space<vmem>>, vector<1x1x4x4x16xf32>,
    } else {
    }
    %c0 = arith.constant 0 : index
    %c0_1 = arith.constant 0 : index
    %c0_2 = arith.constant 0 : index
    %c0_3 = arith.constant 0 : index
    %c0_4 = arith.constant 0 : index
    %3 = vector.load %arg3[%c0, %c0_1, %c0_2, %c0_3, %c0_4] : memref<1x1x6x6x8xbf16, #tpu.memory_space<vmem>>, vector<1x1x6x6x8xbf16>
    %4 = vector.shape_cast %3 : vector<1x1x6x6x8xbf16> to vector<6x6x8xbf16>
    %cst = arith.constant 0.000000e+00 : f32
    %5 = vector.broadcast %cst : f32 to vector<16x16xf32>
    %6 = vector.extract_strided_slice %4 {offsets = [0, 0, 0], sizes = [4, 4, 8], strides = [1, 1, 1]} : vector<6x6x8xbf16> to vector<4x4x8xbf16>
    %7 = vector.shape_cast %6 : vector<4x4x8xbf16> to vector<16x8xbf16>
    %c0_5 = arith.constant 0 : index
    %c0_6 = arith.constant 0 : index
    %c0_7 = arith.constant 0 : index
    %c0_8 = arith.constant 0 : index
    %c0_9 = arith.constant 0 : index
    %8 = vector.load %arg4[%c0_5, %c0_6, %c0_7, %c0_8, %c0_9] : memref<1x3x3x8x16xbf16, #tpu.memory_space<vmem>>, vector<1x1x1x8x16xbf16>
    %9 = vector.shape_cast %8 : vector<1x1x1x8x16xbf16> to vector<8x16xbf16>
    %cst_10 = arith.constant dense<0.000000e+00> : vector<16x16xf32>
    %10 = tpu.matmul %7, %9, %cst_10 {dimension_numbers = #tpu.dot_dimension_numbers<[1], [0], [0], [1], [0, 0, 1, 1], [], []>} : vector<16x8xbf16>, vector<8x16xbf16>, vector<16x16xf32> -> vector<16x16xf32>
    %11 = arith.addf %5, %10 : vector<16x16xf32>
    %12 = vector.extract_strided_slice %4 {offsets = [0, 1, 0], sizes = [4, 4, 8], strides = [1, 1, 1]} : vector<6x6x8xbf16> to vector<4x4x8xbf16>
    %13 = vector.shape_cast %12 : vector<4x4x8xbf16> to vector<16x8xbf16>
    %c0_11 = arith.constant 0 : index
    %c0_12 = arith.constant 0 : index
    %c1 = arith.constant 1 : index
    %c0_13 = arith.constant 0 : index
    %c0_14 = arith.constant 0 : index
    %14 = vector.load %arg4[%c0_11, %c0_12, %c1, %c0_13, %c0_14] : memref<1x3x3x8x16xbf16, #tpu.memory_space<vmem>>, vector<1x1x1x8x16xbf16>
    %15 = vector.shape_cast %14 : vector<1x1x1x8x16xbf16> to vector<8x16xbf16>
    %cst_15 = arith.constant dense<0.000000e+00> : vector<16x16xf32>
    %16 = tpu.matmul %13, %15, %cst_15 {dimension_numbers = #tpu.dot_dimension_numbers<[1], [0], [0], [1], [0, 0, 1, 1], [], []>} : vector<16x8xbf16>, vector<8x16xbf16>, vector<16x16xf32> -> vector<16x16xf32>
    %17 = arith.addf %11, %16 : vector<16x16xf32>
    %18 = vector.extract_strided_slice %4 {offsets = [0, 2, 0], sizes = [4, 4, 8], strides = [1, 1, 1]} : vector<6x6x8xbf16> to vector<4x4x8xbf16>
    %19 = vector.shape_cast %18 : vector<4x4x8xbf16> to vector<16x8xbf16>
    %c0_16 = arith.constant 0 : index
    %c0_17 = arith.constant 0 : index
    %c2 = arith.constant 2 : index
    %c0_18 = arith.constant 0 : index
    %c0_19 = arith.constant 0 : index
    %20 = vector.load %arg4[%c0_16, %c0_17, %c2, %c0_18, %c0_19] : memref<1x3x3x8x16xbf16, #tpu.memory_space<vmem>>, vector<1x1x1x8x16xbf16>
    %21 = vector.shape_cast %20 : vector<1x1x1x8x16xbf16> to vector<8x16xbf16>
    %cst_20 = arith.constant dense<0.000000e+00> : vector<16x16xf32>
    %22 = tpu.matmul %19, %21, %cst_20 {dimension_numbers = #tpu.dot_dimension_numbers<[1], [0], [0], [1], [0, 0, 1, 1], [], []>} : vector<16x8xbf16>, vector<8x16xbf16>, vector<16x16xf32> -> vector<16x16xf32>
    %23 = arith.addf %17, %22 : vector<16x16xf32>
    %24 = vector.extract_strided_slice %4 {offsets = [1, 0, 0], sizes = [4, 4, 8], strides = [1, 1, 1]} : vector<6x6x8xbf16> to vector<4x4x8xbf16>
    %25 = vector.shape_cast %24 : vector<4x4x8xbf16> to vector<16x8xbf16>
    %c0_21 = arith.constant 0 : index
    %c1_22 = arith.constant 1 : index
    %c0_23 = arith.constant 0 : index
    %c0_24 = arith.constant 0 : index
    %c0_25 = arith.constant 0 : index
    %26 = vector.load %arg4[%c0_21, %c1_22, %c0_23, %c0_24, %c0_25] : memref<1x3x3x8x16xbf16, #tpu.memory_space<vmem>>, vector<1x1x1x8x16xbf16>
    %27 = vector.shape_cast %26 : vector<1x1x1x8x16xbf16> to vector<8x16xbf16>
    %cst_26 = arith.constant dense<0.000000e+00> : vector<16x16xf32>
    %28 = tpu.matmul %25, %27, %cst_26 {dimension_numbers = #tpu.dot_dimension_numbers<[1], [0], [0], [1], [0, 0, 1, 1], [], []>} : vector<16x8xbf16>, vector<8x16xbf16>, vector<16x16xf32> -> vector<16x16xf32>
    %29 = arith.addf %23, %28 : vector<16x16xf32>
    %30 = vector.extract_strided_slice %4 {offsets = [1, 1, 0], sizes = [4, 4, 8], strides = [1, 1, 1]} : vector<6x6x8xbf16> to vector<4x4x8xbf16>
    %31 = vector.shape_cast %30 : vector<4x4x8xbf16> to vector<16x8xbf16>
    %c0_27 = arith.constant 0 : index
    %c1_28 = arith.constant 1 : index
    %c1_29 = arith.constant 1 : index
    %c0_30 = arith.constant 0 : index
    %c0_31 = arith.constant 0 : index
    %32 = vector.load %arg4[%c0_27, %c1_28, %c1_29, %c0_30, %c0_31] : memref<1x3x3x8x16xbf16, #tpu.memory_space<vmem>>, vector<1x1x1x8x16xbf16>
    %33 = vector.shape_cast %32 : vector<1x1x1x8x16xbf16> to vector<8x16xbf16>
    %cst_32 = arith.constant dense<0.000000e+00> : vector<16x16xf32>
    %34 = tpu.matmul %31, %33, %cst_32 {dimension_numbers = #tpu.dot_dimension_numbers<[1], [0], [0], [1], [0, 0, 1, 1], [], []>} : vector<16x8xbf16>, vector<8x16xbf16>, vector<16x16xf32> -> vector<16x16xf32>
    %35 = arith.addf %29, %34 : vector<16x16xf32>
    %36 = vector.extract_strided_slice %4 {offsets = [1, 2, 0], sizes = [4, 4, 8], strides = [1, 1, 1]} : vector<6x6x8xbf16> to vector<4x4x8xbf16>
    %37 = vector.shape_cast %36 : vector<4x4x8xbf16> to vector<16x8xbf16>
    %c0_33 = arith.constant 0 : index
    %c1_34 = arith.constant 1 : index
    %c2_35 = arith.constant 2 : index
    %c0_36 = arith.constant 0 : index
    %c0_37 = arith.constant 0 : index
    %38 = vector.load %arg4[%c0_33, %c1_34, %c2_35, %c0_36, %c0_37] : memref<1x3x3x8x16xbf16, #tpu.memory_space<vmem>>, vector<1x1x1x8x16xbf16>
    %39 = vector.shape_cast %38 : vector<1x1x1x8x16xbf16> to vector<8x16xbf16>
    %cst_38 = arith.constant dense<0.000000e+00> : vector<16x16xf32>
    %40 = tpu.matmul %37, %39, %cst_38 {dimension_numbers = #tpu.dot_dimension_numbers<[1], [0], [0], [1], [0, 0, 1, 1], [], []>} : vector<16x8xbf16>, vector<8x16xbf16>, vector<16x16xf32> -> vector<16x16xf32>
    %41 = arith.addf %35, %40 : vector<16x16xf32>
    %42 = vector.extract_strided_slice %4 {offsets = [2, 0, 0], sizes = [4, 4, 8], strides = [1, 1, 1]} : vector<6x6x8xbf16> to vector<4x4x8xbf16>
    %43 = vector.shape_cast %42 : vector<4x4x8xbf16> to vector<16x8xbf16>
    %c0_39 = arith.constant 0 : index
    %c2_40 = arith.constant 2 : index
    %c0_41 = arith.constant 0 : index
    %c0_42 = arith.constant 0 : index
    %c0_43 = arith.constant 0 : index
    %44 = vector.load %arg4[%c0_39, %c2_40, %c0_41, %c0_42, %c0_43] : memref<1x3x3x8x16xbf16, #tpu.memory_space<vmem>>, vector<1x1x1x8x16xbf16>
    %45 = vector.shape_cast %44 : vector<1x1x1x8x16xbf16> to vector<8x16xbf16>
    %cst_44 = arith.constant dense<0.000000e+00> : vector<16x16xf32>
    %46 = tpu.matmul %43, %45, %cst_44 {dimension_numbers = #tpu.dot_dimension_numbers<[1], [0], [0], [1], [0, 0, 1, 1], [], []>} : vector<16x8xbf16>, vector<8x16xbf16>, vector<16x16xf32> -> vector<16x16xf32>
    %47 = arith.addf %41, %46 : vector<16x16xf32>
    %48 = vector.extract_strided_slice %4 {offsets = [2, 1, 0], sizes = [4, 4, 8], strides = [1, 1, 1]} : vector<6x6x8xbf16> to vector<4x4x8xbf16>
    %49 = vector.shape_cast %48 : vector<4x4x8xbf16> to vector<16x8xbf16>
    %c0_45 = arith.constant 0 : index
    %c2_46 = arith.constant 2 : index
    %c1_47 = arith.constant 1 : index
    %c0_48 = arith.constant 0 : index
    %c0_49 = arith.constant 0 : index
    %50 = vector.load %arg4[%c0_45, %c2_46, %c1_47, %c0_48, %c0_49] : memref<1x3x3x8x16xbf16, #tpu.memory_space<vmem>>, vector<1x1x1x8x16xbf16>
    %51 = vector.shape_cast %50 : vector<1x1x1x8x16xbf16> to vector<8x16xbf16>
    %cst_50 = arith.constant dense<0.000000e+00> : vector<16x16xf32>
    %52 = tpu.matmul %49, %51, %cst_50 {dimension_numbers = #tpu.dot_dimension_numbers<[1], [0], [0], [1], [0, 0, 1, 1], [], []>} : vector<16x8xbf16>, vector<8x16xbf16>, vector<16x16xf32> -> vector<16x16xf32>
    %53 = arith.addf %47, %52 : vector<16x16xf32>
    %54 = vector.extract_strided_slice %4 {offsets = [2, 2, 0], sizes = [4, 4, 8], strides = [1, 1, 1]} : vector<6x6x8xbf16> to vector<4x4x8xbf16>
    %55 = vector.shape_cast %54 : vector<4x4x8xbf16> to vector<16x8xbf16>
    %c0_51 = arith.constant 0 : index
    %c2_52 = arith.constant 2 : index
    %c2_53 = arith.constant 2 : index
    %c0_54 = arith.constant 0 : index
    %c0_55 = arith.constant 0 : index
    %56 = vector.load %arg4[%c0_51, %c2_52, %c2_53, %c0_54, %c0_55] : memref<1x3x3x8x16xbf16, #tpu.memory_space<vmem>>, vector<1x1x1x8x16xbf16>
    %57 = vector.shape_cast %56 : vector<1x1x1x8x16xbf16> to vector<8x16xbf16>
    %cst_56 = arith.constant dense<0.000000e+00> : vector<16x16xf32>
    %58 = tpu.matmul %55, %57, %cst_56 {dimension_numbers = #tpu.dot_dimension_numbers<[1], [0], [0], [1], [0, 0, 1, 1], [], []>} : vector<16x8xbf16>, vector<8x16xbf16>, vector<16x16xf32> -> vector<16x16xf32>
    %59 = arith.addf %53, %58 : vector<16x16xf32>
    %c0_57 = arith.constant 0 : index
    %c0_58 = arith.constant 0 : index
    %c0_59 = arith.constant 0 : index
    %c0_60 = arith.constant 0 : index
    %c0_61 = arith.constant 0 : index
    %60 = vector.load %arg7[%c0_57, %c0_58, %c0_59, %c0_60, %c0_61] : memref<1x1x4x4x16xf32, #tpu.memory_space<vmem>>, vector<1x1x4x4x16xf32>
    %61 = vector.shape_cast %60 : vector<1x1x4x4x16xf32> to vector<4x4x16xf32>
    %62 = vector.shape_cast %59 : vector<16x16xf32> to vector<4x4x16xf32>
    %63 = arith.addf %61, %62 : vector<4x4x16xf32>
    %c0_62 = arith.constant 0 : index
    %c0_63 = arith.constant 0 : index
    %c0_64 = arith.constant 0 : index
    %c0_65 = arith.constant 0 : index
    %c0_66 = arith.constant 0 : index
    %64 = vector.load %arg7[%c0_62, %c0_63, %c0_64, %c0_65, %c0_66] : memref<1x1x4x4x16xf32, #tpu.memory_space<vmem>>, vector<1x1x4x4x16xf32>
    %65 = vector.shape_cast %64 : vector<1x1x4x4x16xf32> to vector<4x4x16xf32>
    %66 = vector.shape_cast %63 : vector<4x4x16xf32> to vector<1x1x4x4x16xf32>
    tpu.vector_store %arg7[%c0_62, %c0_63, %c0_64, %c0_65, %c0_66], %66 {strides = array<i32>} : memref<1x1x4x4x16xf32, #tpu.memory_space<vmem>>, vector<1x1x4x4x16xf32>,
    %c2_i32 = arith.constant 2 : i32
    %67 = arith.cmpi eq, %arg2, %c2_i32 : i32
    %68 = arith.extui %67 : i1 to i32
    %c0_i32_67 = arith.constant 0 : i32
    %69 = arith.cmpi ne, %68, %c0_i32_67 : i32
    scf.if %69 {
      %c0_68 = arith.constant 0 : index
      %c0_69 = arith.constant 0 : index
      %c0_70 = arith.constant 0 : index
      %c0_71 = arith.constant 0 : index
      %c0_72 = arith.constant 0 : index
      %70 = vector.load %arg7[%c0_68, %c0_69, %c0_70, %c0_71, %c0_72] : memref<1x1x4x4x16xf32, #tpu.memory_space<vmem>>, vector<1x1x4x4x16xf32>
      %71 = vector.shape_cast %70 : vector<1x1x4x4x16xf32> to vector<4x4x16xf32>
      %c0_73 = arith.constant 0 : index
      %c0_74 = arith.constant 0 : index
      %72 = vector.load %arg5[%c0_73, %c0_74] : memref<1x16xf32, #tpu.memory_space<vmem>>, vector<1x16xf32>
      %73 = vector.shape_cast %72 : vector<1x16xf32> to vector<1x1x16xf32>
      %74 = vector.broadcast %73 : vector<1x1x16xf32> to vector<4x4x16xf32>
      %75 = arith.mulf %71, %74 : vector<4x4x16xf32>
      %c0_75 = arith.constant 0 : index
      %c0_76 = arith.constant 0 : index
      %76 = vector.load %arg6[%c0_75, %c0_76] : memref<1x16xf32, #tpu.memory_space<vmem>>, vector<1x16xf32>
      %77 = vector.shape_cast %76 : vector<1x16xf32> to vector<1x1x16xf32>
      %78 = vector.broadcast %77 : vector<1x1x16xf32> to vector<4x4x16xf32>
      %79 = arith.addf %75, %78 : vector<4x4x16xf32>
      %cst_77 = arith.constant 0.000000e+00 : f32
      %80 = vector.broadcast %cst_77 : f32 to vector<4x4x16xf32>
      %81 = arith.maximumf %79, %80 : vector<4x4x16xf32>
      %c0_78 = arith.constant 0 : index
      %c0_79 = arith.constant 0 : index
      %c0_80 = arith.constant 0 : index
      %c0_81 = arith.constant 0 : index
      %c0_82 = arith.constant 0 : index
      %82 = vector.load %arg7[%c0_78, %c0_79, %c0_80, %c0_81, %c0_82] : memref<1x1x4x4x16xf32, #tpu.memory_space<vmem>>, vector<1x1x4x4x16xf32>
      %83 = vector.shape_cast %82 : vector<1x1x4x4x16xf32> to vector<4x4x16xf32>
      %84 = vector.shape_cast %81 : vector<4x4x16xf32> to vector<1x1x4x4x16xf32>
      tpu.vector_store %arg7[%c0_78, %c0_79, %c0_80, %c0_81, %c0_82], %84 {strides = array<i32>} : memref<1x1x4x4x16xf32, #tpu.memory_space<vmem>>, vector<1x1x4x4x16xf32>,
    } else {
    }
    return
  }
  func.func @transform_0(%arg0: i32, %arg1: i32, %arg2: i32) -> (i32, i32, i32, i32, i32) {
    %0 = arith.addi %arg1, %arg2 : i32
    %c0_i32 = arith.constant 0 : i32
    %c0_i32_0 = arith.constant 0 : i32
    %c0_i32_1 = arith.constant 0 : i32
    %c0_i32_2 = arith.constant 0 : i32
    return %arg0, %0, %c0_i32, %c0_i32_0, %c0_i32_1 : i32, i32, i32, i32, i32
  }
  func.func @transform_1(%arg0: i32, %arg1: i32, %arg2: i32) -> (i32, i32, i32, i32, i32) {
    %c0_i32 = arith.constant 0 : i32
    %c0_i32_0 = arith.constant 0 : i32
    %c0_i32_1 = arith.constant 0 : i32
    %c0_i32_2 = arith.constant 0 : i32
    %c0_i32_3 = arith.constant 0 : i32
    return %arg2, %c0_i32, %c0_i32_0, %c0_i32_1, %c0_i32_2 : i32, i32, i32, i32, i32
  }
  func.func @transform_2(%arg0: i32, %arg1: i32, %arg2: i32) -> (i32, i32) {
    %c0_i32 = arith.constant 0 : i32
    %c0_i32_0 = arith.constant 0 : i32
    %c0_i32_1 = arith.constant 0 : i32
    return %c0_i32, %c0_i32_0 : i32, i32
  }
  func.func @transform_3(%arg0: i32, %arg1: i32, %arg2: i32) -> (i32, i32) {
    %c0_i32 = arith.constant 0 : i32
    %c0_i32_0 = arith.constant 0 : i32
    %c0_i32_1 = arith.constant 0 : i32
    return %c0_i32, %c0_i32_0 : i32, i32
  }
  func.func @transform_4(%arg0: i32, %arg1: i32, %arg2: i32) -> (i32, i32, i32, i32, i32) {
    %c0_i32 = arith.constant 0 : i32
    %c0_i32_0 = arith.constant 0 : i32
    %c0_i32_1 = arith.constant 0 : i32
    %c0_i32_2 = arith.constant 0 : i32
    return %arg0, %arg1, %c0_i32, %c0_i32_0, %c0_i32_1 : i32, i32, i32, i32, i32
  }
}

module attributes {stable_mosaic.version = 11 : i64} {
  func.func @kernel(%arg0: i32, %arg1: i32, %arg2: i32, %arg3: memref<1x1x6x6x16xbf16, #tpu.memory_space<vmem>>, %arg4: memref<1x3x3x16x8xbf16, #tpu.memory_space<vmem>>, %arg5: memref<1x8xf32, #tpu.memory_space<vmem>>, %arg6: memref<1x8xf32, #tpu.memory_space<vmem>>, %arg7: memref<1x1x4x4x8xf32, #tpu.memory_space<vmem>>) attributes {dimension_semantics = [#tpu.dimension_semantics<parallel>, #tpu.dimension_semantics<parallel>, #tpu.dimension_semantics<arbitrary>], iteration_bounds = array<i64: 1, 8, 3>, scalar_prefetch = 0 : i64, scratch_operands = 0 : i64, tpu.core_type = #tpu.core_type<tc>, window_params = [{transform_indices = @transform_0, window_bounds = array<i64: 1, 1, 6, 6, 16>}, {transform_indices = @transform_1, window_bounds = array<i64: 1, 3, 3, 16, 8>}, {pipeline_mode = #tpu.pipeline_mode<synchronous>, transform_indices = @transform_2, window_bounds = array<i64: 1, 8>}, {pipeline_mode = #tpu.pipeline_mode<synchronous>, transform_indices = @transform_3, window_bounds = array<i64: 1, 8>}, {transform_indices = @transform_4, window_bounds = array<i64: 1, 1, 4, 4, 8>}]} {
    %c0_i32 = arith.constant 0 : i32
    %0 = arith.cmpi eq, %arg2, %c0_i32 : i32
    %1 = arith.extui %0 : i1 to i32
    %c0_i32_0 = arith.constant 0 : i32
    %2 = arith.cmpi ne, %1, %c0_i32_0 : i32
    scf.if %2 {
      %cst_68 = arith.constant 0.000000e+00 : f32
      %70 = vector.broadcast %cst_68 : f32 to vector<4x4x8xf32>
      %c0_69 = arith.constant 0 : index
      %c0_70 = arith.constant 0 : index
      %c0_71 = arith.constant 0 : index
      %c0_72 = arith.constant 0 : index
      %c0_73 = arith.constant 0 : index
      %71 = vector.load %arg7[%c0_69, %c0_70, %c0_71, %c0_72, %c0_73] : memref<1x1x4x4x8xf32, #tpu.memory_space<vmem>>, vector<1x1x4x4x8xf32>
      %72 = vector.shape_cast %71 : vector<1x1x4x4x8xf32> to vector<4x4x8xf32>
      %73 = vector.shape_cast %70 : vector<4x4x8xf32> to vector<1x1x4x4x8xf32>
      tpu.vector_store %arg7[%c0_69, %c0_70, %c0_71, %c0_72, %c0_73], %73 {strides = array<i32>} : memref<1x1x4x4x8xf32, #tpu.memory_space<vmem>>, vector<1x1x4x4x8xf32>,
    } else {
    }
    %c0 = arith.constant 0 : index
    %c0_1 = arith.constant 0 : index
    %c0_2 = arith.constant 0 : index
    %c0_3 = arith.constant 0 : index
    %c0_4 = arith.constant 0 : index
    %3 = vector.load %arg3[%c0, %c0_1, %c0_2, %c0_3, %c0_4] : memref<1x1x6x6x16xbf16, #tpu.memory_space<vmem>>, vector<1x1x6x6x16xbf16>
    %4 = vector.shape_cast %3 : vector<1x1x6x6x16xbf16> to vector<6x6x16xbf16>
    %cst = arith.constant 0.000000e+00 : f32
    %5 = vector.broadcast %cst : f32 to vector<16x8xf32>
    %6 = vector.extract_strided_slice %4 {offsets = [0, 0, 0], sizes = [4, 4, 16], strides = [1, 1, 1]} : vector<6x6x16xbf16> to vector<4x4x16xbf16>
    %7 = vector.shape_cast %6 : vector<4x4x16xbf16> to vector<16x16xbf16>
    %c0_5 = arith.constant 0 : index
    %c0_6 = arith.constant 0 : index
    %c0_7 = arith.constant 0 : index
    %c0_8 = arith.constant 0 : index
    %c0_9 = arith.constant 0 : index
    %8 = vector.load %arg4[%c0_5, %c0_6, %c0_7, %c0_8, %c0_9] : memref<1x3x3x16x8xbf16, #tpu.memory_space<vmem>>, vector<1x1x1x16x8xbf16>
    %9 = vector.shape_cast %8 : vector<1x1x1x16x8xbf16> to vector<16x8xbf16>
    %cst_10 = arith.constant dense<0.000000e+00> : vector<16x8xf32>
    %10 = tpu.matmul %7, %9, %cst_10 {dimension_numbers = #tpu.dot_dimension_numbers<[1], [0], [0], [1], [0, 0, 1, 1], [], []>} : vector<16x16xbf16>, vector<16x8xbf16>, vector<16x8xf32> -> vector<16x8xf32>
    %11 = arith.addf %5, %10 : vector<16x8xf32>
    %12 = vector.extract_strided_slice %4 {offsets = [0, 1, 0], sizes = [4, 4, 16], strides = [1, 1, 1]} : vector<6x6x16xbf16> to vector<4x4x16xbf16>
    %13 = vector.shape_cast %12 : vector<4x4x16xbf16> to vector<16x16xbf16>
    %c0_11 = arith.constant 0 : index
    %c0_12 = arith.constant 0 : index
    %c1 = arith.constant 1 : index
    %c0_13 = arith.constant 0 : index
    %c0_14 = arith.constant 0 : index
    %14 = vector.load %arg4[%c0_11, %c0_12, %c1, %c0_13, %c0_14] : memref<1x3x3x16x8xbf16, #tpu.memory_space<vmem>>, vector<1x1x1x16x8xbf16>
    %15 = vector.shape_cast %14 : vector<1x1x1x16x8xbf16> to vector<16x8xbf16>
    %cst_15 = arith.constant dense<0.000000e+00> : vector<16x8xf32>
    %16 = tpu.matmul %13, %15, %cst_15 {dimension_numbers = #tpu.dot_dimension_numbers<[1], [0], [0], [1], [0, 0, 1, 1], [], []>} : vector<16x16xbf16>, vector<16x8xbf16>, vector<16x8xf32> -> vector<16x8xf32>
    %17 = arith.addf %11, %16 : vector<16x8xf32>
    %18 = vector.extract_strided_slice %4 {offsets = [0, 2, 0], sizes = [4, 4, 16], strides = [1, 1, 1]} : vector<6x6x16xbf16> to vector<4x4x16xbf16>
    %19 = vector.shape_cast %18 : vector<4x4x16xbf16> to vector<16x16xbf16>
    %c0_16 = arith.constant 0 : index
    %c0_17 = arith.constant 0 : index
    %c2 = arith.constant 2 : index
    %c0_18 = arith.constant 0 : index
    %c0_19 = arith.constant 0 : index
    %20 = vector.load %arg4[%c0_16, %c0_17, %c2, %c0_18, %c0_19] : memref<1x3x3x16x8xbf16, #tpu.memory_space<vmem>>, vector<1x1x1x16x8xbf16>
    %21 = vector.shape_cast %20 : vector<1x1x1x16x8xbf16> to vector<16x8xbf16>
    %cst_20 = arith.constant dense<0.000000e+00> : vector<16x8xf32>
    %22 = tpu.matmul %19, %21, %cst_20 {dimension_numbers = #tpu.dot_dimension_numbers<[1], [0], [0], [1], [0, 0, 1, 1], [], []>} : vector<16x16xbf16>, vector<16x8xbf16>, vector<16x8xf32> -> vector<16x8xf32>
    %23 = arith.addf %17, %22 : vector<16x8xf32>
    %24 = vector.extract_strided_slice %4 {offsets = [1, 0, 0], sizes = [4, 4, 16], strides = [1, 1, 1]} : vector<6x6x16xbf16> to vector<4x4x16xbf16>
    %25 = vector.shape_cast %24 : vector<4x4x16xbf16> to vector<16x16xbf16>
    %c0_21 = arith.constant 0 : index
    %c1_22 = arith.constant 1 : index
    %c0_23 = arith.constant 0 : index
    %c0_24 = arith.constant 0 : index
    %c0_25 = arith.constant 0 : index
    %26 = vector.load %arg4[%c0_21, %c1_22, %c0_23, %c0_24, %c0_25] : memref<1x3x3x16x8xbf16, #tpu.memory_space<vmem>>, vector<1x1x1x16x8xbf16>
    %27 = vector.shape_cast %26 : vector<1x1x1x16x8xbf16> to vector<16x8xbf16>
    %cst_26 = arith.constant dense<0.000000e+00> : vector<16x8xf32>
    %28 = tpu.matmul %25, %27, %cst_26 {dimension_numbers = #tpu.dot_dimension_numbers<[1], [0], [0], [1], [0, 0, 1, 1], [], []>} : vector<16x16xbf16>, vector<16x8xbf16>, vector<16x8xf32> -> vector<16x8xf32>
    %29 = arith.addf %23, %28 : vector<16x8xf32>
    %30 = vector.extract_strided_slice %4 {offsets = [1, 1, 0], sizes = [4, 4, 16], strides = [1, 1, 1]} : vector<6x6x16xbf16> to vector<4x4x16xbf16>
    %31 = vector.shape_cast %30 : vector<4x4x16xbf16> to vector<16x16xbf16>
    %c0_27 = arith.constant 0 : index
    %c1_28 = arith.constant 1 : index
    %c1_29 = arith.constant 1 : index
    %c0_30 = arith.constant 0 : index
    %c0_31 = arith.constant 0 : index
    %32 = vector.load %arg4[%c0_27, %c1_28, %c1_29, %c0_30, %c0_31] : memref<1x3x3x16x8xbf16, #tpu.memory_space<vmem>>, vector<1x1x1x16x8xbf16>
    %33 = vector.shape_cast %32 : vector<1x1x1x16x8xbf16> to vector<16x8xbf16>
    %cst_32 = arith.constant dense<0.000000e+00> : vector<16x8xf32>
    %34 = tpu.matmul %31, %33, %cst_32 {dimension_numbers = #tpu.dot_dimension_numbers<[1], [0], [0], [1], [0, 0, 1, 1], [], []>} : vector<16x16xbf16>, vector<16x8xbf16>, vector<16x8xf32> -> vector<16x8xf32>
    %35 = arith.addf %29, %34 : vector<16x8xf32>
    %36 = vector.extract_strided_slice %4 {offsets = [1, 2, 0], sizes = [4, 4, 16], strides = [1, 1, 1]} : vector<6x6x16xbf16> to vector<4x4x16xbf16>
    %37 = vector.shape_cast %36 : vector<4x4x16xbf16> to vector<16x16xbf16>
    %c0_33 = arith.constant 0 : index
    %c1_34 = arith.constant 1 : index
    %c2_35 = arith.constant 2 : index
    %c0_36 = arith.constant 0 : index
    %c0_37 = arith.constant 0 : index
    %38 = vector.load %arg4[%c0_33, %c1_34, %c2_35, %c0_36, %c0_37] : memref<1x3x3x16x8xbf16, #tpu.memory_space<vmem>>, vector<1x1x1x16x8xbf16>
    %39 = vector.shape_cast %38 : vector<1x1x1x16x8xbf16> to vector<16x8xbf16>
    %cst_38 = arith.constant dense<0.000000e+00> : vector<16x8xf32>
    %40 = tpu.matmul %37, %39, %cst_38 {dimension_numbers = #tpu.dot_dimension_numbers<[1], [0], [0], [1], [0, 0, 1, 1], [], []>} : vector<16x16xbf16>, vector<16x8xbf16>, vector<16x8xf32> -> vector<16x8xf32>
    %41 = arith.addf %35, %40 : vector<16x8xf32>
    %42 = vector.extract_strided_slice %4 {offsets = [2, 0, 0], sizes = [4, 4, 16], strides = [1, 1, 1]} : vector<6x6x16xbf16> to vector<4x4x16xbf16>
    %43 = vector.shape_cast %42 : vector<4x4x16xbf16> to vector<16x16xbf16>
    %c0_39 = arith.constant 0 : index
    %c2_40 = arith.constant 2 : index
    %c0_41 = arith.constant 0 : index
    %c0_42 = arith.constant 0 : index
    %c0_43 = arith.constant 0 : index
    %44 = vector.load %arg4[%c0_39, %c2_40, %c0_41, %c0_42, %c0_43] : memref<1x3x3x16x8xbf16, #tpu.memory_space<vmem>>, vector<1x1x1x16x8xbf16>
    %45 = vector.shape_cast %44 : vector<1x1x1x16x8xbf16> to vector<16x8xbf16>
    %cst_44 = arith.constant dense<0.000000e+00> : vector<16x8xf32>
    %46 = tpu.matmul %43, %45, %cst_44 {dimension_numbers = #tpu.dot_dimension_numbers<[1], [0], [0], [1], [0, 0, 1, 1], [], []>} : vector<16x16xbf16>, vector<16x8xbf16>, vector<16x8xf32> -> vector<16x8xf32>
    %47 = arith.addf %41, %46 : vector<16x8xf32>
    %48 = vector.extract_strided_slice %4 {offsets = [2, 1, 0], sizes = [4, 4, 16], strides = [1, 1, 1]} : vector<6x6x16xbf16> to vector<4x4x16xbf16>
    %49 = vector.shape_cast %48 : vector<4x4x16xbf16> to vector<16x16xbf16>
    %c0_45 = arith.constant 0 : index
    %c2_46 = arith.constant 2 : index
    %c1_47 = arith.constant 1 : index
    %c0_48 = arith.constant 0 : index
    %c0_49 = arith.constant 0 : index
    %50 = vector.load %arg4[%c0_45, %c2_46, %c1_47, %c0_48, %c0_49] : memref<1x3x3x16x8xbf16, #tpu.memory_space<vmem>>, vector<1x1x1x16x8xbf16>
    %51 = vector.shape_cast %50 : vector<1x1x1x16x8xbf16> to vector<16x8xbf16>
    %cst_50 = arith.constant dense<0.000000e+00> : vector<16x8xf32>
    %52 = tpu.matmul %49, %51, %cst_50 {dimension_numbers = #tpu.dot_dimension_numbers<[1], [0], [0], [1], [0, 0, 1, 1], [], []>} : vector<16x16xbf16>, vector<16x8xbf16>, vector<16x8xf32> -> vector<16x8xf32>
    %53 = arith.addf %47, %52 : vector<16x8xf32>
    %54 = vector.extract_strided_slice %4 {offsets = [2, 2, 0], sizes = [4, 4, 16], strides = [1, 1, 1]} : vector<6x6x16xbf16> to vector<4x4x16xbf16>
    %55 = vector.shape_cast %54 : vector<4x4x16xbf16> to vector<16x16xbf16>
    %c0_51 = arith.constant 0 : index
    %c2_52 = arith.constant 2 : index
    %c2_53 = arith.constant 2 : index
    %c0_54 = arith.constant 0 : index
    %c0_55 = arith.constant 0 : index
    %56 = vector.load %arg4[%c0_51, %c2_52, %c2_53, %c0_54, %c0_55] : memref<1x3x3x16x8xbf16, #tpu.memory_space<vmem>>, vector<1x1x1x16x8xbf16>
    %57 = vector.shape_cast %56 : vector<1x1x1x16x8xbf16> to vector<16x8xbf16>
    %cst_56 = arith.constant dense<0.000000e+00> : vector<16x8xf32>
    %58 = tpu.matmul %55, %57, %cst_56 {dimension_numbers = #tpu.dot_dimension_numbers<[1], [0], [0], [1], [0, 0, 1, 1], [], []>} : vector<16x16xbf16>, vector<16x8xbf16>, vector<16x8xf32> -> vector<16x8xf32>
    %59 = arith.addf %53, %58 : vector<16x8xf32>
    %c0_57 = arith.constant 0 : index
    %c0_58 = arith.constant 0 : index
    %c0_59 = arith.constant 0 : index
    %c0_60 = arith.constant 0 : index
    %c0_61 = arith.constant 0 : index
    %60 = vector.load %arg7[%c0_57, %c0_58, %c0_59, %c0_60, %c0_61] : memref<1x1x4x4x8xf32, #tpu.memory_space<vmem>>, vector<1x1x4x4x8xf32>
    %61 = vector.shape_cast %60 : vector<1x1x4x4x8xf32> to vector<4x4x8xf32>
    %62 = vector.shape_cast %59 : vector<16x8xf32> to vector<4x4x8xf32>
    %63 = arith.addf %61, %62 : vector<4x4x8xf32>
    %c0_62 = arith.constant 0 : index
    %c0_63 = arith.constant 0 : index
    %c0_64 = arith.constant 0 : index
    %c0_65 = arith.constant 0 : index
    %c0_66 = arith.constant 0 : index
    %64 = vector.load %arg7[%c0_62, %c0_63, %c0_64, %c0_65, %c0_66] : memref<1x1x4x4x8xf32, #tpu.memory_space<vmem>>, vector<1x1x4x4x8xf32>
    %65 = vector.shape_cast %64 : vector<1x1x4x4x8xf32> to vector<4x4x8xf32>
    %66 = vector.shape_cast %63 : vector<4x4x8xf32> to vector<1x1x4x4x8xf32>
    tpu.vector_store %arg7[%c0_62, %c0_63, %c0_64, %c0_65, %c0_66], %66 {strides = array<i32>} : memref<1x1x4x4x8xf32, #tpu.memory_space<vmem>>, vector<1x1x4x4x8xf32>,
    %c2_i32 = arith.constant 2 : i32
    %67 = arith.cmpi eq, %arg2, %c2_i32 : i32
    %68 = arith.extui %67 : i1 to i32
    %c0_i32_67 = arith.constant 0 : i32
    %69 = arith.cmpi ne, %68, %c0_i32_67 : i32
    scf.if %69 {
      %c0_68 = arith.constant 0 : index
      %c0_69 = arith.constant 0 : index
      %c0_70 = arith.constant 0 : index
      %c0_71 = arith.constant 0 : index
      %c0_72 = arith.constant 0 : index
      %70 = vector.load %arg7[%c0_68, %c0_69, %c0_70, %c0_71, %c0_72] : memref<1x1x4x4x8xf32, #tpu.memory_space<vmem>>, vector<1x1x4x4x8xf32>
      %71 = vector.shape_cast %70 : vector<1x1x4x4x8xf32> to vector<4x4x8xf32>
      %c0_73 = arith.constant 0 : index
      %c0_74 = arith.constant 0 : index
      %72 = vector.load %arg5[%c0_73, %c0_74] : memref<1x8xf32, #tpu.memory_space<vmem>>, vector<1x8xf32>
      %73 = vector.shape_cast %72 : vector<1x8xf32> to vector<1x1x8xf32>
      %74 = vector.broadcast %73 : vector<1x1x8xf32> to vector<4x4x8xf32>
      %75 = arith.mulf %71, %74 : vector<4x4x8xf32>
      %c0_75 = arith.constant 0 : index
      %c0_76 = arith.constant 0 : index
      %76 = vector.load %arg6[%c0_75, %c0_76] : memref<1x8xf32, #tpu.memory_space<vmem>>, vector<1x8xf32>
      %77 = vector.shape_cast %76 : vector<1x8xf32> to vector<1x1x8xf32>
      %78 = vector.broadcast %77 : vector<1x1x8xf32> to vector<4x4x8xf32>
      %79 = arith.addf %75, %78 : vector<4x4x8xf32>
      %cst_77 = arith.constant 0.000000e+00 : f32
      %80 = vector.broadcast %cst_77 : f32 to vector<4x4x8xf32>
      %81 = arith.maximumf %79, %80 : vector<4x4x8xf32>
      %c0_78 = arith.constant 0 : index
      %c0_79 = arith.constant 0 : index
      %c0_80 = arith.constant 0 : index
      %c0_81 = arith.constant 0 : index
      %c0_82 = arith.constant 0 : index
      %82 = vector.load %arg7[%c0_78, %c0_79, %c0_80, %c0_81, %c0_82] : memref<1x1x4x4x8xf32, #tpu.memory_space<vmem>>, vector<1x1x4x4x8xf32>
      %83 = vector.shape_cast %82 : vector<1x1x4x4x8xf32> to vector<4x4x8xf32>
      %84 = vector.shape_cast %81 : vector<4x4x8xf32> to vector<1x1x4x4x8xf32>
      tpu.vector_store %arg7[%c0_78, %c0_79, %c0_80, %c0_81, %c0_82], %84 {strides = array<i32>} : memref<1x1x4x4x8xf32, #tpu.memory_space<vmem>>, vector<1x1x4x4x8xf32>,
    } else {
    }
    return
  }
  func.func @transform_0(%arg0: i32, %arg1: i32, %arg2: i32) -> (i32, i32, i32, i32, i32) {
    %0 = arith.addi %arg1, %arg2 : i32
    %c0_i32 = arith.constant 0 : i32
    %c0_i32_0 = arith.constant 0 : i32
    %c0_i32_1 = arith.constant 0 : i32
    %c0_i32_2 = arith.constant 0 : i32
    return %arg0, %0, %c0_i32, %c0_i32_0, %c0_i32_1 : i32, i32, i32, i32, i32
  }
  func.func @transform_1(%arg0: i32, %arg1: i32, %arg2: i32) -> (i32, i32, i32, i32, i32) {
    %c0_i32 = arith.constant 0 : i32
    %c0_i32_0 = arith.constant 0 : i32
    %c0_i32_1 = arith.constant 0 : i32
    %c0_i32_2 = arith.constant 0 : i32
    %c0_i32_3 = arith.constant 0 : i32
    return %arg2, %c0_i32, %c0_i32_0, %c0_i32_1, %c0_i32_2 : i32, i32, i32, i32, i32
  }
  func.func @transform_2(%arg0: i32, %arg1: i32, %arg2: i32) -> (i32, i32) {
    %c0_i32 = arith.constant 0 : i32
    %c0_i32_0 = arith.constant 0 : i32
    %c0_i32_1 = arith.constant 0 : i32
    return %c0_i32, %c0_i32_0 : i32, i32
  }
  func.func @transform_3(%arg0: i32, %arg1: i32, %arg2: i32) -> (i32, i32) {
    %c0_i32 = arith.constant 0 : i32
    %c0_i32_0 = arith.constant 0 : i32
    %c0_i32_1 = arith.constant 0 : i32
    return %c0_i32, %c0_i32_0 : i32, i32
  }
  func.func @transform_4(%arg0: i32, %arg1: i32, %arg2: i32) -> (i32, i32, i32, i32, i32) {
    %c0_i32 = arith.constant 0 : i32
    %c0_i32_0 = arith.constant 0 : i32
    %c0_i32_1 = arith.constant 0 : i32
    %c0_i32_2 = arith.constant 0 : i32
    return %arg0, %arg1, %c0_i32, %c0_i32_0, %c0_i32_1 : i32, i32, i32, i32, i32
  }
}

module attributes {stable_mosaic.version = 11 : i64} {
  func.func @kernel(%arg0: i32, %arg1: i32, %arg2: i32, %arg3: memref<1x1x10x10x16xbf16, #tpu.memory_space<vmem>>, %arg4: memref<1x3x3x16x4xbf16, #tpu.memory_space<vmem>>, %arg5: memref<1x4xf32, #tpu.memory_space<vmem>>, %arg6: memref<1x4xf32, #tpu.memory_space<vmem>>, %arg7: memref<1x1x8x8x4xf32, #tpu.memory_space<vmem>>) attributes {dimension_semantics = [#tpu.dimension_semantics<parallel>, #tpu.dimension_semantics<parallel>, #tpu.dimension_semantics<arbitrary>], iteration_bounds = array<i64: 1, 8, 3>, scalar_prefetch = 0 : i64, scratch_operands = 0 : i64, tpu.core_type = #tpu.core_type<tc>, window_params = [{transform_indices = @transform_0, window_bounds = array<i64: 1, 1, 10, 10, 16>}, {transform_indices = @transform_1, window_bounds = array<i64: 1, 3, 3, 16, 4>}, {pipeline_mode = #tpu.pipeline_mode<synchronous>, transform_indices = @transform_2, window_bounds = array<i64: 1, 4>}, {pipeline_mode = #tpu.pipeline_mode<synchronous>, transform_indices = @transform_3, window_bounds = array<i64: 1, 4>}, {transform_indices = @transform_4, window_bounds = array<i64: 1, 1, 8, 8, 4>}]} {
    %c0_i32 = arith.constant 0 : i32
    %0 = arith.cmpi eq, %arg2, %c0_i32 : i32
    %1 = arith.extui %0 : i1 to i32
    %c0_i32_0 = arith.constant 0 : i32
    %2 = arith.cmpi ne, %1, %c0_i32_0 : i32
    scf.if %2 {
      %cst_68 = arith.constant 0.000000e+00 : f32
      %70 = vector.broadcast %cst_68 : f32 to vector<8x8x4xf32>
      %c0_69 = arith.constant 0 : index
      %c0_70 = arith.constant 0 : index
      %c0_71 = arith.constant 0 : index
      %c0_72 = arith.constant 0 : index
      %c0_73 = arith.constant 0 : index
      %71 = vector.load %arg7[%c0_69, %c0_70, %c0_71, %c0_72, %c0_73] : memref<1x1x8x8x4xf32, #tpu.memory_space<vmem>>, vector<1x1x8x8x4xf32>
      %72 = vector.shape_cast %71 : vector<1x1x8x8x4xf32> to vector<8x8x4xf32>
      %73 = vector.shape_cast %70 : vector<8x8x4xf32> to vector<1x1x8x8x4xf32>
      tpu.vector_store %arg7[%c0_69, %c0_70, %c0_71, %c0_72, %c0_73], %73 {strides = array<i32>} : memref<1x1x8x8x4xf32, #tpu.memory_space<vmem>>, vector<1x1x8x8x4xf32>,
    } else {
    }
    %c0 = arith.constant 0 : index
    %c0_1 = arith.constant 0 : index
    %c0_2 = arith.constant 0 : index
    %c0_3 = arith.constant 0 : index
    %c0_4 = arith.constant 0 : index
    %3 = vector.load %arg3[%c0, %c0_1, %c0_2, %c0_3, %c0_4] : memref<1x1x10x10x16xbf16, #tpu.memory_space<vmem>>, vector<1x1x10x10x16xbf16>
    %4 = vector.shape_cast %3 : vector<1x1x10x10x16xbf16> to vector<10x10x16xbf16>
    %cst = arith.constant 0.000000e+00 : f32
    %5 = vector.broadcast %cst : f32 to vector<64x4xf32>
    %6 = vector.extract_strided_slice %4 {offsets = [0, 0, 0], sizes = [8, 8, 16], strides = [1, 1, 1]} : vector<10x10x16xbf16> to vector<8x8x16xbf16>
    %7 = vector.shape_cast %6 : vector<8x8x16xbf16> to vector<64x16xbf16>
    %c0_5 = arith.constant 0 : index
    %c0_6 = arith.constant 0 : index
    %c0_7 = arith.constant 0 : index
    %c0_8 = arith.constant 0 : index
    %c0_9 = arith.constant 0 : index
    %8 = vector.load %arg4[%c0_5, %c0_6, %c0_7, %c0_8, %c0_9] : memref<1x3x3x16x4xbf16, #tpu.memory_space<vmem>>, vector<1x1x1x16x4xbf16>
    %9 = vector.shape_cast %8 : vector<1x1x1x16x4xbf16> to vector<16x4xbf16>
    %cst_10 = arith.constant dense<0.000000e+00> : vector<64x4xf32>
    %10 = tpu.matmul %7, %9, %cst_10 {dimension_numbers = #tpu.dot_dimension_numbers<[1], [0], [0], [1], [0, 0, 1, 1], [], []>} : vector<64x16xbf16>, vector<16x4xbf16>, vector<64x4xf32> -> vector<64x4xf32>
    %11 = arith.addf %5, %10 : vector<64x4xf32>
    %12 = vector.extract_strided_slice %4 {offsets = [0, 1, 0], sizes = [8, 8, 16], strides = [1, 1, 1]} : vector<10x10x16xbf16> to vector<8x8x16xbf16>
    %13 = vector.shape_cast %12 : vector<8x8x16xbf16> to vector<64x16xbf16>
    %c0_11 = arith.constant 0 : index
    %c0_12 = arith.constant 0 : index
    %c1 = arith.constant 1 : index
    %c0_13 = arith.constant 0 : index
    %c0_14 = arith.constant 0 : index
    %14 = vector.load %arg4[%c0_11, %c0_12, %c1, %c0_13, %c0_14] : memref<1x3x3x16x4xbf16, #tpu.memory_space<vmem>>, vector<1x1x1x16x4xbf16>
    %15 = vector.shape_cast %14 : vector<1x1x1x16x4xbf16> to vector<16x4xbf16>
    %cst_15 = arith.constant dense<0.000000e+00> : vector<64x4xf32>
    %16 = tpu.matmul %13, %15, %cst_15 {dimension_numbers = #tpu.dot_dimension_numbers<[1], [0], [0], [1], [0, 0, 1, 1], [], []>} : vector<64x16xbf16>, vector<16x4xbf16>, vector<64x4xf32> -> vector<64x4xf32>
    %17 = arith.addf %11, %16 : vector<64x4xf32>
    %18 = vector.extract_strided_slice %4 {offsets = [0, 2, 0], sizes = [8, 8, 16], strides = [1, 1, 1]} : vector<10x10x16xbf16> to vector<8x8x16xbf16>
    %19 = vector.shape_cast %18 : vector<8x8x16xbf16> to vector<64x16xbf16>
    %c0_16 = arith.constant 0 : index
    %c0_17 = arith.constant 0 : index
    %c2 = arith.constant 2 : index
    %c0_18 = arith.constant 0 : index
    %c0_19 = arith.constant 0 : index
    %20 = vector.load %arg4[%c0_16, %c0_17, %c2, %c0_18, %c0_19] : memref<1x3x3x16x4xbf16, #tpu.memory_space<vmem>>, vector<1x1x1x16x4xbf16>
    %21 = vector.shape_cast %20 : vector<1x1x1x16x4xbf16> to vector<16x4xbf16>
    %cst_20 = arith.constant dense<0.000000e+00> : vector<64x4xf32>
    %22 = tpu.matmul %19, %21, %cst_20 {dimension_numbers = #tpu.dot_dimension_numbers<[1], [0], [0], [1], [0, 0, 1, 1], [], []>} : vector<64x16xbf16>, vector<16x4xbf16>, vector<64x4xf32> -> vector<64x4xf32>
    %23 = arith.addf %17, %22 : vector<64x4xf32>
    %24 = vector.extract_strided_slice %4 {offsets = [1, 0, 0], sizes = [8, 8, 16], strides = [1, 1, 1]} : vector<10x10x16xbf16> to vector<8x8x16xbf16>
    %25 = vector.shape_cast %24 : vector<8x8x16xbf16> to vector<64x16xbf16>
    %c0_21 = arith.constant 0 : index
    %c1_22 = arith.constant 1 : index
    %c0_23 = arith.constant 0 : index
    %c0_24 = arith.constant 0 : index
    %c0_25 = arith.constant 0 : index
    %26 = vector.load %arg4[%c0_21, %c1_22, %c0_23, %c0_24, %c0_25] : memref<1x3x3x16x4xbf16, #tpu.memory_space<vmem>>, vector<1x1x1x16x4xbf16>
    %27 = vector.shape_cast %26 : vector<1x1x1x16x4xbf16> to vector<16x4xbf16>
    %cst_26 = arith.constant dense<0.000000e+00> : vector<64x4xf32>
    %28 = tpu.matmul %25, %27, %cst_26 {dimension_numbers = #tpu.dot_dimension_numbers<[1], [0], [0], [1], [0, 0, 1, 1], [], []>} : vector<64x16xbf16>, vector<16x4xbf16>, vector<64x4xf32> -> vector<64x4xf32>
    %29 = arith.addf %23, %28 : vector<64x4xf32>
    %30 = vector.extract_strided_slice %4 {offsets = [1, 1, 0], sizes = [8, 8, 16], strides = [1, 1, 1]} : vector<10x10x16xbf16> to vector<8x8x16xbf16>
    %31 = vector.shape_cast %30 : vector<8x8x16xbf16> to vector<64x16xbf16>
    %c0_27 = arith.constant 0 : index
    %c1_28 = arith.constant 1 : index
    %c1_29 = arith.constant 1 : index
    %c0_30 = arith.constant 0 : index
    %c0_31 = arith.constant 0 : index
    %32 = vector.load %arg4[%c0_27, %c1_28, %c1_29, %c0_30, %c0_31] : memref<1x3x3x16x4xbf16, #tpu.memory_space<vmem>>, vector<1x1x1x16x4xbf16>
    %33 = vector.shape_cast %32 : vector<1x1x1x16x4xbf16> to vector<16x4xbf16>
    %cst_32 = arith.constant dense<0.000000e+00> : vector<64x4xf32>
    %34 = tpu.matmul %31, %33, %cst_32 {dimension_numbers = #tpu.dot_dimension_numbers<[1], [0], [0], [1], [0, 0, 1, 1], [], []>} : vector<64x16xbf16>, vector<16x4xbf16>, vector<64x4xf32> -> vector<64x4xf32>
    %35 = arith.addf %29, %34 : vector<64x4xf32>
    %36 = vector.extract_strided_slice %4 {offsets = [1, 2, 0], sizes = [8, 8, 16], strides = [1, 1, 1]} : vector<10x10x16xbf16> to vector<8x8x16xbf16>
    %37 = vector.shape_cast %36 : vector<8x8x16xbf16> to vector<64x16xbf16>
    %c0_33 = arith.constant 0 : index
    %c1_34 = arith.constant 1 : index
    %c2_35 = arith.constant 2 : index
    %c0_36 = arith.constant 0 : index
    %c0_37 = arith.constant 0 : index
    %38 = vector.load %arg4[%c0_33, %c1_34, %c2_35, %c0_36, %c0_37] : memref<1x3x3x16x4xbf16, #tpu.memory_space<vmem>>, vector<1x1x1x16x4xbf16>
    %39 = vector.shape_cast %38 : vector<1x1x1x16x4xbf16> to vector<16x4xbf16>
    %cst_38 = arith.constant dense<0.000000e+00> : vector<64x4xf32>
    %40 = tpu.matmul %37, %39, %cst_38 {dimension_numbers = #tpu.dot_dimension_numbers<[1], [0], [0], [1], [0, 0, 1, 1], [], []>} : vector<64x16xbf16>, vector<16x4xbf16>, vector<64x4xf32> -> vector<64x4xf32>
    %41 = arith.addf %35, %40 : vector<64x4xf32>
    %42 = vector.extract_strided_slice %4 {offsets = [2, 0, 0], sizes = [8, 8, 16], strides = [1, 1, 1]} : vector<10x10x16xbf16> to vector<8x8x16xbf16>
    %43 = vector.shape_cast %42 : vector<8x8x16xbf16> to vector<64x16xbf16>
    %c0_39 = arith.constant 0 : index
    %c2_40 = arith.constant 2 : index
    %c0_41 = arith.constant 0 : index
    %c0_42 = arith.constant 0 : index
    %c0_43 = arith.constant 0 : index
    %44 = vector.load %arg4[%c0_39, %c2_40, %c0_41, %c0_42, %c0_43] : memref<1x3x3x16x4xbf16, #tpu.memory_space<vmem>>, vector<1x1x1x16x4xbf16>
    %45 = vector.shape_cast %44 : vector<1x1x1x16x4xbf16> to vector<16x4xbf16>
    %cst_44 = arith.constant dense<0.000000e+00> : vector<64x4xf32>
    %46 = tpu.matmul %43, %45, %cst_44 {dimension_numbers = #tpu.dot_dimension_numbers<[1], [0], [0], [1], [0, 0, 1, 1], [], []>} : vector<64x16xbf16>, vector<16x4xbf16>, vector<64x4xf32> -> vector<64x4xf32>
    %47 = arith.addf %41, %46 : vector<64x4xf32>
    %48 = vector.extract_strided_slice %4 {offsets = [2, 1, 0], sizes = [8, 8, 16], strides = [1, 1, 1]} : vector<10x10x16xbf16> to vector<8x8x16xbf16>
    %49 = vector.shape_cast %48 : vector<8x8x16xbf16> to vector<64x16xbf16>
    %c0_45 = arith.constant 0 : index
    %c2_46 = arith.constant 2 : index
    %c1_47 = arith.constant 1 : index
    %c0_48 = arith.constant 0 : index
    %c0_49 = arith.constant 0 : index
    %50 = vector.load %arg4[%c0_45, %c2_46, %c1_47, %c0_48, %c0_49] : memref<1x3x3x16x4xbf16, #tpu.memory_space<vmem>>, vector<1x1x1x16x4xbf16>
    %51 = vector.shape_cast %50 : vector<1x1x1x16x4xbf16> to vector<16x4xbf16>
    %cst_50 = arith.constant dense<0.000000e+00> : vector<64x4xf32>
    %52 = tpu.matmul %49, %51, %cst_50 {dimension_numbers = #tpu.dot_dimension_numbers<[1], [0], [0], [1], [0, 0, 1, 1], [], []>} : vector<64x16xbf16>, vector<16x4xbf16>, vector<64x4xf32> -> vector<64x4xf32>
    %53 = arith.addf %47, %52 : vector<64x4xf32>
    %54 = vector.extract_strided_slice %4 {offsets = [2, 2, 0], sizes = [8, 8, 16], strides = [1, 1, 1]} : vector<10x10x16xbf16> to vector<8x8x16xbf16>
    %55 = vector.shape_cast %54 : vector<8x8x16xbf16> to vector<64x16xbf16>
    %c0_51 = arith.constant 0 : index
    %c2_52 = arith.constant 2 : index
    %c2_53 = arith.constant 2 : index
    %c0_54 = arith.constant 0 : index
    %c0_55 = arith.constant 0 : index
    %56 = vector.load %arg4[%c0_51, %c2_52, %c2_53, %c0_54, %c0_55] : memref<1x3x3x16x4xbf16, #tpu.memory_space<vmem>>, vector<1x1x1x16x4xbf16>
    %57 = vector.shape_cast %56 : vector<1x1x1x16x4xbf16> to vector<16x4xbf16>
    %cst_56 = arith.constant dense<0.000000e+00> : vector<64x4xf32>
    %58 = tpu.matmul %55, %57, %cst_56 {dimension_numbers = #tpu.dot_dimension_numbers<[1], [0], [0], [1], [0, 0, 1, 1], [], []>} : vector<64x16xbf16>, vector<16x4xbf16>, vector<64x4xf32> -> vector<64x4xf32>
    %59 = arith.addf %53, %58 : vector<64x4xf32>
    %c0_57 = arith.constant 0 : index
    %c0_58 = arith.constant 0 : index
    %c0_59 = arith.constant 0 : index
    %c0_60 = arith.constant 0 : index
    %c0_61 = arith.constant 0 : index
    %60 = vector.load %arg7[%c0_57, %c0_58, %c0_59, %c0_60, %c0_61] : memref<1x1x8x8x4xf32, #tpu.memory_space<vmem>>, vector<1x1x8x8x4xf32>
    %61 = vector.shape_cast %60 : vector<1x1x8x8x4xf32> to vector<8x8x4xf32>
    %62 = vector.shape_cast %59 : vector<64x4xf32> to vector<8x8x4xf32>
    %63 = arith.addf %61, %62 : vector<8x8x4xf32>
    %c0_62 = arith.constant 0 : index
    %c0_63 = arith.constant 0 : index
    %c0_64 = arith.constant 0 : index
    %c0_65 = arith.constant 0 : index
    %c0_66 = arith.constant 0 : index
    %64 = vector.load %arg7[%c0_62, %c0_63, %c0_64, %c0_65, %c0_66] : memref<1x1x8x8x4xf32, #tpu.memory_space<vmem>>, vector<1x1x8x8x4xf32>
    %65 = vector.shape_cast %64 : vector<1x1x8x8x4xf32> to vector<8x8x4xf32>
    %66 = vector.shape_cast %63 : vector<8x8x4xf32> to vector<1x1x8x8x4xf32>
    tpu.vector_store %arg7[%c0_62, %c0_63, %c0_64, %c0_65, %c0_66], %66 {strides = array<i32>} : memref<1x1x8x8x4xf32, #tpu.memory_space<vmem>>, vector<1x1x8x8x4xf32>,
    %c2_i32 = arith.constant 2 : i32
    %67 = arith.cmpi eq, %arg2, %c2_i32 : i32
    %68 = arith.extui %67 : i1 to i32
    %c0_i32_67 = arith.constant 0 : i32
    %69 = arith.cmpi ne, %68, %c0_i32_67 : i32
    scf.if %69 {
      %c0_68 = arith.constant 0 : index
      %c0_69 = arith.constant 0 : index
      %c0_70 = arith.constant 0 : index
      %c0_71 = arith.constant 0 : index
      %c0_72 = arith.constant 0 : index
      %70 = vector.load %arg7[%c0_68, %c0_69, %c0_70, %c0_71, %c0_72] : memref<1x1x8x8x4xf32, #tpu.memory_space<vmem>>, vector<1x1x8x8x4xf32>
      %71 = vector.shape_cast %70 : vector<1x1x8x8x4xf32> to vector<8x8x4xf32>
      %c0_73 = arith.constant 0 : index
      %c0_74 = arith.constant 0 : index
      %72 = vector.load %arg5[%c0_73, %c0_74] : memref<1x4xf32, #tpu.memory_space<vmem>>, vector<1x4xf32>
      %73 = vector.shape_cast %72 : vector<1x4xf32> to vector<1x1x4xf32>
      %74 = vector.broadcast %73 : vector<1x1x4xf32> to vector<8x8x4xf32>
      %75 = arith.mulf %71, %74 : vector<8x8x4xf32>
      %c0_75 = arith.constant 0 : index
      %c0_76 = arith.constant 0 : index
      %76 = vector.load %arg6[%c0_75, %c0_76] : memref<1x4xf32, #tpu.memory_space<vmem>>, vector<1x4xf32>
      %77 = vector.shape_cast %76 : vector<1x4xf32> to vector<1x1x4xf32>
      %78 = vector.broadcast %77 : vector<1x1x4xf32> to vector<8x8x4xf32>
      %79 = arith.addf %75, %78 : vector<8x8x4xf32>
      %cst_77 = arith.constant 0.000000e+00 : f32
      %80 = vector.broadcast %cst_77 : f32 to vector<8x8x4xf32>
      %81 = arith.maximumf %79, %80 : vector<8x8x4xf32>
      %c0_78 = arith.constant 0 : index
      %c0_79 = arith.constant 0 : index
      %c0_80 = arith.constant 0 : index
      %c0_81 = arith.constant 0 : index
      %c0_82 = arith.constant 0 : index
      %82 = vector.load %arg7[%c0_78, %c0_79, %c0_80, %c0_81, %c0_82] : memref<1x1x8x8x4xf32, #tpu.memory_space<vmem>>, vector<1x1x8x8x4xf32>
      %83 = vector.shape_cast %82 : vector<1x1x8x8x4xf32> to vector<8x8x4xf32>
      %84 = vector.shape_cast %81 : vector<8x8x4xf32> to vector<1x1x8x8x4xf32>
      tpu.vector_store %arg7[%c0_78, %c0_79, %c0_80, %c0_81, %c0_82], %84 {strides = array<i32>} : memref<1x1x8x8x4xf32, #tpu.memory_space<vmem>>, vector<1x1x8x8x4xf32>,
    } else {
    }
    return
  }
  func.func @transform_0(%arg0: i32, %arg1: i32, %arg2: i32) -> (i32, i32, i32, i32, i32) {
    %0 = arith.addi %arg1, %arg2 : i32
    %c0_i32 = arith.constant 0 : i32
    %c0_i32_0 = arith.constant 0 : i32
    %c0_i32_1 = arith.constant 0 : i32
    %c0_i32_2 = arith.constant 0 : i32
    return %arg0, %0, %c0_i32, %c0_i32_0, %c0_i32_1 : i32, i32, i32, i32, i32
  }
  func.func @transform_1(%arg0: i32, %arg1: i32, %arg2: i32) -> (i32, i32, i32, i32, i32) {
    %c0_i32 = arith.constant 0 : i32
    %c0_i32_0 = arith.constant 0 : i32
    %c0_i32_1 = arith.constant 0 : i32
    %c0_i32_2 = arith.constant 0 : i32
    %c0_i32_3 = arith.constant 0 : i32
    return %arg2, %c0_i32, %c0_i32_0, %c0_i32_1, %c0_i32_2 : i32, i32, i32, i32, i32
  }
  func.func @transform_2(%arg0: i32, %arg1: i32, %arg2: i32) -> (i32, i32) {
    %c0_i32 = arith.constant 0 : i32
    %c0_i32_0 = arith.constant 0 : i32
    %c0_i32_1 = arith.constant 0 : i32
    return %c0_i32, %c0_i32_0 : i32, i32
  }
  func.func @transform_3(%arg0: i32, %arg1: i32, %arg2: i32) -> (i32, i32) {
    %c0_i32 = arith.constant 0 : i32
    %c0_i32_0 = arith.constant 0 : i32
    %c0_i32_1 = arith.constant 0 : i32
    return %c0_i32, %c0_i32_0 : i32, i32
  }
  func.func @transform_4(%arg0: i32, %arg1: i32, %arg2: i32) -> (i32, i32, i32, i32, i32) {
    %c0_i32 = arith.constant 0 : i32
    %c0_i32_0 = arith.constant 0 : i32
    %c0_i32_1 = arith.constant 0 : i32
    %c0_i32_2 = arith.constant 0 : i32
    return %arg0, %arg1, %c0_i32, %c0_i32_0, %c0_i32_1 : i32, i32, i32, i32, i32
  }
}

module attributes {stable_mosaic.version = 11 : i64} {
  func.func @kernel(%arg0: i32, %arg1: i32, %arg2: i32, %arg3: memref<1x1x8x8x10xbf16, #tpu.memory_space<vmem>>, %arg4: memref<1x7x7x10x10xbf16, #tpu.memory_space<vmem>>, %arg5: memref<1x10xf32, #tpu.memory_space<vmem>>, %arg6: memref<1x10xf32, #tpu.memory_space<vmem>>, %arg7: memref<1x1x2x2x10xf32, #tpu.memory_space<vmem>>) attributes {dimension_semantics = [#tpu.dimension_semantics<parallel>, #tpu.dimension_semantics<parallel>, #tpu.dimension_semantics<arbitrary>], iteration_bounds = array<i64: 1, 8, 7>, scalar_prefetch = 0 : i64, scratch_operands = 0 : i64, tpu.core_type = #tpu.core_type<tc>, window_params = [{transform_indices = @transform_0, window_bounds = array<i64: 1, 1, 8, 8, 10>}, {transform_indices = @transform_1, window_bounds = array<i64: 1, 7, 7, 10, 10>}, {pipeline_mode = #tpu.pipeline_mode<synchronous>, transform_indices = @transform_2, window_bounds = array<i64: 1, 10>}, {pipeline_mode = #tpu.pipeline_mode<synchronous>, transform_indices = @transform_3, window_bounds = array<i64: 1, 10>}, {transform_indices = @transform_4, window_bounds = array<i64: 1, 1, 2, 2, 10>}]} {
    %c0_i32 = arith.constant 0 : i32
    %0 = arith.cmpi eq, %arg2, %c0_i32 : i32
    %1 = arith.extui %0 : i1 to i32
    %c0_i32_0 = arith.constant 0 : i32
    %2 = arith.cmpi ne, %1, %c0_i32_0 : i32
    scf.if %2 {
      %cst_304 = arith.constant 0.000000e+00 : f32
      %310 = vector.broadcast %cst_304 : f32 to vector<2x2x10xf32>
      %c0_305 = arith.constant 0 : index
      %c0_306 = arith.constant 0 : index
      %c0_307 = arith.constant 0 : index
      %c0_308 = arith.constant 0 : index
      %c0_309 = arith.constant 0 : index
      %311 = vector.load %arg7[%c0_305, %c0_306, %c0_307, %c0_308, %c0_309] : memref<1x1x2x2x10xf32, #tpu.memory_space<vmem>>, vector<1x1x2x2x10xf32>
      %312 = vector.shape_cast %311 : vector<1x1x2x2x10xf32> to vector<2x2x10xf32>
      %313 = vector.shape_cast %310 : vector<2x2x10xf32> to vector<1x1x2x2x10xf32>
      tpu.vector_store %arg7[%c0_305, %c0_306, %c0_307, %c0_308, %c0_309], %313 {strides = array<i32>} : memref<1x1x2x2x10xf32, #tpu.memory_space<vmem>>, vector<1x1x2x2x10xf32>,
    } else {
    }
    %c0 = arith.constant 0 : index
    %c0_1 = arith.constant 0 : index
    %c0_2 = arith.constant 0 : index
    %c0_3 = arith.constant 0 : index
    %c0_4 = arith.constant 0 : index
    %3 = vector.load %arg3[%c0, %c0_1, %c0_2, %c0_3, %c0_4] : memref<1x1x8x8x10xbf16, #tpu.memory_space<vmem>>, vector<1x1x8x8x10xbf16>
    %4 = vector.shape_cast %3 : vector<1x1x8x8x10xbf16> to vector<8x8x10xbf16>
    %cst = arith.constant 0.000000e+00 : f32
    %5 = vector.broadcast %cst : f32 to vector<4x10xf32>
    %6 = vector.extract_strided_slice %4 {offsets = [0, 0, 0], sizes = [2, 2, 10], strides = [1, 1, 1]} : vector<8x8x10xbf16> to vector<2x2x10xbf16>
    %7 = vector.shape_cast %6 : vector<2x2x10xbf16> to vector<4x10xbf16>
    %c0_5 = arith.constant 0 : index
    %c0_6 = arith.constant 0 : index
    %c0_7 = arith.constant 0 : index
    %c0_8 = arith.constant 0 : index
    %c0_9 = arith.constant 0 : index
    %8 = vector.load %arg4[%c0_5, %c0_6, %c0_7, %c0_8, %c0_9] : memref<1x7x7x10x10xbf16, #tpu.memory_space<vmem>>, vector<1x1x1x10x10xbf16>
    %9 = vector.shape_cast %8 : vector<1x1x1x10x10xbf16> to vector<10x10xbf16>
    %cst_10 = arith.constant dense<0.000000e+00> : vector<4x10xf32>
    %10 = tpu.matmul %7, %9, %cst_10 {dimension_numbers = #tpu.dot_dimension_numbers<[1], [0], [0], [1], [0, 0, 1, 1], [], []>} : vector<4x10xbf16>, vector<10x10xbf16>, vector<4x10xf32> -> vector<4x10xf32>
    %11 = arith.addf %5, %10 : vector<4x10xf32>
    %12 = vector.extract_strided_slice %4 {offsets = [0, 1, 0], sizes = [2, 2, 10], strides = [1, 1, 1]} : vector<8x8x10xbf16> to vector<2x2x10xbf16>
    %13 = vector.shape_cast %12 : vector<2x2x10xbf16> to vector<4x10xbf16>
    %c0_11 = arith.constant 0 : index
    %c0_12 = arith.constant 0 : index
    %c1 = arith.constant 1 : index
    %c0_13 = arith.constant 0 : index
    %c0_14 = arith.constant 0 : index
    %14 = vector.load %arg4[%c0_11, %c0_12, %c1, %c0_13, %c0_14] : memref<1x7x7x10x10xbf16, #tpu.memory_space<vmem>>, vector<1x1x1x10x10xbf16>
    %15 = vector.shape_cast %14 : vector<1x1x1x10x10xbf16> to vector<10x10xbf16>
    %cst_15 = arith.constant dense<0.000000e+00> : vector<4x10xf32>
    %16 = tpu.matmul %13, %15, %cst_15 {dimension_numbers = #tpu.dot_dimension_numbers<[1], [0], [0], [1], [0, 0, 1, 1], [], []>} : vector<4x10xbf16>, vector<10x10xbf16>, vector<4x10xf32> -> vector<4x10xf32>
    %17 = arith.addf %11, %16 : vector<4x10xf32>
    %18 = vector.extract_strided_slice %4 {offsets = [0, 2, 0], sizes = [2, 2, 10], strides = [1, 1, 1]} : vector<8x8x10xbf16> to vector<2x2x10xbf16>
    %19 = vector.shape_cast %18 : vector<2x2x10xbf16> to vector<4x10xbf16>
    %c0_16 = arith.constant 0 : index
    %c0_17 = arith.constant 0 : index
    %c2 = arith.constant 2 : index
    %c0_18 = arith.constant 0 : index
    %c0_19 = arith.constant 0 : index
    %20 = vector.load %arg4[%c0_16, %c0_17, %c2, %c0_18, %c0_19] : memref<1x7x7x10x10xbf16, #tpu.memory_space<vmem>>, vector<1x1x1x10x10xbf16>
    %21 = vector.shape_cast %20 : vector<1x1x1x10x10xbf16> to vector<10x10xbf16>
    %cst_20 = arith.constant dense<0.000000e+00> : vector<4x10xf32>
    %22 = tpu.matmul %19, %21, %cst_20 {dimension_numbers = #tpu.dot_dimension_numbers<[1], [0], [0], [1], [0, 0, 1, 1], [], []>} : vector<4x10xbf16>, vector<10x10xbf16>, vector<4x10xf32> -> vector<4x10xf32>
    %23 = arith.addf %17, %22 : vector<4x10xf32>
    %24 = vector.extract_strided_slice %4 {offsets = [0, 3, 0], sizes = [2, 2, 10], strides = [1, 1, 1]} : vector<8x8x10xbf16> to vector<2x2x10xbf16>
    %25 = vector.shape_cast %24 : vector<2x2x10xbf16> to vector<4x10xbf16>
    %c0_21 = arith.constant 0 : index
    %c0_22 = arith.constant 0 : index
    %c3 = arith.constant 3 : index
    %c0_23 = arith.constant 0 : index
    %c0_24 = arith.constant 0 : index
    %26 = vector.load %arg4[%c0_21, %c0_22, %c3, %c0_23, %c0_24] : memref<1x7x7x10x10xbf16, #tpu.memory_space<vmem>>, vector<1x1x1x10x10xbf16>
    %27 = vector.shape_cast %26 : vector<1x1x1x10x10xbf16> to vector<10x10xbf16>
    %cst_25 = arith.constant dense<0.000000e+00> : vector<4x10xf32>
    %28 = tpu.matmul %25, %27, %cst_25 {dimension_numbers = #tpu.dot_dimension_numbers<[1], [0], [0], [1], [0, 0, 1, 1], [], []>} : vector<4x10xbf16>, vector<10x10xbf16>, vector<4x10xf32> -> vector<4x10xf32>
    %29 = arith.addf %23, %28 : vector<4x10xf32>
    %30 = vector.extract_strided_slice %4 {offsets = [0, 4, 0], sizes = [2, 2, 10], strides = [1, 1, 1]} : vector<8x8x10xbf16> to vector<2x2x10xbf16>
    %31 = vector.shape_cast %30 : vector<2x2x10xbf16> to vector<4x10xbf16>
    %c0_26 = arith.constant 0 : index
    %c0_27 = arith.constant 0 : index
    %c4 = arith.constant 4 : index
    %c0_28 = arith.constant 0 : index
    %c0_29 = arith.constant 0 : index
    %32 = vector.load %arg4[%c0_26, %c0_27, %c4, %c0_28, %c0_29] : memref<1x7x7x10x10xbf16, #tpu.memory_space<vmem>>, vector<1x1x1x10x10xbf16>
    %33 = vector.shape_cast %32 : vector<1x1x1x10x10xbf16> to vector<10x10xbf16>
    %cst_30 = arith.constant dense<0.000000e+00> : vector<4x10xf32>
    %34 = tpu.matmul %31, %33, %cst_30 {dimension_numbers = #tpu.dot_dimension_numbers<[1], [0], [0], [1], [0, 0, 1, 1], [], []>} : vector<4x10xbf16>, vector<10x10xbf16>, vector<4x10xf32> -> vector<4x10xf32>
    %35 = arith.addf %29, %34 : vector<4x10xf32>
    %36 = vector.extract_strided_slice %4 {offsets = [0, 5, 0], sizes = [2, 2, 10], strides = [1, 1, 1]} : vector<8x8x10xbf16> to vector<2x2x10xbf16>
    %37 = vector.shape_cast %36 : vector<2x2x10xbf16> to vector<4x10xbf16>
    %c0_31 = arith.constant 0 : index
    %c0_32 = arith.constant 0 : index
    %c5 = arith.constant 5 : index
    %c0_33 = arith.constant 0 : index
    %c0_34 = arith.constant 0 : index
    %38 = vector.load %arg4[%c0_31, %c0_32, %c5, %c0_33, %c0_34] : memref<1x7x7x10x10xbf16, #tpu.memory_space<vmem>>, vector<1x1x1x10x10xbf16>
    %39 = vector.shape_cast %38 : vector<1x1x1x10x10xbf16> to vector<10x10xbf16>
    %cst_35 = arith.constant dense<0.000000e+00> : vector<4x10xf32>
    %40 = tpu.matmul %37, %39, %cst_35 {dimension_numbers = #tpu.dot_dimension_numbers<[1], [0], [0], [1], [0, 0, 1, 1], [], []>} : vector<4x10xbf16>, vector<10x10xbf16>, vector<4x10xf32> -> vector<4x10xf32>
    %41 = arith.addf %35, %40 : vector<4x10xf32>
    %42 = vector.extract_strided_slice %4 {offsets = [0, 6, 0], sizes = [2, 2, 10], strides = [1, 1, 1]} : vector<8x8x10xbf16> to vector<2x2x10xbf16>
    %43 = vector.shape_cast %42 : vector<2x2x10xbf16> to vector<4x10xbf16>
    %c0_36 = arith.constant 0 : index
    %c0_37 = arith.constant 0 : index
    %c6 = arith.constant 6 : index
    %c0_38 = arith.constant 0 : index
    %c0_39 = arith.constant 0 : index
    %44 = vector.load %arg4[%c0_36, %c0_37, %c6, %c0_38, %c0_39] : memref<1x7x7x10x10xbf16, #tpu.memory_space<vmem>>, vector<1x1x1x10x10xbf16>
    %45 = vector.shape_cast %44 : vector<1x1x1x10x10xbf16> to vector<10x10xbf16>
    %cst_40 = arith.constant dense<0.000000e+00> : vector<4x10xf32>
    %46 = tpu.matmul %43, %45, %cst_40 {dimension_numbers = #tpu.dot_dimension_numbers<[1], [0], [0], [1], [0, 0, 1, 1], [], []>} : vector<4x10xbf16>, vector<10x10xbf16>, vector<4x10xf32> -> vector<4x10xf32>
    %47 = arith.addf %41, %46 : vector<4x10xf32>
    %48 = vector.extract_strided_slice %4 {offsets = [1, 0, 0], sizes = [2, 2, 10], strides = [1, 1, 1]} : vector<8x8x10xbf16> to vector<2x2x10xbf16>
    %49 = vector.shape_cast %48 : vector<2x2x10xbf16> to vector<4x10xbf16>
    %c0_41 = arith.constant 0 : index
    %c1_42 = arith.constant 1 : index
    %c0_43 = arith.constant 0 : index
    %c0_44 = arith.constant 0 : index
    %c0_45 = arith.constant 0 : index
    %50 = vector.load %arg4[%c0_41, %c1_42, %c0_43, %c0_44, %c0_45] : memref<1x7x7x10x10xbf16, #tpu.memory_space<vmem>>, vector<1x1x1x10x10xbf16>
    %51 = vector.shape_cast %50 : vector<1x1x1x10x10xbf16> to vector<10x10xbf16>
    %cst_46 = arith.constant dense<0.000000e+00> : vector<4x10xf32>
    %52 = tpu.matmul %49, %51, %cst_46 {dimension_numbers = #tpu.dot_dimension_numbers<[1], [0], [0], [1], [0, 0, 1, 1], [], []>} : vector<4x10xbf16>, vector<10x10xbf16>, vector<4x10xf32> -> vector<4x10xf32>
    %53 = arith.addf %47, %52 : vector<4x10xf32>
    %54 = vector.extract_strided_slice %4 {offsets = [1, 1, 0], sizes = [2, 2, 10], strides = [1, 1, 1]} : vector<8x8x10xbf16> to vector<2x2x10xbf16>
    %55 = vector.shape_cast %54 : vector<2x2x10xbf16> to vector<4x10xbf16>
    %c0_47 = arith.constant 0 : index
    %c1_48 = arith.constant 1 : index
    %c1_49 = arith.constant 1 : index
    %c0_50 = arith.constant 0 : index
    %c0_51 = arith.constant 0 : index
    %56 = vector.load %arg4[%c0_47, %c1_48, %c1_49, %c0_50, %c0_51] : memref<1x7x7x10x10xbf16, #tpu.memory_space<vmem>>, vector<1x1x1x10x10xbf16>
    %57 = vector.shape_cast %56 : vector<1x1x1x10x10xbf16> to vector<10x10xbf16>
    %cst_52 = arith.constant dense<0.000000e+00> : vector<4x10xf32>
    %58 = tpu.matmul %55, %57, %cst_52 {dimension_numbers = #tpu.dot_dimension_numbers<[1], [0], [0], [1], [0, 0, 1, 1], [], []>} : vector<4x10xbf16>, vector<10x10xbf16>, vector<4x10xf32> -> vector<4x10xf32>
    %59 = arith.addf %53, %58 : vector<4x10xf32>
    %60 = vector.extract_strided_slice %4 {offsets = [1, 2, 0], sizes = [2, 2, 10], strides = [1, 1, 1]} : vector<8x8x10xbf16> to vector<2x2x10xbf16>
    %61 = vector.shape_cast %60 : vector<2x2x10xbf16> to vector<4x10xbf16>
    %c0_53 = arith.constant 0 : index
    %c1_54 = arith.constant 1 : index
    %c2_55 = arith.constant 2 : index
    %c0_56 = arith.constant 0 : index
    %c0_57 = arith.constant 0 : index
    %62 = vector.load %arg4[%c0_53, %c1_54, %c2_55, %c0_56, %c0_57] : memref<1x7x7x10x10xbf16, #tpu.memory_space<vmem>>, vector<1x1x1x10x10xbf16>
    %63 = vector.shape_cast %62 : vector<1x1x1x10x10xbf16> to vector<10x10xbf16>
    %cst_58 = arith.constant dense<0.000000e+00> : vector<4x10xf32>
    %64 = tpu.matmul %61, %63, %cst_58 {dimension_numbers = #tpu.dot_dimension_numbers<[1], [0], [0], [1], [0, 0, 1, 1], [], []>} : vector<4x10xbf16>, vector<10x10xbf16>, vector<4x10xf32> -> vector<4x10xf32>
    %65 = arith.addf %59, %64 : vector<4x10xf32>
    %66 = vector.extract_strided_slice %4 {offsets = [1, 3, 0], sizes = [2, 2, 10], strides = [1, 1, 1]} : vector<8x8x10xbf16> to vector<2x2x10xbf16>
    %67 = vector.shape_cast %66 : vector<2x2x10xbf16> to vector<4x10xbf16>
    %c0_59 = arith.constant 0 : index
    %c1_60 = arith.constant 1 : index
    %c3_61 = arith.constant 3 : index
    %c0_62 = arith.constant 0 : index
    %c0_63 = arith.constant 0 : index
    %68 = vector.load %arg4[%c0_59, %c1_60, %c3_61, %c0_62, %c0_63] : memref<1x7x7x10x10xbf16, #tpu.memory_space<vmem>>, vector<1x1x1x10x10xbf16>
    %69 = vector.shape_cast %68 : vector<1x1x1x10x10xbf16> to vector<10x10xbf16>
    %cst_64 = arith.constant dense<0.000000e+00> : vector<4x10xf32>
    %70 = tpu.matmul %67, %69, %cst_64 {dimension_numbers = #tpu.dot_dimension_numbers<[1], [0], [0], [1], [0, 0, 1, 1], [], []>} : vector<4x10xbf16>, vector<10x10xbf16>, vector<4x10xf32> -> vector<4x10xf32>
    %71 = arith.addf %65, %70 : vector<4x10xf32>
    %72 = vector.extract_strided_slice %4 {offsets = [1, 4, 0], sizes = [2, 2, 10], strides = [1, 1, 1]} : vector<8x8x10xbf16> to vector<2x2x10xbf16>
    %73 = vector.shape_cast %72 : vector<2x2x10xbf16> to vector<4x10xbf16>
    %c0_65 = arith.constant 0 : index
    %c1_66 = arith.constant 1 : index
    %c4_67 = arith.constant 4 : index
    %c0_68 = arith.constant 0 : index
    %c0_69 = arith.constant 0 : index
    %74 = vector.load %arg4[%c0_65, %c1_66, %c4_67, %c0_68, %c0_69] : memref<1x7x7x10x10xbf16, #tpu.memory_space<vmem>>, vector<1x1x1x10x10xbf16>
    %75 = vector.shape_cast %74 : vector<1x1x1x10x10xbf16> to vector<10x10xbf16>
    %cst_70 = arith.constant dense<0.000000e+00> : vector<4x10xf32>
    %76 = tpu.matmul %73, %75, %cst_70 {dimension_numbers = #tpu.dot_dimension_numbers<[1], [0], [0], [1], [0, 0, 1, 1], [], []>} : vector<4x10xbf16>, vector<10x10xbf16>, vector<4x10xf32> -> vector<4x10xf32>
    %77 = arith.addf %71, %76 : vector<4x10xf32>
    %78 = vector.extract_strided_slice %4 {offsets = [1, 5, 0], sizes = [2, 2, 10], strides = [1, 1, 1]} : vector<8x8x10xbf16> to vector<2x2x10xbf16>
    %79 = vector.shape_cast %78 : vector<2x2x10xbf16> to vector<4x10xbf16>
    %c0_71 = arith.constant 0 : index
    %c1_72 = arith.constant 1 : index
    %c5_73 = arith.constant 5 : index
    %c0_74 = arith.constant 0 : index
    %c0_75 = arith.constant 0 : index
    %80 = vector.load %arg4[%c0_71, %c1_72, %c5_73, %c0_74, %c0_75] : memref<1x7x7x10x10xbf16, #tpu.memory_space<vmem>>, vector<1x1x1x10x10xbf16>
    %81 = vector.shape_cast %80 : vector<1x1x1x10x10xbf16> to vector<10x10xbf16>
    %cst_76 = arith.constant dense<0.000000e+00> : vector<4x10xf32>
    %82 = tpu.matmul %79, %81, %cst_76 {dimension_numbers = #tpu.dot_dimension_numbers<[1], [0], [0], [1], [0, 0, 1, 1], [], []>} : vector<4x10xbf16>, vector<10x10xbf16>, vector<4x10xf32> -> vector<4x10xf32>
    %83 = arith.addf %77, %82 : vector<4x10xf32>
    %84 = vector.extract_strided_slice %4 {offsets = [1, 6, 0], sizes = [2, 2, 10], strides = [1, 1, 1]} : vector<8x8x10xbf16> to vector<2x2x10xbf16>
    %85 = vector.shape_cast %84 : vector<2x2x10xbf16> to vector<4x10xbf16>
    %c0_77 = arith.constant 0 : index
    %c1_78 = arith.constant 1 : index
    %c6_79 = arith.constant 6 : index
    %c0_80 = arith.constant 0 : index
    %c0_81 = arith.constant 0 : index
    %86 = vector.load %arg4[%c0_77, %c1_78, %c6_79, %c0_80, %c0_81] : memref<1x7x7x10x10xbf16, #tpu.memory_space<vmem>>, vector<1x1x1x10x10xbf16>
    %87 = vector.shape_cast %86 : vector<1x1x1x10x10xbf16> to vector<10x10xbf16>
    %cst_82 = arith.constant dense<0.000000e+00> : vector<4x10xf32>
    %88 = tpu.matmul %85, %87, %cst_82 {dimension_numbers = #tpu.dot_dimension_numbers<[1], [0], [0], [1], [0, 0, 1, 1], [], []>} : vector<4x10xbf16>, vector<10x10xbf16>, vector<4x10xf32> -> vector<4x10xf32>
    %89 = arith.addf %83, %88 : vector<4x10xf32>
    %90 = vector.extract_strided_slice %4 {offsets = [2, 0, 0], sizes = [2, 2, 10], strides = [1, 1, 1]} : vector<8x8x10xbf16> to vector<2x2x10xbf16>
    %91 = vector.shape_cast %90 : vector<2x2x10xbf16> to vector<4x10xbf16>
    %c0_83 = arith.constant 0 : index
    %c2_84 = arith.constant 2 : index
    %c0_85 = arith.constant 0 : index
    %c0_86 = arith.constant 0 : index
    %c0_87 = arith.constant 0 : index
    %92 = vector.load %arg4[%c0_83, %c2_84, %c0_85, %c0_86, %c0_87] : memref<1x7x7x10x10xbf16, #tpu.memory_space<vmem>>, vector<1x1x1x10x10xbf16>
    %93 = vector.shape_cast %92 : vector<1x1x1x10x10xbf16> to vector<10x10xbf16>
    %cst_88 = arith.constant dense<0.000000e+00> : vector<4x10xf32>
    %94 = tpu.matmul %91, %93, %cst_88 {dimension_numbers = #tpu.dot_dimension_numbers<[1], [0], [0], [1], [0, 0, 1, 1], [], []>} : vector<4x10xbf16>, vector<10x10xbf16>, vector<4x10xf32> -> vector<4x10xf32>
    %95 = arith.addf %89, %94 : vector<4x10xf32>
    %96 = vector.extract_strided_slice %4 {offsets = [2, 1, 0], sizes = [2, 2, 10], strides = [1, 1, 1]} : vector<8x8x10xbf16> to vector<2x2x10xbf16>
    %97 = vector.shape_cast %96 : vector<2x2x10xbf16> to vector<4x10xbf16>
    %c0_89 = arith.constant 0 : index
    %c2_90 = arith.constant 2 : index
    %c1_91 = arith.constant 1 : index
    %c0_92 = arith.constant 0 : index
    %c0_93 = arith.constant 0 : index
    %98 = vector.load %arg4[%c0_89, %c2_90, %c1_91, %c0_92, %c0_93] : memref<1x7x7x10x10xbf16, #tpu.memory_space<vmem>>, vector<1x1x1x10x10xbf16>
    %99 = vector.shape_cast %98 : vector<1x1x1x10x10xbf16> to vector<10x10xbf16>
    %cst_94 = arith.constant dense<0.000000e+00> : vector<4x10xf32>
    %100 = tpu.matmul %97, %99, %cst_94 {dimension_numbers = #tpu.dot_dimension_numbers<[1], [0], [0], [1], [0, 0, 1, 1], [], []>} : vector<4x10xbf16>, vector<10x10xbf16>, vector<4x10xf32> -> vector<4x10xf32>
    %101 = arith.addf %95, %100 : vector<4x10xf32>
    %102 = vector.extract_strided_slice %4 {offsets = [2, 2, 0], sizes = [2, 2, 10], strides = [1, 1, 1]} : vector<8x8x10xbf16> to vector<2x2x10xbf16>
    %103 = vector.shape_cast %102 : vector<2x2x10xbf16> to vector<4x10xbf16>
    %c0_95 = arith.constant 0 : index
    %c2_96 = arith.constant 2 : index
    %c2_97 = arith.constant 2 : index
    %c0_98 = arith.constant 0 : index
    %c0_99 = arith.constant 0 : index
    %104 = vector.load %arg4[%c0_95, %c2_96, %c2_97, %c0_98, %c0_99] : memref<1x7x7x10x10xbf16, #tpu.memory_space<vmem>>, vector<1x1x1x10x10xbf16>
    %105 = vector.shape_cast %104 : vector<1x1x1x10x10xbf16> to vector<10x10xbf16>
    %cst_100 = arith.constant dense<0.000000e+00> : vector<4x10xf32>
    %106 = tpu.matmul %103, %105, %cst_100 {dimension_numbers = #tpu.dot_dimension_numbers<[1], [0], [0], [1], [0, 0, 1, 1], [], []>} : vector<4x10xbf16>, vector<10x10xbf16>, vector<4x10xf32> -> vector<4x10xf32>
    %107 = arith.addf %101, %106 : vector<4x10xf32>
    %108 = vector.extract_strided_slice %4 {offsets = [2, 3, 0], sizes = [2, 2, 10], strides = [1, 1, 1]} : vector<8x8x10xbf16> to vector<2x2x10xbf16>
    %109 = vector.shape_cast %108 : vector<2x2x10xbf16> to vector<4x10xbf16>
    %c0_101 = arith.constant 0 : index
    %c2_102 = arith.constant 2 : index
    %c3_103 = arith.constant 3 : index
    %c0_104 = arith.constant 0 : index
    %c0_105 = arith.constant 0 : index
    %110 = vector.load %arg4[%c0_101, %c2_102, %c3_103, %c0_104, %c0_105] : memref<1x7x7x10x10xbf16, #tpu.memory_space<vmem>>, vector<1x1x1x10x10xbf16>
    %111 = vector.shape_cast %110 : vector<1x1x1x10x10xbf16> to vector<10x10xbf16>
    %cst_106 = arith.constant dense<0.000000e+00> : vector<4x10xf32>
    %112 = tpu.matmul %109, %111, %cst_106 {dimension_numbers = #tpu.dot_dimension_numbers<[1], [0], [0], [1], [0, 0, 1, 1], [], []>} : vector<4x10xbf16>, vector<10x10xbf16>, vector<4x10xf32> -> vector<4x10xf32>
    %113 = arith.addf %107, %112 : vector<4x10xf32>
    %114 = vector.extract_strided_slice %4 {offsets = [2, 4, 0], sizes = [2, 2, 10], strides = [1, 1, 1]} : vector<8x8x10xbf16> to vector<2x2x10xbf16>
    %115 = vector.shape_cast %114 : vector<2x2x10xbf16> to vector<4x10xbf16>
    %c0_107 = arith.constant 0 : index
    %c2_108 = arith.constant 2 : index
    %c4_109 = arith.constant 4 : index
    %c0_110 = arith.constant 0 : index
    %c0_111 = arith.constant 0 : index
    %116 = vector.load %arg4[%c0_107, %c2_108, %c4_109, %c0_110, %c0_111] : memref<1x7x7x10x10xbf16, #tpu.memory_space<vmem>>, vector<1x1x1x10x10xbf16>
    %117 = vector.shape_cast %116 : vector<1x1x1x10x10xbf16> to vector<10x10xbf16>
    %cst_112 = arith.constant dense<0.000000e+00> : vector<4x10xf32>
    %118 = tpu.matmul %115, %117, %cst_112 {dimension_numbers = #tpu.dot_dimension_numbers<[1], [0], [0], [1], [0, 0, 1, 1], [], []>} : vector<4x10xbf16>, vector<10x10xbf16>, vector<4x10xf32> -> vector<4x10xf32>
    %119 = arith.addf %113, %118 : vector<4x10xf32>
    %120 = vector.extract_strided_slice %4 {offsets = [2, 5, 0], sizes = [2, 2, 10], strides = [1, 1, 1]} : vector<8x8x10xbf16> to vector<2x2x10xbf16>
    %121 = vector.shape_cast %120 : vector<2x2x10xbf16> to vector<4x10xbf16>
    %c0_113 = arith.constant 0 : index
    %c2_114 = arith.constant 2 : index
    %c5_115 = arith.constant 5 : index
    %c0_116 = arith.constant 0 : index
    %c0_117 = arith.constant 0 : index
    %122 = vector.load %arg4[%c0_113, %c2_114, %c5_115, %c0_116, %c0_117] : memref<1x7x7x10x10xbf16, #tpu.memory_space<vmem>>, vector<1x1x1x10x10xbf16>
    %123 = vector.shape_cast %122 : vector<1x1x1x10x10xbf16> to vector<10x10xbf16>
    %cst_118 = arith.constant dense<0.000000e+00> : vector<4x10xf32>
    %124 = tpu.matmul %121, %123, %cst_118 {dimension_numbers = #tpu.dot_dimension_numbers<[1], [0], [0], [1], [0, 0, 1, 1], [], []>} : vector<4x10xbf16>, vector<10x10xbf16>, vector<4x10xf32> -> vector<4x10xf32>
    %125 = arith.addf %119, %124 : vector<4x10xf32>
    %126 = vector.extract_strided_slice %4 {offsets = [2, 6, 0], sizes = [2, 2, 10], strides = [1, 1, 1]} : vector<8x8x10xbf16> to vector<2x2x10xbf16>
    %127 = vector.shape_cast %126 : vector<2x2x10xbf16> to vector<4x10xbf16>
    %c0_119 = arith.constant 0 : index
    %c2_120 = arith.constant 2 : index
    %c6_121 = arith.constant 6 : index
    %c0_122 = arith.constant 0 : index
    %c0_123 = arith.constant 0 : index
    %128 = vector.load %arg4[%c0_119, %c2_120, %c6_121, %c0_122, %c0_123] : memref<1x7x7x10x10xbf16, #tpu.memory_space<vmem>>, vector<1x1x1x10x10xbf16>
    %129 = vector.shape_cast %128 : vector<1x1x1x10x10xbf16> to vector<10x10xbf16>
    %cst_124 = arith.constant dense<0.000000e+00> : vector<4x10xf32>
    %130 = tpu.matmul %127, %129, %cst_124 {dimension_numbers = #tpu.dot_dimension_numbers<[1], [0], [0], [1], [0, 0, 1, 1], [], []>} : vector<4x10xbf16>, vector<10x10xbf16>, vector<4x10xf32> -> vector<4x10xf32>
    %131 = arith.addf %125, %130 : vector<4x10xf32>
    %132 = vector.extract_strided_slice %4 {offsets = [3, 0, 0], sizes = [2, 2, 10], strides = [1, 1, 1]} : vector<8x8x10xbf16> to vector<2x2x10xbf16>
    %133 = vector.shape_cast %132 : vector<2x2x10xbf16> to vector<4x10xbf16>
    %c0_125 = arith.constant 0 : index
    %c3_126 = arith.constant 3 : index
    %c0_127 = arith.constant 0 : index
    %c0_128 = arith.constant 0 : index
    %c0_129 = arith.constant 0 : index
    %134 = vector.load %arg4[%c0_125, %c3_126, %c0_127, %c0_128, %c0_129] : memref<1x7x7x10x10xbf16, #tpu.memory_space<vmem>>, vector<1x1x1x10x10xbf16>
    %135 = vector.shape_cast %134 : vector<1x1x1x10x10xbf16> to vector<10x10xbf16>
    %cst_130 = arith.constant dense<0.000000e+00> : vector<4x10xf32>
    %136 = tpu.matmul %133, %135, %cst_130 {dimension_numbers = #tpu.dot_dimension_numbers<[1], [0], [0], [1], [0, 0, 1, 1], [], []>} : vector<4x10xbf16>, vector<10x10xbf16>, vector<4x10xf32> -> vector<4x10xf32>
    %137 = arith.addf %131, %136 : vector<4x10xf32>
    %138 = vector.extract_strided_slice %4 {offsets = [3, 1, 0], sizes = [2, 2, 10], strides = [1, 1, 1]} : vector<8x8x10xbf16> to vector<2x2x10xbf16>
    %139 = vector.shape_cast %138 : vector<2x2x10xbf16> to vector<4x10xbf16>
    %c0_131 = arith.constant 0 : index
    %c3_132 = arith.constant 3 : index
    %c1_133 = arith.constant 1 : index
    %c0_134 = arith.constant 0 : index
    %c0_135 = arith.constant 0 : index
    %140 = vector.load %arg4[%c0_131, %c3_132, %c1_133, %c0_134, %c0_135] : memref<1x7x7x10x10xbf16, #tpu.memory_space<vmem>>, vector<1x1x1x10x10xbf16>
    %141 = vector.shape_cast %140 : vector<1x1x1x10x10xbf16> to vector<10x10xbf16>
    %cst_136 = arith.constant dense<0.000000e+00> : vector<4x10xf32>
    %142 = tpu.matmul %139, %141, %cst_136 {dimension_numbers = #tpu.dot_dimension_numbers<[1], [0], [0], [1], [0, 0, 1, 1], [], []>} : vector<4x10xbf16>, vector<10x10xbf16>, vector<4x10xf32> -> vector<4x10xf32>
    %143 = arith.addf %137, %142 : vector<4x10xf32>
    %144 = vector.extract_strided_slice %4 {offsets = [3, 2, 0], sizes = [2, 2, 10], strides = [1, 1, 1]} : vector<8x8x10xbf16> to vector<2x2x10xbf16>
    %145 = vector.shape_cast %144 : vector<2x2x10xbf16> to vector<4x10xbf16>
    %c0_137 = arith.constant 0 : index
    %c3_138 = arith.constant 3 : index
    %c2_139 = arith.constant 2 : index
    %c0_140 = arith.constant 0 : index
    %c0_141 = arith.constant 0 : index
    %146 = vector.load %arg4[%c0_137, %c3_138, %c2_139, %c0_140, %c0_141] : memref<1x7x7x10x10xbf16, #tpu.memory_space<vmem>>, vector<1x1x1x10x10xbf16>
    %147 = vector.shape_cast %146 : vector<1x1x1x10x10xbf16> to vector<10x10xbf16>
    %cst_142 = arith.constant dense<0.000000e+00> : vector<4x10xf32>
    %148 = tpu.matmul %145, %147, %cst_142 {dimension_numbers = #tpu.dot_dimension_numbers<[1], [0], [0], [1], [0, 0, 1, 1], [], []>} : vector<4x10xbf16>, vector<10x10xbf16>, vector<4x10xf32> -> vector<4x10xf32>
    %149 = arith.addf %143, %148 : vector<4x10xf32>
    %150 = vector.extract_strided_slice %4 {offsets = [3, 3, 0], sizes = [2, 2, 10], strides = [1, 1, 1]} : vector<8x8x10xbf16> to vector<2x2x10xbf16>
    %151 = vector.shape_cast %150 : vector<2x2x10xbf16> to vector<4x10xbf16>
    %c0_143 = arith.constant 0 : index
    %c3_144 = arith.constant 3 : index
    %c3_145 = arith.constant 3 : index
    %c0_146 = arith.constant 0 : index
    %c0_147 = arith.constant 0 : index
    %152 = vector.load %arg4[%c0_143, %c3_144, %c3_145, %c0_146, %c0_147] : memref<1x7x7x10x10xbf16, #tpu.memory_space<vmem>>, vector<1x1x1x10x10xbf16>
    %153 = vector.shape_cast %152 : vector<1x1x1x10x10xbf16> to vector<10x10xbf16>
    %cst_148 = arith.constant dense<0.000000e+00> : vector<4x10xf32>
    %154 = tpu.matmul %151, %153, %cst_148 {dimension_numbers = #tpu.dot_dimension_numbers<[1], [0], [0], [1], [0, 0, 1, 1], [], []>} : vector<4x10xbf16>, vector<10x10xbf16>, vector<4x10xf32> -> vector<4x10xf32>
    %155 = arith.addf %149, %154 : vector<4x10xf32>
    %156 = vector.extract_strided_slice %4 {offsets = [3, 4, 0], sizes = [2, 2, 10], strides = [1, 1, 1]} : vector<8x8x10xbf16> to vector<2x2x10xbf16>
    %157 = vector.shape_cast %156 : vector<2x2x10xbf16> to vector<4x10xbf16>
    %c0_149 = arith.constant 0 : index
    %c3_150 = arith.constant 3 : index
    %c4_151 = arith.constant 4 : index
    %c0_152 = arith.constant 0 : index
    %c0_153 = arith.constant 0 : index
    %158 = vector.load %arg4[%c0_149, %c3_150, %c4_151, %c0_152, %c0_153] : memref<1x7x7x10x10xbf16, #tpu.memory_space<vmem>>, vector<1x1x1x10x10xbf16>
    %159 = vector.shape_cast %158 : vector<1x1x1x10x10xbf16> to vector<10x10xbf16>
    %cst_154 = arith.constant dense<0.000000e+00> : vector<4x10xf32>
    %160 = tpu.matmul %157, %159, %cst_154 {dimension_numbers = #tpu.dot_dimension_numbers<[1], [0], [0], [1], [0, 0, 1, 1], [], []>} : vector<4x10xbf16>, vector<10x10xbf16>, vector<4x10xf32> -> vector<4x10xf32>
    %161 = arith.addf %155, %160 : vector<4x10xf32>
    %162 = vector.extract_strided_slice %4 {offsets = [3, 5, 0], sizes = [2, 2, 10], strides = [1, 1, 1]} : vector<8x8x10xbf16> to vector<2x2x10xbf16>
    %163 = vector.shape_cast %162 : vector<2x2x10xbf16> to vector<4x10xbf16>
    %c0_155 = arith.constant 0 : index
    %c3_156 = arith.constant 3 : index
    %c5_157 = arith.constant 5 : index
    %c0_158 = arith.constant 0 : index
    %c0_159 = arith.constant 0 : index
    %164 = vector.load %arg4[%c0_155, %c3_156, %c5_157, %c0_158, %c0_159] : memref<1x7x7x10x10xbf16, #tpu.memory_space<vmem>>, vector<1x1x1x10x10xbf16>
    %165 = vector.shape_cast %164 : vector<1x1x1x10x10xbf16> to vector<10x10xbf16>
    %cst_160 = arith.constant dense<0.000000e+00> : vector<4x10xf32>
    %166 = tpu.matmul %163, %165, %cst_160 {dimension_numbers = #tpu.dot_dimension_numbers<[1], [0], [0], [1], [0, 0, 1, 1], [], []>} : vector<4x10xbf16>, vector<10x10xbf16>, vector<4x10xf32> -> vector<4x10xf32>
    %167 = arith.addf %161, %166 : vector<4x10xf32>
    %168 = vector.extract_strided_slice %4 {offsets = [3, 6, 0], sizes = [2, 2, 10], strides = [1, 1, 1]} : vector<8x8x10xbf16> to vector<2x2x10xbf16>
    %169 = vector.shape_cast %168 : vector<2x2x10xbf16> to vector<4x10xbf16>
    %c0_161 = arith.constant 0 : index
    %c3_162 = arith.constant 3 : index
    %c6_163 = arith.constant 6 : index
    %c0_164 = arith.constant 0 : index
    %c0_165 = arith.constant 0 : index
    %170 = vector.load %arg4[%c0_161, %c3_162, %c6_163, %c0_164, %c0_165] : memref<1x7x7x10x10xbf16, #tpu.memory_space<vmem>>, vector<1x1x1x10x10xbf16>
    %171 = vector.shape_cast %170 : vector<1x1x1x10x10xbf16> to vector<10x10xbf16>
    %cst_166 = arith.constant dense<0.000000e+00> : vector<4x10xf32>
    %172 = tpu.matmul %169, %171, %cst_166 {dimension_numbers = #tpu.dot_dimension_numbers<[1], [0], [0], [1], [0, 0, 1, 1], [], []>} : vector<4x10xbf16>, vector<10x10xbf16>, vector<4x10xf32> -> vector<4x10xf32>
    %173 = arith.addf %167, %172 : vector<4x10xf32>
    %174 = vector.extract_strided_slice %4 {offsets = [4, 0, 0], sizes = [2, 2, 10], strides = [1, 1, 1]} : vector<8x8x10xbf16> to vector<2x2x10xbf16>
    %175 = vector.shape_cast %174 : vector<2x2x10xbf16> to vector<4x10xbf16>
    %c0_167 = arith.constant 0 : index
    %c4_168 = arith.constant 4 : index
    %c0_169 = arith.constant 0 : index
    %c0_170 = arith.constant 0 : index
    %c0_171 = arith.constant 0 : index
    %176 = vector.load %arg4[%c0_167, %c4_168, %c0_169, %c0_170, %c0_171] : memref<1x7x7x10x10xbf16, #tpu.memory_space<vmem>>, vector<1x1x1x10x10xbf16>
    %177 = vector.shape_cast %176 : vector<1x1x1x10x10xbf16> to vector<10x10xbf16>
    %cst_172 = arith.constant dense<0.000000e+00> : vector<4x10xf32>
    %178 = tpu.matmul %175, %177, %cst_172 {dimension_numbers = #tpu.dot_dimension_numbers<[1], [0], [0], [1], [0, 0, 1, 1], [], []>} : vector<4x10xbf16>, vector<10x10xbf16>, vector<4x10xf32> -> vector<4x10xf32>
    %179 = arith.addf %173, %178 : vector<4x10xf32>
    %180 = vector.extract_strided_slice %4 {offsets = [4, 1, 0], sizes = [2, 2, 10], strides = [1, 1, 1]} : vector<8x8x10xbf16> to vector<2x2x10xbf16>
    %181 = vector.shape_cast %180 : vector<2x2x10xbf16> to vector<4x10xbf16>
    %c0_173 = arith.constant 0 : index
    %c4_174 = arith.constant 4 : index
    %c1_175 = arith.constant 1 : index
    %c0_176 = arith.constant 0 : index
    %c0_177 = arith.constant 0 : index
    %182 = vector.load %arg4[%c0_173, %c4_174, %c1_175, %c0_176, %c0_177] : memref<1x7x7x10x10xbf16, #tpu.memory_space<vmem>>, vector<1x1x1x10x10xbf16>
    %183 = vector.shape_cast %182 : vector<1x1x1x10x10xbf16> to vector<10x10xbf16>
    %cst_178 = arith.constant dense<0.000000e+00> : vector<4x10xf32>
    %184 = tpu.matmul %181, %183, %cst_178 {dimension_numbers = #tpu.dot_dimension_numbers<[1], [0], [0], [1], [0, 0, 1, 1], [], []>} : vector<4x10xbf16>, vector<10x10xbf16>, vector<4x10xf32> -> vector<4x10xf32>
    %185 = arith.addf %179, %184 : vector<4x10xf32>
    %186 = vector.extract_strided_slice %4 {offsets = [4, 2, 0], sizes = [2, 2, 10], strides = [1, 1, 1]} : vector<8x8x10xbf16> to vector<2x2x10xbf16>
    %187 = vector.shape_cast %186 : vector<2x2x10xbf16> to vector<4x10xbf16>
    %c0_179 = arith.constant 0 : index
    %c4_180 = arith.constant 4 : index
    %c2_181 = arith.constant 2 : index
    %c0_182 = arith.constant 0 : index
    %c0_183 = arith.constant 0 : index
    %188 = vector.load %arg4[%c0_179, %c4_180, %c2_181, %c0_182, %c0_183] : memref<1x7x7x10x10xbf16, #tpu.memory_space<vmem>>, vector<1x1x1x10x10xbf16>
    %189 = vector.shape_cast %188 : vector<1x1x1x10x10xbf16> to vector<10x10xbf16>
    %cst_184 = arith.constant dense<0.000000e+00> : vector<4x10xf32>
    %190 = tpu.matmul %187, %189, %cst_184 {dimension_numbers = #tpu.dot_dimension_numbers<[1], [0], [0], [1], [0, 0, 1, 1], [], []>} : vector<4x10xbf16>, vector<10x10xbf16>, vector<4x10xf32> -> vector<4x10xf32>
    %191 = arith.addf %185, %190 : vector<4x10xf32>
    %192 = vector.extract_strided_slice %4 {offsets = [4, 3, 0], sizes = [2, 2, 10], strides = [1, 1, 1]} : vector<8x8x10xbf16> to vector<2x2x10xbf16>
    %193 = vector.shape_cast %192 : vector<2x2x10xbf16> to vector<4x10xbf16>
    %c0_185 = arith.constant 0 : index
    %c4_186 = arith.constant 4 : index
    %c3_187 = arith.constant 3 : index
    %c0_188 = arith.constant 0 : index
    %c0_189 = arith.constant 0 : index
    %194 = vector.load %arg4[%c0_185, %c4_186, %c3_187, %c0_188, %c0_189] : memref<1x7x7x10x10xbf16, #tpu.memory_space<vmem>>, vector<1x1x1x10x10xbf16>
    %195 = vector.shape_cast %194 : vector<1x1x1x10x10xbf16> to vector<10x10xbf16>
    %cst_190 = arith.constant dense<0.000000e+00> : vector<4x10xf32>
    %196 = tpu.matmul %193, %195, %cst_190 {dimension_numbers = #tpu.dot_dimension_numbers<[1], [0], [0], [1], [0, 0, 1, 1], [], []>} : vector<4x10xbf16>, vector<10x10xbf16>, vector<4x10xf32> -> vector<4x10xf32>
    %197 = arith.addf %191, %196 : vector<4x10xf32>
    %198 = vector.extract_strided_slice %4 {offsets = [4, 4, 0], sizes = [2, 2, 10], strides = [1, 1, 1]} : vector<8x8x10xbf16> to vector<2x2x10xbf16>
    %199 = vector.shape_cast %198 : vector<2x2x10xbf16> to vector<4x10xbf16>
    %c0_191 = arith.constant 0 : index
    %c4_192 = arith.constant 4 : index
    %c4_193 = arith.constant 4 : index
    %c0_194 = arith.constant 0 : index
    %c0_195 = arith.constant 0 : index
    %200 = vector.load %arg4[%c0_191, %c4_192, %c4_193, %c0_194, %c0_195] : memref<1x7x7x10x10xbf16, #tpu.memory_space<vmem>>, vector<1x1x1x10x10xbf16>
    %201 = vector.shape_cast %200 : vector<1x1x1x10x10xbf16> to vector<10x10xbf16>
    %cst_196 = arith.constant dense<0.000000e+00> : vector<4x10xf32>
    %202 = tpu.matmul %199, %201, %cst_196 {dimension_numbers = #tpu.dot_dimension_numbers<[1], [0], [0], [1], [0, 0, 1, 1], [], []>} : vector<4x10xbf16>, vector<10x10xbf16>, vector<4x10xf32> -> vector<4x10xf32>
    %203 = arith.addf %197, %202 : vector<4x10xf32>
    %204 = vector.extract_strided_slice %4 {offsets = [4, 5, 0], sizes = [2, 2, 10], strides = [1, 1, 1]} : vector<8x8x10xbf16> to vector<2x2x10xbf16>
    %205 = vector.shape_cast %204 : vector<2x2x10xbf16> to vector<4x10xbf16>
    %c0_197 = arith.constant 0 : index
    %c4_198 = arith.constant 4 : index
    %c5_199 = arith.constant 5 : index
    %c0_200 = arith.constant 0 : index
    %c0_201 = arith.constant 0 : index
    %206 = vector.load %arg4[%c0_197, %c4_198, %c5_199, %c0_200, %c0_201] : memref<1x7x7x10x10xbf16, #tpu.memory_space<vmem>>, vector<1x1x1x10x10xbf16>
    %207 = vector.shape_cast %206 : vector<1x1x1x10x10xbf16> to vector<10x10xbf16>
    %cst_202 = arith.constant dense<0.000000e+00> : vector<4x10xf32>
    %208 = tpu.matmul %205, %207, %cst_202 {dimension_numbers = #tpu.dot_dimension_numbers<[1], [0], [0], [1], [0, 0, 1, 1], [], []>} : vector<4x10xbf16>, vector<10x10xbf16>, vector<4x10xf32> -> vector<4x10xf32>
    %209 = arith.addf %203, %208 : vector<4x10xf32>
    %210 = vector.extract_strided_slice %4 {offsets = [4, 6, 0], sizes = [2, 2, 10], strides = [1, 1, 1]} : vector<8x8x10xbf16> to vector<2x2x10xbf16>
    %211 = vector.shape_cast %210 : vector<2x2x10xbf16> to vector<4x10xbf16>
    %c0_203 = arith.constant 0 : index
    %c4_204 = arith.constant 4 : index
    %c6_205 = arith.constant 6 : index
    %c0_206 = arith.constant 0 : index
    %c0_207 = arith.constant 0 : index
    %212 = vector.load %arg4[%c0_203, %c4_204, %c6_205, %c0_206, %c0_207] : memref<1x7x7x10x10xbf16, #tpu.memory_space<vmem>>, vector<1x1x1x10x10xbf16>
    %213 = vector.shape_cast %212 : vector<1x1x1x10x10xbf16> to vector<10x10xbf16>
    %cst_208 = arith.constant dense<0.000000e+00> : vector<4x10xf32>
    %214 = tpu.matmul %211, %213, %cst_208 {dimension_numbers = #tpu.dot_dimension_numbers<[1], [0], [0], [1], [0, 0, 1, 1], [], []>} : vector<4x10xbf16>, vector<10x10xbf16>, vector<4x10xf32> -> vector<4x10xf32>
    %215 = arith.addf %209, %214 : vector<4x10xf32>
    %216 = vector.extract_strided_slice %4 {offsets = [5, 0, 0], sizes = [2, 2, 10], strides = [1, 1, 1]} : vector<8x8x10xbf16> to vector<2x2x10xbf16>
    %217 = vector.shape_cast %216 : vector<2x2x10xbf16> to vector<4x10xbf16>
    %c0_209 = arith.constant 0 : index
    %c5_210 = arith.constant 5 : index
    %c0_211 = arith.constant 0 : index
    %c0_212 = arith.constant 0 : index
    %c0_213 = arith.constant 0 : index
    %218 = vector.load %arg4[%c0_209, %c5_210, %c0_211, %c0_212, %c0_213] : memref<1x7x7x10x10xbf16, #tpu.memory_space<vmem>>, vector<1x1x1x10x10xbf16>
    %219 = vector.shape_cast %218 : vector<1x1x1x10x10xbf16> to vector<10x10xbf16>
    %cst_214 = arith.constant dense<0.000000e+00> : vector<4x10xf32>
    %220 = tpu.matmul %217, %219, %cst_214 {dimension_numbers = #tpu.dot_dimension_numbers<[1], [0], [0], [1], [0, 0, 1, 1], [], []>} : vector<4x10xbf16>, vector<10x10xbf16>, vector<4x10xf32> -> vector<4x10xf32>
    %221 = arith.addf %215, %220 : vector<4x10xf32>
    %222 = vector.extract_strided_slice %4 {offsets = [5, 1, 0], sizes = [2, 2, 10], strides = [1, 1, 1]} : vector<8x8x10xbf16> to vector<2x2x10xbf16>
    %223 = vector.shape_cast %222 : vector<2x2x10xbf16> to vector<4x10xbf16>
    %c0_215 = arith.constant 0 : index
    %c5_216 = arith.constant 5 : index
    %c1_217 = arith.constant 1 : index
    %c0_218 = arith.constant 0 : index
    %c0_219 = arith.constant 0 : index
    %224 = vector.load %arg4[%c0_215, %c5_216, %c1_217, %c0_218, %c0_219] : memref<1x7x7x10x10xbf16, #tpu.memory_space<vmem>>, vector<1x1x1x10x10xbf16>
    %225 = vector.shape_cast %224 : vector<1x1x1x10x10xbf16> to vector<10x10xbf16>
    %cst_220 = arith.constant dense<0.000000e+00> : vector<4x10xf32>
    %226 = tpu.matmul %223, %225, %cst_220 {dimension_numbers = #tpu.dot_dimension_numbers<[1], [0], [0], [1], [0, 0, 1, 1], [], []>} : vector<4x10xbf16>, vector<10x10xbf16>, vector<4x10xf32> -> vector<4x10xf32>
    %227 = arith.addf %221, %226 : vector<4x10xf32>
    %228 = vector.extract_strided_slice %4 {offsets = [5, 2, 0], sizes = [2, 2, 10], strides = [1, 1, 1]} : vector<8x8x10xbf16> to vector<2x2x10xbf16>
    %229 = vector.shape_cast %228 : vector<2x2x10xbf16> to vector<4x10xbf16>
    %c0_221 = arith.constant 0 : index
    %c5_222 = arith.constant 5 : index
    %c2_223 = arith.constant 2 : index
    %c0_224 = arith.constant 0 : index
    %c0_225 = arith.constant 0 : index
    %230 = vector.load %arg4[%c0_221, %c5_222, %c2_223, %c0_224, %c0_225] : memref<1x7x7x10x10xbf16, #tpu.memory_space<vmem>>, vector<1x1x1x10x10xbf16>
    %231 = vector.shape_cast %230 : vector<1x1x1x10x10xbf16> to vector<10x10xbf16>
    %cst_226 = arith.constant dense<0.000000e+00> : vector<4x10xf32>
    %232 = tpu.matmul %229, %231, %cst_226 {dimension_numbers = #tpu.dot_dimension_numbers<[1], [0], [0], [1], [0, 0, 1, 1], [], []>} : vector<4x10xbf16>, vector<10x10xbf16>, vector<4x10xf32> -> vector<4x10xf32>
    %233 = arith.addf %227, %232 : vector<4x10xf32>
    %234 = vector.extract_strided_slice %4 {offsets = [5, 3, 0], sizes = [2, 2, 10], strides = [1, 1, 1]} : vector<8x8x10xbf16> to vector<2x2x10xbf16>
    %235 = vector.shape_cast %234 : vector<2x2x10xbf16> to vector<4x10xbf16>
    %c0_227 = arith.constant 0 : index
    %c5_228 = arith.constant 5 : index
    %c3_229 = arith.constant 3 : index
    %c0_230 = arith.constant 0 : index
    %c0_231 = arith.constant 0 : index
    %236 = vector.load %arg4[%c0_227, %c5_228, %c3_229, %c0_230, %c0_231] : memref<1x7x7x10x10xbf16, #tpu.memory_space<vmem>>, vector<1x1x1x10x10xbf16>
    %237 = vector.shape_cast %236 : vector<1x1x1x10x10xbf16> to vector<10x10xbf16>
    %cst_232 = arith.constant dense<0.000000e+00> : vector<4x10xf32>
    %238 = tpu.matmul %235, %237, %cst_232 {dimension_numbers = #tpu.dot_dimension_numbers<[1], [0], [0], [1], [0, 0, 1, 1], [], []>} : vector<4x10xbf16>, vector<10x10xbf16>, vector<4x10xf32> -> vector<4x10xf32>
    %239 = arith.addf %233, %238 : vector<4x10xf32>
    %240 = vector.extract_strided_slice %4 {offsets = [5, 4, 0], sizes = [2, 2, 10], strides = [1, 1, 1]} : vector<8x8x10xbf16> to vector<2x2x10xbf16>
    %241 = vector.shape_cast %240 : vector<2x2x10xbf16> to vector<4x10xbf16>
    %c0_233 = arith.constant 0 : index
    %c5_234 = arith.constant 5 : index
    %c4_235 = arith.constant 4 : index
    %c0_236 = arith.constant 0 : index
    %c0_237 = arith.constant 0 : index
    %242 = vector.load %arg4[%c0_233, %c5_234, %c4_235, %c0_236, %c0_237] : memref<1x7x7x10x10xbf16, #tpu.memory_space<vmem>>, vector<1x1x1x10x10xbf16>
    %243 = vector.shape_cast %242 : vector<1x1x1x10x10xbf16> to vector<10x10xbf16>
    %cst_238 = arith.constant dense<0.000000e+00> : vector<4x10xf32>
    %244 = tpu.matmul %241, %243, %cst_238 {dimension_numbers = #tpu.dot_dimension_numbers<[1], [0], [0], [1], [0, 0, 1, 1], [], []>} : vector<4x10xbf16>, vector<10x10xbf16>, vector<4x10xf32> -> vector<4x10xf32>
    %245 = arith.addf %239, %244 : vector<4x10xf32>
    %246 = vector.extract_strided_slice %4 {offsets = [5, 5, 0], sizes = [2, 2, 10], strides = [1, 1, 1]} : vector<8x8x10xbf16> to vector<2x2x10xbf16>
    %247 = vector.shape_cast %246 : vector<2x2x10xbf16> to vector<4x10xbf16>
    %c0_239 = arith.constant 0 : index
    %c5_240 = arith.constant 5 : index
    %c5_241 = arith.constant 5 : index
    %c0_242 = arith.constant 0 : index
    %c0_243 = arith.constant 0 : index
    %248 = vector.load %arg4[%c0_239, %c5_240, %c5_241, %c0_242, %c0_243] : memref<1x7x7x10x10xbf16, #tpu.memory_space<vmem>>, vector<1x1x1x10x10xbf16>
    %249 = vector.shape_cast %248 : vector<1x1x1x10x10xbf16> to vector<10x10xbf16>
    %cst_244 = arith.constant dense<0.000000e+00> : vector<4x10xf32>
    %250 = tpu.matmul %247, %249, %cst_244 {dimension_numbers = #tpu.dot_dimension_numbers<[1], [0], [0], [1], [0, 0, 1, 1], [], []>} : vector<4x10xbf16>, vector<10x10xbf16>, vector<4x10xf32> -> vector<4x10xf32>
    %251 = arith.addf %245, %250 : vector<4x10xf32>
    %252 = vector.extract_strided_slice %4 {offsets = [5, 6, 0], sizes = [2, 2, 10], strides = [1, 1, 1]} : vector<8x8x10xbf16> to vector<2x2x10xbf16>
    %253 = vector.shape_cast %252 : vector<2x2x10xbf16> to vector<4x10xbf16>
    %c0_245 = arith.constant 0 : index
    %c5_246 = arith.constant 5 : index
    %c6_247 = arith.constant 6 : index
    %c0_248 = arith.constant 0 : index
    %c0_249 = arith.constant 0 : index
    %254 = vector.load %arg4[%c0_245, %c5_246, %c6_247, %c0_248, %c0_249] : memref<1x7x7x10x10xbf16, #tpu.memory_space<vmem>>, vector<1x1x1x10x10xbf16>
    %255 = vector.shape_cast %254 : vector<1x1x1x10x10xbf16> to vector<10x10xbf16>
    %cst_250 = arith.constant dense<0.000000e+00> : vector<4x10xf32>
    %256 = tpu.matmul %253, %255, %cst_250 {dimension_numbers = #tpu.dot_dimension_numbers<[1], [0], [0], [1], [0, 0, 1, 1], [], []>} : vector<4x10xbf16>, vector<10x10xbf16>, vector<4x10xf32> -> vector<4x10xf32>
    %257 = arith.addf %251, %256 : vector<4x10xf32>
    %258 = vector.extract_strided_slice %4 {offsets = [6, 0, 0], sizes = [2, 2, 10], strides = [1, 1, 1]} : vector<8x8x10xbf16> to vector<2x2x10xbf16>
    %259 = vector.shape_cast %258 : vector<2x2x10xbf16> to vector<4x10xbf16>
    %c0_251 = arith.constant 0 : index
    %c6_252 = arith.constant 6 : index
    %c0_253 = arith.constant 0 : index
    %c0_254 = arith.constant 0 : index
    %c0_255 = arith.constant 0 : index
    %260 = vector.load %arg4[%c0_251, %c6_252, %c0_253, %c0_254, %c0_255] : memref<1x7x7x10x10xbf16, #tpu.memory_space<vmem>>, vector<1x1x1x10x10xbf16>
    %261 = vector.shape_cast %260 : vector<1x1x1x10x10xbf16> to vector<10x10xbf16>
    %cst_256 = arith.constant dense<0.000000e+00> : vector<4x10xf32>
    %262 = tpu.matmul %259, %261, %cst_256 {dimension_numbers = #tpu.dot_dimension_numbers<[1], [0], [0], [1], [0, 0, 1, 1], [], []>} : vector<4x10xbf16>, vector<10x10xbf16>, vector<4x10xf32> -> vector<4x10xf32>
    %263 = arith.addf %257, %262 : vector<4x10xf32>
    %264 = vector.extract_strided_slice %4 {offsets = [6, 1, 0], sizes = [2, 2, 10], strides = [1, 1, 1]} : vector<8x8x10xbf16> to vector<2x2x10xbf16>
    %265 = vector.shape_cast %264 : vector<2x2x10xbf16> to vector<4x10xbf16>
    %c0_257 = arith.constant 0 : index
    %c6_258 = arith.constant 6 : index
    %c1_259 = arith.constant 1 : index
    %c0_260 = arith.constant 0 : index
    %c0_261 = arith.constant 0 : index
    %266 = vector.load %arg4[%c0_257, %c6_258, %c1_259, %c0_260, %c0_261] : memref<1x7x7x10x10xbf16, #tpu.memory_space<vmem>>, vector<1x1x1x10x10xbf16>
    %267 = vector.shape_cast %266 : vector<1x1x1x10x10xbf16> to vector<10x10xbf16>
    %cst_262 = arith.constant dense<0.000000e+00> : vector<4x10xf32>
    %268 = tpu.matmul %265, %267, %cst_262 {dimension_numbers = #tpu.dot_dimension_numbers<[1], [0], [0], [1], [0, 0, 1, 1], [], []>} : vector<4x10xbf16>, vector<10x10xbf16>, vector<4x10xf32> -> vector<4x10xf32>
    %269 = arith.addf %263, %268 : vector<4x10xf32>
    %270 = vector.extract_strided_slice %4 {offsets = [6, 2, 0], sizes = [2, 2, 10], strides = [1, 1, 1]} : vector<8x8x10xbf16> to vector<2x2x10xbf16>
    %271 = vector.shape_cast %270 : vector<2x2x10xbf16> to vector<4x10xbf16>
    %c0_263 = arith.constant 0 : index
    %c6_264 = arith.constant 6 : index
    %c2_265 = arith.constant 2 : index
    %c0_266 = arith.constant 0 : index
    %c0_267 = arith.constant 0 : index
    %272 = vector.load %arg4[%c0_263, %c6_264, %c2_265, %c0_266, %c0_267] : memref<1x7x7x10x10xbf16, #tpu.memory_space<vmem>>, vector<1x1x1x10x10xbf16>
    %273 = vector.shape_cast %272 : vector<1x1x1x10x10xbf16> to vector<10x10xbf16>
    %cst_268 = arith.constant dense<0.000000e+00> : vector<4x10xf32>
    %274 = tpu.matmul %271, %273, %cst_268 {dimension_numbers = #tpu.dot_dimension_numbers<[1], [0], [0], [1], [0, 0, 1, 1], [], []>} : vector<4x10xbf16>, vector<10x10xbf16>, vector<4x10xf32> -> vector<4x10xf32>
    %275 = arith.addf %269, %274 : vector<4x10xf32>
    %276 = vector.extract_strided_slice %4 {offsets = [6, 3, 0], sizes = [2, 2, 10], strides = [1, 1, 1]} : vector<8x8x10xbf16> to vector<2x2x10xbf16>
    %277 = vector.shape_cast %276 : vector<2x2x10xbf16> to vector<4x10xbf16>
    %c0_269 = arith.constant 0 : index
    %c6_270 = arith.constant 6 : index
    %c3_271 = arith.constant 3 : index
    %c0_272 = arith.constant 0 : index
    %c0_273 = arith.constant 0 : index
    %278 = vector.load %arg4[%c0_269, %c6_270, %c3_271, %c0_272, %c0_273] : memref<1x7x7x10x10xbf16, #tpu.memory_space<vmem>>, vector<1x1x1x10x10xbf16>
    %279 = vector.shape_cast %278 : vector<1x1x1x10x10xbf16> to vector<10x10xbf16>
    %cst_274 = arith.constant dense<0.000000e+00> : vector<4x10xf32>
    %280 = tpu.matmul %277, %279, %cst_274 {dimension_numbers = #tpu.dot_dimension_numbers<[1], [0], [0], [1], [0, 0, 1, 1], [], []>} : vector<4x10xbf16>, vector<10x10xbf16>, vector<4x10xf32> -> vector<4x10xf32>
    %281 = arith.addf %275, %280 : vector<4x10xf32>
    %282 = vector.extract_strided_slice %4 {offsets = [6, 4, 0], sizes = [2, 2, 10], strides = [1, 1, 1]} : vector<8x8x10xbf16> to vector<2x2x10xbf16>
    %283 = vector.shape_cast %282 : vector<2x2x10xbf16> to vector<4x10xbf16>
    %c0_275 = arith.constant 0 : index
    %c6_276 = arith.constant 6 : index
    %c4_277 = arith.constant 4 : index
    %c0_278 = arith.constant 0 : index
    %c0_279 = arith.constant 0 : index
    %284 = vector.load %arg4[%c0_275, %c6_276, %c4_277, %c0_278, %c0_279] : memref<1x7x7x10x10xbf16, #tpu.memory_space<vmem>>, vector<1x1x1x10x10xbf16>
    %285 = vector.shape_cast %284 : vector<1x1x1x10x10xbf16> to vector<10x10xbf16>
    %cst_280 = arith.constant dense<0.000000e+00> : vector<4x10xf32>
    %286 = tpu.matmul %283, %285, %cst_280 {dimension_numbers = #tpu.dot_dimension_numbers<[1], [0], [0], [1], [0, 0, 1, 1], [], []>} : vector<4x10xbf16>, vector<10x10xbf16>, vector<4x10xf32> -> vector<4x10xf32>
    %287 = arith.addf %281, %286 : vector<4x10xf32>
    %288 = vector.extract_strided_slice %4 {offsets = [6, 5, 0], sizes = [2, 2, 10], strides = [1, 1, 1]} : vector<8x8x10xbf16> to vector<2x2x10xbf16>
    %289 = vector.shape_cast %288 : vector<2x2x10xbf16> to vector<4x10xbf16>
    %c0_281 = arith.constant 0 : index
    %c6_282 = arith.constant 6 : index
    %c5_283 = arith.constant 5 : index
    %c0_284 = arith.constant 0 : index
    %c0_285 = arith.constant 0 : index
    %290 = vector.load %arg4[%c0_281, %c6_282, %c5_283, %c0_284, %c0_285] : memref<1x7x7x10x10xbf16, #tpu.memory_space<vmem>>, vector<1x1x1x10x10xbf16>
    %291 = vector.shape_cast %290 : vector<1x1x1x10x10xbf16> to vector<10x10xbf16>
    %cst_286 = arith.constant dense<0.000000e+00> : vector<4x10xf32>
    %292 = tpu.matmul %289, %291, %cst_286 {dimension_numbers = #tpu.dot_dimension_numbers<[1], [0], [0], [1], [0, 0, 1, 1], [], []>} : vector<4x10xbf16>, vector<10x10xbf16>, vector<4x10xf32> -> vector<4x10xf32>
    %293 = arith.addf %287, %292 : vector<4x10xf32>
    %294 = vector.extract_strided_slice %4 {offsets = [6, 6, 0], sizes = [2, 2, 10], strides = [1, 1, 1]} : vector<8x8x10xbf16> to vector<2x2x10xbf16>
    %295 = vector.shape_cast %294 : vector<2x2x10xbf16> to vector<4x10xbf16>
    %c0_287 = arith.constant 0 : index
    %c6_288 = arith.constant 6 : index
    %c6_289 = arith.constant 6 : index
    %c0_290 = arith.constant 0 : index
    %c0_291 = arith.constant 0 : index
    %296 = vector.load %arg4[%c0_287, %c6_288, %c6_289, %c0_290, %c0_291] : memref<1x7x7x10x10xbf16, #tpu.memory_space<vmem>>, vector<1x1x1x10x10xbf16>
    %297 = vector.shape_cast %296 : vector<1x1x1x10x10xbf16> to vector<10x10xbf16>
    %cst_292 = arith.constant dense<0.000000e+00> : vector<4x10xf32>
    %298 = tpu.matmul %295, %297, %cst_292 {dimension_numbers = #tpu.dot_dimension_numbers<[1], [0], [0], [1], [0, 0, 1, 1], [], []>} : vector<4x10xbf16>, vector<10x10xbf16>, vector<4x10xf32> -> vector<4x10xf32>
    %299 = arith.addf %293, %298 : vector<4x10xf32>
    %c0_293 = arith.constant 0 : index
    %c0_294 = arith.constant 0 : index
    %c0_295 = arith.constant 0 : index
    %c0_296 = arith.constant 0 : index
    %c0_297 = arith.constant 0 : index
    %300 = vector.load %arg7[%c0_293, %c0_294, %c0_295, %c0_296, %c0_297] : memref<1x1x2x2x10xf32, #tpu.memory_space<vmem>>, vector<1x1x2x2x10xf32>
    %301 = vector.shape_cast %300 : vector<1x1x2x2x10xf32> to vector<2x2x10xf32>
    %302 = vector.shape_cast %299 : vector<4x10xf32> to vector<2x2x10xf32>
    %303 = arith.addf %301, %302 : vector<2x2x10xf32>
    %c0_298 = arith.constant 0 : index
    %c0_299 = arith.constant 0 : index
    %c0_300 = arith.constant 0 : index
    %c0_301 = arith.constant 0 : index
    %c0_302 = arith.constant 0 : index
    %304 = vector.load %arg7[%c0_298, %c0_299, %c0_300, %c0_301, %c0_302] : memref<1x1x2x2x10xf32, #tpu.memory_space<vmem>>, vector<1x1x2x2x10xf32>
    %305 = vector.shape_cast %304 : vector<1x1x2x2x10xf32> to vector<2x2x10xf32>
    %306 = vector.shape_cast %303 : vector<2x2x10xf32> to vector<1x1x2x2x10xf32>
    tpu.vector_store %arg7[%c0_298, %c0_299, %c0_300, %c0_301, %c0_302], %306 {strides = array<i32>} : memref<1x1x2x2x10xf32, #tpu.memory_space<vmem>>, vector<1x1x2x2x10xf32>,
    %c6_i32 = arith.constant 6 : i32
    %307 = arith.cmpi eq, %arg2, %c6_i32 : i32
    %308 = arith.extui %307 : i1 to i32
    %c0_i32_303 = arith.constant 0 : i32
    %309 = arith.cmpi ne, %308, %c0_i32_303 : i32
    scf.if %309 {
      %c0_304 = arith.constant 0 : index
      %c0_305 = arith.constant 0 : index
      %c0_306 = arith.constant 0 : index
      %c0_307 = arith.constant 0 : index
      %c0_308 = arith.constant 0 : index
      %310 = vector.load %arg7[%c0_304, %c0_305, %c0_306, %c0_307, %c0_308] : memref<1x1x2x2x10xf32, #tpu.memory_space<vmem>>, vector<1x1x2x2x10xf32>
      %311 = vector.shape_cast %310 : vector<1x1x2x2x10xf32> to vector<2x2x10xf32>
      %c0_309 = arith.constant 0 : index
      %c0_310 = arith.constant 0 : index
      %312 = vector.load %arg5[%c0_309, %c0_310] : memref<1x10xf32, #tpu.memory_space<vmem>>, vector<1x10xf32>
      %313 = vector.shape_cast %312 : vector<1x10xf32> to vector<1x1x10xf32>
      %314 = vector.broadcast %313 : vector<1x1x10xf32> to vector<2x2x10xf32>
      %315 = arith.mulf %311, %314 : vector<2x2x10xf32>
      %c0_311 = arith.constant 0 : index
      %c0_312 = arith.constant 0 : index
      %316 = vector.load %arg6[%c0_311, %c0_312] : memref<1x10xf32, #tpu.memory_space<vmem>>, vector<1x10xf32>
      %317 = vector.shape_cast %316 : vector<1x10xf32> to vector<1x1x10xf32>
      %318 = vector.broadcast %317 : vector<1x1x10xf32> to vector<2x2x10xf32>
      %319 = arith.addf %315, %318 : vector<2x2x10xf32>
      %c0_313 = arith.constant 0 : index
      %c0_314 = arith.constant 0 : index
      %c0_315 = arith.constant 0 : index
      %c0_316 = arith.constant 0 : index
      %c0_317 = arith.constant 0 : index
      %320 = vector.load %arg7[%c0_313, %c0_314, %c0_315, %c0_316, %c0_317] : memref<1x1x2x2x10xf32, #tpu.memory_space<vmem>>, vector<1x1x2x2x10xf32>
      %321 = vector.shape_cast %320 : vector<1x1x2x2x10xf32> to vector<2x2x10xf32>
      %322 = vector.shape_cast %319 : vector<2x2x10xf32> to vector<1x1x2x2x10xf32>
      tpu.vector_store %arg7[%c0_313, %c0_314, %c0_315, %c0_316, %c0_317], %322 {strides = array<i32>} : memref<1x1x2x2x10xf32, #tpu.memory_space<vmem>>, vector<1x1x2x2x10xf32>,
    } else {
    }
    return
  }
  func.func @transform_0(%arg0: i32, %arg1: i32, %arg2: i32) -> (i32, i32, i32, i32, i32) {
    %0 = arith.addi %arg1, %arg2 : i32
    %c0_i32 = arith.constant 0 : i32
    %c0_i32_0 = arith.constant 0 : i32
    %c0_i32_1 = arith.constant 0 : i32
    %c0_i32_2 = arith.constant 0 : i32
    return %arg0, %0, %c0_i32, %c0_i32_0, %c0_i32_1 : i32, i32, i32, i32, i32
  }
  func.func @transform_1(%arg0: i32, %arg1: i32, %arg2: i32) -> (i32, i32, i32, i32, i32) {
    %c0_i32 = arith.constant 0 : i32
    %c0_i32_0 = arith.constant 0 : i32
    %c0_i32_1 = arith.constant 0 : i32
    %c0_i32_2 = arith.constant 0 : i32
    %c0_i32_3 = arith.constant 0 : i32
    return %arg2, %c0_i32, %c0_i32_0, %c0_i32_1, %c0_i32_2 : i32, i32, i32, i32, i32
  }
  func.func @transform_2(%arg0: i32, %arg1: i32, %arg2: i32) -> (i32, i32) {
    %c0_i32 = arith.constant 0 : i32
    %c0_i32_0 = arith.constant 0 : i32
    %c0_i32_1 = arith.constant 0 : i32
    return %c0_i32, %c0_i32_0 : i32, i32
  }
  func.func @transform_3(%arg0: i32, %arg1: i32, %arg2: i32) -> (i32, i32) {
    %c0_i32 = arith.constant 0 : i32
    %c0_i32_0 = arith.constant 0 : i32
    %c0_i32_1 = arith.constant 0 : i32
    return %c0_i32, %c0_i32_0 : i32, i32
  }
  func.func @transform_4(%arg0: i32, %arg1: i32, %arg2: i32) -> (i32, i32, i32, i32, i32) {
    %c0_i32 = arith.constant 0 : i32
    %c0_i32_0 = arith.constant 0 : i32
    %c0_i32_1 = arith.constant 0 : i32
    %c0_i32_2 = arith.constant 0 : i32
    return %arg0, %arg1, %c0_i32, %c0_i32_0, %c0_i32_1 : i32, i32, i32, i32, i32
  }
}

module attributes {stable_mosaic.version = 11 : i64} {
  func.func @_kp_reduce_kernel(%arg0: memref<8x2x4xf32, #tpu.memory_space<vmem>>, %arg1: memref<2x4xf32, #tpu.memory_space<vmem>>, %arg2: memref<8x2x4x4xf32, #tpu.memory_space<vmem>>, %arg3: memref<8x2x2xf32, #tpu.memory_space<vmem>>, %arg4: memref<8x2x4xf32, #tpu.memory_space<vmem>>) attributes {dimension_semantics = [], scalar_prefetch = 0 : i64, scratch_operands = 0 : i64, tpu.core_type = #tpu.core_type<tc>} {
    %c0 = arith.constant 0 : index
    %c0_0 = arith.constant 0 : index
    %c0_1 = arith.constant 0 : index
    %0 = vector.load %arg0[%c0, %c0_0, %c0_1] : memref<8x2x4xf32, #tpu.memory_space<vmem>>, vector<8x2x4xf32>
    %cst = arith.constant 1.000000e+01 : f32
    %1 = vector.broadcast %cst : f32 to vector<8x2x4xf32>
    %2 = arith.mulf %0, %1 : vector<8x2x4xf32>
    %cst_2 = arith.constant dense<0xFF800000> : vector<8x2xf32>
    %3 = vector.multi_reduction <maximumf>, %2, %cst_2 [2] : vector<8x2x4xf32> to vector<8x2xf32>
    %4 = vector.shape_cast %3 : vector<8x2xf32> to vector<8x2x1xf32>
    %5 = vector.broadcast %4 : vector<8x2x1xf32> to vector<8x2x4xf32>
    %6 = arith.subf %2, %5 : vector<8x2x4xf32>
    %7 = math.exp %6 : vector<8x2x4xf32>
    %cst_3 = arith.constant dense<0.000000e+00> : vector<8x2xf32>
    %8 = vector.multi_reduction <add>, %7, %cst_3 [2] : vector<8x2x4xf32> to vector<8x2xf32>
    %9 = vector.shape_cast %8 : vector<8x2xf32> to vector<8x2x1xf32>
    %10 = vector.broadcast %9 : vector<8x2x1xf32> to vector<8x2x4xf32>
    %11 = arith.divf %7, %10 : vector<8x2x4xf32>
    %c0_4 = arith.constant 0 : index
    %c0_5 = arith.constant 0 : index
    %12 = vector.load %arg1[%c0_4, %c0_5] : memref<2x4xf32, #tpu.memory_space<vmem>>, vector<1x4xf32>
    %13 = vector.shape_cast %12 : vector<1x4xf32> to vector<1x1x4xf32>
    %c1 = arith.constant 1 : index
    %c0_6 = arith.constant 0 : index
    %14 = vector.load %arg1[%c1, %c0_6] : memref<2x4xf32, #tpu.memory_space<vmem>>, vector<1x4xf32>
    %15 = vector.shape_cast %14 : vector<1x4xf32> to vector<1x1x4xf32>
    %16 = vector.broadcast %13 : vector<1x1x4xf32> to vector<8x2x4xf32>
    %17 = arith.mulf %11, %16 : vector<8x2x4xf32>
    %cst_7 = arith.constant dense<0.000000e+00> : vector<8x2xf32>
    %18 = vector.multi_reduction <add>, %17, %cst_7 [2] : vector<8x2x4xf32> to vector<8x2xf32>
    %19 = vector.broadcast %15 : vector<1x1x4xf32> to vector<8x2x4xf32>
    %20 = arith.mulf %11, %19 : vector<8x2x4xf32>
    %cst_8 = arith.constant dense<0.000000e+00> : vector<8x2xf32>
    %21 = vector.multi_reduction <add>, %20, %cst_8 [2] : vector<8x2x4xf32> to vector<8x2xf32>
    %22 = vector.shape_cast %18 : vector<8x2xf32> to vector<8x2x1xf32>
    %23 = vector.shape_cast %21 : vector<8x2xf32> to vector<8x2x1xf32>
    %24 = tpu.concatenate %22, %23 in 2 : vector<8x2x1xf32>, vector<8x2x1xf32> -> vector<8x2x2xf32>
    %c0_9 = arith.constant 0 : index
    %c0_10 = arith.constant 0 : index
    %c0_11 = arith.constant 0 : index
    %25 = vector.load %arg3[%c0_9, %c0_10, %c0_11] : memref<8x2x2xf32, #tpu.memory_space<vmem>>, vector<8x2x2xf32>
    tpu.vector_store %arg3[%c0_9, %c0_10, %c0_11], %24 {strides = array<i32>} : memref<8x2x2xf32, #tpu.memory_space<vmem>>, vector<8x2x2xf32>,
    %c0_12 = arith.constant 0 : index
    %c0_13 = arith.constant 0 : index
    %c0_14 = arith.constant 0 : index
    %c0_15 = arith.constant 0 : index
    %26 = vector.load %arg2[%c0_12, %c0_13, %c0_14, %c0_15] : memref<8x2x4x4xf32, #tpu.memory_space<vmem>>, vector<8x2x1x4xf32>
    %27 = vector.shape_cast %26 : vector<8x2x1x4xf32> to vector<8x2x4xf32>
    %28 = arith.mulf %11, %27 : vector<8x2x4xf32>
    %cst_16 = arith.constant dense<0.000000e+00> : vector<8x2xf32>
    %29 = vector.multi_reduction <add>, %28, %cst_16 [2] : vector<8x2x4xf32> to vector<8x2xf32>
    %c0_17 = arith.constant 0 : index
    %c0_18 = arith.constant 0 : index
    %c1_19 = arith.constant 1 : index
    %c0_20 = arith.constant 0 : index
    %30 = vector.load %arg2[%c0_17, %c0_18, %c1_19, %c0_20] : memref<8x2x4x4xf32, #tpu.memory_space<vmem>>, vector<8x2x1x4xf32>
    %31 = vector.shape_cast %30 : vector<8x2x1x4xf32> to vector<8x2x4xf32>
    %32 = arith.mulf %11, %31 : vector<8x2x4xf32>
    %cst_21 = arith.constant dense<0.000000e+00> : vector<8x2xf32>
    %33 = vector.multi_reduction <add>, %32, %cst_21 [2] : vector<8x2x4xf32> to vector<8x2xf32>
    %c0_22 = arith.constant 0 : index
    %c0_23 = arith.constant 0 : index
    %c2 = arith.constant 2 : index
    %c0_24 = arith.constant 0 : index
    %34 = vector.load %arg2[%c0_22, %c0_23, %c2, %c0_24] : memref<8x2x4x4xf32, #tpu.memory_space<vmem>>, vector<8x2x1x4xf32>
    %35 = vector.shape_cast %34 : vector<8x2x1x4xf32> to vector<8x2x4xf32>
    %36 = arith.mulf %11, %35 : vector<8x2x4xf32>
    %cst_25 = arith.constant dense<0.000000e+00> : vector<8x2xf32>
    %37 = vector.multi_reduction <add>, %36, %cst_25 [2] : vector<8x2x4xf32> to vector<8x2xf32>
    %c0_26 = arith.constant 0 : index
    %c0_27 = arith.constant 0 : index
    %c3 = arith.constant 3 : index
    %c0_28 = arith.constant 0 : index
    %38 = vector.load %arg2[%c0_26, %c0_27, %c3, %c0_28] : memref<8x2x4x4xf32, #tpu.memory_space<vmem>>, vector<8x2x1x4xf32>
    %39 = vector.shape_cast %38 : vector<8x2x1x4xf32> to vector<8x2x4xf32>
    %40 = arith.mulf %11, %39 : vector<8x2x4xf32>
    %cst_29 = arith.constant dense<0.000000e+00> : vector<8x2xf32>
    %41 = vector.multi_reduction <add>, %40, %cst_29 [2] : vector<8x2x4xf32> to vector<8x2xf32>
    %42 = vector.shape_cast %29 : vector<8x2xf32> to vector<8x2x1xf32>
    %43 = vector.shape_cast %33 : vector<8x2xf32> to vector<8x2x1xf32>
    %44 = vector.shape_cast %37 : vector<8x2xf32> to vector<8x2x1xf32>
    %45 = vector.shape_cast %41 : vector<8x2xf32> to vector<8x2x1xf32>
    %46 = tpu.concatenate %42, %43, %44, %45 in 2 : vector<8x2x1xf32>, vector<8x2x1xf32>, vector<8x2x1xf32>, vector<8x2x1xf32> -> vector<8x2x4xf32>
    %c0_30 = arith.constant 0 : index
    %c0_31 = arith.constant 0 : index
    %c0_32 = arith.constant 0 : index
    %47 = vector.load %arg4[%c0_30, %c0_31, %c0_32] : memref<8x2x4xf32, #tpu.memory_space<vmem>>, vector<8x2x4xf32>
    tpu.vector_store %arg4[%c0_30, %c0_31, %c0_32], %46 {strides = array<i32>} : memref<8x2x4xf32, #tpu.memory_space<vmem>>, vector<8x2x4xf32>,
    return
  }
}

</mosaic_0001>

<bundles_post_ra>
// kernel: reverse
= control target key start
LH: loop header
LB: loop body
LE: loop exit
PB: predicated region body
PF: predicated region fallthrough
CT: control target
= control target key end

     0   :  { %s468_s0 = inlined_call_operand.vmem [shape: bf16[8,8,8], index: 0, kind: input, shape index: {}]   ;;  %s469_s1 = inlined_call_operand.vmem [shape: bf16[8,8,8], index: 1, kind: output, shape index: {}]  }
   0x1   :  { %v18_v0 = vld [vmem:[%s468_s0] sm:$0xff]   ;;  %v22_v1 = vld [vmem:[%s468_s0 + $0x8] sm:$0xff]   ;;  %v26_v2 = vld [vmem:[%s468_s0 + $0x10] sm:$0xff]  }
   0x2   :  { %19 = vst [vmem:[#allocation1] sm:$0xff] %v18_v0   ;;  %23 = vst [vmem:[#allocation1 + $0x8] sm:$0xff] %v22_v1   ;;  %v30_v3 = vld [vmem:[%s468_s0 + $0x18] sm:$0xff]  }
   0x3   :  { %27 = vst [vmem:[#allocation1 + $0x10] sm:$0xff] %v26_v2   ;;  %31 = vst [vmem:[#allocation1 + $0x18] sm:$0xff] %v30_v3  }
   0x9   :  { %v407_v5 = vld [vmem:[#allocation1 + $0x8] sm:$0xff]   ;;  %v411_v6 = vld [vmem:[#allocation1] sm:$0xff]  }
   0xa   :  { %v403_v4 = vld [vmem:[#allocation1 + $0x10] sm:$0xff]   ;;  %v399_v7 = vld [vmem:[#allocation1 + $0x18] sm:$0xff]   ;;  %v408_v10 = vunpack.c.l.bf16 %v407_v5  ;;  %v409_v11 = vunpack.c.h.bf16 %v407_v5  ;;  %v412_v14 = vunpack.c.l.bf16 %v411_v6  ;;  %v413_v15 = vunpack.c.h.bf16 %v411_v6 }
   0xb   :  { %v404_v8 = vunpack.c.l.bf16 %v403_v4  ;;  %v405_v9 = vunpack.c.h.bf16 %v403_v4  ;;  %v400_v12 = vunpack.c.l.bf16 %v399_v7  ;;  %v401_v13 = vunpack.c.h.bf16 %v399_v7 }
   0xc   :  { %154 = vst [vmem:[#allocation0 + $0x18] sm:$0xff] %v409_v11  ;;  %170 = vst [vmem:[#allocation0 + $0x10] sm:$0xff] %v408_v10 }
   0xd   :  { %122 = vst [vmem:[#allocation0 + $0x28] sm:$0xff] %v405_v9  ;;  %138 = vst [vmem:[#allocation0 + $0x20] sm:$0xff] %v404_v8 }
   0xe   :  { %90 = vst [vmem:[#allocation0 + $0x38] sm:$0xff] %v401_v13  ;;  %106 = vst [vmem:[#allocation0 + $0x30] sm:$0xff] %v400_v12 }
   0xf   :  { %185 = vst [vmem:[#allocation0 + $0x8] sm:$0xff] %v413_v15  ;;  %198 = vst [vmem:[#allocation0] sm:$0xff] %v412_v14 }
  0x13   :  { %v221_v18 = vld [vmem:[#allocation0 + $0x1f] ss:$-1 sm:$0xff]  ;;  %v226_v21 = vld [vmem:[#allocation0 + $0x17] ss:$-1 sm:$0xff] }
  0x14   :  { %v211_v16 = vld [vmem:[#allocation0 + $0x2f] ss:$-1 sm:$0xff]  ;;  %v216_v17 = vld [vmem:[#allocation0 + $0x27] ss:$-1 sm:$0xff]  ;;  %v427_v26 = vpack.c.bf16 %v226_v21, %v221_v18 }
  0x15   :  { %v201_v19 = vld [vmem:[#allocation0 + $0x3f] ss:$-1 sm:$0xff]  ;;  %v206_v20 = vld [vmem:[#allocation0 + $0x37] ss:$-1 sm:$0xff]  ;;  %v422_v22 = vpack.c.bf16 %v216_v17, %v211_v16 }
  0x16   :  { %v231_v23 = vld [vmem:[#allocation0 + $0xf] ss:$-1 sm:$0xff]  ;;  %v235_v24 = vld [vmem:[#allocation0 + $0x7] ss:$-1 sm:$0xff]  ;;  %v417_v25 = vpack.c.bf16 %v206_v20, %v201_v19  ;;  %428 = vst [vmem:[#allocation3 + $0x10] sm:$0xff] %v427_v26  }
  0x17   :  { %423 = vst [vmem:[#allocation3 + $0x8] sm:$0xff] %v422_v22   ;;  %v432_v27 = vpack.c.bf16 %v235_v24, %v231_v23 }
  0x18   :  { %418 = vst [vmem:[#allocation3] sm:$0xff] %v417_v25  }
  0x19   :  { %433 = vst [vmem:[#allocation3 + $0x18] sm:$0xff] %v432_v27  }
  0x1d   :  { %v326_v30 = vld [vmem:[#allocation3 + $0x10] sm:$0xff]  }
  0x1e   :  { %v322_v28 = vld [vmem:[#allocation3 + $0x8] sm:$0xff]   ;;  %327 = vst [vmem:[%s469_s1 + $0x10] sm:$0xff] %v326_v30  }
  0x1f   :  { %v318_v29 = vld [vmem:[#allocation3] sm:$0xff]   ;;  %323 = vst [vmem:[%s469_s1 + $0x8] sm:$0xff] %v322_v28  }
  0x20   :  { %319 = vst [vmem:[%s469_s1] sm:$0xff] %v318_v29   ;;  %v330_v31 = vld [vmem:[#allocation3 + $0x18] sm:$0xff]  }
  0x21   :  { %331 = vst [vmem:[%s469_s1 + $0x18] sm:$0xff] %v330_v31  }

// kernel: forward.8
= control target key start
LH: loop header
LB: loop body
LE: loop exit
PB: predicated region body
PF: predicated region fallthrough
CT: control target
= control target key end

     0   :  { %8 = vsyncpa [#allocation3], 0  ;;  %s2701_s0 = inlined_call_operand.vmem [shape: f32[8,44,44], index: 0, kind: input, shape index: {}]   ;;  %s2702_s1 = inlined_call_operand.hbm [shape: f32[8,44], index: 1, kind: input, shape index: {}]   ;;  %s2703_s2 = inlined_call_operand.hbm [shape: f32[44,8], index: 2, kind: input, shape index: {}]   ;;  %s2704_s3 = inlined_call_operand.vmem [shape: f32[8,8,8], index: 3, kind: output, shape index: {}]  }
   0x1   :  { %9 = vsyncpa [#allocation5], 0  ;;  %s2231_s12 = smov [#allocation2]   ;;  %s2232_s14 = smov [#allocation4]  }
   0x2   :  { %s18_s13 = sshll.u32 %s2231_s12, 4  ;;  %s27_s15 = sshll.u32 %s2232_s14, 4  ;;  %s19_s13 = int_to_ptr.vmem [resolvable:$true] %s18_s13  ;;  %s28_s15 = int_to_ptr.vmem [resolvable:$true] %s27_s15 }
   0x3   :  { %s2195_s16 = scalar_lea.vmem %s19_s13, 128  ;;  %p2200_p1 = scmp.lt.s32.totalorder %s19_s13, %s19_s13 }
   0x4   :  { %p2196_p0 = scmp.ne.s32.totalorder %s19_s13, %s2195_s16  ;;  %p2201_p2 = scmp.lt.s32.totalorder %s2195_s16, %s2195_s16 }
   0x6   :  { %p2202_p3 = por %p2201_p2, %p2200_p1 }
   0x8   :  { %p2203_p4 = pnand %p2202_p3, %p2196_p0 }
   0xa   :  { %2206 = shalt.err (!%p2203_p4)
}
   0xb   :  { %21 = dma.hbm_to_vmem [thread:$0]  %s2702_s1, 128, %s19_s13, [#allocation3]  }
   0xc   :  { %s2215_s19 = scalar_lea.vmem %s28_s15, 768  ;;  %p2220_p6 = scmp.lt.s32.totalorder %s28_s15, %s28_s15 }
   0xd   :  { %p2216_p5 = scmp.ne.s32.totalorder %s28_s15, %s2215_s19  ;;  %p2221_p7 = scmp.lt.s32.totalorder %s2215_s19, %s2215_s19 }
   0xf   :  { %p2222_p8 = por %p2221_p7, %p2220_p6 }
  0x11   :  { %p2223_p9 = pnand %p2222_p8, %p2216_p5 }
  0x13   :  { %2226 = shalt.err (!%p2223_p9)
}
  0x14   :  { %s2233_s20 = smov 128   ;;  %s2234_s21 = smov 8  }
  0x15   :  { %33 = dma.hbm_to_vmem [thread:$0]  %s2703_s2, 768, %s28_s15, [#allocation5], %s2233_s20, %s2233_s20, %s2234_s21  }
  0x16   :  { %2227 = dma.done.wait [#allocation3], 128  }
  0x17   :  { %2228 = vsyncadd [#allocation3], 4294967168 }
  0x18   :  { %2229 = dma.done.wait [#allocation5], 768  }
  0x19   :  { %2230 = vsyncadd [#allocation5], 4294966528  ;;  %vm72_vm0 = vcmask 1043456   ;;  %v2263_v0 = vld [vmem:[#allocation4 + $0x28] sm:$0xf]  ;;  %v2265_v1 = vld [vmem:[#allocation4 + $0x20] sm:$0xff] }
  0x1a   :  { %vm53_vm1 = vcmask 359424   ;;  %1893 = vmatprep.subr.msk.mxu0 %vm72_vm0, %v2263_v0  ;;  %v2271_v2 = vld [vmem:[#allocation4 + $0x18] sm:$0xff]  ;;  %v2279_v4 = vld [vmem:[#allocation4 + $0x10] sm:$0xff]  ;;  %v2283_v5 = vld [vmem:[#allocation4 + $0x8] sm:$0xff]  ;;  %v2235_v47 = vmov 0.0   ;;  %vm2236_vm2 = vmmov 0  }
  0x1b   :  { %1894 = vmatpush3.msk.msra.mxu0 %vm72_vm0, %v2263_v0  ;;  %v47_v3 = vld [vmem:[%s2701_s0] sm:$0xff]  ;;  %v2287_v6 = vld [vmem:[#allocation4] sm:$0xff]  ;;  %v49_v8 = vld [vmem:[%s2701_s0 + $0x10] sm:$0xff]  ;;  %1914 = vmatprep.subr.mxu1 %v2235_v47  ;;  %vm247_vm3 = vcmask 64512  }
  0x1c   :  { %1895 = vmatprep.subr.mxu0 %v2265_v1  ;;  %1905 = vmatprep.mubr.msk.f32.mxu0 %vm53_vm1, %v47_v3  ;;  %v48_v7 = vld [vmem:[%s2701_s0 + $0x8] sm:$0xff]  ;;  %v50_v9 = vld [vmem:[%s2701_s0 + $0x18] sm:$0xff]  ;;  %v51_v10 = vld [vmem:[%s2701_s0 + $0x20] sm:$0xff] }
  0x1d   :  { %1896 = vmatpush3.msra.mxu0 %v2265_v1  ;;  %v52_v11 = vld [vmem:[%s2701_s0 + $0x28] sm:$0xf]  ;;  %v1629_v12 = vld [vmem:[%s2701_s0 + $0x30] sm:$0xff]  ;;  %v1630_v13 = vld [vmem:[%s2701_s0 + $0x38] sm:$0xff]  ;;  %1926 = vmatprep.mubr.msk.f32.mxu1 %vm2236_vm2, %v2235_v47 }
  0x1e   :  { %1897 = vmatprep.subr.mxu0 %v2271_v2  ;;  %v1631_v14 = vld [vmem:[%s2701_s0 + $0x40] sm:$0xff]  ;;  %v1632_v15 = vld [vmem:[%s2701_s0 + $0x48] sm:$0xff]  ;;  %v1633_v16 = vld [vmem:[%s2701_s0 + $0x50] sm:$0xff] }
  0x1f   :  { %1898 = vmatpush3.msra.mxu0 %v2271_v2  ;;  %v1634_v17 = vld [vmem:[%s2701_s0 + $0x58] sm:$0xf]  ;;  %v1645_v18 = vld [vmem:[%s2701_s0 + $0x60] sm:$0xff]  ;;  %v1646_v19 = vld [vmem:[%s2701_s0 + $0x68] sm:$0xff] }
  0x20   :  { %1899 = vmatprep.subr.mxu0 %v2279_v4  ;;  %v1647_v20 = vld [vmem:[%s2701_s0 + $0x70] sm:$0xff]  ;;  %v1648_v21 = vld [vmem:[%s2701_s0 + $0x78] sm:$0xff]  ;;  %v1649_v22 = vld [vmem:[%s2701_s0 + $0x80] sm:$0xff] }
  0x21   :  { %1900 = vmatpush3.msra.mxu0 %v2279_v4  ;;  %v1650_v23 = vld [vmem:[%s2701_s0 + $0x88] sm:$0xf]  ;;  %v1661_v24 = vld [vmem:[%s2701_s0 + $0x90] sm:$0xff]  ;;  %v1662_v25 = vld [vmem:[%s2701_s0 + $0x98] sm:$0xff] }
  0x22   :  { %1901 = vmatprep.subr.mxu0 %v2283_v5  ;;  %v1663_v26 = vld [vmem:[%s2701_s0 + $0xa0] sm:$0xff]  ;;  %v1664_v27 = vld [vmem:[%s2701_s0 + $0xa8] sm:$0xff]  ;;  %v1665_v28 = vld [vmem:[%s2701_s0 + $0xb0] sm:$0xff] }
  0x23   :  { %1902 = vmatpush3.msra.mxu0 %v2283_v5  ;;  %v1666_v29 = vld [vmem:[%s2701_s0 + $0xb8] sm:$0xf]  ;;  %v1677_v30 = vld [vmem:[%s2701_s0 + $0xc0] sm:$0xff]  ;;  %v1678_v31 = vld [vmem:[%s2701_s0 + $0xc8] sm:$0xff] }
  0x24   :  { %1903 = vmatprep.subr.mxu0 %v2287_v6  ;;  %v1679_v32 = vld [vmem:[%s2701_s0 + $0xd0] sm:$0xff]  ;;  %v1680_v33 = vld [vmem:[%s2701_s0 + $0xd8] sm:$0xff]  ;;  %v1681_v34 = vld [vmem:[%s2701_s0 + $0xe0] sm:$0xff] }
  0x25   :  { %1904 = vmatpush3.msra.mxu0 %v2287_v6  ;;  %v1682_v35 = vld [vmem:[%s2701_s0 + $0xe8] sm:$0xf]  ;;  %v1693_v36 = vld [vmem:[%s2701_s0 + $0xf0] sm:$0xff]  ;;  %v1694_v37 = vld [vmem:[%s2701_s0 + $0xf8] sm:$0xff] }
  0x26   :  { %1906 = vmatmul.mubr.msk.f32.vlgmr.msra.gmra.mxu0 %vm53_vm1, %v48_v7  ;;  %1929 = vmatprep.subr.msk.mxu0 %vm72_vm0, %v2263_v0  ;;  %v1695_v38 = vld [vmem:[%s2701_s0 + $0x100] sm:$0xff]  ;;  %v1696_v39 = vld [vmem:[%s2701_s0 + $0x108] sm:$0xff]  ;;  %v1697_v40 = vld [vmem:[%s2701_s0 + $0x110] sm:$0xff] }
  0x27   :  { %1930 = vmatpush3.msk.msra.mxu0 %vm72_vm0, %v2263_v0  ;;  %1908 = vmatprep.mubr.msk.f32.mxu0 %vm53_vm1, %v49_v8  ;;  %v1698_v41 = vld [vmem:[%s2701_s0 + $0x118] sm:$0xf]  ;;  %v1709_v42 = vld [vmem:[%s2701_s0 + $0x120] sm:$0xff]  ;;  %v1710_v43 = vld [vmem:[%s2701_s0 + $0x128] sm:$0xff] }
  0x28   :  { %1931 = vmatprep.subr.mxu0 %v2265_v1  ;;  %v1711_v44 = vld [vmem:[%s2701_s0 + $0x130] sm:$0xff]  ;;  %v1712_v45 = vld [vmem:[%s2701_s0 + $0x138] sm:$0xff]  ;;  %v1713_v46 = vld [vmem:[%s2701_s0 + $0x140] sm:$0xff] }
  0x29   :  { %1932 = vmatpush3.msra.mxu0 %v2265_v1  ;;  %v1714_v48 = vld [vmem:[%s2701_s0 + $0x148] sm:$0xf]  ;;  %v1725_v49 = vld [vmem:[%s2701_s0 + $0x150] sm:$0xff]  ;;  %v1726_v50 = vld [vmem:[%s2701_s0 + $0x158] sm:$0xff] }
  0x2a   :  { %1909 = vmatmul.mubr.msk.f32.gmra.mxu0 %vm53_vm1, %v50_v9  ;;  %1933 = vmatprep.subr.mxu0 %v2271_v2  ;;  %v1727_v51 = vld [vmem:[%s2701_s0 + $0x160] sm:$0xff]  ;;  %v1728_v52 = vld [vmem:[%s2701_s0 + $0x168] sm:$0xff]  ;;  %v1729_v53 = vld [vmem:[%s2701_s0 + $0x170] sm:$0xff] }
  0x2b   :  { %1934 = vmatpush3.msra.mxu0 %v2271_v2  ;;  %1911 = vmatprep.mubr.msk.f32.mxu0 %vm53_vm1, %v51_v10  ;;  %v1730_v54 = vld [vmem:[%s2701_s0 + $0x178] sm:$0xf] }
  0x2c   :  { %1935 = vmatprep.subr.mxu0 %v2279_v4 }
  0x2d   :  { %1936 = vmatpush3.msra.mxu0 %v2279_v4 }
  0x2e   :  { %1912 = vmatmul.mubr.msk.f32.gmra.mxu0 %vm53_vm1, %v52_v11  ;;  %1937 = vmatprep.subr.mxu0 %v2283_v5 }
  0x2f   :  { %1938 = vmatpush3.msra.mxu0 %v2283_v5  ;;  %1941 = vmatprep.mubr.msk.f32.mxu0 %vm53_vm1, %v1629_v12 }
  0x30   :  { %1939 = vmatprep.subr.mxu0 %v2287_v6 }
  0x31   :  { %1940 = vmatpush3.msra.mxu0 %v2287_v6 }
  0x32   :  { %1942 = vmatmul.mubr.msk.f32.vlgmr.msra.gmra.mxu0 %vm53_vm1, %v1630_v13  ;;  %1965 = vmatprep.subr.msk.mxu0 %vm72_vm0, %v2263_v0 }
  0x33   :  { %1966 = vmatpush3.msk.msra.mxu0 %vm72_vm0, %v2263_v0  ;;  %1944 = vmatprep.mubr.msk.f32.mxu0 %vm53_vm1, %v1631_v14 }
  0x34   :  { %1967 = vmatprep.subr.mxu0 %v2265_v1 }
  0x35   :  { %1968 = vmatpush3.msra.mxu0 %v2265_v1 }
  0x36   :  { %1945 = vmatmul.mubr.msk.f32.gmra.mxu0 %vm53_vm1, %v1632_v15  ;;  %1969 = vmatprep.subr.mxu0 %v2271_v2 }
  0x37   :  { %1970 = vmatpush3.msra.mxu0 %v2271_v2  ;;  %1947 = vmatprep.mubr.msk.f32.mxu0 %vm53_vm1, %v1633_v16 }
  0x38   :  { %1971 = vmatprep.subr.mxu0 %v2279_v4 }
  0x39   :  { %1972 = vmatpush3.msra.mxu0 %v2279_v4 }
  0x3a   :  { %1948 = vmatmul.mubr.msk.f32.gmra.mxu0 %vm53_vm1, %v1634_v17  ;;  %1973 = vmatprep.subr.mxu0 %v2283_v5 }
  0x3b   :  { %1974 = vmatpush3.msra.mxu0 %v2283_v5  ;;  %1977 = vmatprep.mubr.msk.f32.mxu0 %vm53_vm1, %v1645_v18 }
  0x3c   :  { %1975 = vmatprep.subr.mxu0 %v2287_v6 }
  0x3d   :  { %1976 = vmatpush3.msra.mxu0 %v2287_v6 }
  0x3e   :  { %1978 = vmatmul.mubr.msk.f32.vlgmr.msra.gmra.mxu0 %vm53_vm1, %v1646_v19  ;;  %2001 = vmatprep.subr.msk.mxu0 %vm72_vm0, %v2263_v0 }
  0x3f   :  { %2002 = vmatpush3.msk.msra.mxu0 %vm72_vm0, %v2263_v0  ;;  %1980 = vmatprep.mubr.msk.f32.mxu0 %vm53_vm1, %v1647_v20 }
  0x40   :  { %2003 = vmatprep.subr.mxu0 %v2265_v1 }
  0x41   :  { %2004 = vmatpush3.msra.mxu0 %v2265_v1 }
  0x42   :  { %1981 = vmatmul.mubr.msk.f32.gmra.mxu0 %vm53_vm1, %v1648_v21  ;;  %2005 = vmatprep.subr.mxu0 %v2271_v2 }
  0x43   :  { %2006 = vmatpush3.msra.mxu0 %v2271_v2  ;;  %1983 = vmatprep.mubr.msk.f32.mxu0 %vm53_vm1, %v1649_v22 }
  0x44   :  { %2007 = vmatprep.subr.mxu0 %v2279_v4 }
  0x45   :  { %2008 = vmatpush3.msra.mxu0 %v2279_v4 }
  0x46   :  { %1984 = vmatmul.mubr.msk.f32.gmra.mxu0 %vm53_vm1, %v1650_v23  ;;  %2009 = vmatprep.subr.mxu0 %v2283_v5 }
  0x47   :  { %2010 = vmatpush3.msra.mxu0 %v2283_v5  ;;  %2013 = vmatprep.mubr.msk.f32.mxu0 %vm53_vm1, %v1661_v24 }
  0x48   :  { %2011 = vmatprep.subr.mxu0 %v2287_v6 }
  0x49   :  { %2012 = vmatpush3.msra.mxu0 %v2287_v6 }
  0x4a   :  { %2014 = vmatmul.mubr.msk.f32.vlgmr.msra.gmra.mxu0 %vm53_vm1, %v1662_v25  ;;  %2037 = vmatprep.subr.msk.mxu0 %vm72_vm0, %v2263_v0 }
  0x4b   :  { %2038 = vmatpush3.msk.msra.mxu0 %vm72_vm0, %v2263_v0  ;;  %2016 = vmatprep.mubr.msk.f32.mxu0 %vm53_vm1, %v1663_v26 }
  0x4c   :  { %2039 = vmatprep.subr.mxu0 %v2265_v1 }
  0x4d   :  { %2040 = vmatpush3.msra.mxu0 %v2265_v1 }
  0x4e   :  { %2017 = vmatmul.mubr.msk.f32.gmra.mxu0 %vm53_vm1, %v1664_v27  ;;  %2041 = vmatprep.subr.mxu0 %v2271_v2 }
  0x4f   :  { %2042 = vmatpush3.msra.mxu0 %v2271_v2  ;;  %2019 = vmatprep.mubr.msk.f32.mxu0 %vm53_vm1, %v1665_v28 }
  0x50   :  { %2043 = vmatprep.subr.mxu0 %v2279_v4 }
  0x51   :  { %2044 = vmatpush3.msra.mxu0 %v2279_v4 }
  0x52   :  { %2020 = vmatmul.mubr.msk.f32.gmra.mxu0 %vm53_vm1, %v1666_v29  ;;  %2045 = vmatprep.subr.mxu0 %v2283_v5 }
  0x53   :  { %2046 = vmatpush3.msra.mxu0 %v2283_v5  ;;  %2049 = vmatprep.mubr.msk.f32.mxu0 %vm53_vm1, %v1677_v30 }
  0x54   :  { %2047 = vmatprep.subr.mxu0 %v2287_v6 }
  0x55   :  { %2048 = vmatpush3.msra.mxu0 %v2287_v6 }
  0x56   :  { %2050 = vmatmul.mubr.msk.f32.vlgmr.msra.gmra.mxu0 %vm53_vm1, %v1678_v31  ;;  %2073 = vmatprep.subr.msk.mxu0 %vm72_vm0, %v2263_v0 }
  0x57   :  { %2074 = vmatpush3.msk.msra.mxu0 %vm72_vm0, %v2263_v0  ;;  %2052 = vmatprep.mubr.msk.f32.mxu0 %vm53_vm1, %v1679_v32 }
  0x58   :  { %2075 = vmatprep.subr.mxu0 %v2265_v1 }
  0x59   :  { %2076 = vmatpush3.msra.mxu0 %v2265_v1 }
  0x5a   :  { %2053 = vmatmul.mubr.msk.f32.gmra.mxu0 %vm53_vm1, %v1680_v33  ;;  %2077 = vmatprep.subr.mxu0 %v2271_v2 }
  0x5b   :  { %2078 = vmatpush3.msra.mxu0 %v2271_v2  ;;  %2055 = vmatprep.mubr.msk.f32.mxu0 %vm53_vm1, %v1681_v34 }
  0x5c   :  { %2079 = vmatprep.subr.mxu0 %v2279_v4 }
  0x5d   :  { %2080 = vmatpush3.msra.mxu0 %v2279_v4 }
  0x5e   :  { %2056 = vmatmul.mubr.msk.f32.gmra.mxu0 %vm53_vm1, %v1682_v35  ;;  %2081 = vmatprep.subr.mxu0 %v2283_v5 }
  0x5f   :  { %2082 = vmatpush3.msra.mxu0 %v2283_v5  ;;  %2085 = vmatprep.mubr.msk.f32.mxu0 %vm53_vm1, %v1693_v36 }
  0x60   :  { %2083 = vmatprep.subr.mxu0 %v2287_v6 }
  0x61   :  { %2084 = vmatpush3.msra.mxu0 %v2287_v6 }
  0x62   :  { %2086 = vmatmul.mubr.msk.f32.vlgmr.msra.gmra.mxu0 %vm53_vm1, %v1694_v37  ;;  %2109 = vmatprep.subr.msk.mxu0 %vm72_vm0, %v2263_v0 }
  0x63   :  { %2110 = vmatpush3.msk.msra.mxu0 %vm72_vm0, %v2263_v0  ;;  %2088 = vmatprep.mubr.msk.f32.mxu0 %vm53_vm1, %v1695_v38 }
  0x64   :  { %2111 = vmatprep.subr.mxu0 %v2265_v1 }
  0x65   :  { %2112 = vmatpush3.msra.mxu0 %v2265_v1 }
  0x66   :  { %2089 = vmatmul.mubr.msk.f32.gmra.mxu0 %vm53_vm1, %v1696_v39  ;;  %2113 = vmatprep.subr.mxu0 %v2271_v2 }
  0x67   :  { %2114 = vmatpush3.msra.mxu0 %v2271_v2  ;;  %2091 = vmatprep.mubr.msk.f32.mxu0 %vm53_vm1, %v1697_v40 }
  0x68   :  { %2115 = vmatprep.subr.mxu0 %v2279_v4 }
  0x69   :  { %2116 = vmatpush3.msra.mxu0 %v2279_v4 }
  0x6a   :  { %2092 = vmatmul.mubr.msk.f32.gmra.mxu0 %vm53_vm1, %v1698_v41  ;;  %2117 = vmatprep.subr.mxu0 %v2283_v5 }
  0x6b   :  { %2118 = vmatpush3.msra.mxu0 %v2283_v5  ;;  %2121 = vmatprep.mubr.msk.f32.mxu0 %vm53_vm1, %v1709_v42 }
  0x6c   :  { %2119 = vmatprep.subr.mxu0 %v2287_v6 }
  0x6d   :  { %2120 = vmatpush3.msra.mxu0 %v2287_v6 }
  0x6e   :  { %2122 = vmatmul.mubr.msk.f32.vlgmr.msra.gmra.mxu0 %vm53_vm1, %v1710_v43  ;;  %2145 = vmatprep.subr.msk.mxu0 %vm72_vm0, %v2263_v0 }
  0x6f   :  { %2146 = vmatpush3.msk.msra.mxu0 %vm72_vm0, %v2263_v0  ;;  %2124 = vmatprep.mubr.msk.f32.mxu0 %vm53_vm1, %v1711_v44  ;;  %v2587_v0 = vld [vmem:[#allocation2] sm:$0xff] }
  0x70   :  { %2147 = vmatprep.subr.mxu0 %v2265_v1 }
  0x71   :  { %2148 = vmatpush3.msra.mxu0 %v2265_v1 }
  0x72   :  { %2125 = vmatmul.mubr.msk.f32.gmra.mxu0 %vm53_vm1, %v1712_v45  ;;  %2149 = vmatprep.subr.mxu0 %v2271_v2 }
  0x73   :  { %2150 = vmatpush3.msra.mxu0 %v2271_v2  ;;  %2127 = vmatprep.mubr.msk.f32.mxu0 %vm53_vm1, %v1713_v46 }
  0x74   :  { %2151 = vmatprep.subr.mxu0 %v2279_v4 }
  0x75   :  { %2152 = vmatpush3.msra.mxu0 %v2279_v4 }
  0x76   :  { %2128 = vmatmul.mubr.msk.f32.gmra.mxu0 %vm53_vm1, %v1714_v48  ;;  %2153 = vmatprep.subr.mxu0 %v2283_v5 }
  0x77   :  { %2154 = vmatpush3.msra.mxu0 %v2283_v5  ;;  %2157 = vmatprep.mubr.msk.f32.mxu0 %vm53_vm1, %v1725_v49 }
  0x78   :  { %2155 = vmatprep.subr.mxu0 %v2287_v6 }
  0x79   :  { %2156 = vmatpush3.msra.mxu0 %v2287_v6 }
  0x7a   :  { %2158 = vmatmul.mubr.msk.f32.vlgmr.msra.gmra.mxu0 %vm53_vm1, %v1726_v50 }
  0x7b   :  { %2160 = vmatprep.mubr.msk.f32.mxu0 %vm53_vm1, %v1727_v51 }
  0x7e   :  { %2161 = vmatmul.mubr.msk.f32.gmra.mxu0 %vm53_vm1, %v1728_v52 }
  0x7f   :  { %2163 = vmatprep.mubr.msk.f32.mxu0 %vm53_vm1, %v1729_v53 }
  0x82   :  { %2164 = vmatmul.mubr.msk.f32.gmra.mxu0 %vm53_vm1, %v1730_v54 }
  0xe6   :  { %v1907_v55 = vpop.f32.mrf.mxu0 }
  0xe8   :  { %v142_v56 = vpop.f32.mrf.mxu0 }
  0xea   :  { %v1910_v57 = vpop.f32.mrf.mxu0 }
  0xec   :  { %v152_v58 = vpop.f32.mrf.mxu0 }
  0xee   :  { %v1913_v59 = vpop.f32.mrf.mxu0 }
  0xef   :  { %1915 = vmatpush3.msk.msra.mxu1 %vm72_vm0, %v1913_v59 }
  0xf0   :  { %v162_v60 = vpop.f32.mrf.mxu0  ;;  %1916 = vmatprep.subr.mxu1 %v2235_v47 }
  0xf1   :  { %1917 = vmatpush3.msra.mxu1 %v162_v60 }
  0xf2   :  { %1918 = vmatprep.subr.mxu1 %v2235_v47  ;;  %v1943_v61 = vpop.f32.mrf.mxu0 }
  0xf3   :  { %1919 = vmatpush3.msra.mxu1 %v1910_v57 }
  0xf4   :  { %1920 = vmatprep.subr.mxu1 %v2235_v47  ;;  %v340_v62 = vpop.f32.mrf.mxu0 }
  0xf5   :  { %1921 = vmatpush3.msra.mxu1 %v152_v58 }
  0xf6   :  { %1922 = vmatprep.subr.mxu1 %v2235_v47  ;;  %v1946_v63 = vpop.f32.mrf.mxu0 }
  0xf7   :  { %1923 = vmatpush3.msra.mxu1 %v1907_v55 }
  0xf8   :  { %1924 = vmatprep.subr.mxu1 %v2235_v47  ;;  %v350_v1 = vpop.f32.mrf.mxu0 }
  0xf9   :  { %1925 = vmatpush3.msra.mxu1 %v142_v56 }
  0xfa   :  { %1927 = vmatmul.mubr.msk.f32.vlgmr.msra.gmra.mxu1 %vm53_vm1, %v2587_v0  ;;  %v1949_v2 = vpop.f32.mrf.mxu0  ;;  %1950 = vmatprep.subr.mxu1 %v2235_v47 }
  0xfb   :  { %1951 = vmatpush3.msk.msra.mxu1 %vm72_vm0, %v1949_v2  ;;  %1962 = vmatprep.mubr.msk.f32.mxu1 %vm2236_vm2, %v2235_v47 }
  0xfc   :  { %v360_v3 = vpop.f32.mrf.mxu0  ;;  %1952 = vmatprep.subr.mxu1 %v2235_v47 }
  0xfd   :  { %1953 = vmatpush3.msra.mxu1 %v360_v3 }
  0xfe   :  { %1954 = vmatprep.subr.mxu1 %v2235_v47  ;;  %v1979_v4 = vpop.f32.mrf.mxu0 }
  0xff   :  { %1955 = vmatpush3.msra.mxu1 %v1946_v63 }
 0x100   :  { %1956 = vmatprep.subr.mxu1 %v2235_v47  ;;  %v535_v5 = vpop.f32.mrf.mxu0 }
 0x101   :  { %1957 = vmatpush3.msra.mxu1 %v350_v1 }
 0x102   :  { %1958 = vmatprep.subr.mxu1 %v2235_v47  ;;  %v1982_v6 = vpop.f32.mrf.mxu0 }
 0x103   :  { %1959 = vmatpush3.msra.mxu1 %v1943_v61 }
 0x104   :  { %1960 = vmatprep.subr.mxu1 %v2235_v47  ;;  %v545_v7 = vpop.f32.mrf.mxu0 }
 0x105   :  { %1961 = vmatpush3.msra.mxu1 %v340_v62 }
 0x106   :  { %1963 = vmatmul.mubr.msk.f32.vlgmr.msra.gmra.mxu1 %vm53_vm1, %v2587_v0  ;;  %v1985_v8 = vpop.f32.mrf.mxu0  ;;  %1986 = vmatprep.subr.mxu1 %v2235_v47 }
 0x107   :  { %1987 = vmatpush3.msk.msra.mxu1 %vm72_vm0, %v1985_v8  ;;  %1998 = vmatprep.mubr.msk.f32.mxu1 %vm2236_vm2, %v2235_v47 }
 0x108   :  { %v555_v9 = vpop.f32.mrf.mxu0  ;;  %1988 = vmatprep.subr.mxu1 %v2235_v47 }
 0x109   :  { %1989 = vmatpush3.msra.mxu1 %v555_v9 }
 0x10a   :  { %1990 = vmatprep.subr.mxu1 %v2235_v47  ;;  %v2015_v10 = vpop.f32.mrf.mxu0 }
 0x10b   :  { %1991 = vmatpush3.msra.mxu1 %v1982_v6 }
 0x10c   :  { %1992 = vmatprep.subr.mxu1 %v2235_v47  ;;  %v730_v11 = vpop.f32.mrf.mxu0 }
 0x10d   :  { %1993 = vmatpush3.msra.mxu1 %v545_v7 }
 0x10e   :  { %1994 = vmatprep.subr.mxu1 %v2235_v47  ;;  %v2018_v12 = vpop.f32.mrf.mxu0 }
 0x10f   :  { %1995 = vmatpush3.msra.mxu1 %v1979_v4 }
 0x110   :  { %1996 = vmatprep.subr.mxu1 %v2235_v47  ;;  %v740_v13 = vpop.f32.mrf.mxu0 }
 0x111   :  { %1997 = vmatpush3.msra.mxu1 %v535_v5 }
 0x112   :  { %1999 = vmatmul.mubr.msk.f32.vlgmr.msra.gmra.mxu1 %vm53_vm1, %v2587_v0  ;;  %v2021_v14 = vpop.f32.mrf.mxu0  ;;  %2022 = vmatprep.subr.mxu1 %v2235_v47 }
 0x113   :  { %2023 = vmatpush3.msk.msra.mxu1 %vm72_vm0, %v2021_v14  ;;  %2034 = vmatprep.mubr.msk.f32.mxu1 %vm2236_vm2, %v2235_v47 }
 0x114   :  { %v750_v15 = vpop.f32.mrf.mxu0  ;;  %2024 = vmatprep.subr.mxu1 %v2235_v47 }
 0x115   :  { %2025 = vmatpush3.msra.mxu1 %v750_v15 }
 0x116   :  { %2026 = vmatprep.subr.mxu1 %v2235_v47  ;;  %v2051_v16 = vpop.f32.mrf.mxu0 }
 0x117   :  { %2027 = vmatpush3.msra.mxu1 %v2018_v12 }
 0x118   :  { %2028 = vmatprep.subr.mxu1 %v2235_v47  ;;  %v925_v17 = vpop.f32.mrf.mxu0 }
 0x119   :  { %2029 = vmatpush3.msra.mxu1 %v740_v13 }
 0x11a   :  { %2030 = vmatprep.subr.mxu1 %v2235_v47  ;;  %v2054_v18 = vpop.f32.mrf.mxu0 }
 0x11b   :  { %2031 = vmatpush3.msra.mxu1 %v2015_v10 }
 0x11c   :  { %2032 = vmatprep.subr.mxu1 %v2235_v47  ;;  %v935_v19 = vpop.f32.mrf.mxu0 }
 0x11d   :  { %2033 = vmatpush3.msra.mxu1 %v730_v11 }
 0x11e   :  { %2035 = vmatmul.mubr.msk.f32.vlgmr.msra.gmra.mxu1 %vm53_vm1, %v2587_v0  ;;  %v2057_v20 = vpop.f32.mrf.mxu0  ;;  %2058 = vmatprep.subr.mxu1 %v2235_v47 }
 0x11f   :  { %2059 = vmatpush3.msk.msra.mxu1 %vm72_vm0, %v2057_v20  ;;  %2070 = vmatprep.mubr.msk.f32.mxu1 %vm2236_vm2, %v2235_v47 }
 0x120   :  { %v945_v21 = vpop.f32.mrf.mxu0  ;;  %2060 = vmatprep.subr.mxu1 %v2235_v47 }
 0x121   :  { %2061 = vmatpush3.msra.mxu1 %v945_v21 }
 0x122   :  { %2062 = vmatprep.subr.mxu1 %v2235_v47  ;;  %v2087_v22 = vpop.f32.mrf.mxu0 }
 0x123   :  { %2063 = vmatpush3.msra.mxu1 %v2054_v18 }
 0x124   :  { %2064 = vmatprep.subr.mxu1 %v2235_v47  ;;  %v1120_v23 = vpop.f32.mrf.mxu0 }
 0x125   :  { %2065 = vmatpush3.msra.mxu1 %v935_v19 }
 0x126   :  { %2066 = vmatprep.subr.mxu1 %v2235_v47  ;;  %v2090_v24 = vpop.f32.mrf.mxu0 }
 0x127   :  { %2067 = vmatpush3.msra.mxu1 %v2051_v16 }
 0x128   :  { %2068 = vmatprep.subr.mxu1 %v2235_v47  ;;  %v1130_v25 = vpop.f32.mrf.mxu0 }
 0x129   :  { %2069 = vmatpush3.msra.mxu1 %v925_v17 }
 0x12a   :  { %2071 = vmatmul.mubr.msk.f32.vlgmr.msra.gmra.mxu1 %vm53_vm1, %v2587_v0  ;;  %v2093_v26 = vpop.f32.mrf.mxu0  ;;  %2094 = vmatprep.subr.mxu1 %v2235_v47 }
 0x12b   :  { %2095 = vmatpush3.msk.msra.mxu1 %vm72_vm0, %v2093_v26  ;;  %2106 = vmatprep.mubr.msk.f32.mxu1 %vm2236_vm2, %v2235_v47 }
 0x12c   :  { %v1140_v27 = vpop.f32.mrf.mxu0  ;;  %2096 = vmatprep.subr.mxu1 %v2235_v47 }
 0x12d   :  { %2097 = vmatpush3.msra.mxu1 %v1140_v27 }
 0x12e   :  { %2098 = vmatprep.subr.mxu1 %v2235_v47  ;;  %v2123_v28 = vpop.f32.mrf.mxu0 }
 0x12f   :  { %2099 = vmatpush3.msra.mxu1 %v2090_v24 }
 0x130   :  { %2100 = vmatprep.subr.mxu1 %v2235_v47  ;;  %v1315_v29 = vpop.f32.mrf.mxu0 }
 0x131   :  { %2101 = vmatpush3.msra.mxu1 %v1130_v25 }
 0x132   :  { %2102 = vmatprep.subr.mxu1 %v2235_v47  ;;  %v2126_v30 = vpop.f32.mrf.mxu0 }
 0x133   :  { %2103 = vmatpush3.msra.mxu1 %v2087_v22 }
 0x134   :  { %2104 = vmatprep.subr.mxu1 %v2235_v47  ;;  %v1325_v31 = vpop.f32.mrf.mxu0 }
 0x135   :  { %2105 = vmatpush3.msra.mxu1 %v1120_v23 }
 0x136   :  { %2107 = vmatmul.mubr.msk.f32.vlgmr.msra.gmra.mxu1 %vm53_vm1, %v2587_v0  ;;  %v2129_v32 = vpop.f32.mrf.mxu0  ;;  %2130 = vmatprep.subr.mxu1 %v2235_v47 }
 0x137   :  { %2131 = vmatpush3.msk.msra.mxu1 %vm72_vm0, %v2129_v32  ;;  %2142 = vmatprep.mubr.msk.f32.mxu1 %vm2236_vm2, %v2235_v47 }
 0x138   :  { %v1335_v33 = vpop.f32.mrf.mxu0  ;;  %2132 = vmatprep.subr.mxu1 %v2235_v47 }
 0x139   :  { %2133 = vmatpush3.msra.mxu1 %v1335_v33 }
 0x13a   :  { %2134 = vmatprep.subr.mxu1 %v2235_v47  ;;  %v2159_v34 = vpop.f32.mrf.mxu0 }
 0x13b   :  { %2135 = vmatpush3.msra.mxu1 %v2126_v30 }
 0x13c   :  { %2136 = vmatprep.subr.mxu1 %v2235_v47  ;;  %v1510_v35 = vpop.f32.mrf.mxu0 }
 0x13d   :  { %2137 = vmatpush3.msra.mxu1 %v1325_v31 }
 0x13e   :  { %2138 = vmatprep.subr.mxu1 %v2235_v47  ;;  %v2162_v36 = vpop.f32.mrf.mxu0 }
 0x13f   :  { %2139 = vmatpush3.msra.mxu1 %v2123_v28 }
 0x140   :  { %2140 = vmatprep.subr.mxu1 %v2235_v47  ;;  %v1520_v37 = vpop.f32.mrf.mxu0 }
 0x141   :  { %2141 = vmatpush3.msra.mxu1 %v1315_v29 }
 0x142   :  { %2143 = vmatmul.mubr.msk.f32.vlgmr.msra.gmra.mxu1 %vm53_vm1, %v2587_v0  ;;  %v2165_v38 = vpop.f32.mrf.mxu0  ;;  %2166 = vmatprep.subr.mxu1 %v2235_v47 }
 0x143   :  { %2167 = vmatpush3.msk.msra.mxu1 %vm72_vm0, %v2165_v38  ;;  %2178 = vmatprep.mubr.msk.f32.mxu1 %vm2236_vm2, %v2235_v47 }
 0x144   :  { %v1530_v39 = vpop.f32.mrf.mxu0  ;;  %2168 = vmatprep.subr.mxu1 %v2235_v47 }
 0x145   :  { %2169 = vmatpush3.msra.mxu1 %v1530_v39 }
 0x146   :  { %2170 = vmatprep.subr.mxu1 %v2235_v47 }
 0x147   :  { %2171 = vmatpush3.msra.mxu1 %v2162_v36 }
 0x148   :  { %2172 = vmatprep.subr.mxu1 %v2235_v47 }
 0x149   :  { %2173 = vmatpush3.msra.mxu1 %v1520_v37 }
 0x14a   :  { %2174 = vmatprep.subr.mxu1 %v2235_v47 }
 0x14b   :  { %2175 = vmatpush3.msra.mxu1 %v2159_v34 }
 0x14c   :  { %2176 = vmatprep.subr.mxu1 %v2235_v47 }
 0x14d   :  { %2177 = vmatpush3.msra.mxu1 %v1510_v35 }
 0x14e   :  { %2179 = vmatmul.mubr.msk.f32.vlgmr.msra.gmra.mxu1 %vm53_vm1, %v2587_v0 }
 0x1ba   :  { %v243_v40 = vpop.f32.mrf.mxu1 }
 0x1bb   :  { %248 = vst.msk [vmem:[%s2704_s3] sm:$0xff] %vm247_vm3, %v243_v40 }
 0x1bc   :  { %v1928_v41 = vpop.f32.mrf.mxu1 }
 0x1c6   :  { %v438_v42 = vpop.f32.mrf.mxu1 }
 0x1c7   :  { %1644 = vst.msk [vmem:[%s2704_s3 + $0x8] sm:$0xff] %vm247_vm3, %v438_v42 }
 0x1c8   :  { %v1964_v43 = vpop.f32.mrf.mxu1 }
 0x1d2   :  { %v633_v44 = vpop.f32.mrf.mxu1 }
 0x1d3   :  { %1660 = vst.msk [vmem:[%s2704_s3 + $0x10] sm:$0xff] %vm247_vm3, %v633_v44 }
 0x1d4   :  { %v2000_v45 = vpop.f32.mrf.mxu1 }
 0x1de   :  { %v828_v46 = vpop.f32.mrf.mxu1 }
 0x1df   :  { %1676 = vst.msk [vmem:[%s2704_s3 + $0x18] sm:$0xff] %vm247_vm3, %v828_v46 }
 0x1e0   :  { %v2036_v47 = vpop.f32.mrf.mxu1 }
 0x1ea   :  { %v1023_v48 = vpop.f32.mrf.mxu1 }
 0x1eb   :  { %1692 = vst.msk [vmem:[%s2704_s3 + $0x20] sm:$0xff] %vm247_vm3, %v1023_v48 }
 0x1ec   :  { %v2072_v49 = vpop.f32.mrf.mxu1 }
 0x1f6   :  { %v1218_v50 = vpop.f32.mrf.mxu1 }
 0x1f7   :  { %1708 = vst.msk [vmem:[%s2704_s3 + $0x28] sm:$0xff] %vm247_vm3, %v1218_v50 }
 0x1f8   :  { %v2108_v51 = vpop.f32.mrf.mxu1 }
 0x202   :  { %v1413_v52 = vpop.f32.mrf.mxu1 }
 0x203   :  { %1724 = vst.msk [vmem:[%s2704_s3 + $0x30] sm:$0xff] %vm247_vm3, %v1413_v52 }
 0x204   :  { %v2144_v53 = vpop.f32.mrf.mxu1 }
 0x20e   :  { %v1608_v54 = vpop.f32.mrf.mxu1 }
 0x20f   :  { %1740 = vst.msk [vmem:[%s2704_s3 + $0x38] sm:$0xff] %vm247_vm3, %v1608_v54 }
 0x210   :  { %v2180_v55 = vpop.f32.mrf.mxu1 }
 0x211   :  { %1618 = vsyncpa [#allocation3], 1 }
 0x212   :  { %1619 = vsyncpa [#allocation5], 1 }

// kernel: forward.9
= control target key start
LH: loop header
LB: loop body
LE: loop exit
PB: predicated region body
PF: predicated region fallthrough
CT: control target
= control target key end

     0   :  { %vm46_vm0 = vcmask 1043456   ;;  %vm27_vm1 = vcmask 359424   ;;  %v2155_v47 = vmov 0.0   ;;  %vm2156_vm2 = vmmov 0   ;;  %s2636_s2 = inlined_call_operand.vmem [shape: f32[44,8], index: 2, kind: input, shape index: {}]   ;;  %s2637_s0 = inlined_call_operand.vmem [shape: f32[8,44,44], index: 0, kind: input, shape index: {}]   ;;  %s2638_s1 = inlined_call_operand.vmem [shape: f32[8,44], index: 1, kind: input, shape index: {}]   ;;  %s2639_s3 = inlined_call_operand.vmem [shape: f32[8,8,8], index: 3, kind: output, shape index: {}]  }
   0x1   :  { %v2180_v0 = vld [vmem:[%s2636_s2 + $0x28] sm:$0xf]  ;;  %v2185_v1 = vld [vmem:[%s2636_s2 + $0x20] sm:$0xff]  ;;  %v2194_v2 = vld [vmem:[%s2636_s2 + $0x18] sm:$0xff]  ;;  %1886 = vmatprep.subr.mxu1 %v2155_v47  ;;  %1898 = vmatprep.mubr.msk.f32.mxu1 %vm2156_vm2, %v2155_v47  ;;  %vm221_vm3 = vcmask 64512  }
   0x2   :  { %1865 = vmatprep.subr.msk.mxu0 %vm46_vm0, %v2180_v0  ;;  %v21_v3 = vld [vmem:[%s2637_s0] sm:$0xff]  ;;  %v2205_v4 = vld [vmem:[%s2636_s2 + $0x10] sm:$0xff]  ;;  %v2212_v5 = vld [vmem:[%s2636_s2 + $0x8] sm:$0xff] }
   0x3   :  { %1866 = vmatpush3.msk.msra.mxu0 %vm46_vm0, %v2180_v0  ;;  %1877 = vmatprep.mubr.msk.f32.mxu0 %vm27_vm1, %v21_v3  ;;  %v2219_v6 = vld [vmem:[%s2636_s2] sm:$0xff]  ;;  %v22_v7 = vld [vmem:[%s2637_s0 + $0x8] sm:$0xff]  ;;  %v23_v8 = vld [vmem:[%s2637_s0 + $0x10] sm:$0xff] }
   0x4   :  { %1867 = vmatprep.subr.mxu0 %v2185_v1  ;;  %v24_v9 = vld [vmem:[%s2637_s0 + $0x18] sm:$0xff]  ;;  %v25_v10 = vld [vmem:[%s2637_s0 + $0x20] sm:$0xff]  ;;  %v26_v11 = vld [vmem:[%s2637_s0 + $0x28] sm:$0xf] }
   0x5   :  { %1868 = vmatpush3.msra.mxu0 %v2185_v1  ;;  %v1601_v12 = vld [vmem:[%s2637_s0 + $0x30] sm:$0xff]  ;;  %v1602_v13 = vld [vmem:[%s2637_s0 + $0x38] sm:$0xff]  ;;  %v1603_v14 = vld [vmem:[%s2637_s0 + $0x40] sm:$0xff] }
   0x6   :  { %1869 = vmatprep.subr.mxu0 %v2194_v2  ;;  %v1604_v15 = vld [vmem:[%s2637_s0 + $0x48] sm:$0xff]  ;;  %v1605_v16 = vld [vmem:[%s2637_s0 + $0x50] sm:$0xff]  ;;  %v1606_v17 = vld [vmem:[%s2637_s0 + $0x58] sm:$0xf] }
   0x7   :  { %1870 = vmatpush3.msra.mxu0 %v2194_v2  ;;  %v1617_v18 = vld [vmem:[%s2637_s0 + $0x60] sm:$0xff]  ;;  %v1618_v19 = vld [vmem:[%s2637_s0 + $0x68] sm:$0xff]  ;;  %v1619_v20 = vld [vmem:[%s2637_s0 + $0x70] sm:$0xff] }
   0x8   :  { %1871 = vmatprep.subr.mxu0 %v2205_v4  ;;  %v1620_v21 = vld [vmem:[%s2637_s0 + $0x78] sm:$0xff]  ;;  %v1621_v22 = vld [vmem:[%s2637_s0 + $0x80] sm:$0xff]  ;;  %v1622_v23 = vld [vmem:[%s2637_s0 + $0x88] sm:$0xf] }
   0x9   :  { %1872 = vmatpush3.msra.mxu0 %v2205_v4  ;;  %v1633_v24 = vld [vmem:[%s2637_s0 + $0x90] sm:$0xff]  ;;  %v1634_v25 = vld [vmem:[%s2637_s0 + $0x98] sm:$0xff]  ;;  %v1635_v26 = vld [vmem:[%s2637_s0 + $0xa0] sm:$0xff] }
   0xa   :  { %1873 = vmatprep.subr.mxu0 %v2212_v5  ;;  %v1636_v27 = vld [vmem:[%s2637_s0 + $0xa8] sm:$0xff]  ;;  %v1637_v28 = vld [vmem:[%s2637_s0 + $0xb0] sm:$0xff]  ;;  %v1638_v29 = vld [vmem:[%s2637_s0 + $0xb8] sm:$0xf] }
   0xb   :  { %1874 = vmatpush3.msra.mxu0 %v2212_v5  ;;  %v1649_v30 = vld [vmem:[%s2637_s0 + $0xc0] sm:$0xff]  ;;  %v1650_v31 = vld [vmem:[%s2637_s0 + $0xc8] sm:$0xff]  ;;  %v1651_v32 = vld [vmem:[%s2637_s0 + $0xd0] sm:$0xff] }
   0xc   :  { %1875 = vmatprep.subr.mxu0 %v2219_v6  ;;  %v1652_v33 = vld [vmem:[%s2637_s0 + $0xd8] sm:$0xff]  ;;  %v1653_v34 = vld [vmem:[%s2637_s0 + $0xe0] sm:$0xff]  ;;  %v1654_v35 = vld [vmem:[%s2637_s0 + $0xe8] sm:$0xf] }
   0xd   :  { %1876 = vmatpush3.msra.mxu0 %v2219_v6  ;;  %v1665_v36 = vld [vmem:[%s2637_s0 + $0xf0] sm:$0xff]  ;;  %v1666_v37 = vld [vmem:[%s2637_s0 + $0xf8] sm:$0xff]  ;;  %v1667_v38 = vld [vmem:[%s2637_s0 + $0x100] sm:$0xff] }
   0xe   :  { %1878 = vmatmul.mubr.msk.f32.vlgmr.msra.gmra.mxu0 %vm27_vm1, %v22_v7  ;;  %1901 = vmatprep.subr.msk.mxu0 %vm46_vm0, %v2180_v0  ;;  %v1668_v39 = vld [vmem:[%s2637_s0 + $0x108] sm:$0xff]  ;;  %v1669_v40 = vld [vmem:[%s2637_s0 + $0x110] sm:$0xff]  ;;  %v1670_v41 = vld [vmem:[%s2637_s0 + $0x118] sm:$0xf] }
   0xf   :  { %1902 = vmatpush3.msk.msra.mxu0 %vm46_vm0, %v2180_v0  ;;  %1880 = vmatprep.mubr.msk.f32.mxu0 %vm27_vm1, %v23_v8  ;;  %v1681_v42 = vld [vmem:[%s2637_s0 + $0x120] sm:$0xff]  ;;  %v1682_v43 = vld [vmem:[%s2637_s0 + $0x128] sm:$0xff]  ;;  %v1683_v44 = vld [vmem:[%s2637_s0 + $0x130] sm:$0xff] }
  0x10   :  { %1903 = vmatprep.subr.mxu0 %v2185_v1  ;;  %v1684_v45 = vld [vmem:[%s2637_s0 + $0x138] sm:$0xff]  ;;  %v1685_v46 = vld [vmem:[%s2637_s0 + $0x140] sm:$0xff]  ;;  %v1686_v48 = vld [vmem:[%s2637_s0 + $0x148] sm:$0xf] }
  0x11   :  { %1904 = vmatpush3.msra.mxu0 %v2185_v1  ;;  %v1697_v49 = vld [vmem:[%s2637_s0 + $0x150] sm:$0xff]  ;;  %v1698_v50 = vld [vmem:[%s2637_s0 + $0x158] sm:$0xff]  ;;  %v1699_v51 = vld [vmem:[%s2637_s0 + $0x160] sm:$0xff] }
  0x12   :  { %1881 = vmatmul.mubr.msk.f32.gmra.mxu0 %vm27_vm1, %v24_v9  ;;  %1905 = vmatprep.subr.mxu0 %v2194_v2  ;;  %v1700_v52 = vld [vmem:[%s2637_s0 + $0x168] sm:$0xff]  ;;  %v1701_v53 = vld [vmem:[%s2637_s0 + $0x170] sm:$0xff]  ;;  %v1702_v54 = vld [vmem:[%s2637_s0 + $0x178] sm:$0xf] }
  0x13   :  { %1906 = vmatpush3.msra.mxu0 %v2194_v2  ;;  %1883 = vmatprep.mubr.msk.f32.mxu0 %vm27_vm1, %v25_v10 }
  0x14   :  { %1907 = vmatprep.subr.mxu0 %v2205_v4 }
  0x15   :  { %1908 = vmatpush3.msra.mxu0 %v2205_v4 }
  0x16   :  { %1884 = vmatmul.mubr.msk.f32.gmra.mxu0 %vm27_vm1, %v26_v11  ;;  %1909 = vmatprep.subr.mxu0 %v2212_v5 }
  0x17   :  { %1910 = vmatpush3.msra.mxu0 %v2212_v5  ;;  %1913 = vmatprep.mubr.msk.f32.mxu0 %vm27_vm1, %v1601_v12 }
  0x18   :  { %1911 = vmatprep.subr.mxu0 %v2219_v6 }
  0x19   :  { %1912 = vmatpush3.msra.mxu0 %v2219_v6 }
  0x1a   :  { %1914 = vmatmul.mubr.msk.f32.vlgmr.msra.gmra.mxu0 %vm27_vm1, %v1602_v13  ;;  %1937 = vmatprep.subr.msk.mxu0 %vm46_vm0, %v2180_v0 }
  0x1b   :  { %1938 = vmatpush3.msk.msra.mxu0 %vm46_vm0, %v2180_v0  ;;  %1916 = vmatprep.mubr.msk.f32.mxu0 %vm27_vm1, %v1603_v14 }
  0x1c   :  { %1939 = vmatprep.subr.mxu0 %v2185_v1 }
  0x1d   :  { %1940 = vmatpush3.msra.mxu0 %v2185_v1 }
  0x1e   :  { %1917 = vmatmul.mubr.msk.f32.gmra.mxu0 %vm27_vm1, %v1604_v15  ;;  %1941 = vmatprep.subr.mxu0 %v2194_v2 }
  0x1f   :  { %1942 = vmatpush3.msra.mxu0 %v2194_v2  ;;  %1919 = vmatprep.mubr.msk.f32.mxu0 %vm27_vm1, %v1605_v16 }
  0x20   :  { %1943 = vmatprep.subr.mxu0 %v2205_v4 }
  0x21   :  { %1944 = vmatpush3.msra.mxu0 %v2205_v4 }
  0x22   :  { %1920 = vmatmul.mubr.msk.f32.gmra.mxu0 %vm27_vm1, %v1606_v17  ;;  %1945 = vmatprep.subr.mxu0 %v2212_v5 }
  0x23   :  { %1946 = vmatpush3.msra.mxu0 %v2212_v5  ;;  %1949 = vmatprep.mubr.msk.f32.mxu0 %vm27_vm1, %v1617_v18 }
  0x24   :  { %1947 = vmatprep.subr.mxu0 %v2219_v6 }
  0x25   :  { %1948 = vmatpush3.msra.mxu0 %v2219_v6 }
  0x26   :  { %1950 = vmatmul.mubr.msk.f32.vlgmr.msra.gmra.mxu0 %vm27_vm1, %v1618_v19  ;;  %1973 = vmatprep.subr.msk.mxu0 %vm46_vm0, %v2180_v0 }
  0x27   :  { %1974 = vmatpush3.msk.msra.mxu0 %vm46_vm0, %v2180_v0  ;;  %1952 = vmatprep.mubr.msk.f32.mxu0 %vm27_vm1, %v1619_v20 }
  0x28   :  { %1975 = vmatprep.subr.mxu0 %v2185_v1 }
  0x29   :  { %1976 = vmatpush3.msra.mxu0 %v2185_v1 }
  0x2a   :  { %1953 = vmatmul.mubr.msk.f32.gmra.mxu0 %vm27_vm1, %v1620_v21  ;;  %1977 = vmatprep.subr.mxu0 %v2194_v2 }
  0x2b   :  { %1978 = vmatpush3.msra.mxu0 %v2194_v2  ;;  %1955 = vmatprep.mubr.msk.f32.mxu0 %vm27_vm1, %v1621_v22 }
  0x2c   :  { %1979 = vmatprep.subr.mxu0 %v2205_v4 }
  0x2d   :  { %1980 = vmatpush3.msra.mxu0 %v2205_v4 }
  0x2e   :  { %1956 = vmatmul.mubr.msk.f32.gmra.mxu0 %vm27_vm1, %v1622_v23  ;;  %1981 = vmatprep.subr.mxu0 %v2212_v5 }
  0x2f   :  { %1982 = vmatpush3.msra.mxu0 %v2212_v5  ;;  %1985 = vmatprep.mubr.msk.f32.mxu0 %vm27_vm1, %v1633_v24 }
  0x30   :  { %1983 = vmatprep.subr.mxu0 %v2219_v6 }
  0x31   :  { %1984 = vmatpush3.msra.mxu0 %v2219_v6 }
  0x32   :  { %1986 = vmatmul.mubr.msk.f32.vlgmr.msra.gmra.mxu0 %vm27_vm1, %v1634_v25  ;;  %2009 = vmatprep.subr.msk.mxu0 %vm46_vm0, %v2180_v0 }
  0x33   :  { %2010 = vmatpush3.msk.msra.mxu0 %vm46_vm0, %v2180_v0  ;;  %1988 = vmatprep.mubr.msk.f32.mxu0 %vm27_vm1, %v1635_v26 }
  0x34   :  { %2011 = vmatprep.subr.mxu0 %v2185_v1 }
  0x35   :  { %2012 = vmatpush3.msra.mxu0 %v2185_v1 }
  0x36   :  { %1989 = vmatmul.mubr.msk.f32.gmra.mxu0 %vm27_vm1, %v1636_v27  ;;  %2013 = vmatprep.subr.mxu0 %v2194_v2 }
  0x37   :  { %2014 = vmatpush3.msra.mxu0 %v2194_v2  ;;  %1991 = vmatprep.mubr.msk.f32.mxu0 %vm27_vm1, %v1637_v28 }
  0x38   :  { %2015 = vmatprep.subr.mxu0 %v2205_v4 }
  0x39   :  { %2016 = vmatpush3.msra.mxu0 %v2205_v4 }
  0x3a   :  { %1992 = vmatmul.mubr.msk.f32.gmra.mxu0 %vm27_vm1, %v1638_v29  ;;  %2017 = vmatprep.subr.mxu0 %v2212_v5 }
  0x3b   :  { %2018 = vmatpush3.msra.mxu0 %v2212_v5  ;;  %2021 = vmatprep.mubr.msk.f32.mxu0 %vm27_vm1, %v1649_v30 }
  0x3c   :  { %2019 = vmatprep.subr.mxu0 %v2219_v6 }
  0x3d   :  { %2020 = vmatpush3.msra.mxu0 %v2219_v6 }
  0x3e   :  { %2022 = vmatmul.mubr.msk.f32.vlgmr.msra.gmra.mxu0 %vm27_vm1, %v1650_v31  ;;  %2045 = vmatprep.subr.msk.mxu0 %vm46_vm0, %v2180_v0 }
  0x3f   :  { %2046 = vmatpush3.msk.msra.mxu0 %vm46_vm0, %v2180_v0  ;;  %2024 = vmatprep.mubr.msk.f32.mxu0 %vm27_vm1, %v1651_v32 }
  0x40   :  { %2047 = vmatprep.subr.mxu0 %v2185_v1 }
  0x41   :  { %2048 = vmatpush3.msra.mxu0 %v2185_v1 }
  0x42   :  { %2025 = vmatmul.mubr.msk.f32.gmra.mxu0 %vm27_vm1, %v1652_v33  ;;  %2049 = vmatprep.subr.mxu0 %v2194_v2 }
  0x43   :  { %2050 = vmatpush3.msra.mxu0 %v2194_v2  ;;  %2027 = vmatprep.mubr.msk.f32.mxu0 %vm27_vm1, %v1653_v34 }
  0x44   :  { %2051 = vmatprep.subr.mxu0 %v2205_v4 }
  0x45   :  { %2052 = vmatpush3.msra.mxu0 %v2205_v4 }
  0x46   :  { %2028 = vmatmul.mubr.msk.f32.gmra.mxu0 %vm27_vm1, %v1654_v35  ;;  %2053 = vmatprep.subr.mxu0 %v2212_v5 }
  0x47   :  { %2054 = vmatpush3.msra.mxu0 %v2212_v5  ;;  %2057 = vmatprep.mubr.msk.f32.mxu0 %vm27_vm1, %v1665_v36 }
  0x48   :  { %2055 = vmatprep.subr.mxu0 %v2219_v6 }
  0x49   :  { %2056 = vmatpush3.msra.mxu0 %v2219_v6 }
  0x4a   :  { %2058 = vmatmul.mubr.msk.f32.vlgmr.msra.gmra.mxu0 %vm27_vm1, %v1666_v37  ;;  %2081 = vmatprep.subr.msk.mxu0 %vm46_vm0, %v2180_v0 }
  0x4b   :  { %2082 = vmatpush3.msk.msra.mxu0 %vm46_vm0, %v2180_v0  ;;  %2060 = vmatprep.mubr.msk.f32.mxu0 %vm27_vm1, %v1667_v38 }
  0x4c   :  { %2083 = vmatprep.subr.mxu0 %v2185_v1 }
  0x4d   :  { %2084 = vmatpush3.msra.mxu0 %v2185_v1 }
  0x4e   :  { %2061 = vmatmul.mubr.msk.f32.gmra.mxu0 %vm27_vm1, %v1668_v39  ;;  %2085 = vmatprep.subr.mxu0 %v2194_v2 }
  0x4f   :  { %2086 = vmatpush3.msra.mxu0 %v2194_v2  ;;  %2063 = vmatprep.mubr.msk.f32.mxu0 %vm27_vm1, %v1669_v40 }
  0x50   :  { %2087 = vmatprep.subr.mxu0 %v2205_v4 }
  0x51   :  { %2088 = vmatpush3.msra.mxu0 %v2205_v4 }
  0x52   :  { %2064 = vmatmul.mubr.msk.f32.gmra.mxu0 %vm27_vm1, %v1670_v41  ;;  %2089 = vmatprep.subr.mxu0 %v2212_v5 }
  0x53   :  { %2090 = vmatpush3.msra.mxu0 %v2212_v5  ;;  %2093 = vmatprep.mubr.msk.f32.mxu0 %vm27_vm1, %v1681_v42 }
  0x54   :  { %2091 = vmatprep.subr.mxu0 %v2219_v6 }
  0x55   :  { %2092 = vmatpush3.msra.mxu0 %v2219_v6 }
  0x56   :  { %2094 = vmatmul.mubr.msk.f32.vlgmr.msra.gmra.mxu0 %vm27_vm1, %v1682_v43  ;;  %2117 = vmatprep.subr.msk.mxu0 %vm46_vm0, %v2180_v0 }
  0x57   :  { %2118 = vmatpush3.msk.msra.mxu0 %vm46_vm0, %v2180_v0  ;;  %2096 = vmatprep.mubr.msk.f32.mxu0 %vm27_vm1, %v1683_v44  ;;  %v2522_v0 = vld [vmem:[%s2638_s1] sm:$0xff] }
  0x58   :  { %2119 = vmatprep.subr.mxu0 %v2185_v1 }
  0x59   :  { %2120 = vmatpush3.msra.mxu0 %v2185_v1 }
  0x5a   :  { %2097 = vmatmul.mubr.msk.f32.gmra.mxu0 %vm27_vm1, %v1684_v45  ;;  %2121 = vmatprep.subr.mxu0 %v2194_v2 }
  0x5b   :  { %2122 = vmatpush3.msra.mxu0 %v2194_v2  ;;  %2099 = vmatprep.mubr.msk.f32.mxu0 %vm27_vm1, %v1685_v46 }
  0x5c   :  { %2123 = vmatprep.subr.mxu0 %v2205_v4 }
  0x5d   :  { %2124 = vmatpush3.msra.mxu0 %v2205_v4 }
  0x5e   :  { %2100 = vmatmul.mubr.msk.f32.gmra.mxu0 %vm27_vm1, %v1686_v48  ;;  %2125 = vmatprep.subr.mxu0 %v2212_v5 }
  0x5f   :  { %2126 = vmatpush3.msra.mxu0 %v2212_v5  ;;  %2129 = vmatprep.mubr.msk.f32.mxu0 %vm27_vm1, %v1697_v49 }
  0x60   :  { %2127 = vmatprep.subr.mxu0 %v2219_v6 }
  0x61   :  { %2128 = vmatpush3.msra.mxu0 %v2219_v6 }
  0x62   :  { %2130 = vmatmul.mubr.msk.f32.vlgmr.msra.gmra.mxu0 %vm27_vm1, %v1698_v50 }
  0x63   :  { %2132 = vmatprep.mubr.msk.f32.mxu0 %vm27_vm1, %v1699_v51 }
  0x66   :  { %2133 = vmatmul.mubr.msk.f32.gmra.mxu0 %vm27_vm1, %v1700_v52 }
  0x67   :  { %2135 = vmatprep.mubr.msk.f32.mxu0 %vm27_vm1, %v1701_v53 }
  0x6a   :  { %2136 = vmatmul.mubr.msk.f32.gmra.mxu0 %vm27_vm1, %v1702_v54 }
  0xce   :  { %v1879_v55 = vpop.f32.mrf.mxu0 }
  0xd0   :  { %v116_v56 = vpop.f32.mrf.mxu0 }
  0xd2   :  { %v1882_v57 = vpop.f32.mrf.mxu0 }
  0xd4   :  { %v126_v58 = vpop.f32.mrf.mxu0 }
  0xd6   :  { %v1885_v59 = vpop.f32.mrf.mxu0 }
  0xd7   :  { %1887 = vmatpush3.msk.msra.mxu1 %vm46_vm0, %v1885_v59 }
  0xd8   :  { %v136_v60 = vpop.f32.mrf.mxu0  ;;  %1888 = vmatprep.subr.mxu1 %v2155_v47 }
  0xd9   :  { %1889 = vmatpush3.msra.mxu1 %v136_v60 }
  0xda   :  { %1890 = vmatprep.subr.mxu1 %v2155_v47  ;;  %v1915_v61 = vpop.f32.mrf.mxu0 }
  0xdb   :  { %1891 = vmatpush3.msra.mxu1 %v1882_v57 }
  0xdc   :  { %1892 = vmatprep.subr.mxu1 %v2155_v47  ;;  %v314_v62 = vpop.f32.mrf.mxu0 }
  0xdd   :  { %1893 = vmatpush3.msra.mxu1 %v126_v58 }
  0xde   :  { %1894 = vmatprep.subr.mxu1 %v2155_v47  ;;  %v1918_v63 = vpop.f32.mrf.mxu0 }
  0xdf   :  { %1895 = vmatpush3.msra.mxu1 %v1879_v55 }
  0xe0   :  { %1896 = vmatprep.subr.mxu1 %v2155_v47  ;;  %v324_v1 = vpop.f32.mrf.mxu0 }
  0xe1   :  { %1897 = vmatpush3.msra.mxu1 %v116_v56 }
  0xe2   :  { %1899 = vmatmul.mubr.msk.f32.vlgmr.msra.gmra.mxu1 %vm27_vm1, %v2522_v0  ;;  %v1921_v2 = vpop.f32.mrf.mxu0  ;;  %1922 = vmatprep.subr.mxu1 %v2155_v47 }
  0xe3   :  { %1923 = vmatpush3.msk.msra.mxu1 %vm46_vm0, %v1921_v2  ;;  %1934 = vmatprep.mubr.msk.f32.mxu1 %vm2156_vm2, %v2155_v47 }
  0xe4   :  { %v334_v3 = vpop.f32.mrf.mxu0  ;;  %1924 = vmatprep.subr.mxu1 %v2155_v47 }
  0xe5   :  { %1925 = vmatpush3.msra.mxu1 %v334_v3 }
  0xe6   :  { %1926 = vmatprep.subr.mxu1 %v2155_v47  ;;  %v1951_v4 = vpop.f32.mrf.mxu0 }
  0xe7   :  { %1927 = vmatpush3.msra.mxu1 %v1918_v63 }
  0xe8   :  { %1928 = vmatprep.subr.mxu1 %v2155_v47  ;;  %v509_v5 = vpop.f32.mrf.mxu0 }
  0xe9   :  { %1929 = vmatpush3.msra.mxu1 %v324_v1 }
  0xea   :  { %1930 = vmatprep.subr.mxu1 %v2155_v47  ;;  %v1954_v6 = vpop.f32.mrf.mxu0 }
  0xeb   :  { %1931 = vmatpush3.msra.mxu1 %v1915_v61 }
  0xec   :  { %1932 = vmatprep.subr.mxu1 %v2155_v47  ;;  %v519_v7 = vpop.f32.mrf.mxu0 }
  0xed   :  { %1933 = vmatpush3.msra.mxu1 %v314_v62 }
  0xee   :  { %1935 = vmatmul.mubr.msk.f32.vlgmr.msra.gmra.mxu1 %vm27_vm1, %v2522_v0  ;;  %v1957_v8 = vpop.f32.mrf.mxu0  ;;  %1958 = vmatprep.subr.mxu1 %v2155_v47 }
  0xef   :  { %1959 = vmatpush3.msk.msra.mxu1 %vm46_vm0, %v1957_v8  ;;  %1970 = vmatprep.mubr.msk.f32.mxu1 %vm2156_vm2, %v2155_v47 }
  0xf0   :  { %v529_v9 = vpop.f32.mrf.mxu0  ;;  %1960 = vmatprep.subr.mxu1 %v2155_v47 }
  0xf1   :  { %1961 = vmatpush3.msra.mxu1 %v529_v9 }
  0xf2   :  { %1962 = vmatprep.subr.mxu1 %v2155_v47  ;;  %v1987_v10 = vpop.f32.mrf.mxu0 }
  0xf3   :  { %1963 = vmatpush3.msra.mxu1 %v1954_v6 }
  0xf4   :  { %1964 = vmatprep.subr.mxu1 %v2155_v47  ;;  %v704_v11 = vpop.f32.mrf.mxu0 }
  0xf5   :  { %1965 = vmatpush3.msra.mxu1 %v519_v7 }
  0xf6   :  { %1966 = vmatprep.subr.mxu1 %v2155_v47  ;;  %v1990_v12 = vpop.f32.mrf.mxu0 }
  0xf7   :  { %1967 = vmatpush3.msra.mxu1 %v1951_v4 }
  0xf8   :  { %1968 = vmatprep.subr.mxu1 %v2155_v47  ;;  %v714_v13 = vpop.f32.mrf.mxu0 }
  0xf9   :  { %1969 = vmatpush3.msra.mxu1 %v509_v5 }
  0xfa   :  { %1971 = vmatmul.mubr.msk.f32.vlgmr.msra.gmra.mxu1 %vm27_vm1, %v2522_v0  ;;  %v1993_v14 = vpop.f32.mrf.mxu0  ;;  %1994 = vmatprep.subr.mxu1 %v2155_v47 }
  0xfb   :  { %1995 = vmatpush3.msk.msra.mxu1 %vm46_vm0, %v1993_v14  ;;  %2006 = vmatprep.mubr.msk.f32.mxu1 %vm2156_vm2, %v2155_v47 }
  0xfc   :  { %v724_v15 = vpop.f32.mrf.mxu0  ;;  %1996 = vmatprep.subr.mxu1 %v2155_v47 }
  0xfd   :  { %1997 = vmatpush3.msra.mxu1 %v724_v15 }
  0xfe   :  { %1998 = vmatprep.subr.mxu1 %v2155_v47  ;;  %v2023_v16 = vpop.f32.mrf.mxu0 }
  0xff   :  { %1999 = vmatpush3.msra.mxu1 %v1990_v12 }
 0x100   :  { %2000 = vmatprep.subr.mxu1 %v2155_v47  ;;  %v899_v17 = vpop.f32.mrf.mxu0 }
 0x101   :  { %2001 = vmatpush3.msra.mxu1 %v714_v13 }
 0x102   :  { %2002 = vmatprep.subr.mxu1 %v2155_v47  ;;  %v2026_v18 = vpop.f32.mrf.mxu0 }
 0x103   :  { %2003 = vmatpush3.msra.mxu1 %v1987_v10 }
 0x104   :  { %2004 = vmatprep.subr.mxu1 %v2155_v47  ;;  %v909_v19 = vpop.f32.mrf.mxu0 }
 0x105   :  { %2005 = vmatpush3.msra.mxu1 %v704_v11 }
 0x106   :  { %2007 = vmatmul.mubr.msk.f32.vlgmr.msra.gmra.mxu1 %vm27_vm1, %v2522_v0  ;;  %v2029_v20 = vpop.f32.mrf.mxu0  ;;  %2030 = vmatprep.subr.mxu1 %v2155_v47 }
 0x107   :  { %2031 = vmatpush3.msk.msra.mxu1 %vm46_vm0, %v2029_v20  ;;  %2042 = vmatprep.mubr.msk.f32.mxu1 %vm2156_vm2, %v2155_v47 }
 0x108   :  { %v919_v21 = vpop.f32.mrf.mxu0  ;;  %2032 = vmatprep.subr.mxu1 %v2155_v47 }
 0x109   :  { %2033 = vmatpush3.msra.mxu1 %v919_v21 }
 0x10a   :  { %2034 = vmatprep.subr.mxu1 %v2155_v47  ;;  %v2059_v22 = vpop.f32.mrf.mxu0 }
 0x10b   :  { %2035 = vmatpush3.msra.mxu1 %v2026_v18 }
 0x10c   :  { %2036 = vmatprep.subr.mxu1 %v2155_v47  ;;  %v1094_v23 = vpop.f32.mrf.mxu0 }
 0x10d   :  { %2037 = vmatpush3.msra.mxu1 %v909_v19 }
 0x10e   :  { %2038 = vmatprep.subr.mxu1 %v2155_v47  ;;  %v2062_v24 = vpop.f32.mrf.mxu0 }
 0x10f   :  { %2039 = vmatpush3.msra.mxu1 %v2023_v16 }
 0x110   :  { %2040 = vmatprep.subr.mxu1 %v2155_v47  ;;  %v1104_v25 = vpop.f32.mrf.mxu0 }
 0x111   :  { %2041 = vmatpush3.msra.mxu1 %v899_v17 }
 0x112   :  { %2043 = vmatmul.mubr.msk.f32.vlgmr.msra.gmra.mxu1 %vm27_vm1, %v2522_v0  ;;  %v2065_v26 = vpop.f32.mrf.mxu0  ;;  %2066 = vmatprep.subr.mxu1 %v2155_v47 }
 0x113   :  { %2067 = vmatpush3.msk.msra.mxu1 %vm46_vm0, %v2065_v26  ;;  %2078 = vmatprep.mubr.msk.f32.mxu1 %vm2156_vm2, %v2155_v47 }
 0x114   :  { %v1114_v27 = vpop.f32.mrf.mxu0  ;;  %2068 = vmatprep.subr.mxu1 %v2155_v47 }
 0x115   :  { %2069 = vmatpush3.msra.mxu1 %v1114_v27 }
 0x116   :  { %2070 = vmatprep.subr.mxu1 %v2155_v47  ;;  %v2095_v28 = vpop.f32.mrf.mxu0 }
 0x117   :  { %2071 = vmatpush3.msra.mxu1 %v2062_v24 }
 0x118   :  { %2072 = vmatprep.subr.mxu1 %v2155_v47  ;;  %v1289_v29 = vpop.f32.mrf.mxu0 }
 0x119   :  { %2073 = vmatpush3.msra.mxu1 %v1104_v25 }
 0x11a   :  { %2074 = vmatprep.subr.mxu1 %v2155_v47  ;;  %v2098_v30 = vpop.f32.mrf.mxu0 }
 0x11b   :  { %2075 = vmatpush3.msra.mxu1 %v2059_v22 }
 0x11c   :  { %2076 = vmatprep.subr.mxu1 %v2155_v47  ;;  %v1299_v31 = vpop.f32.mrf.mxu0 }
 0x11d   :  { %2077 = vmatpush3.msra.mxu1 %v1094_v23 }
 0x11e   :  { %2079 = vmatmul.mubr.msk.f32.vlgmr.msra.gmra.mxu1 %vm27_vm1, %v2522_v0  ;;  %v2101_v32 = vpop.f32.mrf.mxu0  ;;  %2102 = vmatprep.subr.mxu1 %v2155_v47 }
 0x11f   :  { %2103 = vmatpush3.msk.msra.mxu1 %vm46_vm0, %v2101_v32  ;;  %2114 = vmatprep.mubr.msk.f32.mxu1 %vm2156_vm2, %v2155_v47 }
 0x120   :  { %v1309_v33 = vpop.f32.mrf.mxu0  ;;  %2104 = vmatprep.subr.mxu1 %v2155_v47 }
 0x121   :  { %2105 = vmatpush3.msra.mxu1 %v1309_v33 }
 0x122   :  { %2106 = vmatprep.subr.mxu1 %v2155_v47  ;;  %v2131_v34 = vpop.f32.mrf.mxu0 }
 0x123   :  { %2107 = vmatpush3.msra.mxu1 %v2098_v30 }
 0x124   :  { %2108 = vmatprep.subr.mxu1 %v2155_v47  ;;  %v1484_v35 = vpop.f32.mrf.mxu0 }
 0x125   :  { %2109 = vmatpush3.msra.mxu1 %v1299_v31 }
 0x126   :  { %2110 = vmatprep.subr.mxu1 %v2155_v47  ;;  %v2134_v36 = vpop.f32.mrf.mxu0 }
 0x127   :  { %2111 = vmatpush3.msra.mxu1 %v2095_v28 }
 0x128   :  { %2112 = vmatprep.subr.mxu1 %v2155_v47  ;;  %v1494_v37 = vpop.f32.mrf.mxu0 }
 0x129   :  { %2113 = vmatpush3.msra.mxu1 %v1289_v29 }
 0x12a   :  { %2115 = vmatmul.mubr.msk.f32.vlgmr.msra.gmra.mxu1 %vm27_vm1, %v2522_v0  ;;  %v2137_v38 = vpop.f32.mrf.mxu0  ;;  %2138 = vmatprep.subr.mxu1 %v2155_v47 }
 0x12b   :  { %2139 = vmatpush3.msk.msra.mxu1 %vm46_vm0, %v2137_v38  ;;  %2150 = vmatprep.mubr.msk.f32.mxu1 %vm2156_vm2, %v2155_v47 }
 0x12c   :  { %v1504_v39 = vpop.f32.mrf.mxu0  ;;  %2140 = vmatprep.subr.mxu1 %v2155_v47 }
 0x12d   :  { %2141 = vmatpush3.msra.mxu1 %v1504_v39 }
 0x12e   :  { %2142 = vmatprep.subr.mxu1 %v2155_v47 }
 0x12f   :  { %2143 = vmatpush3.msra.mxu1 %v2134_v36 }
 0x130   :  { %2144 = vmatprep.subr.mxu1 %v2155_v47 }
 0x131   :  { %2145 = vmatpush3.msra.mxu1 %v1494_v37 }
 0x132   :  { %2146 = vmatprep.subr.mxu1 %v2155_v47 }
 0x133   :  { %2147 = vmatpush3.msra.mxu1 %v2131_v34 }
 0x134   :  { %2148 = vmatprep.subr.mxu1 %v2155_v47 }
 0x135   :  { %2149 = vmatpush3.msra.mxu1 %v1484_v35 }
 0x136   :  { %2151 = vmatmul.mubr.msk.f32.vlgmr.msra.gmra.mxu1 %vm27_vm1, %v2522_v0 }
 0x1a2   :  { %v217_v40 = vpop.f32.mrf.mxu1 }
 0x1a3   :  { %222 = vst.msk [vmem:[%s2639_s3] sm:$0xff] %vm221_vm3, %v217_v40 }
 0x1a4   :  { %v1900_v41 = vpop.f32.mrf.mxu1 }
 0x1ae   :  { %v412_v42 = vpop.f32.mrf.mxu1 }
 0x1af   :  { %1616 = vst.msk [vmem:[%s2639_s3 + $0x8] sm:$0xff] %vm221_vm3, %v412_v42 }
 0x1b0   :  { %v1936_v43 = vpop.f32.mrf.mxu1 }
 0x1ba   :  { %v607_v44 = vpop.f32.mrf.mxu1 }
 0x1bb   :  { %1632 = vst.msk [vmem:[%s2639_s3 + $0x10] sm:$0xff] %vm221_vm3, %v607_v44 }
 0x1bc   :  { %v1972_v45 = vpop.f32.mrf.mxu1 }
 0x1c6   :  { %v802_v46 = vpop.f32.mrf.mxu1 }
 0x1c7   :  { %1648 = vst.msk [vmem:[%s2639_s3 + $0x18] sm:$0xff] %vm221_vm3, %v802_v46 }
 0x1c8   :  { %v2008_v47 = vpop.f32.mrf.mxu1 }
 0x1d2   :  { %v997_v48 = vpop.f32.mrf.mxu1 }
 0x1d3   :  { %1664 = vst.msk [vmem:[%s2639_s3 + $0x20] sm:$0xff] %vm221_vm3, %v997_v48 }
 0x1d4   :  { %v2044_v49 = vpop.f32.mrf.mxu1 }
 0x1de   :  { %v1192_v50 = vpop.f32.mrf.mxu1 }
 0x1df   :  { %1680 = vst.msk [vmem:[%s2639_s3 + $0x28] sm:$0xff] %vm221_vm3, %v1192_v50 }
 0x1e0   :  { %v2080_v51 = vpop.f32.mrf.mxu1 }
 0x1ea   :  { %v1387_v52 = vpop.f32.mrf.mxu1 }
 0x1eb   :  { %1696 = vst.msk [vmem:[%s2639_s3 + $0x30] sm:$0xff] %vm221_vm3, %v1387_v52 }
 0x1ec   :  { %v2116_v53 = vpop.f32.mrf.mxu1 }
 0x1f6   :  { %v1582_v54 = vpop.f32.mrf.mxu1 }
 0x1f7   :  { %1712 = vst.msk [vmem:[%s2639_s3 + $0x38] sm:$0xff] %vm221_vm3, %v1582_v54 }
 0x1f8   :  { %v2152_v55 = vpop.f32.mrf.mxu1 }

// kernel: forward.10
= control target key start
LH: loop header
LB: loop body
LE: loop exit
PB: predicated region body
PF: predicated region fallthrough
CT: control target
= control target key end

     0   :  { %s1888_s15 = smov 0   ;;  %s1890_s16 = smov 0   ;;  %s2363_s0 = inlined_call_operand.vmem [shape: bf16[1,10,10,10,6], index: 0, kind: input, shape index: {}]   ;;  %s2364_s1 = inlined_call_operand.vmem [shape: bf16[3,3,3,6,8], index: 1, kind: input, shape index: {}]   ;;  %s2365_s2 = inlined_call_operand.vmem [shape: f32[1,8], index: 2, kind: input, shape index: {}]   ;;  %s2366_s3 = inlined_call_operand.vmem [shape: f32[1,8], index: 3, kind: input, shape index: {}]   ;;  %s2367_s4 = inlined_call_operand.vmem [shape: f32[1,8,8,8,8], index: 4, kind: output, shape index: {}]  }
   0x1   :  { %s1892_s17 = smov 0   ;;  %s1894_s18 = smov 0  }
   0x2   :  { %s1896_s19 = smov 0  }
   0x3 LB: > { %s26_s20 = sadd.s32 1, %s1852_s17  ;;  %s29_s21 = sadd.s32 1, %s1856_s18  ;;  %s1860_s19 = sphi %s1896_s19, %s14_s19   ;;  %s1856_s18 = sphi %s1894_s18, %s2375_s18   ;;  %s1852_s17 = sphi %s1892_s17, %s2374_s17   ;;  %s1848_s16 = sphi %s1890_s16, %s2373_s16   ;;  %s1844_s15 = sphi %s1888_s15, %s2372_s15  }
   0x4   : > { %p27_p0 = scmp.ge.s32.totalorder %s26_s20, 3  ;;  %p1530_p1 = scmp.ge.s32.totalorder %s1860_s19, 1 }
   0x5   : > { %p203_p2 = scmp.lt.s32.totalorder %s1860_s19, 25 }
   0x6   : > { %s2377_s20 = smov (%p27_p0, %s26_s20), 0  ;;  %s2379_s21 = smov (!%p27_p0, %s29_s21), %s1856_s18 }
   0x7   : > { %p204_p3 = pnand %p1530_p1, %p203_p2  ;;  %p31_p4 = scmp.ge.s32.totalorder %s2379_s21, 8 }
   0x8   : > { %s243_s22 = sadd.s32 (!%p204_p3), %s1844_s15, %s1848_s16  ;;  %p254_p5 = scmp.lt.s32.totalorder (!%p204_p3), %s1844_s15, 2 }
   0x9   : > { %s2381_s21 = smov (%p31_p4, %s2379_s21), 0  ;;  %207 = sbr.rel (%p204_p3) target bundleno = 341 (0x155), region = 36 }
   0xa   : > { %p246_p6 = scmp.lt.s32.totalorder (!%p204_p3), %s243_s22, 9  ;;  %p261_p7 = scmp.lt.s32.totalorder (!%p204_p3), %s1848_s16, 7 }
   0xb   : > { %p1535_p8 = scmp.ne.s32.totalorder (!%p204_p3), %s1844_s15, 0 }
   0xe   : > { %s255_s23 = scalar_select %p254_p5, %s1844_s15, 2 }
   0xf   : > { %s2383_s22 = smov (!%p246_p6, %s243_s22), 9  ;;  %s2385_s16 = smov (!%p261_p7, %s1848_s16), 7 }
  0x10   : > { %s1771_s24 = smul.u32 36, %s255_s23  ;;  %s1622_s6 = sshll.u32 %s2385_s16, 6 }
  0x11   : > { %s1770_s25 = smul.u32 80, %s2383_s22  ;;  %s1936_s9 = scalar_lea.vmem %s2367_s4, %s1622_s6 }
  0x12   : > { %s1926_s28 = scalar_lea.vmem %s2364_s1, %s1771_s24  ;;  %272 = sbr.rel (%p1535_p8) target bundleno = 28 (0x1c), region = 40 }
  0x13   : > { %s1931_s5 = scalar_lea.vmem %s2363_s0, %s1770_s25 }
  0x17   : > { %vm273_vm0 = vcmask 64512   ;;  %v1862_v0 = vmov 0.0  }
  0x18   : > { %274 = vst.msk [vmem:[%s1936_s9] sm:$0xff] %vm273_vm0, %v1862_v0  ;;  %275 = vst.msk [vmem:[%s1936_s9 + $0x8] sm:$0xff] %vm273_vm0, %v1862_v0 }
  0x19   : > { %276 = vst.msk [vmem:[%s1936_s9 + $0x10] sm:$0xff] %vm273_vm0, %v1862_v0  ;;  %277 = vst.msk [vmem:[%s1936_s9 + $0x18] sm:$0xff] %vm273_vm0, %v1862_v0 }
  0x1a   : > { %278 = vst.msk [vmem:[%s1936_s9 + $0x20] sm:$0xff] %vm273_vm0, %v1862_v0  ;;  %279 = vst.msk [vmem:[%s1936_s9 + $0x28] sm:$0xff] %vm273_vm0, %v1862_v0 }
  0x1b   : > { %280 = vst.msk [vmem:[%s1936_s9 + $0x30] sm:$0xff] %vm273_vm0, %v1862_v0  ;;  %281 = vst.msk [vmem:[%s1936_s9 + $0x38] sm:$0xff] %vm273_vm0, %v1862_v0 }
  0x1c PF: > { %v1536_v1 = vld [vmem:[%s1926_s28 + $0x4] sm:$0x7]  ;;  %vm445_vm1 = vcmask 1042432   ;;  %v1949_v2 = vld [vmem:[%s1931_s5] sm:$0xf]  ;;  %vm432_vm5 = vcmask 48128  }
  0x1d   : > { %1761 = vmatprep.subr.msk.bf16.mxu1 %vm445_vm1, %v1536_v1  ;;  %1760 = vmatprep.subr.msk.bf16.mxu0 %vm445_vm1, %v1536_v1  ;;  %v447_v3 = vsel %vm445_vm1, %v1536_v1, 0  ;;  %v1955_v4 = vld [vmem:[%s1931_s5 + $0x4] sm:$0x1]  ;;  %v1958_v5 = vld [vmem:[%s1931_s5 + $0x8] sm:$0xf]  ;;  %v307_v6 = vshrl.u32 %v1949_v2, 16 }
  0x1e   : > { %1759 = vmatpush3.bf16.msra.mxu1 %v447_v3  ;;  %1669 = vmatpush3.bf16.msra.mxu0 %v447_v3  ;;  %v1962_v7 = vld [vmem:[%s1931_s5 + $0xc] sm:$0x1]  ;;  %v1965_v8 = vld [vmem:[%s1931_s5 + $0x10] sm:$0xf]  ;;  %v1968_v9 = vld [vmem:[%s1931_s5 + $0x14] sm:$0x1] }
  0x1f   : > { %vm303_vm2 = vsmask.f32 3328  ;;  %vm304_vm3 = vsmask.f32 7440  ;;  %v309_v10 = vrot.slane %v307_v6, 4  ;;  %v310_v11 = vshll.u32 %v1949_v2, 16 }
  0x20   : > { %v316_v12 = vshll.u32 %v1955_v4, 16  ;;  %v321_v13 = vshrl.u32 %v1958_v5, 16  ;;  %v324_v14 = vshll.u32 %v1958_v5, 16  ;;  %v330_v15 = vshll.u32 %v1962_v7, 16  ;;  %v1979_v22 = vld [vmem:[%s1931_s5 + $0x18] sm:$0xf]  ;;  %vm1983_vm4 = vmor %vm303_vm2, %vm304_vm3 }
  0x21   : > { %v312_v16 = vrot.slane %v310_v11, 5  ;;  %v335_v17 = vshrl.u32 %v1965_v8, 16  ;;  %v338_v18 = vshll.u32 %v1965_v8, 16  ;;  %v344_v19 = vshll.u32 %v1968_v9, 16  ;;  %v1988_v30 = vld [vmem:[%s1931_s5 + $0x1c] sm:$0x1] }
  0x22   : > { %v323_v20 = vrot.slane %v321_v13, 4  ;;  %v326_v21 = vrot.slane %v324_v14, 5  ;;  %v318_v24 = vrot.slane %v316_v12, 5  ;;  %v332_v29 = vrot.slane %v330_v15, 5  ;;  %v1991_v34 = vld [vmem:[%s1931_s5 + $0x20] sm:$0xf] }
  0x23   : > { %v313_v23 = vor.u32 %v312_v16, %v309_v10  ;;  %v337_v25 = vrot.slane %v335_v17, 4  ;;  %v340_v26 = vrot.slane %v338_v18, 5  ;;  %v346_v33 = vrot.slane %v344_v19, 5  ;;  %v1995_v37 = vld [vmem:[%s1931_s5 + $0x24] sm:$0x1]  ;;  %p1617_p9 = scmp.ne.s32.totalorder %s1844_s15, 2 }
  0x24   : > { %v327_v28 = vor.u32 %v326_v21, %v323_v20  ;;  %v349_v35 = vshrl.u32 %v1979_v22, 16  ;;  %v1998_v38 = vld [vmem:[%s1931_s5 + $0x28] sm:$0xf]  ;;  %v352_v39 = vshll.u32 %v1979_v22, 16  ;;  %v2004_v42 = vld [vmem:[%s1931_s5 + $0x2c] sm:$0x1] }
  0x25   : > { %v314_v31 = vrot.slane %v313_v23, 4  ;;  %v341_v32 = vor.u32 %v340_v26, %v337_v25  ;;  %v358_v44 = vshll.u32 %v1988_v30, 16  ;;  %v363_v47 = vshrl.u32 %v1991_v34, 16  ;;  %v2014_v49 = vld [vmem:[%s1926_s28] sm:$0x7] }
  0x26   : > { %v328_v36 = vrot.slane %v327_v28, 4  ;;  %v351_v43 = vrot.slane %v349_v35, 4  ;;  %v354_v46 = vrot.slane %v352_v39, 5  ;;  %v366_v48 = vshll.u32 %v1991_v34, 16  ;;  %v2018_v51 = vld [vmem:[%s1931_s5 + $0x30] sm:$0xf]  ;;  %1762 = vmatprep.subr.msk.bf16.mxu1 %vm445_vm1, %v2014_v49 }
  0x27   : > { %v319_v40 = vsel %vm1983_vm4, %v314_v31, %v318_v24  ;;  %v342_v41 = vrot.slane %v341_v32, 4  ;;  %v372_v52 = vshll.u32 %v1995_v37, 16  ;;  %v1561_v53 = vld [vmem:[%s1926_s28 + $0x8] sm:$0x7]  ;;  %v2025_v54 = vld [vmem:[%s1931_s5 + $0x34] sm:$0x1] }
  0x28   : > { %v2009_v45 = vsel %vm1983_vm4, %v328_v36, %v332_v29  ;;  %v355_v55 = vor.u32 %v354_v46, %v351_v43  ;;  %v360_v56 = vrot.slane %v358_v44, 5  ;;  %v365_v57 = vrot.slane %v363_v47, 4  ;;  %1763 = vmatprep.subr.msk.bf16.mxu0 %vm445_vm1, %v1561_v53  ;;  %v2037_v63 = vld [vmem:[%s1931_s5 + $0x38] sm:$0xf]  ;;  %v2042_v10 = vld [vmem:[%s1931_s5 + $0x3c] sm:$0x1] }
  0x29   : > { %v1537_v50 = vcombine.low %v319_v40, %v2009_v45  ;;  %v368_v58 = vrot.slane %v366_v48, 5  ;;  %v2030_v59 = vsel %vm1983_vm4, %v342_v41, %v346_v33  ;;  %v377_v60 = vshrl.u32 %v1998_v38, 16  ;;  %v1579_v47 = vld [vmem:[%s1926_s28 + $0x10] sm:$0x7] }
  0x2a   : > { %v380_v61 = vshll.u32 %v1998_v38, 16  ;;  %v386_v62 = vshll.u32 %v2004_v42, 16  ;;  %v356_v0 = vrot.slane %v355_v55, 4  ;;  %v391_v3 = vshrl.u32 %v2018_v51, 16 }
  0x2b   : > { %1670 = vmatprep.mubr.msk.bf16.mxu0 %vm432_vm5, %v1537_v50  ;;  %v369_v1 = vor.u32 %v368_v58, %v365_v57  ;;  %v394_v6 = vshll.u32 %v2018_v51, 16  ;;  %v374_v11 = vrot.slane %v372_v52, 5  ;;  %v379_v12 = vrot.slane %v377_v60, 4 }
  0x2c   : > { %v382_v13 = vrot.slane %v380_v61, 5  ;;  %v400_v14 = vshll.u32 %v2025_v54, 16  ;;  %v2047_v15 = vsel %vm1983_vm4, %v356_v0, %v360_v56  ;;  %v393_v17 = vrot.slane %v391_v3, 4  ;;  %v1570_v3 = vld [vmem:[%s1926_s28 + $0xc] sm:$0x7] }
  0x2d   : > { %v370_v16 = vrot.slane %v369_v1, 4  ;;  %v396_v18 = vrot.slane %v394_v6, 5  ;;  %v388_v20 = vrot.slane %v386_v62, 5  ;;  %v405_v21 = vshrl.u32 %v2037_v63, 16 }
  0x2e   : > { %v383_v19 = vor.u32 %v382_v13, %v379_v12  ;;  %v408_v23 = vshll.u32 %v2037_v63, 16  ;;  %v402_v25 = vrot.slane %v400_v14, 5  ;;  %v414_v26 = vshll.u32 %v2042_v10, 16 }
  0x2f   : > { %v397_v24 = vor.u32 %v396_v18, %v393_v17  ;;  %v2054_v28 = vcombine.low %v2030_v59, %v2047_v15  ;;  %v2058_v29 = vsel %vm1983_vm4, %v370_v16, %v374_v11  ;;  %v407_v32 = vrot.slane %v405_v21, 4  ;;  %v1598_v21 = vld [vmem:[%s1926_s28 + $0x18] sm:$0x7] }
  0x30   : > { %v384_v31 = vrot.slane %v383_v19, 4  ;;  %v410_v33 = vrot.slane %v408_v23, 5  ;;  %v627_v35 = vrot.slane %v1955_v4, 5  ;;  %v631_v36 = vrot.slane %v1962_v7, 5 }
  0x31   : > { %v398_v39 = vrot.slane %v397_v24, 4  ;;  %1671 = vmatmul.mubr.msk.bf16.vlgmr.msra.gmra.mxu0 %vm432_vm5, %v2054_v28  ;;  %v1545_v40 = vcombine.low %v1949_v2, %v1958_v5  ;;  %v635_v41 = vrot.slane %v1968_v9, 5  ;;  %v416_v46 = vrot.slane %v414_v26, 5 }
  0x32   : > { %v2069_v43 = vsel %vm1983_vm4, %v384_v31, %v388_v20  ;;  %v411_v44 = vor.u32 %v410_v33, %v407_v32  ;;  %v639_v7 = vrot.slane %v1988_v30, 5  ;;  %v643_v48 = vrot.slane %v1995_v37, 5  ;;  %v2145_v20 = vld [vmem:[%s1931_s5 + $0x40] sm:$0xf] }
  0x33   : > { %v2074_v4 = vcombine.low %v2058_v29, %v2069_v43  ;;  %v684_v50 = vsel %vm445_vm1, %v1561_v53, 0  ;;  %v2081_v9 = vsel %vm1983_vm4, %v398_v39, %v402_v25  ;;  %vm623_vm6 = vcmask 1046532  }
  0x34   : > { %v412_v52 = vrot.slane %v411_v44, 4  ;;  %1689 = vmatpush3.bf16.msra.mxu0 %v684_v50  ;;  %v1553_v55 = vrot.slane %v1949_v2, 9  ;;  %v647_v56 = vrot.slane %v2004_v42, 5  ;;  %vm2088_vm7 = vmor %vm445_vm1, %vm623_vm6  ;;  %v1554_v37 = vrot.slane %v1958_v5, 9 }
  0x35   : > { %1674 = vmatprep.mubr.msk.bf16.mxu1 %vm432_vm5, %v2074_v4  ;;  %v1555_v53 = vrot.slane %v1965_v8, 9  ;;  %v1556_v57 = vrot.slane %v1979_v22, 9  ;;  %1765 = vmatprep.subr.msk.bf16.mxu0 %vm445_vm1, %v1579_v47  ;;  %v547_v42 = vsel %vm445_vm1, %v2014_v49, 0  ;;  %v1557_v60 = vrot.slane %v1991_v34, 9 }
  0x36   : > { %v2098_v2 = vsel %vm1983_vm4, %v412_v52, %v416_v46  ;;  %v628_v58 = vsel %vm2088_vm7, %v1553_v55, %v627_v35  ;;  %v2111_v62 = vsel %vm2088_vm7, %v1554_v37, %v631_v36  ;;  %v1558_v12 = vrot.slane %v1998_v38, 9  ;;  %v1589_v35 = vld [vmem:[%s1926_s28 + $0x14] sm:$0x7]  ;;  %v1611_v55 = vld [vmem:[%s1926_s28 + $0x20] sm:$0x7] }
  0x37   : > { %v2107_v61 = vcombine.low %v2081_v9, %v2098_v2  ;;  %v2115_v0 = vsel %vm2088_vm7, %v1555_v53, %v635_v41  ;;  %v2119_v49 = vsel %vm2088_vm7, %v1556_v57, %v639_v7  ;;  %v1562_v1 = vcombine.low %v628_v58, %v2111_v62  ;;  %v299_v41 = vld [vmem:[%s1931_s5 + $0x44] sm:$0x1] }
  0x38   : > { %v2125_v6 = vcombine.low %v2115_v0, %v2119_v49  ;;  %v2129_v11 = vsel %vm2088_vm7, %v1557_v60, %v643_v48  ;;  %v651_v13 = vrot.slane %v2025_v54, 5  ;;  %v1559_v14 = vrot.slane %v2018_v51, 9 }
  0x39   : > { %1675 = vmatmul.mubr.msk.bf16.vlgmr.msra.gmra.mxu1 %vm432_vm5, %v2107_v61  ;;  %v1560_v16 = vrot.slane %v2037_v63, 9  ;;  %v889_v17 = vsel %vm445_vm1, %v1579_v47, 0  ;;  %v2141_v18 = vsel %vm2088_vm7, %v1558_v12, %v647_v56  ;;  %v655_v19 = vrot.slane %v2042_v10, 5  ;;  %1690 = vmatprep.mubr.msk.bf16.mxu0 %vm432_vm5, %v1562_v1  ;;  %v301_v1 = vld [vmem:[%s1931_s5 + $0x4c] sm:$0x1] }
  0x3a   : > { %1679 = vmatpush3.bf16.msra.mxu1 %v547_v42  ;;  %1680 = vmatprep.mubr.msk.bf16.mxu1 %vm432_vm5, %v1545_v40  ;;  %v2151_v54 = vcombine.low %v2129_v11, %v2141_v18  ;;  %v1546_v23 = vcombine.low %v1965_v8, %v1979_v22  ;;  %v2162_v10 = vsel %vm2088_vm7, %v1559_v14, %v651_v13  ;;  %v856_v25 = vshrl.u32 %v2145_v20, 16 }
  0x3b   : > { %1764 = vmatprep.subr.msk.bf16.mxu1 %vm445_vm1, %v1570_v3  ;;  %1691 = vmatmul.mubr.msk.bf16.vlgmr.msra.gmra.mxu0 %vm432_vm5, %v2125_v6  ;;  %v2166_v24 = vsel %vm2088_vm7, %v1560_v16, %v655_v19  ;;  %v859_v26 = vshll.u32 %v2145_v20, 16  ;;  %v1547_v31 = vcombine.low %v1991_v34, %v1998_v38  ;;  %v780_v32 = vsel %vm445_vm1, %v1570_v3, 0 }
  0x3c   : > { %1709 = vmatpush3.bf16.msra.mxu0 %v889_v17  ;;  %1694 = vmatprep.mubr.msk.bf16.mxu0 %vm432_vm5, %v2151_v54  ;;  %v2176_v33 = vcombine.low %v2162_v10, %v2166_v24  ;;  %v1580_v36 = vcombine.low %v2009_v45, %v2030_v59  ;;  %v858_v39 = vrot.slane %v856_v25, 4  ;;  %v1548_v44 = vcombine.low %v2018_v51, %v2037_v63 }
  0x3d   : > { %1767 = vmatprep.subr.msk.bf16.mxu0 %vm445_vm1, %v1598_v21  ;;  %v861_v40 = vrot.slane %v859_v26, 5  ;;  %v865_v59 = vshll.u32 %v299_v41, 16  ;;  %v1571_v46 = vcombine.low %v1958_v5, %v1965_v8  ;;  %v1581_v47 = vcombine.low %v2047_v15, %v2058_v29 }
  0x3e   : > { %v1582_v7 = vcombine.low %v2069_v43, %v2081_v9  ;;  %v1073_v52 = vsel %vm445_vm1, %v1598_v21, 0  ;;  %v1572_v5 = vcombine.low %v1979_v22, %v1991_v34  ;;  %v1573_v15 = vcombine.low %v1998_v38, %v2018_v51  ;;  %v1604_v9 = vld [vmem:[%s1926_s28 + $0x1c] sm:$0x7] }
  0x3f   : > { %v862_v45 = vor.u32 %v861_v40, %v858_v39  ;;  %v867_v50 = vrot.slane %v865_v59, 5  ;;  %v989_v29 = vsel %vm445_vm1, %v1589_v35, 0  ;;  %v1574_v22 = vcombine.low %v2037_v63, %v2145_v20  ;;  %v300_v63 = vld [vmem:[%s1931_s5 + $0x48] sm:$0xf] }
  0x40   : > { %v1590_v34 = vcombine.low %v2111_v62, %v2115_v0  ;;  %v1258_v38 = vsel %vm445_vm1, %v1611_v55, 0  ;;  %v1591_v51 = vcombine.low %v2119_v49, %v2129_v11  ;;  %v1592_v56 = vcombine.low %v2141_v18, %v2162_v10 }
  0x41   : > { %1681 = vmatmul.mubr.msk.bf16.vlgmr.msra.gmra.mxu1 %vm432_vm5, %v1546_v23  ;;  %v863_v48 = vrot.slane %v862_v45, 4  ;;  %v1588_v37 = vrot.slane %v2145_v20, 9  ;;  %v967_v53 = vrot.slane %v299_v41, 5  ;;  %v1170_v57 = vsel %vm445_vm1, %v1604_v9, 0 }
  0x42   : > { %1699 = vmatpush3.bf16.msra.mxu1 %v780_v32  ;;  %1684 = vmatprep.mubr.msk.bf16.mxu1 %vm432_vm5, %v1547_v31  ;;  %v1149_v58 = vshrl.u32 %v300_v63, 16  ;;  %v1152_v60 = vshll.u32 %v300_v63, 16  ;;  %v1610_v3 = vrot.slane %v300_v63, 9  ;;  %v1248_v11 = vrot.slane %v301_v1, 5 }
  0x43   : > { %1766 = vmatprep.subr.msk.bf16.mxu1 %vm445_vm1, %v1589_v35  ;;  %1695 = vmatmul.mubr.msk.bf16.gmra.mxu0 %vm432_vm5, %v2176_v33  ;;  %v868_v8 = vsel %vm1983_vm4, %v863_v48, %v867_v50  ;;  %v968_v42 = vsel %vm2088_vm7, %v1588_v37, %v967_v53  ;;  %v1158_v13 = vshll.u32 %v301_v1, 16  ;;  %vm1349_vm8 = vcmask 64512  }
  0x44   : > { %1710 = vmatprep.mubr.msk.bf16.mxu0 %vm432_vm5, %v1580_v36  ;;  %v1583_v43 = vcombine.low %v2098_v2, %v868_v8  ;;  %v1599_v2 = vcombine.low %v2145_v20, %v300_v63  ;;  %v1593_v62 = vcombine.low %v2166_v24, %v968_v42  ;;  %v1151_v0 = vrot.slane %v1149_v58, 4 }
  0x45   : > { %v1154_v49 = vrot.slane %v1152_v60, 5  ;;  %v1160_v16 = vrot.slane %v1158_v13, 5 }
  0x47   : > { %v1155_v12 = vor.u32 %v1154_v49, %v1151_v0 }
  0x49   : > { %1685 = vmatmul.mubr.msk.bf16.gmra.mxu1 %vm432_vm5, %v1548_v44  ;;  %v1156_v14 = vrot.slane %v1155_v12, 4 }
  0x4a   : > { %1700 = vmatprep.mubr.msk.bf16.mxu1 %vm432_vm5, %v1571_v46 }
  0x4b   : > { %1711 = vmatmul.mubr.msk.bf16.vlgmr.msra.gmra.mxu0 %vm432_vm5, %v1581_v47 }
  0x4c   : > { %1729 = vmatpush3.bf16.msra.mxu0 %v1073_v52  ;;  %1714 = vmatprep.mubr.msk.bf16.mxu0 %vm432_vm5, %v1582_v7 }
  0x4d   : > { %1769 = vmatprep.subr.msk.bf16.mxu0 %vm445_vm1, %v1611_v55 }
  0x51   : > { %1701 = vmatmul.mubr.msk.bf16.vlgmr.msra.gmra.mxu1 %vm432_vm5, %v1572_v5 }
  0x52   : > { %1719 = vmatpush3.bf16.msra.mxu1 %v989_v29  ;;  %1704 = vmatprep.mubr.msk.bf16.mxu1 %vm432_vm5, %v1573_v15 }
  0x53   : > { %1768 = vmatprep.subr.msk.bf16.mxu1 %vm445_vm1, %v1604_v9  ;;  %1715 = vmatmul.mubr.msk.bf16.gmra.mxu0 %vm432_vm5, %v1583_v43 }
  0x54   : > { %1730 = vmatprep.mubr.msk.bf16.mxu0 %vm432_vm5, %v1546_v23 }
  0x59   : > { %1705 = vmatmul.mubr.msk.bf16.gmra.mxu1 %vm432_vm5, %v1574_v22 }
  0x5a   : > { %1720 = vmatprep.mubr.msk.bf16.mxu1 %vm432_vm5, %v1590_v34 }
  0x5b   : > { %1731 = vmatmul.mubr.msk.bf16.vlgmr.msra.gmra.mxu0 %vm432_vm5, %v1547_v31 }
  0x5c   : > { %1749 = vmatpush3.bf16.msra.mxu0 %v1258_v38  ;;  %1734 = vmatprep.mubr.msk.bf16.mxu0 %vm432_vm5, %v1548_v44 }
  0x61   : > { %1721 = vmatmul.mubr.msk.bf16.vlgmr.msra.gmra.mxu1 %vm432_vm5, %v1591_v51 }
  0x62   : > { %1739 = vmatpush3.bf16.msra.mxu1 %v1170_v57  ;;  %1724 = vmatprep.mubr.msk.bf16.mxu1 %vm432_vm5, %v1592_v56 }
  0x63   : > { %1735 = vmatmul.mubr.msk.bf16.gmra.mxu0 %vm432_vm5, %v1599_v2 }
  0x64   : > { %1750 = vmatprep.mubr.msk.bf16.mxu0 %vm432_vm5, %v2125_v6  ;;  %v1249_v6 = vsel %vm2088_vm7, %v1610_v3, %v1248_v11 }
  0x65   : > { %v1612_v17 = vcombine.low %v968_v42, %v1249_v6 }
  0x69   : > { %1725 = vmatmul.mubr.msk.bf16.gmra.mxu1 %vm432_vm5, %v1593_v62 }
  0x6a   : > { %1740 = vmatprep.mubr.msk.bf16.mxu1 %vm432_vm5, %v2054_v28  ;;  %v1161_v28 = vsel %vm1983_vm4, %v1156_v14, %v1160_v16 }
  0x6b   : > { %1751 = vmatmul.mubr.msk.bf16.vlgmr.msra.gmra.mxu0 %vm432_vm5, %v2151_v54  ;;  %v1605_v18 = vcombine.low %v868_v8, %v1161_v28 }
  0x6c   : > { %1754 = vmatprep.mubr.msk.bf16.mxu0 %vm432_vm5, %v2176_v33 }
  0x71   : > { %1741 = vmatmul.mubr.msk.bf16.vlgmr.msra.gmra.mxu1 %vm432_vm5, %v2074_v4 }
  0x72   : > { %1744 = vmatprep.mubr.msk.bf16.mxu1 %vm432_vm5, %v2107_v61 }
  0x73   : > { %1755 = vmatmul.mubr.msk.bf16.gmra.mxu0 %vm432_vm5, %v1612_v17 }
  0x79   : > { %1745 = vmatmul.mubr.msk.bf16.gmra.mxu1 %vm432_vm5, %v1605_v18 }
  0xf1   : > { %v1672_v19 = vpop.f32.mrf.mxu0 }
  0xf3   : > { %v483_v30 = vpop.f32.mrf.mxu0 }
  0xf5   : > { %v1673_v20 = vpop.f32.mrf.mxu0 }
  0xf7   : > { %v486_v54 = vpop.f32.mrf.mxu0 }
  0xf9   : > { %v1676_v21 = vpop.f32.mrf.mxu1 }
  0xfb   : > { %v499_v23 = vpop.f32.mrf.mxu1  ;;  %v1692_v10 = vpop.f32.mrf.mxu0 }
  0xfd   : > { %v1677_v24 = vpop.f32.mrf.mxu1  ;;  %v720_v4 = vpop.f32.mrf.mxu0 }
  0xff   : > { %v2260_v25 = vpop.f32.mrf.mxu1  ;;  %v1693_v61 = vpop.f32.mrf.mxu0 }
 0x101   : > { %v1682_v26 = vpop.f32.mrf.mxu1  ;;  %v723_v27 = vpop.f32.mrf.mxu0 }
 0x102   : > { %v592_v56 = vadd.f32 %v1682_v26, %v1672_v19 }
 0x103   : > { %v583_v31 = vpop.f32.mrf.mxu1  ;;  %v1696_v32 = vpop.f32.mrf.mxu0 }
 0x104   : > { %v584_v57 = vadd.f32 %v583_v31, %v483_v30  ;;  %v753_v58 = vadd.f32 %v1692_v10, %v592_v56 }
 0x105   : > { %v1683_v33 = vpop.f32.mrf.mxu1  ;;  %v736_v35 = vpop.f32.mrf.mxu0 }
 0x106   : > { %v595_v60 = vadd.f32 %v1683_v33, %v1673_v20  ;;  %v751_v49 = vadd.f32 %v720_v4, %v584_v57 }
 0x107   : > { %v586_v36 = vpop.f32.mrf.mxu1  ;;  %v2262_v39 = vpop.f32.mrf.mxu0 }
 0x108   : > { %v587_v1 = vadd.f32 %v586_v36, %v486_v54  ;;  %v754_v6 = vadd.f32 %v1693_v61, %v595_v60 }
 0x109   : > { %v1686_v40 = vpop.f32.mrf.mxu1  ;;  %v2264_v41 = vpop.f32.mrf.mxu0 }
 0x10a   : > { %v608_v12 = vadd.f32 %v1686_v40, %v1676_v21  ;;  %v752_v18 = vadd.f32 %v723_v27, %v587_v1 }
 0x10b   : > { %v599_v44 = vpop.f32.mrf.mxu1  ;;  %v1712_v45 = vpop.f32.mrf.mxu0 }
 0x10c   : > { %v600_v17 = vadd.f32 %v599_v44, %v499_v23  ;;  %v757_v10 = vadd.f32 %v1696_v32, %v608_v12  ;;  %v1336_v12 = vld [vmem:[%s1936_s9 + $0x18] sm:$0xff] }
 0x10d   : > { %v1687_v59 = vpop.f32.mrf.mxu1  ;;  %v925_v46 = vpop.f32.mrf.mxu0 }
 0x10e   : > { %v611_v26 = vadd.f32 %v1687_v59, %v1677_v24  ;;  %v755_v21 = vadd.f32 %v736_v35, %v600_v17 }
 0x10f   : > { %v602_v47 = vpop.f32.mrf.mxu1  ;;  %v1713_v7 = vpop.f32.mrf.mxu0 }
 0x110   : > { %v603_v61 = vadd.f32 %v602_v47, %v2260_v25  ;;  %v758_v27 = vadd.f32 %v2262_v39, %v611_v26  ;;  %v1339_v26 = vld [vmem:[%s1936_s9 + $0x30] sm:$0xff] }
 0x111   : > { %v1702_v48 = vpop.f32.mrf.mxu1  ;;  %v928_v50 = vpop.f32.mrf.mxu0 }
 0x112   : > { %v849_v3 = vadd.f32 %v1702_v48, %v753_v58 }
 0x113   : > { %v816_v52 = vpop.f32.mrf.mxu1  ;;  %v1716_v55 = vpop.f32.mrf.mxu0 }
 0x114   : > { %v847_v14 = vadd.f32 %v816_v52, %v751_v49  ;;  %v958_v19 = vadd.f32 %v1712_v45, %v849_v3 }
 0x115   : > { %v1703_v5 = vpop.f32.mrf.mxu1  ;;  %v2266_v8 = vpop.f32.mrf.mxu0 }
 0x116   : > { %v850_v30 = vadd.f32 %v1703_v5, %v754_v6  ;;  %v956_v54 = vadd.f32 %v925_v46, %v847_v14 }
 0x117   : > { %v819_v15 = vpop.f32.mrf.mxu1  ;;  %v2268_v29 = vpop.f32.mrf.mxu0 }
 0x118   : > { %v848_v31 = vadd.f32 %v819_v15, %v752_v18  ;;  %v959_v52 = vadd.f32 %v1713_v7, %v850_v30  ;;  %v756_v15 = vadd.f32 %v2264_v41, %v603_v61 }
 0x119   : > { %v1706_v43 = vpop.f32.mrf.mxu1  ;;  %v2270_v9 = vpop.f32.mrf.mxu0 }
 0x11a   : > { %v853_v40 = vadd.f32 %v1706_v43, %v757_v10  ;;  %v957_v32 = vadd.f32 %v928_v50, %v848_v31 }
 0x11b   : > { %v832_v22 = vpop.f32.mrf.mxu1  ;;  %v1732_v34 = vpop.f32.mrf.mxu0 }
 0x11c   : > { %v851_v45 = vadd.f32 %v832_v22, %v755_v21  ;;  %v962_v56 = vadd.f32 %v1716_v55, %v853_v40 }
 0x11d   : > { %v1707_v38 = vpop.f32.mrf.mxu1  ;;  %v1109_v51 = vpop.f32.mrf.mxu0 }
 0x11e   : > { %v854_v35 = vadd.f32 %v1707_v38, %v758_v27  ;;  %v960_v57 = vadd.f32 %v2266_v8, %v851_v45  ;;  %v1333_v38 = vld [vmem:[%s1936_s9] sm:$0xff] }
 0x11f   : > { %v835_v63 = vpop.f32.mrf.mxu1  ;;  %v1733_v37 = vpop.f32.mrf.mxu0 }
 0x120   : > { %v852_v39 = vadd.f32 %v835_v63, %v756_v15  ;;  %v963_v41 = vadd.f32 %v2268_v29, %v854_v35 }
 0x121   : > { %v1722_v53 = vpop.f32.mrf.mxu1  ;;  %v2272_v2 = vpop.f32.mrf.mxu0 }
 0x122   : > { %v1058_v33 = vadd.f32 %v1722_v53, %v958_v19  ;;  %v961_v3 = vadd.f32 %v2270_v9, %v852_v39 }
 0x123   : > { %v1025_v42 = vpop.f32.mrf.mxu1  ;;  %v2274_v62 = vpop.f32.mrf.mxu0 }
 0x124   : > { %v1056_v23 = vadd.f32 %v1025_v42, %v956_v54  ;;  %v1142_v24 = vadd.f32 %v1732_v34, %v1058_v33  ;;  %v1335_v42 = vld [vmem:[%s1936_s9 + $0x10] sm:$0xff] }
 0x125   : > { %v1723_v0 = vpop.f32.mrf.mxu1  ;;  %v2276_v11 = vpop.f32.mrf.mxu0 }
 0x126   : > { %v1059_v59 = vadd.f32 %v1723_v0, %v959_v52  ;;  %v1140_v25 = vadd.f32 %v1109_v51, %v1056_v23 }
 0x127   : > { %v1028_v13 = vpop.f32.mrf.mxu1  ;;  %v2278_v16 = vpop.f32.mrf.mxu0 }
 0x128   : > { %v1057_v47 = vadd.f32 %v1028_v13, %v957_v32  ;;  %v1143_v50 = vadd.f32 %v1733_v37, %v1059_v59 }
 0x129   : > { %v1726_v28 = vpop.f32.mrf.mxu1  ;;  %v2280_v20 = vpop.f32.mrf.mxu0 }
 0x12a   : > { %v1062_v22 = vadd.f32 %v1726_v28, %v962_v56  ;;  %v1141_v49 = vadd.f32 %v2272_v2, %v1057_v47  ;;  %v1334_v28 = vld [vmem:[%s1936_s9 + $0x8] sm:$0xff] }
 0x12b   : > { %v1041_v4 = vpop.f32.mrf.mxu1  ;;  %v1752_v36 = vpop.f32.mrf.mxu0 }
 0x12c   : > { %v1060_v55 = vadd.f32 %v1041_v4, %v960_v57  ;;  %v1146_v37 = vadd.f32 %v2274_v62, %v1062_v22 }
 0x12d   : > { %v1727_v48 = vpop.f32.mrf.mxu1  ;;  %v1294_v44 = vpop.f32.mrf.mxu0 }
 0x12e   : > { %v1063_v29 = vadd.f32 %v1727_v48, %v963_v41  ;;  %v1144_v2 = vadd.f32 %v2276_v11, %v1060_v55 }
 0x12f   : > { %v1044_v5 = vpop.f32.mrf.mxu1  ;;  %v1753_v46 = vpop.f32.mrf.mxu0 }
 0x130   : > { %v1061_v30 = vadd.f32 %v1044_v5, %v961_v3  ;;  %v1147_v54 = vadd.f32 %v2278_v16, %v1063_v29  ;;  %v1340_v16 = vld [vmem:[%s1936_s9 + $0x38] sm:$0xff] }
 0x131   : > { %v1742_v53 = vpop.f32.mrf.mxu1  ;;  %v1297_v43 = vpop.f32.mrf.mxu0 }
 0x132   : > { %v1239_v7 = vadd.f32 %v1742_v53, %v1142_v24  ;;  %v1145_v40 = vadd.f32 %v2280_v20, %v1061_v30  ;;  %v1338_v24 = vld [vmem:[%s1936_s9 + $0x28] sm:$0xff] }
 0x133   : > { %v1206_v58 = vpop.f32.mrf.mxu1  ;;  %v1756_v0 = vpop.f32.mrf.mxu0 }
 0x134   : > { %v1327_v34 = vadd.f32 %v1752_v36, %v1239_v7  ;;  %v1237_v60 = vadd.f32 %v1206_v58, %v1140_v25  ;;  %v1337_v36 = vld [vmem:[%s1936_s9 + $0x20] sm:$0xff] }
 0x135   : > { %v1743_v51 = vpop.f32.mrf.mxu1  ;;  %v1310_v19 = vpop.f32.mrf.mxu0 }
 0x136   : > { %v1343_v8 = vadd.f32 %v1335_v42, %v1327_v34  ;;  %v1325_v63 = vadd.f32 %v1294_v44, %v1237_v60  ;;  %v1240_v1 = vadd.f32 %v1743_v51, %v1143_v50 }
 0x137   : > { %v1209_v13 = vpop.f32.mrf.mxu1  ;;  %v1757_v61 = vpop.f32.mrf.mxu0 }
 0x138   : > { %1352 = vst.msk [vmem:[%s1936_s9 + $0x10] sm:$0xff] %vm1349_vm8, %v1343_v8  ;;  %v1341_v6 = vadd.f32 %v1333_v38, %v1325_v63  ;;  %v1328_v14 = vadd.f32 %v1753_v46, %v1240_v1  ;;  %v1238_v17 = vadd.f32 %v1209_v13, %v1141_v49 }
 0x139   : > { %v1746_v18 = vpop.f32.mrf.mxu1  ;;  %v1313_v32 = vpop.f32.mrf.mxu0 }
 0x13a   : > { %1350 = vst.msk [vmem:[%s1936_s9] sm:$0xff] %vm1349_vm8, %v1341_v6  ;;  %v1344_v9 = vadd.f32 %v1336_v12, %v1328_v14  ;;  %v1326_v62 = vadd.f32 %v1297_v43, %v1238_v17  ;;  %v1243_v10 = vadd.f32 %v1746_v18, %v1146_v37 }
 0x13b   : > { %v1222_v4 = vpop.f32.mrf.mxu1 }
 0x13c   : > { %1353 = vst.msk [vmem:[%s1936_s9 + $0x18] sm:$0xff] %vm1349_vm8, %v1344_v9  ;;  %v1342_v11 = vadd.f32 %v1334_v28, %v1326_v62  ;;  %v1331_v31 = vadd.f32 %v1756_v0, %v1243_v10  ;;  %v1241_v33 = vadd.f32 %v1222_v4, %v1144_v2 }
 0x13d   : > { %v1747_v21 = vpop.f32.mrf.mxu1 }
 0x13e   : > { %1351 = vst.msk [vmem:[%s1936_s9 + $0x8] sm:$0xff] %vm1349_vm8, %v1342_v11  ;;  %v1347_v48 = vadd.f32 %v1339_v26, %v1331_v31  ;;  %v1329_v52 = vadd.f32 %v1310_v19, %v1241_v33  ;;  %v1244_v23 = vadd.f32 %v1747_v21, %v1147_v54 }
 0x13f   : > { %v1225_v44 = vpop.f32.mrf.mxu1 }
 0x140   : > { %1356 = vst.msk [vmem:[%s1936_s9 + $0x30] sm:$0xff] %vm1349_vm8, %v1347_v48  ;;  %v1345_v27 = vadd.f32 %v1337_v36, %v1329_v52  ;;  %v1332_v45 = vadd.f32 %v1757_v61, %v1244_v23  ;;  %v1242_v5 = vadd.f32 %v1225_v44, %v1145_v40 }
 0x142   : > { %1354 = vst.msk [vmem:[%s1936_s9 + $0x20] sm:$0xff] %vm1349_vm8, %v1345_v27  ;;  %v1348_v59 = vadd.f32 %v1340_v16, %v1332_v45  ;;  %v1330_v20 = vadd.f32 %v1313_v32, %v1242_v5  ;;  %1361 = sbr.rel (%p1617_p9) target bundleno = 341 (0x155), region = 44 }
 0x144   : > { %1357 = vst.msk [vmem:[%s1936_s9 + $0x38] sm:$0xff] %vm1349_vm8, %v1348_v59  ;;  %v1346_v46 = vadd.f32 %v1338_v24, %v1330_v20 }
 0x146   : > { %1355 = vst.msk [vmem:[%s1936_s9 + $0x28] sm:$0xff] %vm1349_vm8, %v1346_v46 }
 0x147   : > { %v1362_v15 = vld [vmem:[%s1936_s9] sm:$0xff]  ;;  %v1363_v25 = vld [vmem:[%s1936_s9 + $0x8] sm:$0xff]  ;;  %v1364_v47 = vld [vmem:[%s1936_s9 + $0x10] sm:$0xff] }
 0x148   : > { %v1618_v56 = vld [vmem:[%s2365_s2] ss:$0 sm:$0xff]  ;;  %v1365_v7 = vld [vmem:[%s1936_s9 + $0x18] sm:$0xff]  ;;  %v1368_v58 = vld [vmem:[%s1936_s9 + $0x30] sm:$0xff] }
 0x149   : > { %v1619_v35 = vld [vmem:[%s2366_s3] ss:$0 sm:$0xff]  ;;  %v1377_v53 = vmul.f32 %v1618_v56, %v1362_v15  ;;  %v1378_v43 = vmul.f32 %v1618_v56, %v1363_v25  ;;  %v1379_v57 = vmul.f32 %v1618_v56, %v1364_v47  ;;  %v1380_v39 = vmul.f32 %v1618_v56, %v1365_v7 }
 0x14a   : > { %v1366_v22 = vld [vmem:[%s1936_s9 + $0x20] sm:$0xff]  ;;  %v1383_v41 = vmul.f32 %v1618_v56, %v1368_v58 }
 0x14b   : > { %v1392_v50 = vadd.f32 %v1619_v35, %v1377_v53  ;;  %v1381_v34 = vmul.f32 %v1618_v56, %v1366_v22  ;;  %v1369_v55 = vld [vmem:[%s1936_s9 + $0x38] sm:$0xff]  ;;  %v1393_v38 = vadd.f32 %v1619_v35, %v1378_v43  ;;  %v1394_v51 = vadd.f32 %v1619_v35, %v1379_v57 }
 0x14c   : > { %v1395_v0 = vadd.f32 %v1619_v35, %v1380_v39  ;;  %v1384_v49 = vmul.f32 %v1618_v56, %v1369_v55  ;;  %v1398_v3 = vadd.f32 %v1619_v35, %v1383_v41 }
 0x14d   : > { %v1367_v42 = vld [vmem:[%s1936_s9 + $0x28] sm:$0xff]  ;;  %v1400_v8 = vmax.f32 %v1392_v50, 0.0  ;;  %v1396_v63 = vadd.f32 %v1619_v35, %v1381_v34  ;;  %v1401_v37 = vmax.f32 %v1393_v38, 0.0  ;;  %v1402_v12 = vmax.f32 %v1394_v51, 0.0 }
 0x14e   : > { %v1382_v60 = vmul.f32 %v1618_v56, %v1367_v42  ;;  %v1403_v13 = vmax.f32 %v1395_v0, 0.0  ;;  %v1399_v29 = vadd.f32 %v1619_v35, %v1384_v49  ;;  %v1406_v17 = vmax.f32 %v1398_v3, 0.0 }
 0x14f   : > { %1408 = vst.msk [vmem:[%s1936_s9] sm:$0xff] %vm1349_vm8, %v1400_v8  ;;  %v1404_v6 = vmax.f32 %v1396_v63, 0.0  ;;  %1409 = vst.msk [vmem:[%s1936_s9 + $0x8] sm:$0xff] %vm1349_vm8, %v1401_v37 }
 0x150   : > { %v1397_v1 = vadd.f32 %v1619_v35, %v1382_v60  ;;  %1410 = vst.msk [vmem:[%s1936_s9 + $0x10] sm:$0xff] %vm1349_vm8, %v1402_v12  ;;  %1411 = vst.msk [vmem:[%s1936_s9 + $0x18] sm:$0xff] %vm1349_vm8, %v1403_v13  ;;  %v1407_v2 = vmax.f32 %v1399_v29, 0.0 }
 0x151   : > { %1412 = vst.msk [vmem:[%s1936_s9 + $0x20] sm:$0xff] %vm1349_vm8, %v1404_v6  ;;  %1414 = vst.msk [vmem:[%s1936_s9 + $0x30] sm:$0xff] %vm1349_vm8, %v1406_v17 }
 0x152   : > { %v1405_v14 = vmax.f32 %v1397_v1, 0.0  ;;  %1415 = vst.msk [vmem:[%s1936_s9 + $0x38] sm:$0xff] %vm1349_vm8, %v1407_v2 }
 0x154   : > { %1413 = vst.msk [vmem:[%s1936_s9 + $0x28] sm:$0xff] %vm1349_vm8, %v1405_v14 }
 0x155 PF: > { %s14_s19 = sadd.s32 1, %s1860_s19   ;;  %s2372_s15 = smov %s1852_s17 }
 0x156   : > { %p11_p10 = scmp.ge.s32.totalorder %s14_s19, 26   ;;  %s2373_s16 = smov %s1856_s18 }
 0x157   : > { %s2374_s17 = smov %s2377_s20  ;;  %s2375_s18 = smov %s2381_s21 }
 0x158   :  { %13 = sbr.rel (!%p11_p10) target bundleno = 3 (0x3), region = 85 }

// kernel: forward.11
= control target key start
LH: loop header
LB: loop body
LE: loop exit
PB: predicated region body
PF: predicated region fallthrough
CT: control target
= control target key end

     0   :  { %s1443_s15 = smov 0   ;;  %s1445_s16 = smov 0   ;;  %s1786_s0 = inlined_call_operand.vmem [shape: bf16[1,10,6,6,8], index: 0, kind: input, shape index: {}]   ;;  %s1787_s1 = inlined_call_operand.vmem [shape: bf16[3,3,3,8,16], index: 1, kind: input, shape index: {}]   ;;  %s1788_s2 = inlined_call_operand.vmem [shape: f32[1,16], index: 2, kind: input, shape index: {}]   ;;  %s1789_s3 = inlined_call_operand.vmem [shape: f32[1,16], index: 3, kind: input, shape index: {}]   ;;  %s1790_s4 = inlined_call_operand.vmem [shape: f32[1,8,4,4,16], index: 4, kind: output, shape index: {}]  }
   0x1   :  { %s1447_s17 = smov 0   ;;  %s1449_s18 = smov 0  }
   0x2   :  { %s1451_s19 = smov 0  }
   0x3 LB: > { %s26_s20 = sadd.s32 1, %s1404_s17  ;;  %s29_s21 = sadd.s32 1, %s1408_s18  ;;  %s1412_s19 = sphi %s1451_s19, %s14_s19   ;;  %s1408_s18 = sphi %s1449_s18, %s1800_s18   ;;  %s1404_s17 = sphi %s1447_s17, %s1799_s17   ;;  %s1400_s16 = sphi %s1445_s16, %s1798_s16   ;;  %s1396_s15 = sphi %s1443_s15, %s1797_s15  }
   0x4   : > { %p27_p0 = scmp.ge.s32.totalorder %s26_s20, 3  ;;  %p1216_p1 = scmp.ge.s32.totalorder %s1412_s19, 1 }
   0x5   : > { %p203_p2 = scmp.lt.s32.totalorder %s1412_s19, 25 }
   0x6   : > { %s1802_s20 = smov (%p27_p0, %s26_s20), 0  ;;  %s1804_s21 = smov (!%p27_p0, %s29_s21), %s1408_s18 }
   0x7   : > { %p204_p3 = pnand %p1216_p1, %p203_p2  ;;  %p31_p4 = scmp.ge.s32.totalorder %s1804_s21, 8 }
   0x8   : > { %s243_s22 = sadd.s32 (!%p204_p3), %s1396_s15, %s1400_s16  ;;  %p254_p5 = scmp.lt.s32.totalorder (!%p204_p3), %s1396_s15, 2 }
   0x9   : > { %s1806_s21 = smov (%p31_p4, %s1804_s21), 0  ;;  %207 = sbr.rel (%p204_p3) target bundleno = 307 (0x133), region = 36 }
   0xa   : > { %p246_p6 = scmp.lt.s32.totalorder (!%p204_p3), %s243_s22, 9  ;;  %p261_p7 = scmp.lt.s32.totalorder (!%p204_p3), %s1400_s16, 7 }
   0xb   : > { %p1221_p8 = scmp.ne.s32.totalorder (!%p204_p3), %s1396_s15, 0 }
   0xe   : > { %s255_s23 = scalar_select %p254_p5, %s1396_s15, 2 }
   0xf   : > { %s1808_s22 = smov (!%p246_p6, %s243_s22), 9  ;;  %s1810_s16 = smov (!%p261_p7, %s1400_s16), 7 }
  0x10   : > { %s1324_s24 = smul.u32 36, %s255_s23  ;;  %s1250_s6 = sshll.u32 %s1810_s16, 4 }
  0x11   : > { %s1323_s25 = smul.u32 24, %s1808_s22  ;;  %s1491_s9 = scalar_lea.vmem %s1790_s4, %s1250_s6 }
  0x12   : > { %s1481_s28 = scalar_lea.vmem %s1787_s1, %s1324_s24  ;;  %272 = sbr.rel (%p1221_p8) target bundleno = 26 (0x1a), region = 40 }
  0x13   : > { %s1486_s5 = scalar_lea.vmem %s1786_s0, %s1323_s25 }
  0x17   : > { %vm273_vm0 = vcmask 125952   ;;  %v1414_v0 = vmov 0.0  }
  0x18   : > { %274 = vst.msk [vmem:[%s1491_s9] sm:$0xf] %vm273_vm0, %v1414_v0  ;;  %275 = vst.msk [vmem:[%s1491_s9 + $0x4] sm:$0xf] %vm273_vm0, %v1414_v0 }
  0x19   : > { %276 = vst.msk [vmem:[%s1491_s9 + $0x8] sm:$0xf] %vm273_vm0, %v1414_v0  ;;  %277 = vst.msk [vmem:[%s1491_s9 + $0xc] sm:$0xf] %vm273_vm0, %v1414_v0 }
  0x1a PF: > { %v1222_v1 = vld [vmem:[%s1481_s28 + $0x4] sm:$0xf]  ;;  %vm407_vm1 = vcmask 1043456   ;;  %v284_v2 = vld [vmem:[%s1481_s28] sm:$0xf]  ;;  %v292_v3 = vlaneseq  ;;  %v1415_v4 = vmov 0.0  }
  0x1b   : > { %1269 = vmatprep.subr.bf16.mxu0 %v1415_v4  ;;  %v409_v5 = vsel %vm407_vm1, %v1222_v1, 0  ;;  %1275 = vmatprep.subr.bf16.mxu1 %v1415_v4  ;;  %v473_v6 = vsel %vm407_vm1, %v284_v2, 0  ;;  %vm1416_vm2 = vmmov 0   ;;  %v1417_v7 = vmov 1983009808   ;;  %p1245_p9 = scmp.ne.s32.totalorder %s1396_s15, 2 }
  0x1c   : > { %1270 = vmatpush3.bf16.msra.mxu0 %v409_v5  ;;  %1276 = vmatpush3.bf16.msra.mxu1 %v473_v6  ;;  %v290_v8 = vunpack.c.l.s4 %v1417_v7  ;;  %v293_v9 = vshrl.u32 %v292_v3, 7  ;;  %v278_v10 = vld [vmem:[%s1486_s5] sm:$0x7]  ;;  %v1512_v12 = vld [vmem:[%s1486_s5 + $0x4] sm:$0x7]  ;;  %vm516_vm7 = vcmask 1040384  }
  0x1d   : > { %1271 = vmatprep.mubr.msk.bf16.mxu0 %vm1416_vm2, %v1415_v4  ;;  %1277 = vmatprep.mubr.msk.bf16.mxu1 %vm1416_vm2, %v1415_v4  ;;  %v1515_v13 = vld [vmem:[%s1486_s5 + $0x8] sm:$0x7]  ;;  %v1518_v14 = vld [vmem:[%s1486_s5 + $0xc] sm:$0x7]  ;;  %v1521_v15 = vld [vmem:[%s1486_s5 + $0x10] sm:$0x7]  ;;  %v452_v18 = vcombine.low %v278_v10, %v1512_v12 }
  0x1e   : > { %1281 = vmatprep.subr.bf16.mxu0 %v1415_v4  ;;  %1287 = vmatprep.subr.bf16.mxu1 %v1415_v4  ;;  %v291_v11 = vunpack.c.0.s8 %v290_v8  ;;  %v1524_v16 = vld [vmem:[%s1486_s5 + $0x14] sm:$0x7]  ;;  %vm321_vm3 = vsmask.f32 1280  ;;  %v453_v19 = vcombine.low %v1515_v13, %v1518_v14  ;;  %vm322_vm4 = vsmask.f32 3336 }
  0x1f   : > { %vm324_vm5 = vsmask.f32 5392  ;;  %vm326_vm6 = vsmask.f32 7448  ;;  %v610_v20 = vcombine.low %v1512_v12, %v1515_v13  ;;  %vm517_vm8 = vcmask 1042434   ;;  %vm323_vm9 = vmor %vm321_vm3, %vm322_vm4 }
  0x20   : > { %v1526_v17 = vsub.s32 %v291_v11, %v293_v9  ;;  %vm519_vm10 = vcmask 1044484   ;;  %vm325_vm11 = vmor %vm323_vm9, %vm324_vm5  ;;  %vm403_vm12 = vcmask 64512   ;;  %v1231_v8 = vld [vmem:[%s1481_s28 + $0xc] sm:$0xf]  ;;  %vm521_vm15 = vcmask 1046534  }
  0x21   : > { %vm1586_vm13 = vmor %vm325_vm11, %vm326_vm6 }
  0x22   : > { %v1534_v21 = vrot.slane %v278_v10, %v1526_v17  ;;  %v1538_v22 = vrot.slane %v1512_v12, %v1526_v17  ;;  %v1542_v23 = vrot.slane %v1515_v13, %v1526_v17  ;;  %v1546_v24 = vrot.slane %v1518_v14, %v1526_v17  ;;  %vm518_vm14 = vmor %vm516_vm7, %vm517_vm8 }
  0x23   : > { %v1550_v25 = vrot.slane %v1521_v15, %v1526_v17  ;;  %v1554_v26 = vrot.slane %v1524_v16, %v1526_v17  ;;  %v460_v55 = vrot.slane %v452_v18, %v1526_v17  ;;  %v1606_v3 = vrot.slane %v453_v19, %v1526_v17  ;;  %vm1624_vm0 = vmor %vm518_vm14, %vm519_vm10 }
  0x24   : > { %v1558_v27 = vcombine.high %v1534_v21, %v1534_v21  ;;  %v1562_v28 = vcombine.high %v1538_v22, %v1538_v22  ;;  %v1566_v29 = vcombine.high %v1542_v23, %v1542_v23  ;;  %v1570_v30 = vcombine.high %v1546_v24, %v1546_v24  ;;  %vm1646_vm3 = vmor %vm1624_vm0, %vm521_vm15 }
  0x25   : > { %v329_v31 = vshrl.u32 %v1534_v21, 16  ;;  %v332_v32 = vshll.u32 %v1534_v21, 16  ;;  %v343_v33 = vshrl.u32 %v1538_v22, 16  ;;  %v346_v34 = vshll.u32 %v1538_v22, 16 }
  0x26   : > { %v338_v35 = vshll.u32 %v1558_v27, 16  ;;  %v352_v36 = vshll.u32 %v1562_v28, 16  ;;  %v357_v37 = vshrl.u32 %v1542_v23, 16  ;;  %v360_v38 = vshll.u32 %v1542_v23, 16 }
  0x27   : > { %v331_v39 = vrot.slane %v329_v31, 6  ;;  %v334_v40 = vrot.slane %v332_v32, 7  ;;  %v345_v41 = vrot.slane %v343_v33, 6  ;;  %v348_v42 = vrot.slane %v346_v34, 7 }
  0x28   : > { %v340_v43 = vrot.slane %v338_v35, 7  ;;  %v354_v44 = vrot.slane %v352_v36, 7  ;;  %v359_v45 = vrot.slane %v357_v37, 6  ;;  %v362_v46 = vrot.slane %v360_v38, 7 }
  0x29   : > { %v335_v47 = vor.u32 %v334_v40, %v331_v39  ;;  %v349_v48 = vor.u32 %v348_v42, %v345_v41  ;;  %v366_v49 = vshll.u32 %v1566_v29, 16  ;;  %v371_v50 = vshrl.u32 %v1546_v24, 16 }
  0x2a   : > { %v363_v52 = vor.u32 %v362_v46, %v359_v45  ;;  %v374_v53 = vshll.u32 %v1546_v24, 16  ;;  %v380_v54 = vshll.u32 %v1570_v30, 16  ;;  %v1595_v59 = vcombine.high %v1550_v25, %v1550_v25 }
  0x2b   : > { %v336_v56 = vrot.slane %v335_v47, 2  ;;  %v350_v57 = vrot.slane %v349_v48, 2  ;;  %v373_v58 = vrot.slane %v371_v50, 6  ;;  %v368_v61 = vrot.slane %v366_v49, 7 }
  0x2c   : > { %v364_v60 = vrot.slane %v363_v52, 2  ;;  %v376_v62 = vrot.slane %v374_v53, 7  ;;  %v685_v63 = vshrl.u32 %v1550_v25, 16  ;;  %v688_v2 = vshll.u32 %v1550_v25, 16 }
  0x2d   : > { %v341_v0 = vsel %vm1586_vm13, %v336_v56, %v340_v43  ;;  %v1602_v1 = vsel %vm1586_vm13, %v350_v57, %v354_v44  ;;  %v382_v6 = vrot.slane %v380_v54, 7  ;;  %v694_v11 = vshll.u32 %v1595_v59, 16  ;;  %v1236_v56 = vld [vmem:[%s1481_s28 + $0x14] sm:$0xf] }
  0x2e   : > { %v377_v5 = vor.u32 %v376_v62, %v373_v58  ;;  %v687_v7 = vrot.slane %v685_v63, 6  ;;  %v386_v9 = vcombine.low %v341_v0, %v1602_v1  ;;  %v690_v10 = vrot.slane %v688_v2, 7 }
  0x2f   : > { %v1615_v18 = vcombine.high %v1554_v26, %v1554_v26  ;;  %v1619_v19 = vsel %vm1586_vm13, %v364_v60, %v368_v61  ;;  %v908_v32 = vshrl.u32 %v1554_v26, 16  ;;  %v911_v33 = vshll.u32 %v1554_v26, 16 }
  0x30   : > { %v378_v31 = vrot.slane %v377_v5, 2  ;;  %v691_v35 = vor.u32 %v690_v10, %v687_v7  ;;  %v468_v36 = vcombine.low %v460_v55, %v1606_v3  ;;  %v631_v37 = vsel %vm407_vm1, %v1231_v8, 0  ;;  %v1233_v10 = vld [vmem:[%s1481_s28 + $0x10] sm:$0xf] }
  0x31   : > { %v611_v38 = vcombine.low %v1518_v14, %v1521_v15  ;;  %v910_v40 = vrot.slane %v908_v32, 6  ;;  %v913_v41 = vrot.slane %v911_v33, 7  ;;  %v1225_v42 = vrot.slane %v1534_v21, 9  ;;  %v1229_v14 = vld [vmem:[%s1481_s28 + $0x8] sm:$0xf] }
  0x32   : > { %v1634_v39 = vsel %vm1586_vm13, %v378_v31, %v382_v6  ;;  %v394_v44 = vrot.slane %v386_v9, %v1526_v17  ;;  %v696_v45 = vrot.slane %v694_v11, 7  ;;  %v917_v46 = vshll.u32 %v1615_v18, 16  ;;  %1278 = vmatmul.mubr.msk.bf16.vlgmr.msra.gmra.mxu1 %vm403_vm12, %v468_v36  ;;  %v1240_v33 = vld [vmem:[%s1481_s28 + $0x1c] sm:$0xf] }
  0x33   : > { %v387_v43 = vcombine.low %v1619_v19, %v1634_v39  ;;  %v692_v21 = vrot.slane %v691_v35, 2  ;;  %1288 = vmatpush3.bf16.msra.mxu1 %v631_v37  ;;  %1289 = vmatprep.mubr.msk.bf16.mxu1 %vm1416_vm2, %v1415_v4  ;;  %v525_v48 = vrot.slane %v1558_v27, 7  ;;  %v1226_v49 = vrot.slane %v1538_v22, 9 }
  0x34   : > { %v529_v50 = vrot.slane %v1562_v28, 7  ;;  %v914_v53 = vor.u32 %v913_v41, %v910_v40  ;;  %v1227_v54 = vrot.slane %v1542_v23, 9  ;;  %v533_v55 = vrot.slane %v1566_v29, 7  ;;  %1299 = vmatprep.subr.bf16.mxu1 %v1415_v4  ;;  %v1238_v40 = vld [vmem:[%s1481_s28 + $0x18] sm:$0xf] }
  0x35   : > { %v1656_v52 = vrot.slane %v387_v43, %v1526_v17  ;;  %v562_v57 = vsel %vm407_vm1, %v1229_v14, 0  ;;  %v526_v27 = vsel %vm1646_vm3, %v1225_v42, %v525_v48  ;;  %v1228_v23 = vrot.slane %v1546_v24, 9 }
  0x36   : > { %v530_v22 = vsel %vm1646_vm3, %v1226_v49, %v529_v50  ;;  %v534_v58 = vsel %vm1646_vm3, %v1227_v54, %v533_v55  ;;  %v537_v29 = vrot.slane %v1570_v30, 7  ;;  %v618_v61 = vrot.slane %v610_v20, %v1526_v17 }
  0x37   : > { %v402_v28 = vcombine.low %v394_v44, %v1656_v52  ;;  %v541_v60 = vcombine.low %v526_v27, %v530_v22  ;;  %v625_v62 = vrot.slane %v611_v38, %v1526_v17  ;;  %v793_v63 = vsel %vm407_vm1, %v1236_v56, 0 }
  0x38   : > { %v697_v0 = vsel %vm1586_vm13, %v692_v21, %v696_v45  ;;  %v915_v2 = vrot.slane %v914_v53, 2  ;;  %v919_v24 = vrot.slane %v917_v46, 7  ;;  %v538_v30 = vsel %vm1646_vm3, %v1228_v23, %v537_v29 }
  0x39   : > { %1272 = vmatmul.mubr.msk.bf16.vlgmr.msra.gmra.mxu0 %vm403_vm12, %v402_v28  ;;  %v542_v12 = vcombine.low %v534_v58, %v538_v30  ;;  %v549_v13 = vrot.slane %v541_v60, %v1526_v17  ;;  %v626_v20 = vcombine.low %v618_v61, %v625_v62  ;;  %v1235_v5 = vrot.slane %v1550_v25, 9 }
  0x3a   : > { %1282 = vmatpush3.bf16.msra.mxu0 %v562_v57  ;;  %1283 = vmatprep.mubr.msk.bf16.mxu0 %vm1416_vm2, %v1415_v4  ;;  %v768_v6 = vrot.slane %v1595_v59, 7  ;;  %v772_v7 = vcombine.low %v530_v22, %v534_v58  ;;  %v700_v8 = vcombine.low %v1602_v1, %v1619_v19  ;;  %v701_v11 = vcombine.low %v1634_v39, %v697_v0 }
  0x3b   : > { %1293 = vmatprep.subr.bf16.mxu0 %v1415_v4  ;;  %v556_v9 = vrot.slane %v542_v12, %v1526_v17  ;;  %1290 = vmatmul.mubr.msk.bf16.vlgmr.msra.gmra.mxu1 %vm403_vm12, %v626_v20  ;;  %v920_v31 = vsel %vm1586_vm13, %v915_v2, %v919_v24  ;;  %v721_v19 = vsel %vm407_vm1, %v1233_v10, 0  ;;  %v936_v38 = vsel %vm407_vm1, %v1240_v33, 0 }
  0x3c   : > { %1300 = vmatpush3.bf16.msra.mxu1 %v793_v63  ;;  %1301 = vmatprep.mubr.msk.bf16.mxu1 %vm1416_vm2, %v1415_v4  ;;  %v769_v25 = vsel %vm1646_vm3, %v1235_v5, %v768_v6  ;;  %v780_v1 = vrot.slane %v772_v7, %v1526_v17  ;;  %v923_v34 = vcombine.low %v697_v0, %v920_v31  ;;  %v1242_v43 = vrot.slane %v1554_v26, 9 }
  0x3d   : > { %v557_v59 = vcombine.low %v549_v13, %v556_v9  ;;  %v773_v32 = vcombine.low %v538_v30, %v769_v25  ;;  %1311 = vmatprep.subr.bf16.mxu1 %v1415_v4  ;;  %v708_v35 = vrot.slane %v700_v8, %v1526_v17  ;;  %v715_v36 = vrot.slane %v701_v11, %v1526_v17 }
  0x3e   : > { %v930_v39 = vrot.slane %v923_v34, %v1526_v17  ;;  %v841_v41 = vcombine.low %v1521_v15, %v1524_v16  ;;  %v983_v44 = vrot.slane %v1615_v18, 7  ;;  %v854_v45 = vsel %vm407_vm1, %v1238_v40, 0  ;;  %v1243_v16 = vld [vmem:[%s1481_s28 + $0x20] sm:$0xf] }
  0x3f   : > { %v787_v51 = vrot.slane %v773_v32, %v1526_v17  ;;  %v716_v42 = vcombine.low %v708_v35, %v715_v36  ;;  %v1000_v21 = vsel %vm407_vm1, %v1243_v16, 0  ;;  %vm1059_vm1 = vcmask 125952  }
  0x40   : > { %v931_v46 = vcombine.low %v1656_v52, %v930_v39  ;;  %v848_v14 = vrot.slane %v841_v41, %v1526_v17  ;;  %v984_v15 = vsel %vm1646_vm3, %v1242_v43, %v983_v44  ;;  %v1046_v39 = vld [vmem:[%s1491_s9 + $0x4] sm:$0xf] }
  0x41   : > { %1284 = vmatmul.mubr.msk.bf16.vlgmr.msra.gmra.mxu0 %vm403_vm12, %v557_v59  ;;  %v788_v37 = vcombine.low %v780_v1, %v787_v51  ;;  %v987_v18 = vcombine.low %v769_v25, %v984_v15  ;;  %v1048_v15 = vld [vmem:[%s1491_s9 + $0xc] sm:$0xf] }
  0x42   : > { %1294 = vmatpush3.bf16.msra.mxu0 %v721_v19  ;;  %1295 = vmatprep.mubr.msk.bf16.mxu0 %vm1416_vm2, %v1415_v4  ;;  %v849_v26 = vcombine.low %v1606_v3, %v848_v14 }
  0x43   : > { %1305 = vmatprep.subr.bf16.mxu0 %v1415_v4  ;;  %1302 = vmatmul.mubr.msk.bf16.vlgmr.msra.gmra.mxu1 %vm403_vm12, %v788_v37  ;;  %v994_v48 = vrot.slane %v987_v18, %v1526_v17  ;;  %v1045_v37 = vld [vmem:[%s1491_s9] sm:$0xf] }
  0x44   : > { %1312 = vmatpush3.bf16.msra.mxu1 %v936_v38  ;;  %1313 = vmatprep.mubr.msk.bf16.mxu1 %vm1416_vm2, %v1415_v4 }
  0x45   : > { %v995_v47 = vcombine.low %v556_v9, %v994_v48 }
  0x49   : > { %1296 = vmatmul.mubr.msk.bf16.vlgmr.msra.gmra.mxu0 %vm403_vm12, %v716_v42 }
  0x4a   : > { %1306 = vmatpush3.bf16.msra.mxu0 %v854_v45  ;;  %1307 = vmatprep.mubr.msk.bf16.mxu0 %vm1416_vm2, %v1415_v4  ;;  %v1047_v45 = vld [vmem:[%s1491_s9 + $0x8] sm:$0xf] }
  0x4b   : > { %1317 = vmatprep.subr.bf16.mxu0 %v1415_v4  ;;  %1314 = vmatmul.mubr.msk.bf16.vlgmr.msra.gmra.mxu1 %vm403_vm12, %v931_v46 }
  0x51   : > { %1308 = vmatmul.mubr.msk.bf16.vlgmr.msra.gmra.mxu0 %vm403_vm12, %v849_v26 }
  0x52   : > { %1318 = vmatpush3.bf16.msra.mxu0 %v1000_v21  ;;  %1319 = vmatprep.mubr.msk.bf16.mxu0 %vm1416_vm2, %v1415_v4 }
  0x59   : > { %1320 = vmatmul.mubr.msk.bf16.vlgmr.msra.gmra.mxu0 %vm403_vm12, %v995_v47 }
  0xf2   : > { %v509_v49 = vpop.f32.mrf.mxu1 }
  0xf4   : > { %v1279_v50 = vpop.f32.mrf.mxu1 }
  0xf6   : > { %v512_v52 = vpop.f32.mrf.mxu1 }
  0xf8   : > { %v1280_v54 = vpop.f32.mrf.mxu1 }
  0xf9   : > { %v445_v53 = vpop.f32.mrf.mxu0 }
  0xfa   : > { %v510_v4 = vadd.f32 %v509_v49, %v445_v53 }
  0xfb   : > { %v1273_v3 = vpop.f32.mrf.mxu0  ;;  %v667_v55 = vpop.f32.mrf.mxu1 }
  0xfd   : > { %v448_v56 = vpop.f32.mrf.mxu0  ;;  %v1291_v57 = vpop.f32.mrf.mxu1 }
  0xfe   : > { %v513_v2 = vadd.f32 %v512_v52, %v448_v56 }
  0xff   : > { %v1274_v27 = vpop.f32.mrf.mxu0  ;;  %v670_v22 = vpop.f32.mrf.mxu1 }
 0x101   : > { %v598_v28 = vpop.f32.mrf.mxu0  ;;  %v1292_v17 = vpop.f32.mrf.mxu1 }
 0x102   : > { %v605_v62 = vadd.f32 %v598_v28, %v510_v4 }
 0x103   : > { %v1285_v58 = vpop.f32.mrf.mxu0  ;;  %v829_v23 = vpop.f32.mrf.mxu1 }
 0x104   : > { %v674_v12 = vadd.f32 %v667_v55, %v605_v62 }
 0x105   : > { %v601_v29 = vpop.f32.mrf.mxu0  ;;  %v1303_v60 = vpop.f32.mrf.mxu1 }
 0x106   : > { %v606_v13 = vadd.f32 %v601_v29, %v513_v2 }
 0x107   : > { %v1286_v61 = vpop.f32.mrf.mxu0  ;;  %v832_v63 = vpop.f32.mrf.mxu1 }
 0x108   : > { %v675_v9 = vadd.f32 %v670_v22, %v606_v13 }
 0x109   : > { %v757_v0 = vpop.f32.mrf.mxu0  ;;  %v1304_v24 = vpop.f32.mrf.mxu1 }
 0x10a   : > { %v764_v6 = vadd.f32 %v757_v0, %v674_v12 }
 0x10b   : > { %v1297_v30 = vpop.f32.mrf.mxu0  ;;  %v972_v20 = vpop.f32.mrf.mxu1 }
 0x10c   : > { %v836_v31 = vadd.f32 %v829_v23, %v764_v6 }
 0x10d   : > { %v760_v5 = vpop.f32.mrf.mxu0  ;;  %v1315_v7 = vpop.f32.mrf.mxu1 }
 0x10e   : > { %v765_v25 = vadd.f32 %v760_v5, %v675_v9 }
 0x10f   : > { %v1298_v8 = vpop.f32.mrf.mxu0  ;;  %v975_v10 = vpop.f32.mrf.mxu1 }
 0x110   : > { %v837_v33 = vadd.f32 %v832_v63, %v765_v25 }
 0x111   : > { %v890_v11 = vpop.f32.mrf.mxu0  ;;  %v1316_v59 = vpop.f32.mrf.mxu1 }
 0x112   : > { %v897_v1 = vadd.f32 %v890_v11, %v836_v31 }
 0x113   : > { %v1309_v32 = vpop.f32.mrf.mxu0 }
 0x114   : > { %v979_v51 = vadd.f32 %v972_v20, %v897_v1 }
 0x115   : > { %v893_v19 = vpop.f32.mrf.mxu0 }
 0x116   : > { %v898_v35 = vadd.f32 %v893_v19, %v837_v33 }
 0x117   : > { %v1310_v34 = vpop.f32.mrf.mxu0 }
 0x118   : > { %v980_v41 = vadd.f32 %v975_v10, %v898_v35 }
 0x119   : > { %v1036_v36 = vpop.f32.mrf.mxu0 }
 0x11a   : > { %v1043_v38 = vadd.f32 %v1036_v36, %v979_v51 }
 0x11b   : > { %v1321_v40 = vpop.f32.mrf.mxu0 }
 0x11c   : > { %v1051_v42 = vcombine.high %v1043_v38, %v1043_v38  ;;  %v1055_v43 = vadd.f32 %v1045_v37, %v1043_v38 }
 0x11d   : > { %v1039_v44 = vpop.f32.mrf.mxu0 }
 0x11e   : > { %v1056_v46 = vadd.f32 %v1051_v42, %v1046_v39  ;;  %1060 = vst.msk [vmem:[%s1491_s9] sm:$0xf] %vm1059_vm1, %v1055_v43  ;;  %v1044_v14 = vadd.f32 %v1039_v44, %v980_v41 }
 0x11f   : > { %v1322_v16 = vpop.f32.mrf.mxu0 }
 0x120   : > { %1061 = vst.msk [vmem:[%s1491_s9 + $0x4] sm:$0xf] %vm1059_vm1, %v1056_v46  ;;  %v1052_v26 = vcombine.high %v1044_v14, %v1044_v14  ;;  %v1057_v18 = vadd.f32 %v1047_v45, %v1044_v14  ;;  %1067 = sbr.rel (%p1245_p9) target bundleno = 307 (0x133), region = 44 }
 0x122   : > { %v1058_v21 = vadd.f32 %v1052_v26, %v1048_v15  ;;  %1062 = vst.msk [vmem:[%s1491_s9 + $0x8] sm:$0xf] %vm1059_vm1, %v1057_v18 }
 0x124   : > { %1063 = vst.msk [vmem:[%s1491_s9 + $0xc] sm:$0xf] %vm1059_vm1, %v1058_v21 }
 0x125   : > { %v1068_v48 = vld [vmem:[%s1491_s9] sm:$0xf] }
 0x126   : > { %v1246_v47 = vld [vmem:[%s1788_s2] ss:$0 sm:$0xff] }
 0x127   : > { %v1247_v49 = vld [vmem:[%s1789_s3] ss:$0 sm:$0xff]  ;;  %v1079_v50 = vmul.f32 %v1246_v47, %v1068_v48  ;;  %v1069_v52 = vld [vmem:[%s1491_s9 + $0x4] sm:$0xf] }
 0x128   : > { %v1080_v3 = vmul.f32 %v1246_v47, %v1069_v52 }
 0x129   : > { %v1070_v53 = vld [vmem:[%s1491_s9 + $0x8] sm:$0xf]  ;;  %v1090_v57 = vadd.f32 %v1247_v49, %v1079_v50 }
 0x12a   : > { %v1081_v55 = vmul.f32 %v1246_v47, %v1070_v53  ;;  %v1091_v27 = vadd.f32 %v1247_v49, %v1080_v3 }
 0x12b   : > { %v1071_v54 = vld [vmem:[%s1491_s9 + $0xc] sm:$0xf]  ;;  %v1094_v17 = vmax.f32 %v1090_v57, 0.0 }
 0x12c   : > { %v1082_v56 = vmul.f32 %v1246_v47, %v1071_v54  ;;  %v1092_v22 = vadd.f32 %v1247_v49, %v1081_v55  ;;  %v1095_v58 = vmax.f32 %v1091_v27, 0.0 }
 0x12d   : > { %1098 = vst.msk [vmem:[%s1491_s9] sm:$0xf] %vm1059_vm1, %v1094_v17 }
 0x12e   : > { %v1093_v28 = vadd.f32 %v1247_v49, %v1082_v56  ;;  %v1096_v23 = vmax.f32 %v1092_v22, 0.0  ;;  %1099 = vst.msk [vmem:[%s1491_s9 + $0x4] sm:$0xf] %vm1059_vm1, %v1095_v58 }
 0x130   : > { %v1097_v29 = vmax.f32 %v1093_v28, 0.0  ;;  %1100 = vst.msk [vmem:[%s1491_s9 + $0x8] sm:$0xf] %vm1059_vm1, %v1096_v23 }
 0x132   : > { %1101 = vst.msk [vmem:[%s1491_s9 + $0xc] sm:$0xf] %vm1059_vm1, %v1097_v29 }
 0x133 PF: > { %s14_s19 = sadd.s32 1, %s1412_s19   ;;  %s1797_s15 = smov %s1404_s17 }
 0x134   : > { %p11_p10 = scmp.ge.s32.totalorder %s14_s19, 26   ;;  %s1798_s16 = smov %s1408_s18 }
 0x135   : > { %s1799_s17 = smov %s1802_s20  ;;  %s1800_s18 = smov %s1806_s21 }
 0x136   :  { %13 = sbr.rel (!%p11_p10) target bundleno = 3 (0x3), region = 85 }

// kernel: forward.12
= control target key start
LH: loop header
LB: loop body
LE: loop exit
PB: predicated region body
PF: predicated region fallthrough
CT: control target
= control target key end

     0   :  { %s1504_s15 = smov 0   ;;  %s1506_s16 = smov 0   ;;  %s1825_s0 = inlined_call_operand.vmem [shape: bf16[1,10,6,6,16], index: 0, kind: input, shape index: {}]   ;;  %s1826_s1 = inlined_call_operand.vmem [shape: bf16[3,3,3,16,8], index: 1, kind: input, shape index: {}]   ;;  %s1827_s2 = inlined_call_operand.vmem [shape: f32[1,8], index: 2, kind: input, shape index: {}]   ;;  %s1828_s3 = inlined_call_operand.vmem [shape: f32[1,8], index: 3, kind: input, shape index: {}]   ;;  %s1829_s4 = inlined_call_operand.vmem [shape: f32[1,8,4,4,8], index: 4, kind: output, shape index: {}]  }
   0x1   :  { %s1508_s17 = smov 0   ;;  %s1510_s18 = smov 0  }
   0x2   :  { %s1512_s19 = smov 0  }
   0x3 LB: > { %s26_s20 = sadd.s32 1, %s1465_s17  ;;  %s29_s21 = sadd.s32 1, %s1469_s18  ;;  %s1473_s19 = sphi %s1512_s19, %s14_s19   ;;  %s1469_s18 = sphi %s1510_s18, %s1837_s18   ;;  %s1465_s17 = sphi %s1508_s17, %s1836_s17   ;;  %s1461_s16 = sphi %s1506_s16, %s1835_s16   ;;  %s1457_s15 = sphi %s1504_s15, %s1834_s15  }
   0x4   : > { %p27_p0 = scmp.ge.s32.totalorder %s26_s20, 3  ;;  %p1251_p1 = scmp.ge.s32.totalorder %s1473_s19, 1 }
   0x5   : > { %p203_p2 = scmp.lt.s32.totalorder %s1473_s19, 25 }
   0x6   : > { %s1839_s20 = smov (%p27_p0, %s26_s20), 0  ;;  %s1841_s21 = smov (!%p27_p0, %s29_s21), %s1469_s18 }
   0x7   : > { %p204_p3 = pnand %p1251_p1, %p203_p2  ;;  %p31_p4 = scmp.ge.s32.totalorder %s1841_s21, 8 }
   0x8   : > { %s243_s22 = sadd.s32 (!%p204_p3), %s1457_s15, %s1461_s16  ;;  %p254_p5 = scmp.lt.s32.totalorder (!%p204_p3), %s1457_s15, 2 }
   0x9   : > { %s1843_s21 = smov (%p31_p4, %s1841_s21), 0  ;;  %207 = sbr.rel (%p204_p3) target bundleno = 306 (0x132), region = 36 }
   0xa   : > { %p246_p6 = scmp.lt.s32.totalorder (!%p204_p3), %s243_s22, 9  ;;  %p261_p7 = scmp.lt.s32.totalorder (!%p204_p3), %s1461_s16, 7 }
   0xb   : > { %p1256_p8 = scmp.ne.s32.totalorder (!%p204_p3), %s1457_s15, 0 }
   0xe   : > { %s255_s23 = scalar_select %p254_p5, %s1457_s15, 2 }
   0xf   : > { %s1845_s22 = smov (!%p246_p6, %s243_s22), 9  ;;  %s1847_s16 = smov (!%p261_p7, %s1461_s16), 7 }
  0x10   : > { %s1376_s24 = smul.u32 72, %s255_s23  ;;  %s1302_s6 = sshll.u32 %s1847_s16, 4 }
  0x11   : > { %s1375_s25 = smul.u32 24, %s1845_s22  ;;  %s1552_s9 = scalar_lea.vmem %s1829_s4, %s1302_s6 }
  0x12   : > { %s1542_s28 = scalar_lea.vmem %s1826_s1, %s1376_s24  ;;  %272 = sbr.rel (%p1256_p8) target bundleno = 26 (0x1a), region = 40 }
  0x13   : > { %s1547_s5 = scalar_lea.vmem %s1825_s0, %s1375_s25 }
  0x17   : > { %vm273_vm0 = vcmask 60416   ;;  %v1475_v0 = vmov 0.0  }
  0x18   : > { %274 = vst.msk [vmem:[%s1552_s9] sm:$0xf] %vm273_vm0, %v1475_v0  ;;  %275 = vst.msk [vmem:[%s1552_s9 + $0x4] sm:$0xf] %vm273_vm0, %v1475_v0 }
  0x19   : > { %276 = vst.msk [vmem:[%s1552_s9 + $0x8] sm:$0xf] %vm273_vm0, %v1475_v0  ;;  %277 = vst.msk [vmem:[%s1552_s9 + $0xc] sm:$0xf] %vm273_vm0, %v1475_v0 }
  0x1a PF: > { %v1421_v1 = vld [vmem:[%s1542_s28 + $0x8] sm:$0xff]   ;;  %v1476_v2 = vmov 0.0   ;;  %v1422_v3 = vld [vmem:[%s1542_s28] sm:$0xff]   ;;  %v293_v4 = vlaneseq  ;;  %vm1477_vm1 = vmmov 0   ;;  %v1478_v5 = vmov 1983009808  }
  0x1b   : > { %1321 = vmatprep.subr.bf16.mxu0 %v1476_v2  ;;  %1327 = vmatprep.subr.bf16.mxu1 %v1476_v2  ;;  %v291_v6 = vunpack.c.l.s4 %v1478_v5  ;;  %v278_v8 = vld [vmem:[%s1547_s5] sm:$0x7]  ;;  %v1571_v9 = vld [vmem:[%s1547_s5 + $0x4] sm:$0x7]  ;;  %v1574_v10 = vld [vmem:[%s1547_s5 + $0x8] sm:$0x7] }
  0x1c   : > { %1322 = vmatpush3.bf16.msra.mxu0 %v1421_v1  ;;  %1323 = vmatprep.mubr.msk.bf16.mxu0 %vm1477_vm1, %v1476_v2  ;;  %v294_v7 = vshrl.u32 %v293_v4, 7  ;;  %v1577_v11 = vld [vmem:[%s1547_s5 + $0xc] sm:$0x7]  ;;  %v1580_v12 = vld [vmem:[%s1547_s5 + $0x10] sm:$0x7]  ;;  %v456_v16 = vcombine.low %v278_v8, %v1571_v9  ;;  %vm523_vm6 = vcmask 1040384  }
  0x1d   : > { %1328 = vmatpush3.bf16.msra.mxu1 %v1422_v3  ;;  %1329 = vmatprep.mubr.msk.bf16.mxu1 %vm1477_vm1, %v1476_v2  ;;  %v292_v13 = vunpack.c.0.s8 %v291_v6  ;;  %v1583_v14 = vld [vmem:[%s1547_s5 + $0x14] sm:$0x7]  ;;  %vm322_vm2 = vsmask.f32 1280  ;;  %vm323_vm3 = vsmask.f32 3336  ;;  %v457_v17 = vcombine.low %v1574_v10, %v1577_v11 }
  0x1e   : > { %1333 = vmatprep.subr.bf16.mxu0 %v1476_v2  ;;  %1339 = vmatprep.subr.bf16.mxu1 %v1476_v2  ;;  %vm325_vm4 = vsmask.f32 5392  ;;  %vm327_vm5 = vsmask.f32 7448  ;;  %vm524_vm7 = vcmask 1042434   ;;  %vm324_vm8 = vmor %vm322_vm2, %vm323_vm3  ;;  %vm526_vm9 = vcmask 1044484  }
  0x1f   : > { %v1585_v15 = vsub.s32 %v292_v13, %v294_v7  ;;  %vm326_vm10 = vmor %vm324_vm8, %vm325_vm4  ;;  %vm411_vm11 = vcmask 130048   ;;  %vm528_vm14 = vcmask 1046534   ;;  %p1297_p9 = scmp.ne.s32.totalorder %s1457_s15, 2 }
  0x20   : > { %vm1643_vm12 = vmor %vm326_vm10, %vm327_vm5 }
  0x21   : > { %v1591_v18 = vrot.slane %v278_v8, %v1585_v15  ;;  %v1595_v19 = vrot.slane %v1571_v9, %v1585_v15  ;;  %v1599_v20 = vrot.slane %v1574_v10, %v1585_v15  ;;  %v1603_v21 = vrot.slane %v1577_v11, %v1585_v15  ;;  %vm525_vm13 = vmor %vm523_vm6, %vm524_vm7 }
  0x22   : > { %v1607_v22 = vrot.slane %v1580_v12, %v1585_v15  ;;  %v1611_v23 = vrot.slane %v1583_v14, %v1585_v15  ;;  %v464_v52 = vrot.slane %v456_v16, %v1585_v15  ;;  %v1663_v0 = vrot.slane %v457_v17, %v1585_v15  ;;  %vm527_vm15 = vmor %vm525_vm13, %vm526_vm9 }
  0x23   : > { %v1615_v24 = vcombine.high %v1591_v18, %v1591_v18  ;;  %v1619_v25 = vcombine.high %v1595_v19, %v1595_v19  ;;  %v1623_v26 = vcombine.high %v1599_v20, %v1599_v20  ;;  %v1627_v27 = vcombine.high %v1603_v21, %v1603_v21  ;;  %vm1697_vm0 = vmor %vm527_vm15, %vm528_vm14 }
  0x24   : > { %v330_v28 = vshrl.u32 %v1591_v18, 16  ;;  %v333_v29 = vshll.u32 %v1591_v18, 16  ;;  %v344_v30 = vshrl.u32 %v1595_v19, 16  ;;  %v347_v31 = vshll.u32 %v1595_v19, 16 }
  0x25   : > { %v339_v32 = vshll.u32 %v1615_v24, 16  ;;  %v353_v33 = vshll.u32 %v1619_v25, 16  ;;  %v358_v34 = vshrl.u32 %v1599_v20, 16  ;;  %v361_v35 = vshll.u32 %v1599_v20, 16 }
  0x26   : > { %v332_v36 = vrot.slane %v330_v28, 6  ;;  %v335_v37 = vrot.slane %v333_v29, 7  ;;  %v346_v38 = vrot.slane %v344_v30, 6  ;;  %v349_v39 = vrot.slane %v347_v31, 7  ;;  %v1427_v29 = vld [vmem:[%s1542_s28 + $0x18] sm:$0xff]  }
  0x27   : > { %v341_v40 = vrot.slane %v339_v32, 7  ;;  %v355_v41 = vrot.slane %v353_v33, 7  ;;  %v360_v42 = vrot.slane %v358_v34, 6  ;;  %v363_v43 = vrot.slane %v361_v35, 7 }
  0x28   : > { %v336_v44 = vor.u32 %v335_v37, %v332_v36  ;;  %v350_v45 = vor.u32 %v349_v39, %v346_v38  ;;  %v367_v46 = vshll.u32 %v1623_v26, 16  ;;  %v372_v47 = vshrl.u32 %v1603_v21, 16 }
  0x29   : > { %v364_v49 = vor.u32 %v363_v43, %v360_v42  ;;  %v375_v50 = vshll.u32 %v1603_v21, 16  ;;  %v381_v51 = vshll.u32 %v1627_v27, 16  ;;  %v1652_v56 = vcombine.high %v1607_v22, %v1607_v22 }
  0x2a   : > { %v337_v53 = vrot.slane %v336_v44, 2  ;;  %v351_v54 = vrot.slane %v350_v45, 2  ;;  %v374_v55 = vrot.slane %v372_v47, 6  ;;  %v369_v58 = vrot.slane %v367_v46, 7  ;;  %v1426_v47 = vld [vmem:[%s1542_s28 + $0x10] sm:$0xff]  }
  0x2b   : > { %v365_v57 = vrot.slane %v364_v49, 2  ;;  %v377_v59 = vrot.slane %v375_v50, 7  ;;  %v700_v60 = vshrl.u32 %v1607_v22, 16  ;;  %v703_v63 = vshll.u32 %v1607_v22, 16 }
  0x2c   : > { %v342_v61 = vsel %vm1643_vm12, %v337_v53, %v341_v40  ;;  %v1659_v62 = vsel %vm1643_vm12, %v351_v54, %v355_v41  ;;  %v383_v3 = vrot.slane %v381_v51, 7  ;;  %v709_v7 = vshll.u32 %v1652_v56, 16 }
  0x2d   : > { %v378_v1 = vor.u32 %v377_v59, %v374_v55  ;;  %v702_v4 = vrot.slane %v700_v60, 6  ;;  %v388_v5 = vcombine.low %v342_v61, %v1659_v62  ;;  %v705_v6 = vrot.slane %v703_v63, 7 }
  0x2e   : > { %v1671_v8 = vcombine.high %v1611_v23, %v1611_v23  ;;  %v1675_v13 = vsel %vm1643_vm12, %v365_v57, %v369_v58  ;;  %v935_v17 = vshrl.u32 %v1611_v23, 16  ;;  %v938_v28 = vshll.u32 %v1611_v23, 16  ;;  %v1431_v58 = vld [vmem:[%s1542_s28 + $0x28] sm:$0xff]  }
  0x2f   : > { %v379_v16 = vrot.slane %v378_v1, 2  ;;  %v706_v30 = vor.u32 %v705_v6, %v702_v4  ;;  %v472_v31 = vcombine.low %v464_v52, %v1663_v0  ;;  %v622_v32 = vcombine.low %v1571_v9, %v1574_v10  ;;  %v1430_v6 = vld [vmem:[%s1542_s28 + $0x20] sm:$0xff]  }
  0x30   : > { %v623_v33 = vcombine.low %v1577_v11, %v1580_v12  ;;  %v937_v35 = vrot.slane %v935_v17, 6  ;;  %v940_v36 = vrot.slane %v938_v28, 7  ;;  %v1263_v37 = vrot.slane %v1591_v18, 9  ;;  %v1433_v28 = vld [vmem:[%s1542_s28 + $0x38] sm:$0xff]  }
  0x31   : > { %v1688_v34 = vsel %vm1643_vm12, %v379_v16, %v383_v3  ;;  %v396_v39 = vrot.slane %v388_v5, %v1585_v15  ;;  %v711_v40 = vrot.slane %v709_v7, 7  ;;  %v944_v9 = vshll.u32 %v1671_v8, 16  ;;  %1330 = vmatmul.mubr.msk.bf16.vlgmr.msra.gmra.mxu1 %vm411_vm11, %v472_v31 }
  0x32   : > { %v389_v38 = vcombine.low %v1675_v13, %v1688_v34  ;;  %v707_v11 = vrot.slane %v706_v30, 2  ;;  %1340 = vmatpush3.bf16.msra.mxu1 %v1427_v29  ;;  %1341 = vmatprep.mubr.msk.bf16.mxu1 %vm1477_vm1, %v1476_v2  ;;  %v532_v18 = vrot.slane %v1615_v24, 7  ;;  %v1264_v41 = vrot.slane %v1595_v19, 9 }
  0x33   : > { %v536_v42 = vrot.slane %v1619_v25, 7  ;;  %v941_v44 = vor.u32 %v940_v36, %v937_v35  ;;  %v1265_v45 = vrot.slane %v1599_v20, 9  ;;  %v540_v46 = vrot.slane %v1623_v26, 7  ;;  %1351 = vmatprep.subr.bf16.mxu1 %v1476_v2 }
  0x34   : > { %v403_v43 = vrot.slane %v389_v38, %v1585_v15  ;;  %v533_v49 = vsel %vm1697_vm0, %v1263_v37, %v532_v18  ;;  %v1266_v50 = vrot.slane %v1603_v21, 9  ;;  %v544_v20 = vrot.slane %v1627_v27, 7 }
  0x35   : > { %v537_v24 = vsel %vm1697_vm0, %v1264_v41, %v536_v42  ;;  %v541_v25 = vsel %vm1697_vm0, %v1265_v45, %v540_v46  ;;  %v630_v26 = vrot.slane %v622_v32, %v1585_v15  ;;  %v637_v52 = vrot.slane %v623_v33, %v1585_v15  ;;  %v1432_v33 = vld [vmem:[%s1542_s28 + $0x30] sm:$0xff]  }
  0x36   : > { %v404_v19 = vcombine.low %v396_v39, %v403_v43  ;;  %v549_v51 = vcombine.low %v533_v49, %v537_v24  ;;  %v712_v53 = vsel %vm1643_vm12, %v707_v11, %v711_v40  ;;  %v942_v54 = vrot.slane %v941_v44, 2 }
  0x37   : > { %v946_v55 = vrot.slane %v944_v9, 7  ;;  %v545_v57 = vsel %vm1697_vm0, %v1266_v50, %v544_v20  ;;  %v638_v59 = vcombine.low %v630_v26, %v637_v52  ;;  %v1279_v60 = vrot.slane %v1607_v22, 9 }
  0x38   : > { %1324 = vmatmul.mubr.msk.bf16.vlgmr.msra.gmra.mxu0 %vm411_vm11, %v404_v19  ;;  %v550_v21 = vcombine.low %v541_v25, %v545_v57  ;;  %v557_v27 = vrot.slane %v549_v51, %v1585_v15  ;;  %v787_v61 = vrot.slane %v1652_v56, 7  ;;  %v792_v63 = vcombine.low %v537_v24, %v541_v25 }
  0x39   : > { %1334 = vmatpush3.bf16.msra.mxu0 %v1426_v47  ;;  %1335 = vmatprep.mubr.msk.bf16.mxu0 %vm1477_vm1, %v1476_v2  ;;  %v716_v1 = vcombine.low %v1659_v62, %v1675_v13  ;;  %v717_v4 = vcombine.low %v1688_v34, %v712_v53  ;;  %v947_v5 = vsel %vm1643_vm12, %v942_v54, %v946_v55  ;;  %v1292_v34 = vrot.slane %v1611_v23, 9 }
  0x3a   : > { %1345 = vmatprep.subr.bf16.mxu0 %v1476_v2  ;;  %v564_v3 = vrot.slane %v550_v21, %v1585_v15  ;;  %1342 = vmatmul.mubr.msk.bf16.vlgmr.msra.gmra.mxu1 %vm411_vm11, %v638_v59  ;;  %v788_v22 = vsel %vm1697_vm0, %v1279_v60, %v787_v61  ;;  %v800_v7 = vrot.slane %v792_v63, %v1585_v15  ;;  %v1014_v35 = vrot.slane %v1671_v8, 7  ;;  %v1434_v8 = vld [vmem:[%s1542_s28 + $0x40] sm:$0xff]  }
  0x3b   : > { %1352 = vmatpush3.bf16.msra.mxu1 %v1431_v58  ;;  %1353 = vmatprep.mubr.msk.bf16.mxu1 %vm1477_vm1, %v1476_v2  ;;  %v793_v62 = vcombine.low %v545_v57, %v788_v22  ;;  %v951_v13 = vcombine.low %v712_v53, %v947_v5  ;;  %v724_v48 = vrot.slane %v716_v1, %v1585_v15 }
  0x3c   : > { %v565_v56 = vcombine.low %v557_v27, %v564_v3  ;;  %1363 = vmatprep.subr.bf16.mxu1 %v1476_v2  ;;  %v731_v17 = vrot.slane %v717_v4, %v1585_v15  ;;  %v865_v31 = vcombine.low %v1580_v12, %v1583_v14  ;;  %v1015_v12 = vsel %vm1697_vm0, %v1292_v34, %v1014_v35  ;;  %v1082_v34 = vld [vmem:[%s1552_s9 + $0x8] sm:$0xf] }
  0x3d   : > { %v807_v16 = vrot.slane %v793_v62, %v1585_v15  ;;  %v958_v30 = vrot.slane %v951_v13, %v1585_v15  ;;  %v1019_v23 = vcombine.low %v788_v22, %v1015_v12 }
  0x3e   : > { %v732_v32 = vcombine.low %v724_v48, %v731_v17  ;;  %v872_v37 = vrot.slane %v865_v31, %v1585_v15  ;;  %v1080_v48 = vld [vmem:[%s1552_s9] sm:$0xf] }
  0x3f   : > { %v808_v29 = vcombine.low %v800_v7, %v807_v16  ;;  %v959_v36 = vcombine.low %v403_v43, %v958_v30  ;;  %v1026_v38 = vrot.slane %v1019_v23, %v1585_v15 }
  0x40   : > { %1336 = vmatmul.mubr.msk.bf16.vlgmr.msra.gmra.mxu0 %vm411_vm11, %v565_v56  ;;  %v873_v14 = vcombine.low %v1663_v0, %v872_v37  ;;  %v1083_v37 = vld [vmem:[%s1552_s9 + $0xc] sm:$0xf] }
  0x41   : > { %1346 = vmatpush3.bf16.msra.mxu0 %v1430_v6  ;;  %1347 = vmatprep.mubr.msk.bf16.mxu0 %vm1477_vm1, %v1476_v2  ;;  %v1027_v39 = vcombine.low %v564_v3, %v1026_v38 }
  0x42   : > { %1357 = vmatprep.subr.bf16.mxu0 %v1476_v2  ;;  %1354 = vmatmul.mubr.msk.bf16.vlgmr.msra.gmra.mxu1 %vm411_vm11, %v808_v29 }
  0x43   : > { %1364 = vmatpush3.bf16.msra.mxu1 %v1433_v28  ;;  %1365 = vmatprep.mubr.msk.bf16.mxu1 %vm1477_vm1, %v1476_v2  ;;  %v1081_v28 = vld [vmem:[%s1552_s9 + $0x4] sm:$0xf] }
  0x48   : > { %1348 = vmatmul.mubr.msk.bf16.vlgmr.msra.gmra.mxu0 %vm411_vm11, %v732_v32 }
  0x49   : > { %1358 = vmatpush3.bf16.msra.mxu0 %v1432_v33  ;;  %1359 = vmatprep.mubr.msk.bf16.mxu0 %vm1477_vm1, %v1476_v2 }
  0x4a   : > { %1369 = vmatprep.subr.bf16.mxu0 %v1476_v2  ;;  %1366 = vmatmul.mubr.msk.bf16.vlgmr.msra.gmra.mxu1 %vm411_vm11, %v959_v36 }
  0x50   : > { %1360 = vmatmul.mubr.msk.bf16.vlgmr.msra.gmra.mxu0 %vm411_vm11, %v873_v14 }
  0x51   : > { %1370 = vmatpush3.bf16.msra.mxu0 %v1434_v8  ;;  %1371 = vmatprep.mubr.msk.bf16.mxu0 %vm1477_vm1, %v1476_v2  ;;  %vm1094_vm1 = vcmask 60416  }
  0x58   : > { %1372 = vmatmul.mubr.msk.bf16.vlgmr.msra.gmra.mxu0 %vm411_vm11, %v1027_v39 }
  0xf1   : > { %v516_v40 = vpop.f32.mrf.mxu1 }
  0xf3   : > { %v1331_v9 = vpop.f32.mrf.mxu1 }
  0xf5   : > { %v519_v10 = vpop.f32.mrf.mxu1 }
  0xf7   : > { %v1332_v18 = vpop.f32.mrf.mxu1 }
  0xf8   : > { %v449_v11 = vpop.f32.mrf.mxu0 }
  0xf9   : > { %v517_v2 = vadd.f32 %v516_v40, %v449_v11 }
  0xfa   : > { %v1325_v41 = vpop.f32.mrf.mxu0  ;;  %v682_v0 = vpop.f32.mrf.mxu1 }
  0xfc   : > { %v452_v42 = vpop.f32.mrf.mxu0  ;;  %v1343_v43 = vpop.f32.mrf.mxu1 }
  0xfd   : > { %v520_v26 = vadd.f32 %v519_v10, %v452_v42 }
  0xfe   : > { %v1326_v44 = vpop.f32.mrf.mxu0  ;;  %v685_v45 = vpop.f32.mrf.mxu1 }
 0x100   : > { %v609_v46 = vpop.f32.mrf.mxu0  ;;  %v1344_v15 = vpop.f32.mrf.mxu1 }
 0x101   : > { %v616_v50 = vadd.f32 %v609_v46, %v517_v2 }
 0x102   : > { %v1337_v47 = vpop.f32.mrf.mxu0  ;;  %v852_v49 = vpop.f32.mrf.mxu1 }
 0x103   : > { %v689_v54 = vadd.f32 %v682_v0, %v616_v50 }
 0x104   : > { %v612_v24 = vpop.f32.mrf.mxu0  ;;  %v1355_v19 = vpop.f32.mrf.mxu1 }
 0x105   : > { %v617_v55 = vadd.f32 %v612_v24, %v520_v26 }
 0x106   : > { %v1338_v25 = vpop.f32.mrf.mxu0  ;;  %v855_v20 = vpop.f32.mrf.mxu1 }
 0x107   : > { %v690_v60 = vadd.f32 %v685_v45, %v617_v55 }
 0x108   : > { %v776_v51 = vpop.f32.mrf.mxu0  ;;  %v1356_v52 = vpop.f32.mrf.mxu1 }
 0x109   : > { %v783_v21 = vadd.f32 %v776_v51, %v689_v54 }
 0x10a   : > { %v1349_v53 = vpop.f32.mrf.mxu0  ;;  %v1003_v57 = vpop.f32.mrf.mxu1 }
 0x10b   : > { %v859_v1 = vadd.f32 %v852_v49, %v783_v21 }
 0x10c   : > { %v779_v58 = vpop.f32.mrf.mxu0  ;;  %v1367_v27 = vpop.f32.mrf.mxu1 }
 0x10d   : > { %v784_v3 = vadd.f32 %v779_v58, %v690_v60 }
 0x10e   : > { %v1350_v59 = vpop.f32.mrf.mxu0  ;;  %v1006_v61 = vpop.f32.mrf.mxu1 }
 0x10f   : > { %v860_v6 = vadd.f32 %v855_v20, %v784_v3 }
 0x110   : > { %v917_v63 = vpop.f32.mrf.mxu0  ;;  %v1368_v4 = vpop.f32.mrf.mxu1 }
 0x111   : > { %v924_v22 = vadd.f32 %v917_v63, %v859_v1 }
 0x112   : > { %v1361_v5 = vpop.f32.mrf.mxu0 }
 0x113   : > { %v1010_v7 = vadd.f32 %v1003_v57, %v924_v22 }
 0x114   : > { %v920_v56 = vpop.f32.mrf.mxu0 }
 0x115   : > { %v925_v13 = vadd.f32 %v920_v56, %v860_v6 }
 0x116   : > { %v1362_v62 = vpop.f32.mrf.mxu0 }
 0x117   : > { %v1011_v30 = vadd.f32 %v1006_v61, %v925_v13 }
 0x118   : > { %v1071_v16 = vpop.f32.mrf.mxu0 }
 0x119   : > { %v1078_v17 = vadd.f32 %v1071_v16, %v1010_v7 }
 0x11a   : > { %v1373_v29 = vpop.f32.mrf.mxu0 }
 0x11b   : > { %v1086_v31 = vcombine.high %v1078_v17, %v1078_v17  ;;  %v1090_v32 = vadd.f32 %v1080_v48, %v1078_v17 }
 0x11c   : > { %v1074_v33 = vpop.f32.mrf.mxu0 }
 0x11d   : > { %v1091_v35 = vadd.f32 %v1086_v31, %v1081_v28  ;;  %1095 = vst.msk [vmem:[%s1552_s9] sm:$0xf] %vm1094_vm1, %v1090_v32  ;;  %v1079_v36 = vadd.f32 %v1074_v33, %v1011_v30 }
 0x11e   : > { %v1374_v12 = vpop.f32.mrf.mxu0 }
 0x11f   : > { %1096 = vst.msk [vmem:[%s1552_s9 + $0x4] sm:$0xf] %vm1094_vm1, %v1091_v35  ;;  %v1087_v14 = vcombine.high %v1079_v36, %v1079_v36  ;;  %v1092_v23 = vadd.f32 %v1082_v34, %v1079_v36  ;;  %1102 = sbr.rel (%p1297_p9) target bundleno = 306 (0x132), region = 44 }
 0x121   : > { %v1093_v8 = vadd.f32 %v1087_v14, %v1083_v37  ;;  %1097 = vst.msk [vmem:[%s1552_s9 + $0x8] sm:$0xf] %vm1094_vm1, %v1092_v23 }
 0x123   : > { %1098 = vst.msk [vmem:[%s1552_s9 + $0xc] sm:$0xf] %vm1094_vm1, %v1093_v8 }
 0x124   : > { %v1103_v38 = vld [vmem:[%s1552_s9] sm:$0xf] }
 0x125   : > { %v1298_v39 = vld [vmem:[%s1827_s2] ss:$0 sm:$0xff] }
 0x126   : > { %v1299_v40 = vld [vmem:[%s1828_s3] ss:$0 sm:$0xff]  ;;  %v1114_v9 = vmul.f32 %v1298_v39, %v1103_v38  ;;  %v1104_v10 = vld [vmem:[%s1552_s9 + $0x4] sm:$0xf] }
 0x127   : > { %v1115_v41 = vmul.f32 %v1298_v39, %v1104_v10 }
 0x128   : > { %v1105_v11 = vld [vmem:[%s1552_s9 + $0x8] sm:$0xf]  ;;  %v1125_v43 = vadd.f32 %v1299_v40, %v1114_v9 }
 0x129   : > { %v1116_v0 = vmul.f32 %v1298_v39, %v1105_v11  ;;  %v1126_v44 = vadd.f32 %v1299_v40, %v1115_v41 }
 0x12a   : > { %v1106_v18 = vld [vmem:[%s1552_s9 + $0xc] sm:$0xf]  ;;  %v1129_v15 = vmax.f32 %v1125_v43, 0.0 }
 0x12b   : > { %v1117_v42 = vmul.f32 %v1298_v39, %v1106_v18  ;;  %v1127_v45 = vadd.f32 %v1299_v40, %v1116_v0  ;;  %v1130_v47 = vmax.f32 %v1126_v44, 0.0 }
 0x12c   : > { %1133 = vst.msk [vmem:[%s1552_s9] sm:$0xf] %vm1094_vm1, %v1129_v15 }
 0x12d   : > { %v1128_v46 = vadd.f32 %v1299_v40, %v1117_v42  ;;  %v1131_v49 = vmax.f32 %v1127_v45, 0.0  ;;  %1134 = vst.msk [vmem:[%s1552_s9 + $0x4] sm:$0xf] %vm1094_vm1, %v1130_v47 }
 0x12f   : > { %v1132_v24 = vmax.f32 %v1128_v46, 0.0  ;;  %1135 = vst.msk [vmem:[%s1552_s9 + $0x8] sm:$0xf] %vm1094_vm1, %v1131_v49 }
 0x131   : > { %1136 = vst.msk [vmem:[%s1552_s9 + $0xc] sm:$0xf] %vm1094_vm1, %v1132_v24 }
 0x132 PF: > { %s14_s19 = sadd.s32 1, %s1473_s19   ;;  %s1834_s15 = smov %s1465_s17 }
 0x133   : > { %p11_p10 = scmp.ge.s32.totalorder %s14_s19, 26   ;;  %s1835_s16 = smov %s1469_s18 }
 0x134   : > { %s1836_s17 = smov %s1839_s20  ;;  %s1837_s18 = smov %s1843_s21 }
 0x135   :  { %13 = sbr.rel (!%p11_p10) target bundleno = 3 (0x3), region = 85 }

// kernel: forward.13
= control target key start
LH: loop header
LB: loop body
LE: loop exit
PB: predicated region body
PF: predicated region fallthrough
CT: control target
= control target key end

     0   :  { %s1939_s15 = smov 0   ;;  %s1941_s16 = smov 0   ;;  %s2396_s0 = inlined_call_operand.vmem [shape: bf16[1,10,10,10,16], index: 0, kind: input, shape index: {}]   ;;  %s2397_s1 = inlined_call_operand.vmem [shape: bf16[3,3,3,16,4], index: 1, kind: input, shape index: {}]   ;;  %s2398_s2 = inlined_call_operand.vmem [shape: f32[1,4], index: 2, kind: input, shape index: {}]   ;;  %s2399_s3 = inlined_call_operand.vmem [shape: f32[1,4], index: 3, kind: input, shape index: {}]   ;;  %s2400_s4 = inlined_call_operand.vmem [shape: f32[1,8,8,8,4], index: 4, kind: output, shape index: {}]  }
   0x1   :  { %s1943_s17 = smov 0   ;;  %s1945_s18 = smov 0  }
   0x2   :  { %s1947_s19 = smov 0  }
   0x3 LB: > { %s26_s20 = sadd.s32 1, %s1903_s17  ;;  %s29_s21 = sadd.s32 1, %s1907_s18  ;;  %s1911_s19 = sphi %s1947_s19, %s14_s19   ;;  %s1907_s18 = sphi %s1945_s18, %s2408_s18   ;;  %s1903_s17 = sphi %s1943_s17, %s2407_s17   ;;  %s1899_s16 = sphi %s1941_s16, %s2406_s16   ;;  %s1895_s15 = sphi %s1939_s15, %s2405_s15  }
   0x4   : > { %p27_p0 = scmp.ge.s32.totalorder %s26_s20, 3  ;;  %p1565_p1 = scmp.ge.s32.totalorder %s1911_s19, 1 }
   0x5   : > { %p203_p2 = scmp.lt.s32.totalorder %s1911_s19, 25 }
   0x6   : > { %s2410_s20 = smov (%p27_p0, %s26_s20), 0  ;;  %s2412_s21 = smov (!%p27_p0, %s29_s21), %s1907_s18 }
   0x7   : > { %p204_p3 = pnand %p1565_p1, %p203_p2  ;;  %p31_p4 = scmp.ge.s32.totalorder %s2412_s21, 8 }
   0x8   : > { %s243_s22 = sadd.s32 (!%p204_p3), %s1895_s15, %s1899_s16  ;;  %p254_p5 = scmp.lt.s32.totalorder (!%p204_p3), %s1895_s15, 2 }
   0x9   : > { %s2414_s21 = smov (%p31_p4, %s2412_s21), 0  ;;  %207 = sbr.rel (%p204_p3) target bundleno = 340 (0x154), region = 36 }
   0xa   : > { %p246_p6 = scmp.lt.s32.totalorder (!%p204_p3), %s243_s22, 9  ;;  %p261_p7 = scmp.lt.s32.totalorder (!%p204_p3), %s1899_s16, 7 }
   0xb   : > { %p1570_p8 = scmp.ne.s32.totalorder (!%p204_p3), %s1895_s15, 0 }
   0xe   : > { %s255_s23 = scalar_select %p254_p5, %s1895_s15, 2 }
   0xf   : > { %s2416_s22 = smov (!%p246_p6, %s243_s22), 9  ;;  %s2418_s16 = smov (!%p261_p7, %s1899_s16), 7 }
  0x10   : > { %s1813_s24 = smul.u32 72, %s255_s23  ;;  %s1674_s6 = sshll.u32 %s2418_s16, 6 }
  0x11   : > { %s1812_s25 = smul.u32 80, %s2416_s22  ;;  %s1987_s9 = scalar_lea.vmem %s2400_s4, %s1674_s6 }
  0x12   : > { %s1977_s28 = scalar_lea.vmem %s2397_s1, %s1813_s24  ;;  %272 = sbr.rel (%p1570_p8) target bundleno = 28 (0x1c), region = 40 }
  0x13   : > { %s1982_s5 = scalar_lea.vmem %s2396_s0, %s1812_s25 }
  0x17   : > { %vm273_vm0 = vcmask 31744   ;;  %v1913_v0 = vmov 0.0  }
  0x18   : > { %274 = vst.msk [vmem:[%s1987_s9] sm:$0xff] %vm273_vm0, %v1913_v0  ;;  %275 = vst.msk [vmem:[%s1987_s9 + $0x8] sm:$0xff] %vm273_vm0, %v1913_v0 }
  0x19   : > { %276 = vst.msk [vmem:[%s1987_s9 + $0x10] sm:$0xff] %vm273_vm0, %v1913_v0  ;;  %277 = vst.msk [vmem:[%s1987_s9 + $0x18] sm:$0xff] %vm273_vm0, %v1913_v0 }
  0x1a   : > { %278 = vst.msk [vmem:[%s1987_s9 + $0x20] sm:$0xff] %vm273_vm0, %v1913_v0  ;;  %279 = vst.msk [vmem:[%s1987_s9 + $0x28] sm:$0xff] %vm273_vm0, %v1913_v0 }
  0x1b   : > { %280 = vst.msk [vmem:[%s1987_s9 + $0x30] sm:$0xff] %vm273_vm0, %v1913_v0  ;;  %281 = vst.msk [vmem:[%s1987_s9 + $0x38] sm:$0xff] %vm273_vm0, %v1913_v0 }
  0x1c PF: > { %v1855_v1 = vld [vmem:[%s1977_s28 + $0x8] sm:$0xff]   ;;  %v2000_v2 = vld [vmem:[%s1982_s5] sm:$0xf]  ;;  %v2003_v3 = vld [vmem:[%s1982_s5 + $0x4] sm:$0x1]  ;;  %vm440_vm4 = vcmask 130048  }
  0x1d   : > { %v2006_v4 = vld [vmem:[%s1982_s5 + $0x8] sm:$0xf]  ;;  %1810 = vmatprep.subr.bf16.mxu1 %v1855_v1  ;;  %1720 = vmatprep.subr.bf16.mxu0 %v1855_v1  ;;  %v2009_v5 = vld [vmem:[%s1982_s5 + $0xc] sm:$0x1]  ;;  %v2012_v6 = vld [vmem:[%s1982_s5 + $0x10] sm:$0xf] }
  0x1e   : > { %1811 = vmatpush3.bf16.msra.mxu1 %v1855_v1  ;;  %1721 = vmatpush3.bf16.msra.mxu0 %v1855_v1  ;;  %vm304_vm1 = vsmask.f32 3328  ;;  %vm305_vm2 = vsmask.f32 7440  ;;  %v308_v7 = vshrl.u32 %v2000_v2, 16  ;;  %v311_v8 = vshll.u32 %v2000_v2, 16 }
  0x1f   : > { %v2017_v9 = vld [vmem:[%s1982_s5 + $0x14] sm:$0x1]  ;;  %v317_v10 = vshll.u32 %v2003_v3, 16  ;;  %v322_v11 = vshrl.u32 %v2006_v4, 16  ;;  %v325_v12 = vshll.u32 %v2006_v4, 16  ;;  %v331_v13 = vshll.u32 %v2009_v5, 16  ;;  %vm2034_vm3 = vmor %vm304_vm1, %vm305_vm2 }
  0x20   : > { %v310_v14 = vrot.slane %v308_v7, 4  ;;  %v313_v15 = vrot.slane %v311_v8, 5  ;;  %v336_v16 = vshrl.u32 %v2012_v6, 16  ;;  %v339_v17 = vshll.u32 %v2012_v6, 16  ;;  %v2027_v25 = vld [vmem:[%s1982_s5 + $0x18] sm:$0xf] }
  0x21   : > { %v319_v18 = vrot.slane %v317_v10, 5  ;;  %v324_v19 = vrot.slane %v322_v11, 4  ;;  %v327_v20 = vrot.slane %v325_v12, 5  ;;  %v345_v24 = vshll.u32 %v2017_v9, 16  ;;  %v2030_v26 = vld [vmem:[%s1977_s28] sm:$0xff]   ;;  %v2042_v31 = vld [vmem:[%s1977_s28 + $0x10] sm:$0xff]  }
  0x22   : > { %v314_v21 = vor.u32 %v313_v15, %v310_v14  ;;  %v338_v22 = vrot.slane %v336_v16, 4  ;;  %v341_v23 = vrot.slane %v339_v17, 5  ;;  %v333_v29 = vrot.slane %v331_v13, 5  ;;  %v2039_v30 = vld [vmem:[%s1982_s5 + $0x1c] sm:$0x1]  ;;  %1730 = vmatprep.subr.bf16.mxu1 %v2030_v26  ;;  %1740 = vmatprep.subr.bf16.mxu0 %v2042_v31  ;;  %p1669_p9 = scmp.ne.s32.totalorder %s1895_s15, 2 }
  0x23   : > { %v328_v28 = vor.u32 %v327_v20, %v324_v19  ;;  %v347_v34 = vrot.slane %v345_v24, 5  ;;  %v2045_v35 = vld [vmem:[%s1982_s5 + $0x20] sm:$0xf]  ;;  %v2048_v36 = vld [vmem:[%s1982_s5 + $0x24] sm:$0x1]  ;;  %v350_v40 = vshrl.u32 %v2027_v25, 16 }
  0x24   : > { %v315_v32 = vrot.slane %v314_v21, 4  ;;  %v342_v33 = vor.u32 %v341_v23, %v338_v22  ;;  %v2052_v38 = vld [vmem:[%s1982_s5 + $0x28] sm:$0xf]  ;;  %v2055_v39 = vld [vmem:[%s1982_s5 + $0x2c] sm:$0x1]  ;;  %v353_v44 = vshll.u32 %v2027_v25, 16 }
  0x25   : > { %v329_v37 = vrot.slane %v328_v28, 4  ;;  %v2062_v43 = vld [vmem:[%s1982_s5 + $0x30] sm:$0xf]  ;;  %v359_v45 = vshll.u32 %v2039_v30, 16  ;;  %v352_v47 = vrot.slane %v350_v40, 4  ;;  %v364_v48 = vshrl.u32 %v2045_v35, 16 }
  0x26   : > { %v320_v41 = vsel %vm2034_vm3, %v315_v32, %v319_v18  ;;  %v343_v42 = vrot.slane %v342_v33, 4  ;;  %v367_v49 = vshll.u32 %v2045_v35, 16  ;;  %v634_v52 = vrot.slane %v2003_v3, 5  ;;  %v2079_v53 = vld [vmem:[%s1982_s5 + $0x34] sm:$0x1]  ;;  %v1861_v40 = vld [vmem:[%s1977_s28 + $0x20] sm:$0xff]  }
  0x27   : > { %v2068_v46 = vsel %vm2034_vm3, %v329_v37, %v333_v29  ;;  %v355_v54 = vrot.slane %v353_v44, 5  ;;  %v2082_v55 = vld [vmem:[%s1982_s5 + $0x38] sm:$0xf]  ;;  %v361_v56 = vrot.slane %v359_v45, 5  ;;  %v366_v57 = vrot.slane %v364_v48, 4 }
  0x28   : > { %v2074_v50 = vsel %vm2034_vm3, %v343_v42, %v347_v34  ;;  %v1573_v51 = vcombine.low %v320_v41, %v2068_v46  ;;  %v369_v58 = vrot.slane %v367_v49, 5  ;;  %v373_v59 = vshll.u32 %v2048_v36, 16  ;;  %v2087_v60 = vld [vmem:[%s1982_s5 + $0x3c] sm:$0x1] }
  0x29   : > { %v356_v61 = vor.u32 %v355_v54, %v352_v47  ;;  %v378_v62 = vshrl.u32 %v2052_v38, 16  ;;  %v381_v63 = vshll.u32 %v2052_v38, 16  ;;  %v387_v0 = vshll.u32 %v2055_v39, 16 }
  0x2a   : > { %1722 = vmatprep.mubr.msk.bf16.mxu0 %vm440_vm4, %v1573_v51  ;;  %v370_v1 = vor.u32 %v369_v58, %v366_v57  ;;  %v375_v7 = vrot.slane %v373_v59, 5  ;;  %v392_v8 = vshrl.u32 %v2062_v43, 16  ;;  %v395_v10 = vshll.u32 %v2062_v43, 16 }
  0x2b   : > { %v357_v11 = vrot.slane %v356_v61, 4  ;;  %v380_v12 = vrot.slane %v378_v62, 4  ;;  %v383_v13 = vrot.slane %v381_v63, 5  ;;  %v389_v14 = vrot.slane %v387_v0, 5 }
  0x2c   : > { %v371_v15 = vrot.slane %v370_v1, 4  ;;  %v394_v16 = vrot.slane %v392_v8, 4  ;;  %v397_v17 = vrot.slane %v395_v10, 5  ;;  %v401_v18 = vshll.u32 %v2079_v53, 16 }
  0x2d   : > { %v2097_v19 = vsel %vm2034_vm3, %v357_v11, %v361_v56  ;;  %v384_v20 = vor.u32 %v383_v13, %v380_v12  ;;  %v406_v21 = vshrl.u32 %v2082_v55, 16  ;;  %v409_v22 = vshll.u32 %v2082_v55, 16 }
  0x2e   : > { %v2103_v23 = vsel %vm2034_vm3, %v371_v15, %v375_v7  ;;  %v398_v24 = vor.u32 %v397_v17, %v394_v16  ;;  %v403_v28 = vrot.slane %v401_v18, 5  ;;  %v415_v29 = vshll.u32 %v2087_v60, 16  ;;  %v1859_v7 = vld [vmem:[%s1977_s28 + $0x18] sm:$0xff]   ;;  %v1867_v17 = vld [vmem:[%s1977_s28 + $0x30] sm:$0xff]  }
  0x2f   : > { %v385_v32 = vrot.slane %v384_v20, 4  ;;  %v408_v33 = vrot.slane %v406_v21, 4  ;;  %v411_v34 = vrot.slane %v409_v22, 5  ;;  %v2108_v37 = vcombine.low %v2074_v50, %v2097_v19 }
  0x30   : > { %v638_v41 = vrot.slane %v2009_v5, 5  ;;  %v642_v42 = vrot.slane %v2017_v9, 5  ;;  %v399_v44 = vrot.slane %v398_v24, 4  ;;  %v417_v45 = vrot.slane %v415_v29, 5  ;;  %v1865_v24 = vld [vmem:[%s1977_s28 + $0x28] sm:$0xff]  }
  0x31   : > { %v2115_v47 = vsel %vm2034_vm3, %v385_v32, %v389_v14  ;;  %v412_v48 = vor.u32 %v411_v34, %v408_v33  ;;  %v646_v49 = vrot.slane %v2039_v30, 5  ;;  %v650_v51 = vrot.slane %v2048_v36, 5  ;;  %1723 = vmatmul.mubr.msk.bf16.vlgmr.msra.gmra.mxu0 %vm440_vm4, %v2108_v37  ;;  %v299_v34 = vld [vmem:[%s1982_s5 + $0x44] sm:$0x1] }
  0x32   : > { %v2123_v54 = vcombine.low %v2103_v23, %v2115_v47  ;;  %v654_v5 = vrot.slane %v2055_v39, 5  ;;  %1741 = vmatpush3.bf16.msra.mxu0 %v2042_v31  ;;  %vm629_vm5 = vcmask 1042432   ;;  %v2129_v9 = vsel %vm2034_vm3, %v399_v44, %v403_v28 }
  0x33   : > { %v413_v56 = vrot.slane %v412_v48, 4  ;;  %vm630_vm6 = vcmask 1046532   ;;  %v1591_v30 = vrot.slane %v2000_v2, 9  ;;  %1760 = vmatprep.subr.bf16.mxu0 %v1861_v40  ;;  %v1592_v31 = vrot.slane %v2006_v4, 9 }
  0x34   : > { %1726 = vmatprep.mubr.msk.bf16.mxu1 %vm440_vm4, %v2123_v54  ;;  %vm2134_vm7 = vmor %vm629_vm5, %vm630_vm6  ;;  %v1593_v39 = vrot.slane %v2012_v6, 9  ;;  %v1594_v57 = vrot.slane %v2027_v25, 9  ;;  %v1595_v58 = vrot.slane %v2045_v35, 9  ;;  %v1582_v61 = vcombine.low %v2000_v2, %v2006_v4 }
  0x35   : > { %v2144_v59 = vsel %vm2034_vm3, %v413_v56, %v417_v45  ;;  %v635_v62 = vsel %vm2134_vm7, %v1591_v30, %v634_v52  ;;  %v1596_v63 = vrot.slane %v2052_v38, 9  ;;  %v2159_v1 = vsel %vm2134_vm7, %v1592_v31, %v638_v41 }
  0x36   : > { %v2155_v0 = vcombine.low %v2129_v9, %v2144_v59  ;;  %v2164_v2 = vsel %vm2134_vm7, %v1593_v39, %v642_v42  ;;  %v2168_v3 = vsel %vm2134_vm7, %v1594_v57, %v646_v49  ;;  %v1601_v52 = vcombine.low %v635_v62, %v2159_v1  ;;  %v1871_v49 = vld [vmem:[%s1977_s28 + $0x40] sm:$0xff]  }
  0x37   : > { %v2173_v8 = vcombine.low %v2164_v2, %v2168_v3  ;;  %v2177_v10 = vsel %vm2134_vm7, %v1595_v58, %v650_v51  ;;  %v2181_v11 = vsel %vm2134_vm7, %v1596_v63, %v654_v5  ;;  %v658_v12 = vrot.slane %v2079_v53, 5  ;;  %v2197_v53 = vld [vmem:[%s1982_s5 + $0x40] sm:$0xf] }
  0x38   : > { %1727 = vmatmul.mubr.msk.bf16.vlgmr.msra.gmra.mxu1 %vm440_vm4, %v2155_v0  ;;  %v2188_v13 = vcombine.low %v2177_v10, %v2181_v11  ;;  %v1597_v14 = vrot.slane %v2062_v43, 9  ;;  %v1598_v15 = vrot.slane %v2082_v55, 9  ;;  %v662_v16 = vrot.slane %v2087_v60, 5  ;;  %1742 = vmatprep.mubr.msk.bf16.mxu0 %vm440_vm4, %v1601_v52 }
  0x39   : > { %1731 = vmatpush3.bf16.msra.mxu1 %v2030_v26  ;;  %1732 = vmatprep.mubr.msk.bf16.mxu1 %vm440_vm4, %v1582_v61  ;;  %v1583_v18 = vcombine.low %v2012_v6, %v2027_v25  ;;  %v871_v20 = vshrl.u32 %v2197_v53, 16  ;;  %v874_v21 = vshll.u32 %v2197_v53, 16  ;;  %v1584_v22 = vcombine.low %v2045_v35, %v2052_v38 }
  0x3a   : > { %1750 = vmatprep.subr.bf16.mxu1 %v1859_v7  ;;  %1743 = vmatmul.mubr.msk.bf16.vlgmr.msra.gmra.mxu0 %vm440_vm4, %v2173_v8  ;;  %v659_v26 = vsel %vm2134_vm7, %v1597_v14, %v658_v12  ;;  %v2210_v60 = vsel %vm2134_vm7, %v1598_v15, %v662_v16  ;;  %v1623_v29 = vcombine.low %v2068_v46, %v2074_v50  ;;  %v880_v46 = vshll.u32 %v299_v34, 16 }
  0x3b   : > { %1761 = vmatpush3.bf16.msra.mxu0 %v1861_v40  ;;  %1746 = vmatprep.mubr.msk.bf16.mxu0 %vm440_vm4, %v2188_v13  ;;  %v2218_v28 = vcombine.low %v659_v26, %v2210_v60  ;;  %v873_v32 = vrot.slane %v871_v20, 4  ;;  %v876_v33 = vrot.slane %v874_v21, 5  ;;  %v1585_v40 = vcombine.low %v2062_v43, %v2082_v55 }
  0x3c   : > { %1780 = vmatprep.subr.bf16.mxu0 %v1867_v17  ;;  %v1612_v50 = vcombine.low %v2006_v4, %v2012_v6  ;;  %v1624_v42 = vcombine.low %v2097_v19, %v2103_v23  ;;  %v1625_v44 = vcombine.low %v2115_v47, %v2129_v9  ;;  %v882_v48 = vrot.slane %v880_v46, 5  ;;  %v1870_v19 = vld [vmem:[%s1977_s28 + $0x38] sm:$0xff]  }
  0x3d   : > { %v877_v41 = vor.u32 %v876_v33, %v873_v32  ;;  %v1613_v51 = vcombine.low %v2027_v25, %v2045_v35  ;;  %v1614_v6 = vcombine.low %v2052_v38, %v2062_v43  ;;  %v1615_v25 = vcombine.low %v2082_v55, %v2197_v53  ;;  %v300_v43 = vld [vmem:[%s1982_s5 + $0x48] sm:$0xf] }
  0x3e   : > { %v1635_v35 = vcombine.low %v2159_v1, %v2164_v2  ;;  %v1636_v38 = vcombine.low %v2168_v3, %v2177_v10  ;;  %v1637_v55 = vcombine.low %v2181_v11, %v659_v26  ;;  %v1632_v47 = vrot.slane %v2197_v53, 9 }
  0x3f   : > { %v878_v45 = vrot.slane %v877_v41, 4  ;;  %v986_v5 = vrot.slane %v299_v34, 5  ;;  %v1646_v9 = vcombine.low %v2197_v53, %v300_v43  ;;  %v1176_v30 = vshrl.u32 %v300_v43, 16 }
  0x40   : > { %1733 = vmatmul.mubr.msk.bf16.vlgmr.msra.gmra.mxu1 %vm440_vm4, %v1583_v18  ;;  %v1179_v31 = vshll.u32 %v300_v43, 16  ;;  %v1660_v61 = vrot.slane %v300_v43, 9  ;;  %vm1384_vm8 = vcmask 31744  }
  0x41   : > { %1751 = vmatpush3.bf16.msra.mxu1 %v1859_v7  ;;  %1736 = vmatprep.mubr.msk.bf16.mxu1 %vm440_vm4, %v1584_v22  ;;  %v883_v4 = vsel %vm2034_vm3, %v878_v45, %v882_v48  ;;  %v987_v56 = vsel %vm2134_vm7, %v1632_v47, %v986_v5  ;;  %v1178_v57 = vrot.slane %v1176_v30, 4 }
  0x42   : > { %1770 = vmatprep.subr.bf16.mxu1 %v1865_v24  ;;  %1747 = vmatmul.mubr.msk.bf16.gmra.mxu0 %vm440_vm4, %v2218_v28  ;;  %v1626_v23 = vcombine.low %v2144_v59, %v883_v4  ;;  %v1638_v39 = vcombine.low %v2210_v60, %v987_v56  ;;  %v1181_v58 = vrot.slane %v1179_v31, 5  ;;  %v301_v59 = vld [vmem:[%s1982_s5 + $0x4c] sm:$0x1] }
  0x43   : > { %1762 = vmatprep.mubr.msk.bf16.mxu0 %vm440_vm4, %v1623_v29  ;;  %v1279_v62 = vrot.slane %v301_v59, 5  ;;  %v1185_v1 = vshll.u32 %v301_v59, 16 }
  0x44   : > { %v1182_v63 = vor.u32 %v1181_v58, %v1178_v57 }
  0x45   : > { %v1280_v7 = vsel %vm2134_vm7, %v1660_v61, %v1279_v62  ;;  %v1187_v3 = vrot.slane %v1185_v1, 5 }
  0x46   : > { %v1183_v2 = vrot.slane %v1182_v63, 4  ;;  %v1663_v52 = vcombine.low %v987_v56, %v1280_v7 }
  0x48   : > { %1737 = vmatmul.mubr.msk.bf16.gmra.mxu1 %vm440_vm4, %v1585_v40 }
  0x49   : > { %1752 = vmatprep.mubr.msk.bf16.mxu1 %vm440_vm4, %v1612_v50 }
  0x4a   : > { %1763 = vmatmul.mubr.msk.bf16.vlgmr.msra.gmra.mxu0 %vm440_vm4, %v1624_v42 }
  0x4b   : > { %1781 = vmatpush3.bf16.msra.mxu0 %v1867_v17  ;;  %1766 = vmatprep.mubr.msk.bf16.mxu0 %vm440_vm4, %v1625_v44 }
  0x4c   : > { %1800 = vmatprep.subr.bf16.mxu0 %v1871_v49 }
  0x50   : > { %1753 = vmatmul.mubr.msk.bf16.vlgmr.msra.gmra.mxu1 %vm440_vm4, %v1613_v51 }
  0x51   : > { %1771 = vmatpush3.bf16.msra.mxu1 %v1865_v24  ;;  %1756 = vmatprep.mubr.msk.bf16.mxu1 %vm440_vm4, %v1614_v6 }
  0x52   : > { %1790 = vmatprep.subr.bf16.mxu1 %v1870_v19  ;;  %1767 = vmatmul.mubr.msk.bf16.gmra.mxu0 %vm440_vm4, %v1626_v23 }
  0x53   : > { %1782 = vmatprep.mubr.msk.bf16.mxu0 %vm440_vm4, %v1583_v18 }
  0x58   : > { %1757 = vmatmul.mubr.msk.bf16.gmra.mxu1 %vm440_vm4, %v1615_v25 }
  0x59   : > { %1772 = vmatprep.mubr.msk.bf16.mxu1 %vm440_vm4, %v1635_v35 }
  0x5a   : > { %1783 = vmatmul.mubr.msk.bf16.vlgmr.msra.gmra.mxu0 %vm440_vm4, %v1584_v22 }
  0x5b   : > { %1801 = vmatpush3.bf16.msra.mxu0 %v1871_v49  ;;  %1786 = vmatprep.mubr.msk.bf16.mxu0 %vm440_vm4, %v1585_v40 }
  0x60   : > { %1773 = vmatmul.mubr.msk.bf16.vlgmr.msra.gmra.mxu1 %vm440_vm4, %v1636_v38 }
  0x61   : > { %1791 = vmatpush3.bf16.msra.mxu1 %v1870_v19  ;;  %1776 = vmatprep.mubr.msk.bf16.mxu1 %vm440_vm4, %v1637_v55 }
  0x62   : > { %1787 = vmatmul.mubr.msk.bf16.gmra.mxu0 %vm440_vm4, %v1646_v9 }
  0x63   : > { %1802 = vmatprep.mubr.msk.bf16.mxu0 %vm440_vm4, %v2173_v8 }
  0x68   : > { %1777 = vmatmul.mubr.msk.bf16.gmra.mxu1 %vm440_vm4, %v1638_v39 }
  0x69   : > { %1792 = vmatprep.mubr.msk.bf16.mxu1 %vm440_vm4, %v2108_v37  ;;  %v1188_v37 = vsel %vm2034_vm3, %v1183_v2, %v1187_v3 }
  0x6a   : > { %1803 = vmatmul.mubr.msk.bf16.vlgmr.msra.gmra.mxu0 %vm440_vm4, %v2188_v13  ;;  %v1654_v8 = vcombine.low %v883_v4, %v1188_v37 }
  0x6b   : > { %1806 = vmatprep.mubr.msk.bf16.mxu0 %vm440_vm4, %v2218_v28 }
  0x70   : > { %1793 = vmatmul.mubr.msk.bf16.vlgmr.msra.gmra.mxu1 %vm440_vm4, %v2123_v54 }
  0x71   : > { %1796 = vmatprep.mubr.msk.bf16.mxu1 %vm440_vm4, %v2155_v0 }
  0x72   : > { %1807 = vmatmul.mubr.msk.bf16.gmra.mxu0 %vm440_vm4, %v1663_v52 }
  0x78   : > { %1797 = vmatmul.mubr.msk.bf16.gmra.mxu1 %vm440_vm4, %v1654_v8 }
  0xf1   : > { %v1724_v10 = vpop.f32.mrf.mxu0 }
  0xf3   : > { %v487_v36 = vpop.f32.mrf.mxu0 }
  0xf5   : > { %v1725_v11 = vpop.f32.mrf.mxu0 }
  0xf7   : > { %v490_v12 = vpop.f32.mrf.mxu0 }
  0xf8   : > { %v1728_v13 = vpop.f32.mrf.mxu1 }
  0xfa   : > { %v503_v14 = vpop.f32.mrf.mxu1  ;;  %v1744_v15 = vpop.f32.mrf.mxu0 }
  0xfc   : > { %v1729_v16 = vpop.f32.mrf.mxu1  ;;  %v731_v54 = vpop.f32.mrf.mxu0 }
  0xfe   : > { %v2293_v17 = vpop.f32.mrf.mxu1  ;;  %v1745_v0 = vpop.f32.mrf.mxu0 }
 0x100   : > { %v1734_v53 = vpop.f32.mrf.mxu1  ;;  %v734_v27 = vpop.f32.mrf.mxu0 }
 0x101   : > { %v599_v43 = vadd.f32 %v1734_v53, %v1724_v10 }
 0x102   : > { %v590_v18 = vpop.f32.mrf.mxu1  ;;  %v1748_v26 = vpop.f32.mrf.mxu0 }
 0x103   : > { %v591_v5 = vadd.f32 %v590_v18, %v487_v36  ;;  %v764_v30 = vadd.f32 %v1744_v15, %v599_v43 }
 0x104   : > { %v1735_v60 = vpop.f32.mrf.mxu1  ;;  %v747_v20 = vpop.f32.mrf.mxu0 }
 0x105   : > { %v602_v31 = vadd.f32 %v1735_v60, %v1725_v11  ;;  %v762_v58 = vadd.f32 %v731_v54, %v591_v5 }
 0x106   : > { %v593_v21 = vpop.f32.mrf.mxu1  ;;  %v2295_v22 = vpop.f32.mrf.mxu0 }
 0x107   : > { %v594_v59 = vadd.f32 %v593_v21, %v490_v12  ;;  %v765_v7 = vadd.f32 %v1745_v0, %v602_v31 }
 0x108   : > { %v1738_v24 = vpop.f32.mrf.mxu1  ;;  %v2297_v28 = vpop.f32.mrf.mxu0 }
 0x109   : > { %v615_v63 = vadd.f32 %v1738_v24, %v1728_v13  ;;  %v763_v8 = vadd.f32 %v734_v27, %v594_v59 }
 0x10a   : > { %v606_v29 = vpop.f32.mrf.mxu1  ;;  %v1764_v32 = vpop.f32.mrf.mxu0 }
 0x10b   : > { %v607_v52 = vadd.f32 %v606_v29, %v503_v14  ;;  %v768_v15 = vadd.f32 %v1748_v26, %v615_v63  ;;  %v1371_v63 = vld [vmem:[%s1987_s9 + $0x18] sm:$0xff] }
 0x10c   : > { %v1739_v33 = vpop.f32.mrf.mxu1  ;;  %v944_v34 = vpop.f32.mrf.mxu0 }
 0x10d   : > { %v618_v53 = vadd.f32 %v1739_v33, %v1729_v16  ;;  %v766_v13 = vadd.f32 %v747_v20, %v607_v52 }
 0x10e   : > { %v609_v40 = vpop.f32.mrf.mxu1  ;;  %v1765_v41 = vpop.f32.mrf.mxu0 }
 0x10f   : > { %v610_v0 = vadd.f32 %v609_v40, %v2293_v17  ;;  %v769_v27 = vadd.f32 %v2295_v22, %v618_v53  ;;  %v1374_v53 = vld [vmem:[%s1987_s9 + $0x30] sm:$0xff] }
 0x110   : > { %v1754_v46 = vpop.f32.mrf.mxu1  ;;  %v947_v50 = vpop.f32.mrf.mxu0 }
 0x111   : > { %v864_v61 = vadd.f32 %v1754_v46, %v764_v30 }
 0x112   : > { %v831_v42 = vpop.f32.mrf.mxu1  ;;  %v1768_v44 = vpop.f32.mrf.mxu0 }
 0x113   : > { %v862_v2 = vadd.f32 %v831_v42, %v762_v58  ;;  %v977_v10 = vadd.f32 %v1764_v32, %v864_v61 }
 0x114   : > { %v1755_v45 = vpop.f32.mrf.mxu1  ;;  %v2299_v48 = vpop.f32.mrf.mxu0 }
 0x115   : > { %v865_v36 = vadd.f32 %v1755_v45, %v765_v7  ;;  %v975_v12 = vadd.f32 %v944_v34, %v862_v2 }
 0x116   : > { %v834_v49 = vpop.f32.mrf.mxu1  ;;  %v2301_v51 = vpop.f32.mrf.mxu0 }
 0x117   : > { %v863_v18 = vadd.f32 %v834_v49, %v763_v8  ;;  %v978_v42 = vadd.f32 %v1765_v41, %v865_v36  ;;  %v767_v49 = vadd.f32 %v2297_v28, %v610_v0 }
 0x118   : > { %v1758_v4 = vpop.f32.mrf.mxu1  ;;  %v2303_v6 = vpop.f32.mrf.mxu0 }
 0x119   : > { %v868_v24 = vadd.f32 %v1758_v4, %v768_v15  ;;  %v976_v26 = vadd.f32 %v947_v50, %v863_v18 }
 0x11a   : > { %v847_v19 = vpop.f32.mrf.mxu1  ;;  %v1784_v23 = vpop.f32.mrf.mxu0 }
 0x11b   : > { %v866_v32 = vadd.f32 %v847_v19, %v766_v13  ;;  %v981_v43 = vadd.f32 %v1768_v44, %v868_v24 }
 0x11c   : > { %v1759_v25 = vpop.f32.mrf.mxu1  ;;  %v1136_v35 = vpop.f32.mrf.mxu0 }
 0x11d   : > { %v869_v20 = vadd.f32 %v1759_v25, %v769_v27  ;;  %v979_v5 = vadd.f32 %v2299_v48, %v866_v32  ;;  %v1368_v25 = vld [vmem:[%s1987_s9] sm:$0xff] }
 0x11e   : > { %v850_v38 = vpop.f32.mrf.mxu1  ;;  %v1785_v55 = vpop.f32.mrf.mxu0 }
 0x11f   : > { %v867_v22 = vadd.f32 %v850_v38, %v767_v49  ;;  %v982_v28 = vadd.f32 %v2301_v51, %v869_v20 }
 0x120   : > { %v1774_v47 = vpop.f32.mrf.mxu1  ;;  %v2305_v9 = vpop.f32.mrf.mxu0 }
 0x121   : > { %v1081_v60 = vadd.f32 %v1774_v47, %v977_v10  ;;  %v980_v61 = vadd.f32 %v2303_v6, %v867_v22 }
 0x122   : > { %v1048_v56 = vpop.f32.mrf.mxu1  ;;  %v2307_v39 = vpop.f32.mrf.mxu0 }
 0x123   : > { %v1079_v14 = vadd.f32 %v1048_v56, %v975_v12  ;;  %v1169_v16 = vadd.f32 %v1784_v23, %v1081_v60  ;;  %v1370_v56 = vld [vmem:[%s1987_s9 + $0x10] sm:$0xff] }
 0x124   : > { %v1775_v57 = vpop.f32.mrf.mxu1  ;;  %v2309_v62 = vpop.f32.mrf.mxu0 }
 0x125   : > { %v1082_v33 = vadd.f32 %v1775_v57, %v978_v42  ;;  %v1167_v17 = vadd.f32 %v1136_v35, %v1079_v14 }
 0x126   : > { %v1051_v1 = vpop.f32.mrf.mxu1  ;;  %v2311_v3 = vpop.f32.mrf.mxu0 }
 0x127   : > { %v1080_v40 = vadd.f32 %v1051_v1, %v976_v26  ;;  %v1170_v50 = vadd.f32 %v1785_v55, %v1082_v33 }
 0x128   : > { %v1778_v37 = vpop.f32.mrf.mxu1  ;;  %v2313_v11 = vpop.f32.mrf.mxu0 }
 0x129   : > { %v1085_v19 = vadd.f32 %v1778_v37, %v981_v43  ;;  %v1168_v58 = vadd.f32 %v2305_v9, %v1080_v40  ;;  %v1369_v37 = vld [vmem:[%s1987_s9 + $0x8] sm:$0xff] }
 0x12a   : > { %v1064_v54 = vpop.f32.mrf.mxu1  ;;  %v1804_v21 = vpop.f32.mrf.mxu0 }
 0x12b   : > { %v1083_v44 = vadd.f32 %v1064_v54, %v979_v5  ;;  %v1173_v55 = vadd.f32 %v2307_v39, %v1085_v19 }
 0x12c   : > { %v1779_v46 = vpop.f32.mrf.mxu1  ;;  %v1329_v29 = vpop.f32.mrf.mxu0 }
 0x12d   : > { %v1086_v51 = vadd.f32 %v1779_v46, %v982_v28  ;;  %v1171_v9 = vadd.f32 %v2309_v62, %v1083_v44 }
 0x12e   : > { %v1067_v45 = vpop.f32.mrf.mxu1  ;;  %v1805_v34 = vpop.f32.mrf.mxu0 }
 0x12f   : > { %v1084_v36 = vadd.f32 %v1067_v45, %v980_v61  ;;  %v1174_v12 = vadd.f32 %v2311_v3, %v1086_v51  ;;  %v1375_v3 = vld [vmem:[%s1987_s9 + $0x38] sm:$0xff] }
 0x130   : > { %v1794_v47 = vpop.f32.mrf.mxu1  ;;  %v1332_v4 = vpop.f32.mrf.mxu0 }
 0x131   : > { %v1270_v41 = vadd.f32 %v1794_v47, %v1169_v16  ;;  %v1172_v24 = vadd.f32 %v2313_v11, %v1084_v36  ;;  %v1373_v16 = vld [vmem:[%s1987_s9 + $0x28] sm:$0xff] }
 0x132   : > { %v1237_v30 = vpop.f32.mrf.mxu1  ;;  %v1808_v57 = vpop.f32.mrf.mxu0 }
 0x133   : > { %v1362_v23 = vadd.f32 %v1804_v21, %v1270_v41  ;;  %v1268_v31 = vadd.f32 %v1237_v30, %v1167_v17  ;;  %v1372_v21 = vld [vmem:[%s1987_s9 + $0x20] sm:$0xff] }
 0x134   : > { %v1795_v35 = vpop.f32.mrf.mxu1  ;;  %v1345_v10 = vpop.f32.mrf.mxu0 }
 0x135   : > { %v1378_v48 = vadd.f32 %v1370_v56, %v1362_v23  ;;  %v1360_v38 = vadd.f32 %v1329_v29, %v1268_v31  ;;  %v1271_v59 = vadd.f32 %v1795_v35, %v1170_v50 }
 0x136   : > { %v1240_v1 = vpop.f32.mrf.mxu1  ;;  %v1809_v0 = vpop.f32.mrf.mxu0 }
 0x137   : > { %1387 = vst.msk [vmem:[%s1987_s9 + $0x10] sm:$0xff] %vm1384_vm8, %v1378_v48  ;;  %v1376_v7 = vadd.f32 %v1368_v25, %v1360_v38  ;;  %v1363_v2 = vadd.f32 %v1805_v34, %v1271_v59  ;;  %v1269_v52 = vadd.f32 %v1240_v1, %v1168_v58 }
 0x138   : > { %v1798_v8 = vpop.f32.mrf.mxu1  ;;  %v1348_v26 = vpop.f32.mrf.mxu0 }
 0x139   : > { %1385 = vst.msk [vmem:[%s1987_s9] sm:$0xff] %vm1384_vm8, %v1376_v7  ;;  %v1379_v6 = vadd.f32 %v1371_v63, %v1363_v2  ;;  %v1361_v39 = vadd.f32 %v1332_v4, %v1269_v52  ;;  %v1274_v15 = vadd.f32 %v1798_v8, %v1173_v55 }
 0x13a   : > { %v1253_v54 = vpop.f32.mrf.mxu1 }
 0x13b   : > { %1388 = vst.msk [vmem:[%s1987_s9 + $0x18] sm:$0xff] %vm1384_vm8, %v1379_v6  ;;  %v1377_v62 = vadd.f32 %v1369_v37, %v1361_v39  ;;  %v1366_v18 = vadd.f32 %v1808_v57, %v1274_v15  ;;  %v1272_v60 = vadd.f32 %v1253_v54, %v1171_v9 }
 0x13c   : > { %v1799_v13 = vpop.f32.mrf.mxu1 }
 0x13d   : > { %1386 = vst.msk [vmem:[%s1987_s9 + $0x8] sm:$0xff] %vm1384_vm8, %v1377_v62  ;;  %v1382_v46 = vadd.f32 %v1374_v53, %v1366_v18  ;;  %v1364_v42 = vadd.f32 %v1345_v10, %v1272_v60  ;;  %v1275_v14 = vadd.f32 %v1799_v13, %v1174_v12 }
 0x13e   : > { %v1256_v29 = vpop.f32.mrf.mxu1 }
 0x13f   : > { %1391 = vst.msk [vmem:[%s1987_s9 + $0x30] sm:$0xff] %vm1384_vm8, %v1382_v46  ;;  %v1380_v27 = vadd.f32 %v1372_v21, %v1364_v42  ;;  %v1367_v32 = vadd.f32 %v1809_v0, %v1275_v14  ;;  %v1273_v45 = vadd.f32 %v1256_v29, %v1172_v24 }
 0x141   : > { %1389 = vst.msk [vmem:[%s1987_s9 + $0x20] sm:$0xff] %vm1384_vm8, %v1380_v27  ;;  %v1383_v33 = vadd.f32 %v1375_v3, %v1367_v32  ;;  %v1365_v11 = vadd.f32 %v1348_v26, %v1273_v45  ;;  %1396 = sbr.rel (%p1669_p9) target bundleno = 340 (0x154), region = 44 }
 0x143   : > { %1392 = vst.msk [vmem:[%s1987_s9 + $0x38] sm:$0xff] %vm1384_vm8, %v1383_v33  ;;  %v1381_v34 = vadd.f32 %v1373_v16, %v1365_v11 }
 0x145   : > { %1390 = vst.msk [vmem:[%s1987_s9 + $0x28] sm:$0xff] %vm1384_vm8, %v1381_v34 }
 0x146   : > { %v1397_v49 = vld [vmem:[%s1987_s9] sm:$0xff]  ;;  %v1398_v17 = vld [vmem:[%s1987_s9 + $0x8] sm:$0xff]  ;;  %v1399_v40 = vld [vmem:[%s1987_s9 + $0x10] sm:$0xff] }
 0x147   : > { %v1670_v43 = vld [vmem:[%s2398_s2] ss:$0 sm:$0xff]  ;;  %v1400_v41 = vld [vmem:[%s1987_s9 + $0x18] sm:$0xff]  ;;  %v1403_v30 = vld [vmem:[%s1987_s9 + $0x30] sm:$0xff] }
 0x148   : > { %v1671_v20 = vld [vmem:[%s2399_s3] ss:$0 sm:$0xff]  ;;  %v1412_v47 = vmul.f32 %v1670_v43, %v1397_v49  ;;  %v1413_v4 = vmul.f32 %v1670_v43, %v1398_v17  ;;  %v1414_v5 = vmul.f32 %v1670_v43, %v1399_v40  ;;  %v1415_v22 = vmul.f32 %v1670_v43, %v1400_v41 }
 0x149   : > { %v1401_v19 = vld [vmem:[%s1987_s9 + $0x20] sm:$0xff]  ;;  %v1418_v28 = vmul.f32 %v1670_v43, %v1403_v30 }
 0x14a   : > { %v1427_v50 = vadd.f32 %v1671_v20, %v1412_v47  ;;  %v1416_v23 = vmul.f32 %v1670_v43, %v1401_v19  ;;  %v1404_v44 = vld [vmem:[%s1987_s9 + $0x38] sm:$0xff]  ;;  %v1428_v25 = vadd.f32 %v1671_v20, %v1413_v4  ;;  %v1429_v35 = vadd.f32 %v1671_v20, %v1414_v5 }
 0x14b   : > { %v1430_v57 = vadd.f32 %v1671_v20, %v1415_v22  ;;  %v1419_v58 = vmul.f32 %v1670_v43, %v1404_v44  ;;  %v1433_v61 = vadd.f32 %v1671_v20, %v1418_v28 }
 0x14c   : > { %v1402_v56 = vld [vmem:[%s1987_s9 + $0x28] sm:$0xff]  ;;  %v1435_v48 = vmax.f32 %v1427_v50, 0.0  ;;  %v1431_v38 = vadd.f32 %v1671_v20, %v1416_v23  ;;  %v1436_v55 = vmax.f32 %v1428_v25, 0.0  ;;  %v1437_v63 = vmax.f32 %v1429_v35, 0.0 }
 0x14d   : > { %v1417_v31 = vmul.f32 %v1670_v43, %v1402_v56  ;;  %v1438_v1 = vmax.f32 %v1430_v57, 0.0  ;;  %v1434_v51 = vadd.f32 %v1671_v20, %v1419_v58  ;;  %v1441_v52 = vmax.f32 %v1433_v61, 0.0 }
 0x14e   : > { %1443 = vst.msk [vmem:[%s1987_s9] sm:$0xff] %vm1384_vm8, %v1435_v48  ;;  %v1439_v7 = vmax.f32 %v1431_v38, 0.0  ;;  %1444 = vst.msk [vmem:[%s1987_s9 + $0x8] sm:$0xff] %vm1384_vm8, %v1436_v55 }
 0x14f   : > { %v1432_v59 = vadd.f32 %v1671_v20, %v1417_v31  ;;  %1445 = vst.msk [vmem:[%s1987_s9 + $0x10] sm:$0xff] %vm1384_vm8, %v1437_v63  ;;  %1446 = vst.msk [vmem:[%s1987_s9 + $0x18] sm:$0xff] %vm1384_vm8, %v1438_v1  ;;  %v1442_v9 = vmax.f32 %v1434_v51, 0.0 }
 0x150   : > { %1447 = vst.msk [vmem:[%s1987_s9 + $0x20] sm:$0xff] %vm1384_vm8, %v1439_v7  ;;  %1449 = vst.msk [vmem:[%s1987_s9 + $0x30] sm:$0xff] %vm1384_vm8, %v1441_v52 }
 0x151   : > { %v1440_v2 = vmax.f32 %v1432_v59, 0.0  ;;  %1450 = vst.msk [vmem:[%s1987_s9 + $0x38] sm:$0xff] %vm1384_vm8, %v1442_v9 }
 0x153   : > { %1448 = vst.msk [vmem:[%s1987_s9 + $0x28] sm:$0xff] %vm1384_vm8, %v1440_v2 }
 0x154 PF: > { %s14_s19 = sadd.s32 1, %s1911_s19   ;;  %s2405_s15 = smov %s1903_s17 }
 0x155   : > { %p11_p10 = scmp.ge.s32.totalorder %s14_s19, 26   ;;  %s2406_s16 = smov %s1907_s18 }
 0x156   : > { %s2407_s17 = smov %s2410_s20  ;;  %s2408_s18 = smov %s2414_s21 }
 0x157   :  { %13 = sbr.rel (!%p11_p10) target bundleno = 3 (0x3), region = 85 }

// kernel: tile.10
= control target key start
LH: loop header
LB: loop body
LE: loop exit
PB: predicated region body
PF: predicated region fallthrough
CT: control target
= control target key end

     0   :  { %s22_s0 = inlined_call_operand.vmem [shape: f32[2], index: 0, kind: input, shape index: {}]   ;;  %s23_s1 = inlined_call_operand.vmem [shape: f32[2,1,1,2], index: 1, kind: output, shape index: {}]  }
   0x1   :  { %v4_v0 = vld [vmem:[%s22_s0] ss:$0 sm:$0xff] }
   0x2   :  { %5 = vst [vmem:[%s23_s1] sm:$0x3] %v4_v0 }

// kernel: tile.14
= control target key start
LH: loop header
LB: loop body
LE: loop exit
PB: predicated region body
PF: predicated region fallthrough
CT: control target
= control target key end

     0   :  { %vm8_vm0 = vcmask 15360   ;;  %vm14_vm1 = vcmask 31760   ;;  %s42_s0 = inlined_call_operand.vmem [shape: f32[2,1,1,2], index: 0, kind: input, shape index: {}]   ;;  %s43_s1 = inlined_call_operand.vmem [shape: f32[1,4], index: 1, kind: output, shape index: {}]  }
   0x1   :  { %v5_v0 = vld [vmem:[%s42_s0] sm:$0x3]  ;;  %s25_s0 = smov 2  }
   0x2   :  { %6 = vst [vmem:[#allocation1] sm:$0x3] %v5_v0 }
   0x9   :  { %v11_v1 = vld [vmem:[#allocation1 + $0x1] sm:$0x1]   ;;  %v7_v2 = vld [vmem:[#allocation1] sm:$0x1]  }
   0xa   :  { %12 = vrot.lane.b32.xlu0 %v11_v1, %s25_s0  ;;  %9 = vst.msk [vmem:[#allocation0] sm:$0x1] %vm8_vm0, %v7_v2  }
  0x7c   :  { %v13_v3 = vpop.permute.xlu0 %12  }
  0x7d   :  { %15 = vst.msk [vmem:[#allocation0] sm:$0x1] %vm14_vm1, %v13_v3  }
  0x84   :  { %v20_v4 = vld [vmem:[#allocation0] sm:$0x1] }
  0x85   :  { %23 = vst [vmem:[%s43_s1] sm:$0x1] %v20_v4 }

// kernel: forward.15
= control target key start
LH: loop header
LB: loop body
LE: loop exit
PB: predicated region body
PF: predicated region fallthrough
CT: control target
= control target key end

     0   :  { %vm32_vm0 = vcmask 25600   ;;  %vm246_vm1 = vcmask 1041409   ;;  %vm195_vm2 = vcmask 7168   ;;  %vm204_vm3 = vcmask 9216   ;;  %s1209_s0 = inlined_call_operand.vmem [shape: f32[8,2,4], index: 0, kind: input, shape index: {}]   ;;  %s1210_s2 = inlined_call_operand.vmem [shape: f32[8,2,4,4], index: 2, kind: input, shape index: {}]   ;;  %s1211_s1 = inlined_call_operand.vmem [shape: f32[2,4], index: 1, kind: input, shape index: {}]   ;;  %s1212_s3 = inlined_call_operand.vmem [shape: f32[8,2,2], index: 3, kind: output, shape index: {0}]   ;;  %s1213_s4 = inlined_call_operand.vmem [shape: f32[8,2,4], index: 4, kind: output, shape index: {1}]  }
   0x1   :  { %v16_v0 = vld [vmem:[%s1209_s0] sm:$0x3]  ;;  %v18_v1 = vld [vmem:[%s1209_s0 + $0x4] sm:$0x3]  ;;  %v17_v2 = vld [vmem:[%s1209_s0 + $0x2] sm:$0x3] }
   0x2   :  { %v24_v3 = vmul.f32 10.0, %v16_v0  ;;  %v26_v4 = vmul.f32 10.0, %v18_v1  ;;  %v25_v5 = vmul.f32 10.0, %v17_v2  ;;  %v19_v6 = vld [vmem:[%s1209_s0 + $0x6] sm:$0x3]  ;;  %vm574_vm4 = vcmask 15360  }
   0x3   :  { %v27_v7 = vmul.f32 10.0, %v19_v6  ;;  %v20_v8 = vld [vmem:[%s1209_s0 + $0x8] sm:$0x3]  ;;  %v21_v9 = vld [vmem:[%s1209_s0 + $0xa] sm:$0x3]  ;;  %vm583_vm5 = vcmask 23552  }
   0x4   :  { %v33_v10 = vsel %vm32_vm0, %v24_v3, -inf  ;;  %v39_v11 = vsel %vm32_vm0, %v26_v4, -inf  ;;  %v36_v12 = vsel %vm32_vm0, %v25_v5, -inf  ;;  %v28_v14 = vmul.f32 10.0, %v20_v8  ;;  %v22_v16 = vld [vmem:[%s1209_s0 + $0xc] sm:$0x3] }
   0x5   :  { %34 = vmax.xlane.f32.xlu0 %v33_v10  ;;  %40 = vmax.xlane.f32.xlu1 %v39_v11  ;;  %v42_v13 = vsel %vm32_vm0, %v27_v7, -inf  ;;  %v29_v15 = vmul.f32 10.0, %v21_v9  ;;  %v23_v17 = vld [vmem:[%s1209_s0 + $0xe] sm:$0x3]  ;;  %v30_v20 = vmul.f32 10.0, %v22_v16 }
   0x6   :  { %v45_v18 = vsel %vm32_vm0, %v28_v14, -inf  ;;  %v31_v21 = vmul.f32 10.0, %v23_v17  ;;  %v487_v0 = vld [vmem:[%s1210_s2 + $0x27] sm:$0x1]  ;;  %v486_v1 = vld [vmem:[%s1210_s2 + $0x23] sm:$0x1] }
   0x7   :  { %v48_v19 = vsel %vm32_vm0, %v29_v15, -inf  ;;  %v51_v22 = vsel %vm32_vm0, %v30_v20, -inf  ;;  %v518_v2 = vrot.slane %v487_v0, 7  ;;  %v490_v8 = vld [vmem:[%s1210_s2 + $0x33] sm:$0x1] }
   0x8   :  { %v54_v23 = vsel %vm32_vm0, %v31_v21, -inf  ;;  %v493_v11 = vld [vmem:[%s1210_s2 + $0x3f] sm:$0x1]  ;;  %v484_v0 = vld [vmem:[%s1210_s2 + $0x1b] sm:$0x1] }
   0x9   :  { %37 = vmax.xlane.f32.xlu0 %v36_v12  ;;  %43 = vmax.xlane.f32.xlu1 %v42_v13  ;;  %v524_v13 = vrot.slane %v493_v11, 7 }
   0xd   :  { %46 = vmax.xlane.f32.xlu0 %v45_v18  ;;  %49 = vmax.xlane.f32.xlu1 %v48_v19 }
  0x11   :  { %52 = vmax.xlane.f32.xlu0 %v51_v22  ;;  %55 = vmax.xlane.f32.xlu1 %v54_v23 }
  0x8e   :  { %v35_v24 = vpop.xlane.xlu0 %34  ;;  %v41_v25 = vpop.xlane.xlu1 %40 }
  0x8f   :  { %v57_v26 = vsub.f32 %v24_v3, %v35_v24  ;;  %v59_v27 = vsub.f32 %v26_v4, %v41_v25  ;;  %v489_v3 = vld [vmem:[%s1210_s2 + $0x2f] sm:$0x1]  ;;  %v491_v4 = vld [vmem:[%s1210_s2 + $0x37] sm:$0x1]  ;;  %v608_v24 = vld [vmem:[%s1211_s1] ss:$0 sm:$0xff] }
  0x90   :  { %v520_v6 = vrot.slane %v489_v3, 7  ;;  %v522_v10 = vrot.slane %v491_v4, 7 }
  0x91   :  { %v65_v28 = vmul.f32 1.442695, %v57_v26  ;;  %v69_v29 = vmul.f32 1.442695, %v59_v27 }
  0x92   :  { %v38_v30 = vpop.xlane.xlu0 %37  ;;  %v44_v31 = vpop.xlane.xlu1 %43  ;;  %v753_v12 = vsel %vm246_vm1, %v522_v10, %v490_v8  ;;  %v215_v8 = vld [vmem:[%s1210_s2 + $0x8] sm:$0x1] }
  0x93   :  { %610 = vpow2.f32 %v65_v28  ;;  %v58_v32 = vsub.f32 %v25_v5, %v38_v30  ;;  %v60_v33 = vsub.f32 %v27_v7, %v44_v31  ;;  %v738_v5 = vsel %vm246_vm1, %v518_v2, %v486_v1  ;;  %v488_v7 = vld [vmem:[%s1210_s2 + $0x2b] sm:$0x1]  ;;  %v213_v1 = vld [vmem:[%s1210_s2] sm:$0x1] }
  0x94   :  { %612 = vpow2.f32 %v69_v29  ;;  %v747_v9 = vsel %vm246_vm1, %v520_v6, %v488_v7 }
  0x95   :  { %v67_v34 = vmul.f32 1.442695, %v58_v32  ;;  %v71_v35 = vmul.f32 1.442695, %v60_v33 }
  0x96   :  { %v47_v36 = vpop.xlane.xlu0 %46  ;;  %v50_v37 = vpop.xlane.xlu1 %49 }
  0x97   :  { %614 = vpow2.f32 %v67_v34  ;;  %v61_v38 = vsub.f32 %v28_v14, %v47_v36  ;;  %v62_v39 = vsub.f32 %v29_v15, %v50_v37  ;;  %v492_v14 = vld [vmem:[%s1210_s2 + $0x3b] sm:$0x1] }
  0x98   :  { %616 = vpow2.f32 %v71_v35  ;;  %v759_v15 = vsel %vm246_vm1, %v524_v13, %v492_v14  ;;  %v217_v14 = vld [vmem:[%s1210_s2 + $0x10] sm:$0x1] }
  0x99   :  { %v73_v40 = vmul.f32 1.442695, %v61_v38  ;;  %v75_v41 = vmul.f32 1.442695, %v62_v39 }
  0x9a   :  { %v53_v42 = vpop.xlane.xlu0 %52  ;;  %v56_v43 = vpop.xlane.xlu1 %55 }
  0x9b   :  { %618 = vpow2.f32 %v73_v40  ;;  %v63_v44 = vsub.f32 %v30_v20, %v53_v42  ;;  %v64_v45 = vsub.f32 %v31_v21, %v56_v43 }
  0x9c   :  { %620 = vpow2.f32 %v75_v41 }
  0x9d   :  { %v77_v46 = vmul.f32 1.442695, %v63_v44  ;;  %v79_v47 = vmul.f32 1.442695, %v64_v45 }
  0x9f   :  { %622 = vpow2.f32 %v77_v46 }
  0xa0   :  { %v611_v48 = vpop.eup %610  ;;  %624 = vpow2.f32 %v79_v47 }
  0xa1   :  { %v699_v49 = vpop.eup %612  ;;  %v81_v50 = vsel %vm32_vm0, %v611_v48, 0.0 }
  0xa2   :  { %82 = vadd.xlane.f32.xlu0 %v81_v50  ;;  %v87_v51 = vsel %vm32_vm0, %v699_v49, 0.0  ;;  %v797_v50 = vld [vmem:[%s1211_s1 + $0x1] ss:$0 sm:$0xff] }
  0xa4   :  { %v615_v52 = vpop.eup %614 }
  0xa5   :  { %v704_v53 = vpop.eup %616  ;;  %v84_v54 = vsel %vm32_vm0, %v615_v52, 0.0 }
  0xa6   :  { %88 = vadd.xlane.f32.xlu0 %v87_v51  ;;  %85 = vadd.xlane.f32.xlu1 %v84_v54  ;;  %v90_v55 = vsel %vm32_vm0, %v704_v53, 0.0  ;;  %v485_v51 = vld [vmem:[%s1210_s2 + $0x1f] sm:$0x1]  ;;  %v214_v54 = vld [vmem:[%s1210_s2 + $0x4] sm:$0x1] }
  0xa8   :  { %v709_v56 = vpop.eup %618 }
  0xa9   :  { %v711_v57 = vpop.eup %620  ;;  %v93_v58 = vsel %vm32_vm0, %v709_v56, 0.0 }
  0xaa   :  { %91 = vadd.xlane.f32.xlu1 %v90_v55  ;;  %94 = vadd.xlane.f32.xlu0 %v93_v58  ;;  %v96_v59 = vsel %vm32_vm0, %v711_v57, 0.0 }
  0xac   :  { %v717_v60 = vpop.eup %622 }
  0xad   :  { %v719_v61 = vpop.eup %624  ;;  %v99_v62 = vsel %vm32_vm0, %v717_v60, 0.0 }
  0xae   :  { %97 = vadd.xlane.f32.xlu1 %v96_v59  ;;  %100 = vadd.xlane.f32.xlu0 %v99_v62  ;;  %v102_v63 = vsel %vm32_vm0, %v719_v61, 0.0  ;;  %v216_v59 = vld [vmem:[%s1210_s2 + $0xc] sm:$0x1] }
  0xaf   :  { %v248_v4 = vrot.slane %v216_v59, 7  ;;  %v227_v59 = vld [vmem:[%s1210_s2 + $0x38] sm:$0x1] }
  0xb2   :  { %103 = vadd.xlane.f32.xlu1 %v102_v63  ;;  %v245_v63 = vrot.slane %v214_v54, 7 }
  0xb4   :  { %v247_v13 = vsel %vm246_vm1, %v245_v63, %v213_v1  ;;  %v302_v63 = vld [vmem:[%s1210_s2 + $0x1] sm:$0x1] }
 0x12b   :  { %v83_v16 = vpop.xlane.xlu0 %82 }
 0x12c   :  { %626 = vrcp.f32 %v83_v16  ;;  %v220_v16 = vld [vmem:[%s1210_s2 + $0x1c] sm:$0x1] }
 0x12f   :  { %v86_v17 = vpop.xlane.xlu1 %85  ;;  %v89_v18 = vpop.xlane.xlu0 %88 }
 0x130   :  { %628 = vrcp.f32 %v86_v17  ;;  %v222_v17 = vld [vmem:[%s1210_s2 + $0x24] sm:$0x1] }
 0x131   :  { %630 = vrcp.f32 %v89_v18 }
 0x133   :  { %v92_v19 = vpop.xlane.xlu1 %91  ;;  %v95_v20 = vpop.xlane.xlu0 %94 }
 0x134   :  { %632 = vrcp.f32 %v92_v19 }
 0x135   :  { %634 = vrcp.f32 %v95_v20  ;;  %v249_v20 = vsel %vm246_vm1, %v248_v4, %v215_v8  ;;  %v304_v8 = vld [vmem:[%s1210_s2 + $0x9] sm:$0x1] }
 0x137   :  { %v98_v21 = vpop.xlane.xlu1 %97  ;;  %v101_v22 = vpop.xlane.xlu0 %100 }
 0x138   :  { %636 = vrcp.f32 %v98_v21 }
 0x139   :  { %v627_v23 = vpop.eup %626  ;;  %638 = vrcp.f32 %v101_v22 }
 0x13a   :  { %v764_v25 = vmul.f32 %v627_v23, %v611_v48 }
 0x13b   :  { %v104_v26 = vpop.xlane.xlu1 %103 }
 0x13c   :  { %640 = vrcp.f32 %v104_v26  ;;  %v127_v27 = vmul.f32 %v608_v24, %v764_v25  ;;  %v163_v58 = vmul.f32 %v797_v50, %v764_v25  ;;  %v270_v23 = vmul.f32 %v247_v13, %v764_v25  ;;  %v306_v13 = vld [vmem:[%s1210_s2 + $0x11] sm:$0x1] }
 0x13d   :  { %v629_v28 = vpop.eup %628  ;;  %v252_v26 = vrot.slane %v220_v16, 7 }
 0x13e   :  { %v631_v29 = vpop.eup %630  ;;  %v767_v30 = vmul.f32 %v629_v28, %v615_v52  ;;  %v135_v31 = vsel %vm32_vm0, %v127_v27, 0.0  ;;  %v171_v6 = vsel %vm32_vm0, %v163_v58, 0.0  ;;  %v219_v27 = vld [vmem:[%s1210_s2 + $0x18] sm:$0x1]  ;;  %v254_v28 = vrot.slane %v222_v17, 7 }
 0x13f   :  { %v771_v32 = vmul.f32 %v631_v29, %v699_v49  ;;  %136 = vadd.xlane.f32.xlu0 %v135_v31  ;;  %v224_v29 = vld [vmem:[%s1210_s2 + $0x2c] sm:$0x1] }
 0x140   :  { %v128_v33 = vmul.f32 %v608_v24, %v767_v30  ;;  %v164_v3 = vmul.f32 %v797_v50, %v767_v30 }
 0x141   :  { %v633_v34 = vpop.eup %632  ;;  %v129_v35 = vmul.f32 %v608_v24, %v771_v32  ;;  %v165_v7 = vmul.f32 %v797_v50, %v771_v32 }
 0x142   :  { %v635_v36 = vpop.eup %634  ;;  %v776_v37 = vmul.f32 %v633_v34, %v704_v53  ;;  %v138_v38 = vsel %vm32_vm0, %v128_v33, 0.0  ;;  %v174_v18 = vsel %vm32_vm0, %v164_v3, 0.0 }
 0x143   :  { %v780_v39 = vmul.f32 %v635_v36, %v709_v56  ;;  %139 = vadd.xlane.f32.xlu1 %v138_v38  ;;  %v141_v40 = vsel %vm32_vm0, %v129_v35, 0.0  ;;  %v177_v22 = vsel %vm32_vm0, %v165_v7, 0.0  ;;  %v221_v35 = vld [vmem:[%s1210_s2 + $0x20] sm:$0x1]  ;;  %v226_v36 = vld [vmem:[%s1210_s2 + $0x34] sm:$0x1] }
 0x144   :  { %142 = vadd.xlane.f32.xlu0 %v141_v40  ;;  %v130_v41 = vmul.f32 %v608_v24, %v776_v37  ;;  %v166_v19 = vmul.f32 %v797_v50, %v776_v37 }
 0x145   :  { %v637_v42 = vpop.eup %636  ;;  %v131_v43 = vmul.f32 %v608_v24, %v780_v39  ;;  %v864_v31 = vmul.f32 %v738_v5, %v780_v39 }
 0x146   :  { %v639_v44 = vpop.eup %638  ;;  %v786_v45 = vmul.f32 %v637_v42, %v711_v57  ;;  %v144_v46 = vsel %vm32_vm0, %v130_v41, 0.0  ;;  %v180_v38 = vsel %vm32_vm0, %v166_v19, 0.0  ;;  %v253_v41 = vsel %vm246_vm1, %v252_v26, %v219_v27  ;;  %v313_v27 = vld [vmem:[%s1210_s2 + $0x2d] sm:$0x1] }
 0x147   :  { %v790_v47 = vmul.f32 %v639_v44, %v717_v60  ;;  %145 = vadd.xlane.f32.xlu1 %v144_v46  ;;  %v147_v48 = vsel %vm32_vm0, %v131_v43, 0.0  ;;  %v516_v60 = vrot.slane %v485_v51, 7  ;;  %v256_v42 = vrot.slane %v224_v29, 7  ;;  %v228_v46 = vld [vmem:[%s1210_s2 + $0x3c] sm:$0x1] }
 0x148   :  { %148 = vadd.xlane.f32.xlu0 %v147_v48  ;;  %v132_v49 = vmul.f32 %v608_v24, %v786_v45  ;;  %v868_v33 = vmul.f32 %v747_v9, %v786_v45  ;;  %v271_v9 = vmul.f32 %v249_v20, %v767_v30  ;;  %v255_v43 = vsel %vm246_vm1, %v254_v28, %v221_v35  ;;  %v225_v48 = vld [vmem:[%s1210_s2 + $0x30] sm:$0x1]  ;;  %v310_v28 = vld [vmem:[%s1210_s2 + $0x21] sm:$0x1]  ;;  %v315_v29 = vld [vmem:[%s1210_s2 + $0x35] sm:$0x1] }
 0x149   :  { %v641_v52 = vpop.eup %640  ;;  %v133_v53 = vmul.f32 %v608_v24, %v790_v47  ;;  %v517_v11 = vsel %vm246_vm1, %v516_v60, %v484_v0  ;;  %v872_v34 = vmul.f32 %v753_v12, %v790_v47  ;;  %v278_v12 = vsel %vm32_vm0, %v270_v23, 0.0 }
 0x14a   :  { %v807_v55 = vmul.f32 %v641_v52, %v719_v61  ;;  %v150_v56 = vsel %vm32_vm0, %v132_v49, 0.0  ;;  %v218_v61 = vld [vmem:[%s1210_s2 + $0x14] sm:$0x1]  ;;  %v851_v21 = vmul.f32 %v517_v11, %v776_v37  ;;  %v258_v44 = vrot.slane %v226_v36, 7  ;;  %v303_v49 = vld [vmem:[%s1210_s2 + $0x5] sm:$0x1] }
 0x14b   :  { %151 = vadd.xlane.f32.xlu1 %v150_v56  ;;  %v153_v57 = vsel %vm32_vm0, %v133_v53, 0.0  ;;  %v250_v10 = vrot.slane %v218_v61, 7  ;;  %v281_v51 = vsel %vm32_vm0, %v271_v9, 0.0  ;;  %v273_v52 = vmul.f32 %v253_v41, %v776_v37  ;;  %v307_v61 = vld [vmem:[%s1210_s2 + $0x15] sm:$0x1] }
 0x14c   :  { %154 = vadd.xlane.f32.xlu0 %v153_v57  ;;  %v134_v62 = vmul.f32 %v608_v24, %v807_v55  ;;  %v882_v5 = vmul.f32 %v759_v15, %v807_v55  ;;  %v223_v15 = vld [vmem:[%s1210_s2 + $0x28] sm:$0x1]  ;;  %v274_v54 = vmul.f32 %v255_v43, %v780_v39  ;;  %v260_v57 = vrot.slane %v228_v46, 7  ;;  %v309_v11 = vld [vmem:[%s1210_s2 + $0x1d] sm:$0x1] }
 0x14d   :  { %v251_v24 = vsel %vm246_vm1, %v250_v10, %v217_v14  ;;  %v257_v56 = vsel %vm246_vm1, %v256_v42, %v223_v15  ;;  %v259_v58 = vsel %vm246_vm1, %v258_v44, %v225_v48  ;;  %v334_v60 = vrot.slane %v303_v49, 7  ;;  %v311_v14 = vld [vmem:[%s1210_s2 + $0x25] sm:$0x1]  ;;  %v312_v42 = vld [vmem:[%s1210_s2 + $0x29] sm:$0x1] }
 0x14e   :  { %v156_v2 = vsel %vm32_vm0, %v134_v62, 0.0  ;;  %v272_v40 = vmul.f32 %v251_v24, %v771_v32  ;;  %v305_v62 = vld [vmem:[%s1210_s2 + $0xd] sm:$0x1]  ;;  %v287_v0 = vsel %vm32_vm0, %v273_v52, 0.0  ;;  %v275_v1 = vmul.f32 %v257_v56, %v786_v45  ;;  %v308_v24 = vld [vmem:[%s1210_s2 + $0x19] sm:$0x1] }
 0x14f   :  { %157 = vadd.xlane.f32.xlu1 %v156_v2  ;;  %v290_v2 = vsel %vm32_vm0, %v274_v54, 0.0  ;;  %v276_v3 = vmul.f32 %v259_v58, %v790_v47  ;;  %v261_v4 = vsel %vm246_vm1, %v260_v57, %v227_v59  ;;  %v335_v7 = vsel %vm246_vm1, %v334_v60, %v302_v63  ;;  %v317_v15 = vld [vmem:[%s1210_s2 + $0x3d] sm:$0x1]  ;;  %v314_v44 = vld [vmem:[%s1210_s2 + $0x31] sm:$0x1] }
 0x150   :  { %172 = vadd.xlane.f32.xlu0 %v171_v6  ;;  %v284_v53 = vsel %vm32_vm0, %v272_v40, 0.0  ;;  %v336_v6 = vrot.slane %v305_v62, 7  ;;  %v338_v10 = vrot.slane %v307_v61, 7  ;;  %v293_v16 = vsel %vm32_vm0, %v275_v1, 0.0  ;;  %v391_v46 = vld [vmem:[%s1210_s2 + $0x6] sm:$0x1] }
 0x151   :  { %v277_v17 = vmul.f32 %v261_v4, %v807_v55  ;;  %v358_v19 = vmul.f32 %v335_v7, %v764_v25  ;;  %v342_v26 = vrot.slane %v311_v14, 7  ;;  %v344_v40 = vrot.slane %v313_v27, 7  ;;  %v316_v57 = vld [vmem:[%s1210_s2 + $0x39] sm:$0x1]  ;;  %v393_v59 = vld [vmem:[%s1210_s2 + $0xe] sm:$0x1] }
 0x152   :  { %v337_v20 = vsel %vm246_vm1, %v336_v6, %v304_v8  ;;  %v339_v23 = vsel %vm246_vm1, %v338_v10, %v306_v13  ;;  %v346_v43 = vrot.slane %v315_v29, 7  ;;  %v348_v54 = vrot.slane %v317_v15, 7  ;;  %v390_v60 = vld [vmem:[%s1210_s2 + $0x2] sm:$0x1]  ;;  %v395_v62 = vld [vmem:[%s1210_s2 + $0x16] sm:$0x1] }
 0x153   :  { %175 = vadd.xlane.f32.xlu1 %v174_v18  ;;  %v296_v18 = vsel %vm32_vm0, %v276_v3, 0.0  ;;  %v299_v35 = vsel %vm32_vm0, %v277_v17, 0.0  ;;  %v359_v36 = vmul.f32 %v337_v20, %v767_v30  ;;  %v360_v9 = vmul.f32 %v339_v23, %v771_v32  ;;  %v392_v6 = vld [vmem:[%s1210_s2 + $0xa] sm:$0x1]  ;;  %v397_v8 = vld [vmem:[%s1210_s2 + $0x1e] sm:$0x1] }
 0x154   :  { %178 = vadd.xlane.f32.xlu0 %v177_v22  ;;  %v340_v22 = vrot.slane %v309_v11, 7  ;;  %v343_v41 = vsel %vm246_vm1, %v342_v26, %v310_v28  ;;  %v347_v56 = vsel %vm246_vm1, %v346_v43, %v314_v44  ;;  %v422_v58 = vrot.slane %v391_v46, 7  ;;  %v394_v10 = vld [vmem:[%s1210_s2 + $0x12] sm:$0x1]  ;;  %v399_v11 = vld [vmem:[%s1210_s2 + $0x26] sm:$0x1] }
 0x155   :  { %v369_v48 = vsel %vm32_vm0, %v359_v36, 0.0  ;;  %v362_v52 = vmul.f32 %v343_v41, %v780_v39  ;;  %v364_v1 = vmul.f32 %v347_v56, %v790_v47  ;;  %v424_v3 = vrot.slane %v393_v59, 7  ;;  %v398_v26 = vld [vmem:[%s1210_s2 + $0x22] sm:$0x1]  ;;  %v403_v27 = vld [vmem:[%s1210_s2 + $0x36] sm:$0x1] }
 0x156   :  { %v423_v4 = vsel %vm246_vm1, %v422_v58, %v390_v60  ;;  %v426_v7 = vrot.slane %v395_v62, 7  ;;  %v430_v23 = vrot.slane %v399_v11, 7  ;;  %v434_v41 = vrot.slane %v403_v27, 7  ;;  %v402_v43 = vld [vmem:[%s1210_s2 + $0x32] sm:$0x1] }
 0x157   :  { %181 = vadd.xlane.f32.xlu1 %v180_v38  ;;  %v366_v38 = vsel %vm32_vm0, %v358_v19, 0.0  ;;  %v446_v17 = vmul.f32 %v423_v4, %v764_v25  ;;  %v428_v19 = vrot.slane %v397_v8, 7  ;;  %v479_v59 = vld [vmem:[%s1210_s2 + $0x7] sm:$0x1]  ;;  %v480_v11 = vld [vmem:[%s1210_s2 + $0xb] sm:$0x1] }
 0x158   :  { %279 = vadd.xlane.f32.xlu0 %v278_v12  ;;  %v341_v12 = vsel %vm246_vm1, %v340_v22, %v308_v24  ;;  %v427_v20 = vsel %vm246_vm1, %v426_v7, %v394_v10  ;;  %v396_v22 = vld [vmem:[%s1210_s2 + $0x1a] sm:$0x1]  ;;  %v401_v24 = vld [vmem:[%s1210_s2 + $0x2e] sm:$0x1]  ;;  %v169_v7 = vmul.f32 %v797_v50, %v790_v47  ;;  %v563_v27 = vsel %vm32_vm0, %v882_v5, 0.0 }
 0x159   :  { %v361_v49 = vmul.f32 %v341_v12, %v776_v37  ;;  %v448_v36 = vmul.f32 %v427_v20, %v771_v32  ;;  %v431_v12 = vsel %vm246_vm1, %v430_v23, %v398_v26  ;;  %v554_v26 = vsel %vm32_vm0, %v864_v31, 0.0 }
 0x15b   :  { %282 = vadd.xlane.f32.xlu1 %v281_v51  ;;  %v372_v51 = vsel %vm32_vm0, %v360_v9, 0.0  ;;  %v375_v63 = vsel %vm32_vm0, %v361_v49, 0.0  ;;  %v432_v9 = vrot.slane %v401_v24, 7  ;;  %v460_v46 = vsel %vm32_vm0, %v448_v36, 0.0 }
 0x15c   :  { %285 = vadd.xlane.f32.xlu0 %v284_v53  ;;  %v345_v53 = vsel %vm246_vm1, %v344_v40, %v312_v42  ;;  %v400_v40 = vld [vmem:[%s1210_s2 + $0x2a] sm:$0x1]  ;;  %v405_v42 = vld [vmem:[%s1210_s2 + $0x3e] sm:$0x1] }
 0x15d   :  { %v363_v61 = vmul.f32 %v345_v53, %v786_v45  ;;  %v433_v49 = vsel %vm246_vm1, %v432_v9, %v400_v40  ;;  %v404_v53 = vld [vmem:[%s1210_s2 + $0x3a] sm:$0x1] }
 0x15e   :  { %v451_v56 = vmul.f32 %v433_v49, %v786_v45 }
 0x15f   :  { %288 = vadd.xlane.f32.xlu1 %v287_v0  ;;  %v378_v0 = vsel %vm32_vm0, %v362_v52, 0.0  ;;  %v381_v13 = vsel %vm32_vm0, %v363_v61, 0.0  ;;  %v435_v52 = vsel %vm246_vm1, %v434_v41, %v402_v43  ;;  %v167_v61 = vmul.f32 %v797_v50, %v780_v39 }
 0x160   :  { %291 = vadd.xlane.f32.xlu0 %v290_v2  ;;  %v349_v2 = vsel %vm246_vm1, %v348_v54, %v316_v57  ;;  %v452_v57 = vmul.f32 %v435_v52, %v790_v47  ;;  %v469_v60 = vsel %vm32_vm0, %v451_v56, 0.0  ;;  %v189_v47 = vsel %vm32_vm0, %v169_v7, 0.0 }
 0x161   :  { %v365_v14 = vmul.f32 %v349_v2, %v807_v55  ;;  %v478_v2 = vld [vmem:[%s1210_s2 + $0x3] sm:$0x1] }
 0x163   :  { %294 = vadd.xlane.f32.xlu1 %v293_v16  ;;  %v384_v16 = vsel %vm32_vm0, %v364_v1, 0.0  ;;  %v387_v28 = vsel %vm32_vm0, %v365_v14, 0.0  ;;  %v481_v1 = vld [vmem:[%s1210_s2 + $0xf] sm:$0x1]  ;;  %v482_v14 = vld [vmem:[%s1210_s2 + $0x13] sm:$0x1] }
 0x164   :  { %297 = vadd.xlane.f32.xlu0 %v296_v18  ;;  %v425_v18 = vsel %vm246_vm1, %v424_v3, %v392_v6  ;;  %v483_v3 = vld [vmem:[%s1210_s2 + $0x17] sm:$0x1]  ;;  %v168_v6 = vmul.f32 %v797_v50, %v786_v45  ;;  %v512_v8 = vrot.slane %v481_v1, 7 }
 0x165   :  { %v447_v29 = vmul.f32 %v425_v18, %v767_v30 }
 0x166   :  { %v186_v45 = vsel %vm32_vm0, %v168_v6, 0.0  ;;  %v513_v18 = vsel %vm246_vm1, %v512_v8, %v480_v11 }
 0x167   :  { %300 = vadd.xlane.f32.xlu1 %v299_v35  ;;  %v454_v35 = vsel %vm32_vm0, %v446_v17, 0.0  ;;  %v457_v15 = vsel %vm32_vm0, %v447_v29, 0.0 }
 0x168   :  { %367 = vadd.xlane.f32.xlu0 %v366_v38  ;;  %v429_v38 = vsel %vm246_vm1, %v428_v19, %v396_v22  ;;  %v535_v22 = vmul.f32 %v513_v18, %v767_v30  ;;  %v557_v30 = vsel %vm32_vm0, %v868_v33, 0.0 }
 0x169   :  { %v449_v44 = vmul.f32 %v429_v38, %v776_v37 }
 0x16b   :  { %370 = vadd.xlane.f32.xlu1 %v369_v48  ;;  %v450_v48 = vmul.f32 %v431_v12, %v780_v39  ;;  %v463_v54 = vsel %vm32_vm0, %v449_v44, 0.0  ;;  %v183_v39 = vsel %vm32_vm0, %v167_v61, 0.0 }
 0x16c   :  { %373 = vadd.xlane.f32.xlu0 %v372_v51  ;;  %v436_v51 = vrot.slane %v405_v42, 7 }
 0x16d   :  { %v466_v37 = vsel %vm32_vm0, %v450_v48, 0.0 }
 0x16e   :  { %v437_v58 = vsel %vm246_vm1, %v436_v51, %v404_v53 }
 0x16f   :  { %376 = vadd.xlane.f32.xlu1 %v375_v63  ;;  %v453_v62 = vmul.f32 %v437_v58, %v807_v55  ;;  %v472_v63 = vsel %vm32_vm0, %v452_v57, 0.0 }
 0x170   :  { %379 = vadd.xlane.f32.xlu0 %v378_v0  ;;  %v510_v0 = vrot.slane %v479_v59, 7 }
 0x171   :  { %v475_v4 = vsel %vm32_vm0, %v453_v62, 0.0 }
 0x172   :  { %v511_v10 = vsel %vm246_vm1, %v510_v0, %v478_v2 }
 0x173   :  { %382 = vadd.xlane.f32.xlu1 %v381_v13  ;;  %v514_v13 = vrot.slane %v483_v3, 7  ;;  %v534_v17 = vmul.f32 %v511_v10, %v764_v25 }
 0x174   :  { %385 = vadd.xlane.f32.xlu0 %v384_v16  ;;  %v170_v16 = vmul.f32 %v797_v50, %v807_v55  ;;  %v545_v50 = vsel %vm32_vm0, %v535_v22, 0.0  ;;  %v551_v55 = vsel %vm32_vm0, %v851_v21, 0.0 }
 0x175   :  { %v515_v19 = vsel %vm246_vm1, %v514_v13, %v482_v14  ;;  %v542_v23 = vsel %vm32_vm0, %v534_v17, 0.0 }
 0x176   :  { %v192_v20 = vsel %vm32_vm0, %v170_v16, 0.0  ;;  %v536_v24 = vmul.f32 %v515_v19, %v771_v32  ;;  %v560_v32 = vsel %vm32_vm0, %v872_v34, 0.0 }
 0x177   :  { %388 = vadd.xlane.f32.xlu1 %v387_v28 }
 0x178   :  { %455 = vadd.xlane.f32.xlu0 %v454_v35  ;;  %v548_v25 = vsel %vm32_vm0, %v536_v24, 0.0 }
 0x17b   :  { %458 = vadd.xlane.f32.xlu1 %v457_v15 }
 0x17c   :  { %461 = vadd.xlane.f32.xlu0 %v460_v46 }
 0x17f   :  { %464 = vadd.xlane.f32.xlu1 %v463_v54 }
 0x180   :  { %467 = vadd.xlane.f32.xlu0 %v466_v37 }
 0x183   :  { %470 = vadd.xlane.f32.xlu1 %v469_v60 }
 0x184   :  { %473 = vadd.xlane.f32.xlu0 %v472_v63 }
 0x187   :  { %476 = vadd.xlane.f32.xlu1 %v475_v4 }
 0x188   :  { %184 = vadd.xlane.f32.xlu0 %v183_v39 }
 0x18b   :  { %187 = vadd.xlane.f32.xlu1 %v186_v45 }
 0x18c   :  { %190 = vadd.xlane.f32.xlu0 %v189_v47 }
 0x18f   :  { %193 = vadd.xlane.f32.xlu1 %v192_v20 }
 0x190   :  { %543 = vadd.xlane.f32.xlu0 %v542_v23 }
 0x193   :  { %546 = vadd.xlane.f32.xlu1 %v545_v50 }
 0x194   :  { %549 = vadd.xlane.f32.xlu0 %v548_v25 }
 0x197   :  { %552 = vadd.xlane.f32.xlu1 %v551_v55 }
 0x198   :  { %555 = vadd.xlane.f32.xlu0 %v554_v26 }
 0x19b   :  { %558 = vadd.xlane.f32.xlu1 %v557_v30 }
 0x19c   :  { %561 = vadd.xlane.f32.xlu0 %v560_v32 }
 0x19f   :  { %564 = vadd.xlane.f32.xlu1 %v563_v27 }
 0x1c8   :  { %v137_v28 = vpop.xlane.xlu0 %136 }
 0x1cc   :  { %v140_v29 = vpop.xlane.xlu1 %139 }
 0x1cd   :  { %v143_v21 = vpop.xlane.xlu0 %142 }
 0x1d0   :  { %v146_v35 = vpop.xlane.xlu1 %145 }
 0x1d1   :  { %v149_v36 = vpop.xlane.xlu0 %148 }
 0x1d4   :  { %v152_v38 = vpop.xlane.xlu1 %151 }
 0x1d5   :  { %v155_v31 = vpop.xlane.xlu0 %154 }
 0x1d8   :  { %v158_v9 = vpop.xlane.xlu1 %157 }
 0x1d9   :  { %v173_v33 = vpop.xlane.xlu0 %172 }
 0x1da   :  { %v196_v12 = vsel %vm195_vm2, %v137_v28, %v173_v33 }
 0x1db   :  { %205 = vst.msk [vmem:[%s1212_s3] sm:$0x3] %vm204_vm3, %v196_v12 }
 0x1dc   :  { %v176_v34 = vpop.xlane.xlu1 %175 }
 0x1dd   :  { %v197_v5 = vsel %vm195_vm2, %v140_v29, %v176_v34  ;;  %v179_v40 = vpop.xlane.xlu0 %178 }
 0x1de   :  { %206 = vst.msk [vmem:[%s1212_s3 + $0x2] sm:$0x3] %vm204_vm3, %v197_v5  ;;  %v198_v41 = vsel %vm195_vm2, %v143_v21, %v179_v40 }
 0x1df   :  { %207 = vst.msk [vmem:[%s1212_s3 + $0x4] sm:$0x3] %vm204_vm3, %v198_v41 }
 0x1e0   :  { %v182_v42 = vpop.xlane.xlu1 %181 }
 0x1e1   :  { %v199_v43 = vsel %vm195_vm2, %v146_v35, %v182_v42  ;;  %v280_v15 = vpop.xlane.xlu0 %279 }
 0x1e2   :  { %208 = vst.msk [vmem:[%s1212_s3 + $0x6] sm:$0x3] %vm204_vm3, %v199_v43 }
 0x1e4   :  { %v283_v44 = vpop.xlane.xlu1 %282 }
 0x1e5   :  { %v286_v46 = vpop.xlane.xlu0 %285 }
 0x1e8   :  { %v289_v48 = vpop.xlane.xlu1 %288 }
 0x1e9   :  { %v292_v49 = vpop.xlane.xlu0 %291 }
 0x1ec   :  { %v295_v51 = vpop.xlane.xlu1 %294 }
 0x1ed   :  { %v298_v52 = vpop.xlane.xlu0 %297 }
 0x1f0   :  { %v1130_v53 = vpop.xlane.xlu1 %300 }
 0x1f1   :  { %v368_v54 = vpop.xlane.xlu0 %367 }
 0x1f2   :  { %v566_v14 = vsel %vm195_vm2, %v280_v15, %v368_v54 }
 0x1f4   :  { %v371_v56 = vpop.xlane.xlu1 %370 }
 0x1f5   :  { %v374_v37 = vpop.xlane.xlu0 %373  ;;  %v567_v19 = vsel %vm195_vm2, %v283_v44, %v371_v56 }
 0x1f6   :  { %v568_v20 = vsel %vm195_vm2, %v286_v46, %v374_v37 }
 0x1f8   :  { %v377_v57 = vpop.xlane.xlu1 %376 }
 0x1f9   :  { %v380_v58 = vpop.xlane.xlu0 %379  ;;  %v569_v26 = vsel %vm195_vm2, %v289_v48, %v377_v57 }
 0x1fa   :  { %v570_v30 = vsel %vm195_vm2, %v292_v49, %v380_v58 }
 0x1fc   :  { %v383_v59 = vpop.xlane.xlu1 %382 }
 0x1fd   :  { %v386_v60 = vpop.xlane.xlu0 %385 }
 0x200   :  { %v389_v62 = vpop.xlane.xlu1 %388 }
 0x201   :  { %v456_v63 = vpop.xlane.xlu0 %455  ;;  %v573_v40 = vsel %vm195_vm2, %v1130_v53, %v389_v62 }
 0x202   :  { %v575_v16 = vsel %vm574_vm4, %v566_v14, %v456_v63 }
 0x204   :  { %v459_v61 = vpop.xlane.xlu1 %458 }
 0x205   :  { %v462_v0 = vpop.xlane.xlu0 %461  ;;  %v576_v22 = vsel %vm574_vm4, %v567_v19, %v459_v61 }
 0x206   :  { %v577_v24 = vsel %vm574_vm4, %v568_v20, %v462_v0 }
 0x208   :  { %v465_v1 = vpop.xlane.xlu1 %464 }
 0x209   :  { %v468_v2 = vpop.xlane.xlu0 %467  ;;  %v578_v32 = vsel %vm574_vm4, %v569_v26, %v465_v1 }
 0x20a   :  { %v579_v28 = vsel %vm574_vm4, %v570_v30, %v468_v2 }
 0x20c   :  { %v471_v3 = vpop.xlane.xlu1 %470 }
 0x20d   :  { %v474_v4 = vpop.xlane.xlu0 %473 }
 0x210   :  { %v477_v6 = vpop.xlane.xlu1 %476 }
 0x211   :  { %v185_v39 = vpop.xlane.xlu0 %184  ;;  %v582_v41 = vsel %vm574_vm4, %v573_v40, %v477_v6 }
 0x212   :  { %v200_v7 = vsel %vm195_vm2, %v149_v36, %v185_v39  ;;  %v571_v36 = vsel %vm195_vm2, %v295_v51, %v383_v59 }
 0x213   :  { %209 = vst.msk [vmem:[%s1212_s3 + $0x8] sm:$0x3] %vm204_vm3, %v200_v7 }
 0x214   :  { %v188_v8 = vpop.xlane.xlu1 %187 }
 0x215   :  { %v201_v10 = vsel %vm195_vm2, %v152_v38, %v188_v8  ;;  %v191_v11 = vpop.xlane.xlu0 %190  ;;  %v572_v38 = vsel %vm195_vm2, %v298_v52, %v386_v60 }
 0x216   :  { %210 = vst.msk [vmem:[%s1212_s3 + $0xa] sm:$0x3] %vm204_vm3, %v201_v10  ;;  %v202_v13 = vsel %vm195_vm2, %v155_v31, %v191_v11  ;;  %v580_v31 = vsel %vm574_vm4, %v571_v36, %v471_v3  ;;  %v581_v33 = vsel %vm574_vm4, %v572_v38, %v474_v4 }
 0x217   :  { %211 = vst.msk [vmem:[%s1212_s3 + $0xc] sm:$0x3] %vm204_vm3, %v202_v13 }
 0x218   :  { %v194_v45 = vpop.xlane.xlu1 %193 }
 0x219   :  { %v203_v47 = vsel %vm195_vm2, %v158_v9, %v194_v45  ;;  %v544_v17 = vpop.xlane.xlu0 %543 }
 0x21a   :  { %212 = vst.msk [vmem:[%s1212_s3 + $0xe] sm:$0x3] %vm204_vm3, %v203_v47  ;;  %v584_v18 = vsel %vm583_vm5, %v575_v16, %v544_v17 }
 0x21b   :  { %592 = vst.msk [vmem:[%s1213_s4] sm:$0x3] %vm32_vm0, %v584_v18 }
 0x21c   :  { %v547_v23 = vpop.xlane.xlu1 %546 }
 0x21d   :  { %v585_v50 = vsel %vm583_vm5, %v576_v22, %v547_v23  ;;  %v550_v25 = vpop.xlane.xlu0 %549 }
 0x21e   :  { %593 = vst.msk [vmem:[%s1213_s4 + $0x2] sm:$0x3] %vm32_vm0, %v585_v50  ;;  %v586_v55 = vsel %vm583_vm5, %v577_v24, %v550_v25 }
 0x21f   :  { %594 = vst.msk [vmem:[%s1213_s4 + $0x4] sm:$0x3] %vm32_vm0, %v586_v55 }
 0x220   :  { %v553_v27 = vpop.xlane.xlu1 %552 }
 0x221   :  { %v587_v29 = vsel %vm583_vm5, %v578_v32, %v553_v27  ;;  %v556_v21 = vpop.xlane.xlu0 %555 }
 0x222   :  { %595 = vst.msk [vmem:[%s1213_s4 + $0x6] sm:$0x3] %vm32_vm0, %v587_v29  ;;  %v588_v35 = vsel %vm583_vm5, %v579_v28, %v556_v21 }
 0x223   :  { %596 = vst.msk [vmem:[%s1213_s4 + $0x8] sm:$0x3] %vm32_vm0, %v588_v35 }
 0x224   :  { %v559_v9 = vpop.xlane.xlu1 %558 }
 0x225   :  { %v589_v12 = vsel %vm583_vm5, %v580_v31, %v559_v9  ;;  %v562_v34 = vpop.xlane.xlu0 %561 }
 0x226   :  { %597 = vst.msk [vmem:[%s1213_s4 + $0xa] sm:$0x3] %vm32_vm0, %v589_v12  ;;  %v590_v5 = vsel %vm583_vm5, %v581_v33, %v562_v34 }
 0x227   :  { %598 = vst.msk [vmem:[%s1213_s4 + $0xc] sm:$0x3] %vm32_vm0, %v590_v5 }
 0x228   :  { %v565_v42 = vpop.xlane.xlu1 %564 }
 0x229   :  { %v591_v43 = vsel %vm583_vm5, %v582_v41, %v565_v42 }
 0x22a   :  { %599 = vst.msk [vmem:[%s1213_s4 + $0xe] sm:$0x3] %vm32_vm0, %v591_v43 }

// kernel: forward.14
= control target key start
LH: loop header
LB: loop body
LE: loop exit
PB: predicated region body
PF: predicated region fallthrough
CT: control target
= control target key end

     0   :  { %s5096_s15 = smov 0   ;;  %s5098_s16 = smov 0   ;;  %s5901_s0 = inlined_call_operand.vmem [shape: bf16[1,14,8,8,10], index: 0, kind: input, shape index: {}]   ;;  %s5902_s1 = inlined_call_operand.vmem [shape: bf16[7,7,7,10,10], index: 1, kind: input, shape index: {}]   ;;  %s5903_s2 = inlined_call_operand.vmem [shape: f32[1,10], index: 2, kind: input, shape index: {}]   ;;  %s5904_s3 = inlined_call_operand.vmem [shape: f32[1,10], index: 3, kind: input, shape index: {}]   ;;  %s5905_s4 = inlined_call_operand.vmem [shape: f32[1,8,2,2,10], index: 4, kind: output, shape index: {}]  }
   0x1   :  { %s5100_s17 = smov 0   ;;  %s5102_s18 = smov 0  }
   0x2   :  { %s5104_s19 = smov 0  }
   0x3 LB: > { %s26_s20 = sadd.s32 1, %s5056_s17  ;;  %s29_s21 = sadd.s32 1, %s5060_s18  ;;  %s5064_s19 = sphi %s5104_s19, %s14_s19   ;;  %s5060_s18 = sphi %s5102_s18, %s5911_s18   ;;  %s5056_s17 = sphi %s5100_s17, %s5910_s17   ;;  %s5052_s16 = sphi %s5098_s16, %s5909_s16   ;;  %s5048_s15 = sphi %s5096_s15, %s5908_s15  }
   0x4   : > { %p27_p0 = scmp.ge.s32.totalorder %s26_s20, 7  ;;  %p4286_p1 = scmp.ge.s32.totalorder %s5064_s19, 1 }
   0x5   : > { %p203_p2 = scmp.lt.s32.totalorder %s5064_s19, 57 }
   0x6   : > { %s5913_s20 = smov (%p27_p0, %s26_s20), 0  ;;  %s5915_s21 = smov (!%p27_p0, %s29_s21), %s5060_s18 }
   0x7   : > { %p204_p3 = pnand %p4286_p1, %p203_p2  ;;  %p31_p4 = scmp.ge.s32.totalorder %s5915_s21, 8 }
   0x8   : > { %s243_s22 = sadd.s32 (!%p204_p3), %s5048_s15, %s5052_s16  ;;  %p254_p5 = scmp.lt.s32.totalorder (!%p204_p3), %s5048_s15, 6 }
   0x9   : > { %s5917_s21 = smov (%p31_p4, %s5915_s21), 0  ;;  %207 = sbr.rel (%p204_p3) target bundleno = 455 (0x1c7), region = 36 }
   0xa   : > { %p246_p6 = scmp.lt.s32.totalorder (!%p204_p3), %s243_s22, 13  ;;  %p261_p7 = scmp.lt.s32.totalorder (!%p204_p3), %s5052_s16, 7 }
   0xb   : > { %p4292_p8 = scmp.ne.s32.totalorder (!%p204_p3), %s5048_s15, 0 }
   0xe   : > { %s255_s23 = scalar_select %p254_p5, %s5048_s15, 6 }
   0xf   : > { %s5919_s22 = smov (!%p246_p6, %s243_s22), 13  ;;  %s5921_s16 = smov (!%p261_p7, %s5052_s16), 7 }
  0x10   : > { %s4924_s24 = smul.u32 392, %s255_s23  ;;  %s4530_s25 = sshll.u32 %s5919_s22, 5 }
  0x11   : > { %s5134_s28 = scalar_lea.vmem %s5901_s0, %s4530_s25  ;;  %s4531_s6 = sshll.u32 %s5921_s16, 2 }
  0x12   : > { %s5139_s5 = scalar_lea.vmem %s5902_s1, %s4924_s24  ;;  %s5144_s9 = scalar_lea.vmem %s5905_s4, %s4531_s6 }
  0x13   : > { %272 = sbr.rel (%p4292_p8) target bundleno = 26 (0x1a), region = 40 }
  0x18   : > { %vm273_vm0 = vcmask 74752   ;;  %v5066_v0 = vmov 0.0  }
  0x19   : > { %274 = vst.msk [vmem:[%s5144_s9] sm:$0x3] %vm273_vm0, %v5066_v0  ;;  %275 = vst.msk [vmem:[%s5144_s9 + $0x2] sm:$0x3] %vm273_vm0, %v5066_v0 }
  0x1a PF: > { %vm392_vm1 = vcmask 1044480   ;;  %v291_v1 = vlaneseq  ;;  %v5067_v2 = vmov 0.0   ;;  %v4970_v3 = vld [vmem:[%s5139_s5 + $0x8] sm:$0x1f]   ;;  %v4971_v4 = vld [vmem:[%s5139_s5] sm:$0x1f]  }
  0x1b   : > { %4630 = vmatprep.subr.bf16.mxu0 %v5067_v2  ;;  %4636 = vmatprep.subr.bf16.mxu1 %v5067_v2  ;;  %v394_v5 = vsel %vm392_vm1, %v4970_v3, 0  ;;  %vm5068_vm2 = vmmov 0   ;;  %v460_v6 = vsel %vm392_vm1, %v4971_v4, 0  ;;  %v5069_v8 = vmov 1966171168   ;;  %p4525_p9 = scmp.ne.s32.totalorder %s5048_s15, 6 }
  0x1c   : > { %4632 = vmatprep.mubr.msk.bf16.mxu0 %vm5068_vm2, %v5067_v2  ;;  %4638 = vmatprep.mubr.msk.bf16.mxu1 %vm5068_vm2, %v5067_v2  ;;  %v5159_v7 = vshrl.u32 %v291_v1, 7  ;;  %v289_v9 = vunpack.c.l.s4 %v5069_v8  ;;  %vm332_vm3 = vsmask.f32 256  ;;  %vm333_vm4 = vsmask.f32 1284 }
  0x1d   : > { %4631 = vmatpush3.bf16.msra.mxu0 %v394_v5  ;;  %4637 = vmatpush3.bf16.msra.mxu1 %v460_v6  ;;  %vm335_vm5 = vsmask.f32 2312  ;;  %v276_v10 = vld [vmem:[%s5134_s28] sm:$0xf]  ;;  %vm334_vm6 = vmor %vm332_vm3, %vm333_vm4  ;;  %vm337_vm7 = vsmask.f32 3340 }
  0x1e   : > { %4642 = vmatprep.subr.bf16.mxu0 %v5067_v2  ;;  %vm339_vm8 = vsmask.f32 4368  ;;  %4648 = vmatprep.subr.bf16.mxu1 %v5067_v2  ;;  %v5165_v11 = vld [vmem:[%s5134_s28 + $0x4] sm:$0xf]  ;;  %v290_v12 = vunpack.c.0.s8 %v289_v9  ;;  %vm336_vm9 = vmor %vm334_vm6, %vm335_vm5  ;;  %vm341_vm10 = vsmask.f32 5396 }
  0x1f   : > { %vm338_vm11 = vmor %vm336_vm9, %vm337_vm7  ;;  %v436_v13 = vcombine.low %v276_v10, %v5165_v11  ;;  %vm343_vm14 = vsmask.f32 6424  ;;  %vm345_vm15 = vsmask.f32 7452  ;;  %v4974_v18 = vld [vmem:[%s5139_s5 + $0x18] sm:$0x1f]  }
  0x20   : > { %v5169_v14 = vsub.s32 %v290_v12, %v5159_v7  ;;  %vm340_vm12 = vmor %vm338_vm11, %vm339_vm8  ;;  %vm388_vm4 = vcmask 80896   ;;  %v617_v28 = vsel %vm392_vm1, %v4974_v18, 0  ;;  %v4973_v36 = vld [vmem:[%s5139_s5 + $0x10] sm:$0x1f]   ;;  %v5217_v41 = vld [vmem:[%s5134_s28 + $0x8] sm:$0xf] }
  0x21   : > { %vm342_vm13 = vmor %vm340_vm12, %vm341_vm10  ;;  %v529_v46 = vsel %vm392_vm1, %v4973_v36, 0  ;;  %v4976_v54 = vld [vmem:[%s5139_s5 + $0x28] sm:$0x1f]   ;;  %v4975_v61 = vld [vmem:[%s5139_s5 + $0x20] sm:$0x1f]  }
  0x22   : > { %v294_v15 = vrot.slane %v276_v10, %v5169_v14  ;;  %v316_v16 = vrot.slane %v5165_v11, %v5169_v14  ;;  %v443_v17 = vrot.slane %v436_v13, %v5169_v14  ;;  %vm344_vm0 = vmor %vm342_vm13, %vm343_vm14  ;;  %v965_v57 = vrot.slane %v5217_v41, %v5169_v14  ;;  %v4978_v9 = vld [vmem:[%s5139_s5 + $0x38] sm:$0x1f]   ;;  %v5023_v27 = vld [vmem:[%s5139_s5 + $0x170] sm:$0x1f]  }
  0x23   : > { %vm5190_vm3 = vmor %vm344_vm0, %vm345_vm15  ;;  %v775_v0 = vsel %vm392_vm1, %v4976_v54, 0  ;;  %v687_v8 = vsel %vm392_vm1, %v4975_v61, 0  ;;  %v916_v18 = vsel %vm392_vm1, %v4978_v9, 0  ;;  %v4985_v61 = vld [vmem:[%s5139_s5 + $0x68] sm:$0x1f]  }
  0x24   : > { %v295_v19 = vcombine.high %v294_v15, %v294_v15  ;;  %v5177_v20 = vrot.slane %v294_v15, %v5169_v14  ;;  %v317_v21 = vcombine.high %v316_v16, %v316_v16  ;;  %v5180_v22 = vrot.slane %v316_v16, %v5169_v14 }
  0x25   : > { %v450_v31 = vrot.slane %v443_v17, %v5169_v14  ;;  %v966_v3 = vcombine.high %v965_v57, %v965_v57  ;;  %v5265_v10 = vrot.slane %v965_v57, %v5169_v14  ;;  %v892_v16 = vcombine.low %v5165_v11, %v5217_v41  ;;  %v4977_v17 = vld [vmem:[%s5139_s5 + $0x30] sm:$0x1f]  }
  0x26   : > { %v5183_v23 = vrot.slane %v295_v19, %v5169_v14  ;;  %v5186_v24 = vrot.slane %v317_v21, %v5169_v14  ;;  %v348_v25 = vshrl.u32 %v5177_v20, 16  ;;  %v357_v26 = vshrl.u32 %v5180_v22, 16 }
  0x27   : > { %v572_v32 = vcombine.high %v5177_v20, %v5177_v20  ;;  %v573_v33 = vcombine.high %v5180_v22, %v5180_v22  ;;  %4639 = vmatmul.mubr.msk.bf16.vlgmr.msra.gmra.mxu1 %vm388_vm4, %v450_v31  ;;  %v4313_v5 = vcombine.high %v5177_v20, %v5180_v22  ;;  %v5268_v12 = vrot.slane %v966_v3, %v5169_v14 }
  0x28   : > { %v353_v29 = vshll.u32 %v5183_v23, 16  ;;  %v362_v30 = vshll.u32 %v5186_v24, 16  ;;  %v574_v37 = vshrl.u32 %v5183_v23, 16  ;;  %4649 = vmatpush3.bf16.msra.mxu1 %v617_v28  ;;  %4650 = vmatprep.mubr.msk.bf16.mxu1 %vm5068_vm2, %v5067_v2  ;;  %v582_v40 = vshrl.u32 %v5186_v24, 16  ;;  %v4981_v28 = vld [vmem:[%s5139_s5 + $0x48] sm:$0x1f]  }
  0x29   : > { %v579_v39 = vshll.u32 %v572_v32, 16  ;;  %4660 = vmatprep.subr.bf16.mxu1 %v5067_v2  ;;  %v505_v43 = vcombine.low %v5183_v23, %v5186_v24  ;;  %v587_v45 = vshll.u32 %v573_v33, 16  ;;  %v730_v47 = vcombine.high %v5183_v23, %v5183_v23 }
  0x2a   : > { %v355_v34 = vsel %vm5190_vm3, %v348_v25, %v353_v29  ;;  %v5206_v35 = vsel %vm5190_vm3, %v357_v26, %v362_v30  ;;  %v731_v48 = vcombine.high %v5186_v24, %v5186_v24  ;;  %v732_v51 = vshrl.u32 %v572_v32, 16  ;;  %v5299_v30 = vld [vmem:[%s5134_s28 + $0xc] sm:$0xf] }
  0x2b   : > { %v368_v38 = vcombine.low %v355_v34, %v5206_v35  ;;  %v581_v44 = vsel %vm5190_vm3, %v574_v37, %v579_v39  ;;  %v5232_v50 = vsel %vm5190_vm3, %v582_v40, %v587_v45  ;;  %v740_v52 = vshrl.u32 %v573_v33, 16  ;;  %v4980_v34 = vld [vmem:[%s5139_s5 + $0x40] sm:$0x1f]  }
  0x2c   : > { %v593_v53 = vcombine.low %v581_v44, %v5232_v50  ;;  %v737_v55 = vshll.u32 %v730_v47, 16  ;;  %v745_v56 = vshll.u32 %v731_v48, 16  ;;  %v512_v58 = vrot.slane %v505_v43, %v5169_v14 }
  0x2d   : > { %v375_v42 = vrot.slane %v368_v38, %v5169_v14  ;;  %v670_v13 = vrot.slane %v4313_v5, %v5169_v14  ;;  %v982_v19 = vshrl.u32 %v5265_v10, 16  ;;  %v987_v20 = vshll.u32 %v5268_v12, 16  ;;  %v4984_v5 = vld [vmem:[%s5139_s5 + $0x60] sm:$0x1f]  }
  0x2e   : > { %v600_v59 = vrot.slane %v593_v53, %v5169_v14  ;;  %v739_v60 = vsel %vm5190_vm3, %v732_v51, %v737_v55  ;;  %v5249_v62 = vsel %vm5190_vm3, %v740_v52, %v745_v56  ;;  %v519_v4 = vrot.slane %v512_v58, %v5169_v14  ;;  %v4982_v52 = vld [vmem:[%s5139_s5 + $0x50] sm:$0x1f]  }
  0x2f   : > { %v382_v49 = vrot.slane %v375_v42, %v5169_v14  ;;  %v751_v1 = vcombine.low %v739_v60, %v5249_v62  ;;  %v677_v21 = vrot.slane %v670_v13, %v5169_v14  ;;  %v4324_v25 = vcombine.high %v5183_v23, %v5186_v24 }
  0x30   : > { %v607_v63 = vrot.slane %v600_v59, %v5169_v14  ;;  %v899_v26 = vrot.slane %v892_v16, %v5169_v14  ;;  %v845_v11 = vsel %vm392_vm1, %v4977_v17, 0  ;;  %v5294_v29 = vsel %vm5190_vm3, %v982_v19, %v987_v20  ;;  %v4986_v20 = vld [vmem:[%s5139_s5 + $0x70] sm:$0x1f]  }
  0x31   : > { %4633 = vmatmul.mubr.msk.bf16.vlgmr.msra.gmra.mxu0 %vm388_vm4, %v382_v49  ;;  %v758_v6 = vrot.slane %v751_v1, %v5169_v14  ;;  %v828_v23 = vrot.slane %v4324_v25, %v5169_v14  ;;  %v1063_v32 = vcombine.low %v5186_v24, %v5268_v12  ;;  %v1130_v33 = vcombine.high %v5265_v10, %v5265_v10 }
  0x32   : > { %4643 = vmatpush3.bf16.msra.mxu0 %v529_v46  ;;  %4644 = vmatprep.mubr.msk.bf16.mxu0 %vm5068_vm2, %v5067_v2  ;;  %v906_v31 = vrot.slane %v899_v26, %v5169_v14  ;;  %v1087_v36 = vsel %vm392_vm1, %v4981_v28, 0  ;;  %v993_v37 = vcombine.low %v5206_v35, %v5294_v29  ;;  %v1505_v38 = vrot.slane %v5299_v30, %v5169_v14  ;;  %v4983_v35 = vld [vmem:[%s5139_s5 + $0x58] sm:$0x1f]  }
  0x33   : > { %4654 = vmatprep.subr.bf16.mxu0 %v5067_v2  ;;  %4651 = vmatmul.mubr.msk.bf16.vlgmr.msra.gmra.mxu1 %vm388_vm4, %v607_v63  ;;  %v765_v15 = vrot.slane %v758_v6, %v5169_v14  ;;  %v835_v39 = vrot.slane %v828_v23, %v5169_v14  ;;  %v1070_v40 = vrot.slane %v1063_v32, %v5169_v14  ;;  %v1131_v42 = vshrl.u32 %v5268_v12, 16 }
  0x34   : > { %4661 = vmatpush3.bf16.msra.mxu1 %v775_v0  ;;  %4662 = vmatprep.mubr.msk.bf16.mxu1 %vm5068_vm2, %v5067_v2  ;;  %v1136_v43 = vshll.u32 %v1130_v33, 16  ;;  %v1017_v44 = vsel %vm392_vm1, %v4980_v34, 0  ;;  %v1506_v45 = vcombine.high %v1505_v38, %v1505_v38  ;;  %v1000_v46 = vrot.slane %v993_v37, %v5169_v14 }
  0x35   : > { %4672 = vmatprep.subr.bf16.mxu1 %v5067_v2  ;;  %v4347_v47 = vcombine.high %v5180_v22, %v5265_v10  ;;  %v1077_v48 = vrot.slane %v1070_v40, %v5169_v14  ;;  %v1279_v51 = vcombine.high %v5268_v12, %v5268_v12  ;;  %v1236_v53 = vsel %vm392_vm1, %v4983_v35, 0 }
  0x36   : > { %v5333_v49 = vsel %vm5190_vm3, %v1131_v42, %v1136_v43  ;;  %v5341_v22 = vrot.slane %v1505_v38, %v5169_v14  ;;  %v1007_v54 = vrot.slane %v1000_v46, %v5169_v14  ;;  %v5347_v56 = vrot.slane %v1506_v45, %v5169_v14  ;;  %v5438_v46 = vld [vmem:[%s5134_s28 + $0x10] sm:$0xf] }
  0x37   : > { %v1142_v55 = vcombine.low %v5232_v50, %v5333_v49  ;;  %v1219_v57 = vrot.slane %v4347_v47, %v5169_v14  ;;  %v1280_v58 = vshrl.u32 %v1130_v33, 16  ;;  %v1285_v59 = vshll.u32 %v1279_v51, 16  ;;  %v4992_v47 = vld [vmem:[%s5139_s5 + $0x98] sm:$0x1f]  }
  0x38   : > { %v1166_v60 = vsel %vm392_vm1, %v4982_v52, 0  ;;  %v1522_v50 = vshrl.u32 %v5341_v22, 16  ;;  %v1527_v0 = vshll.u32 %v5347_v56, 16  ;;  %v1385_v6 = vsel %vm392_vm1, %v4985_v61, 0  ;;  %v4994_v61 = vld [vmem:[%s5139_s5 + $0xa8] sm:$0x1f]  }
  0x39   : > { %4645 = vmatmul.mubr.msk.bf16.vlgmr.msra.gmra.mxu0 %vm388_vm4, %v519_v4  ;;  %v1149_v63 = vrot.slane %v1142_v55, %v5169_v14  ;;  %v1226_v1 = vrot.slane %v1219_v57, %v5169_v14  ;;  %v5365_v3 = vsel %vm5190_vm3, %v1280_v58, %v1285_v59  ;;  %v4357_v4 = vcombine.high %v5186_v24, %v5268_v12 }
  0x3a   : > { %4655 = vmatpush3.bf16.msra.mxu0 %v687_v8  ;;  %4656 = vmatprep.mubr.msk.bf16.mxu0 %vm5068_vm2, %v5067_v2  ;;  %v1291_v9 = vcombine.low %v5249_v62, %v5365_v3  ;;  %v1315_v24 = vsel %vm392_vm1, %v4984_v5, 0  ;;  %v1670_v16 = vcombine.high %v5341_v22, %v5341_v22  ;;  %v4987_v62 = vld [vmem:[%s5139_s5 + $0x78] sm:$0x1f]   ;;  %v1432_v28 = vcombine.low %v5217_v41, %v5299_v30  ;;  %v4990_v41 = vld [vmem:[%s5139_s5 + $0x88] sm:$0x1f]  }
  0x3b   : > { %4666 = vmatprep.subr.bf16.mxu0 %v5067_v2  ;;  %4663 = vmatmul.mubr.msk.bf16.vlgmr.msra.gmra.mxu1 %vm388_vm4, %v765_v15  ;;  %v1156_v8 = vrot.slane %v1149_v63, %v5169_v14  ;;  %v1368_v13 = vrot.slane %v4357_v4, %v5169_v14  ;;  %v5379_v15 = vsel %vm5190_vm3, %v1522_v50, %v1527_v0  ;;  %v1557_v26 = vsel %vm392_vm1, %v4987_v62, 0 }
  0x3c   : > { %4673 = vmatpush3.bf16.msra.mxu1 %v916_v18  ;;  %4674 = vmatprep.mubr.msk.bf16.mxu1 %vm5068_vm2, %v5067_v2  ;;  %v1298_v17 = vrot.slane %v1291_v9, %v5169_v14  ;;  %v1533_v18 = vcombine.low %v5294_v29, %v5379_v15  ;;  %v1676_v25 = vshll.u32 %v1670_v16, 16  ;;  %v1456_v23 = vsel %vm392_vm1, %v4986_v20, 0 }
  0x3d   : > { %4684 = vmatprep.subr.bf16.mxu1 %v5067_v2  ;;  %v1375_v19 = vrot.slane %v1368_v13, %v5169_v14  ;;  %v1819_v32 = vcombine.high %v5347_v56, %v5347_v56  ;;  %v1439_v33 = vrot.slane %v1432_v28, %v5169_v14  ;;  %v1820_v38 = vshrl.u32 %v1670_v16, 16 }
  0x3e   : > { %v1540_v29 = vrot.slane %v1533_v18, %v5169_v14  ;;  %v1706_v40 = vsel %vm392_vm1, %v4990_v41, 0  ;;  %v1603_v43 = vcombine.low %v5268_v12, %v5347_v56  ;;  %v2045_v52 = vrot.slane %v5438_v46, %v5169_v14 }
  0x3f   : > { %v1446_v42 = vrot.slane %v1439_v33, %v5169_v14  ;;  %v4380_v57 = vcombine.high %v5265_v10, %v5341_v22  ;;  %v1972_v10 = vcombine.low %v5299_v30, %v5438_v46  ;;  %v1996_v4 = vsel %vm392_vm1, %v4994_v61, 0 }
  0x40   : > { %v1547_v34 = vrot.slane %v1540_v29, %v5169_v14  ;;  %v2046_v59 = vcombine.high %v2045_v52, %v2045_v52  ;;  %v5472_v0 = vrot.slane %v2045_v52, %v5169_v14  ;;  %v4390_v5 = vcombine.high %v5268_v12, %v5347_v56 }
  0x41   : > { %4657 = vmatmul.mubr.msk.bf16.vlgmr.msra.gmra.mxu0 %vm388_vm4, %v677_v21  ;;  %v1671_v21 = vshrl.u32 %v5347_v56, 16  ;;  %v1759_v50 = vrot.slane %v4380_v57, %v5169_v14 }
  0x42   : > { %4667 = vmatpush3.bf16.msra.mxu0 %v845_v11  ;;  %4668 = vmatprep.mubr.msk.bf16.mxu0 %vm5068_vm2, %v5067_v2  ;;  %v1305_v11 = vrot.slane %v1298_v17, %v5169_v14  ;;  %v1908_v12 = vrot.slane %v4390_v5, %v5169_v14  ;;  %v2210_v18 = vcombine.high %v5472_v0, %v5472_v0  ;;  %v5002_v5 = vld [vmem:[%s5139_s5 + $0xe0] sm:$0x1f]  }
  0x43   : > { %4678 = vmatprep.subr.bf16.mxu0 %v5067_v2  ;;  %4675 = vmatmul.mubr.msk.bf16.vlgmr.msra.gmra.mxu1 %vm388_vm4, %v906_v31  ;;  %v5409_v31 = vsel %vm5190_vm3, %v1671_v21, %v1676_v25  ;;  %v1766_v30 = vrot.slane %v1759_v50, %v5169_v14  ;;  %v5509_v21 = vld [vmem:[%s5134_s28 + $0x14] sm:$0xf]  ;;  %v4413_v33 = vcombine.high %v5341_v22, %v5472_v0 }
  0x44   : > { %4685 = vmatpush3.bf16.msra.mxu1 %v1087_v36  ;;  %4686 = vmatprep.mubr.msk.bf16.mxu1 %vm5068_vm2, %v5067_v2  ;;  %v4989_v36 = vld [vmem:[%s5139_s5 + $0x80] sm:$0x1f]   ;;  %v1682_v37 = vcombine.low %v5333_v49, %v5409_v31  ;;  %v1915_v25 = vrot.slane %v1908_v12, %v5169_v14  ;;  %v2216_v29 = vshll.u32 %v2210_v18, 16 }
  0x45   : > { %4696 = vmatprep.subr.bf16.mxu1 %v5067_v2  ;;  %v1627_v35 = vsel %vm392_vm1, %v4989_v36, 0 }
  0x49   : > { %4669 = vmatmul.mubr.msk.bf16.vlgmr.msra.gmra.mxu0 %vm388_vm4, %v835_v39  ;;  %v1825_v39 = vshll.u32 %v1819_v32, 16  ;;  %v2585_v32 = vrot.slane %v5509_v21, %v5169_v14 }
  0x4a   : > { %4679 = vmatpush3.bf16.msra.mxu0 %v1017_v44  ;;  %4680 = vmatprep.mubr.msk.bf16.mxu0 %vm5068_vm2, %v5067_v2  ;;  %v1689_v44 = vrot.slane %v1682_v37, %v5169_v14 }
  0x4b   : > { %4690 = vmatprep.subr.bf16.mxu0 %v5067_v2  ;;  %4687 = vmatmul.mubr.msk.bf16.vlgmr.msra.gmra.mxu1 %vm388_vm4, %v1077_v48  ;;  %v5435_v45 = vsel %vm5190_vm3, %v1820_v38, %v1825_v39  ;;  %v1610_v48 = vrot.slane %v1603_v43, %v5169_v14  ;;  %v4998_v38 = vld [vmem:[%s5139_s5 + $0xc0] sm:$0x1f]   ;;  %v2586_v39 = vcombine.high %v2585_v32, %v2585_v32 }
  0x4c   : > { %4697 = vmatpush3.bf16.msra.mxu1 %v1236_v53  ;;  %4698 = vmatprep.mubr.msk.bf16.mxu1 %vm5068_vm2, %v5067_v2  ;;  %v1696_v49 = vrot.slane %v1689_v44, %v5169_v14  ;;  %v1831_v51 = vcombine.low %v5365_v3, %v5435_v45  ;;  %v4991_v53 = vld [vmem:[%s5139_s5 + $0x90] sm:$0x1f]   ;;  %v4993_v3 = vld [vmem:[%s5139_s5 + $0xa0] sm:$0x1f]   ;;  %v2299_v43 = vrot.slane %v4413_v33, %v5169_v14  ;;  %v2360_v44 = vshrl.u32 %v2210_v18, 16 }
  0x4d   : > { %4708 = vmatprep.subr.bf16.mxu1 %v5067_v2  ;;  %v1617_v55 = vrot.slane %v1610_v48, %v5169_v14  ;;  %v1925_v13 = vsel %vm392_vm1, %v4993_v3, 0  ;;  %v5549_v48 = vrot.slane %v2585_v32, %v5169_v14  ;;  %v5638_v33 = vld [vmem:[%s5134_s28 + $0x18] sm:$0xf] }
  0x4e   : > { %v1838_v58 = vrot.slane %v1831_v51, %v5169_v14  ;;  %v2306_v52 = vrot.slane %v2299_v43, %v5169_v14 }
  0x4f   : > { %v2602_v57 = vshrl.u32 %v5549_v48, 16  ;;  %v4446_v43 = vcombine.high %v5472_v0, %v5549_v48 }
  0x50   : > { %v1845_v63 = vrot.slane %v1838_v58, %v5169_v14 }
  0x51   : > { %4681 = vmatmul.mubr.msk.bf16.vlgmr.msra.gmra.mxu0 %vm388_vm4, %v1007_v54  ;;  %v1855_v54 = vsel %vm392_vm1, %v4992_v47, 0  ;;  %v2246_v47 = vsel %vm392_vm1, %v4998_v38, 0 }
  0x52   : > { %4691 = vmatpush3.bf16.msra.mxu0 %v1166_v60  ;;  %4692 = vmatprep.mubr.msk.bf16.mxu0 %vm5068_vm2, %v5067_v2  ;;  %v1776_v60 = vsel %vm392_vm1, %v4991_v53, 0 }
  0x53   : > { %4702 = vmatprep.subr.bf16.mxu0 %v5067_v2  ;;  %4699 = vmatmul.mubr.msk.bf16.vlgmr.msra.gmra.mxu1 %vm388_vm4, %v1226_v1  ;;  %v5475_v1 = vrot.slane %v2046_v59, %v5169_v14 }
  0x54   : > { %4709 = vmatpush3.bf16.msra.mxu1 %v1385_v6  ;;  %4710 = vmatprep.mubr.msk.bf16.mxu1 %vm5068_vm2, %v5067_v2  ;;  %v1979_v6 = vrot.slane %v1972_v10, %v5169_v14 }
  0x55   : > { %4720 = vmatprep.subr.bf16.mxu1 %v5067_v2  ;;  %v2067_v9 = vshll.u32 %v5475_v1, 16  ;;  %v2143_v17 = vcombine.low %v5347_v56, %v5475_v1  ;;  %v2211_v28 = vshrl.u32 %v5475_v1, 16  ;;  %v2359_v37 = vcombine.high %v5475_v1, %v5475_v1 }
  0x56   : > { %v1986_v16 = vrot.slane %v1979_v6, %v5169_v14 }
  0x57   : > { %v5533_v36 = vsel %vm5190_vm3, %v2211_v28, %v2216_v29 }
  0x59   : > { %4693 = vmatmul.mubr.msk.bf16.vlgmr.msra.gmra.mxu0 %vm388_vm4, %v1156_v8  ;;  %v2062_v8 = vshrl.u32 %v5472_v0, 16  ;;  %v3052_v0 = vcombine.low %v5509_v21, %v5638_v33 }
  0x5a   : > { %4703 = vmatpush3.bf16.msra.mxu0 %v1315_v24  ;;  %4704 = vmatprep.mubr.msk.bf16.mxu0 %vm5068_vm2, %v5067_v2  ;;  %v4997_v24 = vld [vmem:[%s5139_s5 + $0xb8] sm:$0x1f]  }
  0x5b   : > { %4714 = vmatprep.subr.bf16.mxu0 %v5067_v2  ;;  %4711 = vmatmul.mubr.msk.bf16.vlgmr.msra.gmra.mxu1 %vm388_vm4, %v1375_v19  ;;  %v5499_v62 = vsel %vm5190_vm3, %v2062_v8, %v2067_v9  ;;  %v4996_v19 = vld [vmem:[%s5139_s5 + $0xb0] sm:$0x1f]   ;;  %v2167_v20 = vsel %vm392_vm1, %v4997_v24, 0  ;;  %v2512_v24 = vcombine.low %v5438_v46, %v5509_v21  ;;  %v5006_v46 = vld [vmem:[%s5139_s5 + $0xf8] sm:$0x1f]  }
  0x5c   : > { %4721 = vmatpush3.bf16.msra.mxu1 %v1557_v26  ;;  %4722 = vmatprep.mubr.msk.bf16.mxu1 %vm5068_vm2, %v5067_v2  ;;  %v2073_v26 = vcombine.low %v5379_v15, %v5499_v62  ;;  %v4999_v15 = vld [vmem:[%s5139_s5 + $0xc8] sm:$0x1f]   ;;  %v2786_v28 = vsel %vm392_vm1, %v5006_v46, 0 }
  0x5d   : > { %4732 = vmatprep.subr.bf16.mxu1 %v5067_v2  ;;  %v2316_v22 = vsel %vm392_vm1, %v4999_v15, 0  ;;  %v2519_v18 = vrot.slane %v2512_v24, %v5169_v14 }
  0x5e   : > { %v2080_v41 = vrot.slane %v2073_v26, %v5169_v14 }
  0x5f   : > { %v2526_v29 = vrot.slane %v2519_v18, %v5169_v14 }
  0x61   : > { %4705 = vmatmul.mubr.msk.bf16.vlgmr.msra.gmra.mxu0 %vm388_vm4, %v1305_v11  ;;  %v2150_v11 = vrot.slane %v2143_v17, %v5169_v14 }
  0x62   : > { %4715 = vmatpush3.bf16.msra.mxu0 %v1456_v23  ;;  %4716 = vmatprep.mubr.msk.bf16.mxu0 %vm5068_vm2, %v5067_v2  ;;  %v2097_v23 = vsel %vm392_vm1, %v4996_v19, 0 }
  0x63   : > { %4726 = vmatprep.subr.bf16.mxu0 %v5067_v2  ;;  %4723 = vmatmul.mubr.msk.bf16.vlgmr.msra.gmra.mxu1 %vm388_vm4, %v1547_v34  ;;  %v2157_v34 = vrot.slane %v2150_v11, %v5169_v14 }
  0x64   : > { %4733 = vmatpush3.bf16.msra.mxu1 %v1706_v40  ;;  %4734 = vmatprep.mubr.msk.bf16.mxu1 %vm5068_vm2, %v5067_v2  ;;  %v2087_v40 = vrot.slane %v2080_v41, %v5169_v14 }
  0x65   : > { %4744 = vmatprep.subr.bf16.mxu1 %v5067_v2 }
  0x69   : > { %4717 = vmatmul.mubr.msk.bf16.vlgmr.msra.gmra.mxu0 %vm388_vm4, %v1446_v42  ;;  %v2222_v42 = vcombine.low %v5409_v31, %v5533_v36  ;;  %v5001_v31 = vld [vmem:[%s5139_s5 + $0xd8] sm:$0x1f]  }
  0x6a   : > { %4727 = vmatpush3.bf16.msra.mxu0 %v1627_v35  ;;  %4728 = vmatprep.mubr.msk.bf16.mxu0 %vm5068_vm2, %v5067_v2  ;;  %v2365_v35 = vshll.u32 %v2359_v37, 16  ;;  %v2465_v59 = vsel %vm392_vm1, %v5001_v31, 0  ;;  %v5010_v31 = vld [vmem:[%s5139_s5 + $0x118] sm:$0x1f]  }
  0x6b   : > { %4738 = vmatprep.subr.bf16.mxu0 %v5067_v2  ;;  %4735 = vmatmul.mubr.msk.bf16.vlgmr.msra.gmra.mxu1 %vm388_vm4, %v1696_v49  ;;  %v5552_v49 = vrot.slane %v2586_v39, %v5169_v14  ;;  %v2229_v51 = vrot.slane %v2222_v42, %v5169_v14  ;;  %v3125_v39 = vrot.slane %v5638_v33, %v5169_v14 }
  0x6c   : > { %4745 = vmatpush3.bf16.msra.mxu1 %v1855_v54  ;;  %4746 = vmatprep.mubr.msk.bf16.mxu1 %vm5068_vm2, %v5067_v2  ;;  %v5563_v53 = vsel %vm5190_vm3, %v2360_v44, %v2365_v35  ;;  %v4423_v54 = vcombine.high %v5347_v56, %v5475_v1 }
  0x6d   : > { %4756 = vmatprep.subr.bf16.mxu1 %v5067_v2  ;;  %v2607_v58 = vshll.u32 %v5552_v49, 16  ;;  %v2371_v61 = vcombine.low %v5435_v45, %v5563_v53  ;;  %v5003_v45 = vld [vmem:[%s5139_s5 + $0xe8] sm:$0x1f]   ;;  %v2751_v6 = vshrl.u32 %v5552_v49, 16  ;;  %v2899_v17 = vcombine.high %v5552_v49, %v5552_v49 }
  0x6e   : > { %v2448_v56 = vrot.slane %v4423_v54, %v5169_v14  ;;  %v2637_v9 = vsel %vm392_vm1, %v5003_v45, 0  ;;  %v3126_v35 = vcombine.high %v3125_v39, %v3125_v39 }
  0x6f   : > { %v5582_v10 = vsel %vm5190_vm3, %v2602_v57, %v2607_v58  ;;  %v2378_v3 = vrot.slane %v2371_v61, %v5169_v14  ;;  %v2905_v11 = vshll.u32 %v2899_v17, 16  ;;  %v3076_v57 = vsel %vm392_vm1, %v5010_v31, 0 }
  0x70   : > { %v5675_v54 = vrot.slane %v3126_v35, %v5169_v14  ;;  %v4456_v58 = vcombine.high %v5475_v1, %v5552_v49 }
  0x71   : > { %4729 = vmatmul.mubr.msk.bf16.vlgmr.msra.gmra.mxu0 %vm388_vm4, %v1617_v55  ;;  %v5000_v55 = vld [vmem:[%s5139_s5 + $0xd0] sm:$0x1f]  }
  0x72   : > { %4739 = vmatpush3.bf16.msra.mxu0 %v1776_v60  ;;  %4740 = vmatprep.mubr.msk.bf16.mxu0 %vm5068_vm2, %v5067_v2  ;;  %v2236_v60 = vrot.slane %v2229_v51, %v5169_v14  ;;  %v2395_v50 = vsel %vm392_vm1, %v5000_v55, 0  ;;  %v2839_v51 = vrot.slane %v4446_v43, %v5169_v14  ;;  %v5009_v55 = vld [vmem:[%s5139_s5 + $0x110] sm:$0x1f]   ;;  %v3147_v61 = vshll.u32 %v5675_v54, 16 }
  0x73   : > { %4750 = vmatprep.subr.bf16.mxu0 %v5067_v2  ;;  %4747 = vmatmul.mubr.msk.bf16.vlgmr.msra.gmra.mxu1 %vm388_vm4, %v1845_v63  ;;  %v2750_v63 = vcombine.high %v5549_v48, %v5549_v48  ;;  %v3291_v24 = vshrl.u32 %v5675_v54, 16 }
  0x74   : > { %4757 = vmatpush3.bf16.msra.mxu1 %v1996_v4  ;;  %4758 = vmatprep.mubr.msk.bf16.mxu1 %vm5068_vm2, %v5067_v2  ;;  %v2455_v4 = vrot.slane %v2448_v56, %v5169_v14  ;;  %v2846_v21 = vrot.slane %v2839_v51, %v5169_v14  ;;  %v3005_v56 = vsel %vm392_vm1, %v5009_v55, 0 }
  0x75   : > { %4768 = vmatprep.subr.bf16.mxu1 %v5067_v2  ;;  %v2756_v8 = vshll.u32 %v2750_v63, 16  ;;  %v2900_v26 = vshrl.u32 %v2750_v63, 16 }
  0x77   : > { %v5635_v41 = vsel %vm5190_vm3, %v2900_v26, %v2905_v11  ;;  %v5014_v26 = vld [vmem:[%s5139_s5 + $0x130] sm:$0x1f]  }
  0x78   : > { %v2911_v38 = vcombine.low %v5563_v53, %v5635_v41  ;;  %v5672_v53 = vrot.slane %v3125_v39, %v5169_v14 }
  0x79   : > { %4741 = vmatmul.mubr.msk.bf16.vlgmr.msra.gmra.mxu0 %vm388_vm4, %v1766_v30  ;;  %v2613_v30 = vcombine.low %v5499_v62, %v5582_v10  ;;  %v5609_v62 = vsel %vm5190_vm3, %v2751_v6, %v2756_v8  ;;  %v5709_v6 = vld [vmem:[%s5134_s28 + $0x1c] sm:$0xf] }
  0x7a   : > { %4751 = vmatpush3.bf16.msra.mxu0 %v1925_v13  ;;  %4752 = vmatprep.mubr.msk.bf16.mxu0 %vm5068_vm2, %v5067_v2  ;;  %v2385_v13 = vrot.slane %v2378_v3, %v5169_v14  ;;  %v2918_v44 = vrot.slane %v2911_v38, %v5169_v14  ;;  %v3223_v3 = vcombine.low %v5552_v49, %v5675_v54 }
  0x7b   : > { %4762 = vmatprep.subr.bf16.mxu0 %v5067_v2  ;;  %4759 = vmatmul.mubr.msk.bf16.vlgmr.msra.gmra.mxu1 %vm388_vm4, %v1986_v16  ;;  %v2620_v12 = vrot.slane %v2613_v30, %v5169_v14  ;;  %v2536_v16 = vsel %vm392_vm1, %v5002_v5, 0  ;;  %v5012_v30 = vld [vmem:[%s5139_s5 + $0x120] sm:$0x1f]   ;;  %v3665_v17 = vrot.slane %v5709_v6, %v5169_v14  ;;  %v4479_v18 = vcombine.high %v5549_v48, %v5672_v53 }
  0x7c   : > { %4769 = vmatpush3.bf16.msra.mxu1 %v2167_v20  ;;  %4770 = vmatprep.mubr.msk.bf16.mxu1 %vm5068_vm2, %v5067_v2  ;;  %v2762_v20 = vcombine.low %v5533_v36, %v5609_v62 }
  0x7d   : > { %4780 = vmatprep.subr.bf16.mxu1 %v5067_v2  ;;  %v2627_v19 = vrot.slane %v2620_v12, %v5169_v14  ;;  %v3666_v11 = vcombine.high %v3665_v17, %v3665_v17 }
  0x7e   : > { %v2769_v32 = vrot.slane %v2762_v20, %v5169_v14 }
  0x80   : > { %v2776_v37 = vrot.slane %v2769_v32, %v5169_v14 }
  0x81   : > { %4753 = vmatmul.mubr.msk.bf16.vlgmr.msra.gmra.mxu0 %vm388_vm4, %v1915_v25  ;;  %v5005_v25 = vld [vmem:[%s5139_s5 + $0xf0] sm:$0x1f]  }
  0x82   : > { %4763 = vmatpush3.bf16.msra.mxu0 %v2097_v23  ;;  %4764 = vmatprep.mubr.msk.bf16.mxu0 %vm5068_vm2, %v5067_v2  ;;  %v2683_v23 = vcombine.low %v5475_v1, %v5552_v49  ;;  %v2707_v15 = vsel %vm392_vm1, %v5005_v25, 0  ;;  %v2988_v1 = vrot.slane %v4456_v58, %v5169_v14  ;;  %v3439_v25 = vcombine.high %v5675_v54, %v5675_v54  ;;  %v5018_v58 = vld [vmem:[%s5139_s5 + $0x150] sm:$0x1f]  }
  0x83   : > { %4774 = vmatprep.subr.bf16.mxu0 %v5067_v2  ;;  %4771 = vmatmul.mubr.msk.bf16.vlgmr.msra.gmra.mxu1 %vm388_vm4, %v2157_v34  ;;  %v5008_v34 = vld [vmem:[%s5139_s5 + $0x108] sm:$0x1f]  }
  0x84   : > { %4781 = vmatpush3.bf16.msra.mxu1 %v2316_v22  ;;  %4782 = vmatprep.mubr.msk.bf16.mxu1 %vm5068_vm2, %v5067_v2  ;;  %v2690_v36 = vrot.slane %v2683_v23, %v5169_v14  ;;  %v5007_v22 = vld [vmem:[%s5139_s5 + $0x100] sm:$0x1f]   ;;  %v2995_v8 = vrot.slane %v2988_v1, %v5169_v14  ;;  %v3379_v23 = vrot.slane %v4479_v18, %v5169_v14 }
  0x85   : > { %4792 = vmatprep.subr.bf16.mxu1 %v5067_v2 }
  0x86   : > { %v2697_v42 = vrot.slane %v2690_v36, %v5169_v14  ;;  %v5749_v36 = vrot.slane %v3665_v17, %v5169_v14  ;;  %v3386_v39 = vrot.slane %v3379_v23, %v5169_v14  ;;  %v5025_v23 = vld [vmem:[%s5139_s5 + $0x180] sm:$0x1f]  }
  0x88   : > { %v3682_v43 = vshrl.u32 %v5749_v36, 16 }
  0x89   : > { %4765 = vmatmul.mubr.msk.bf16.vlgmr.msra.gmra.mxu0 %vm388_vm4, %v2087_v40  ;;  %v2935_v40 = vsel %vm392_vm1, %v5008_v34, 0  ;;  %v3326_v34 = vsel %vm392_vm1, %v5014_v26, 0 }
  0x8a   : > { %4775 = vmatpush3.bf16.msra.mxu0 %v2246_v47  ;;  %4776 = vmatprep.mubr.msk.bf16.mxu0 %vm5068_vm2, %v5067_v2  ;;  %v2856_v47 = vsel %vm392_vm1, %v5007_v22, 0 }
  0x8b   : > { %4786 = vmatprep.subr.bf16.mxu0 %v5067_v2  ;;  %4783 = vmatmul.mubr.msk.bf16.vlgmr.msra.gmra.mxu1 %vm388_vm4, %v2306_v52  ;;  %v2925_v52 = vrot.slane %v2918_v44, %v5169_v14 }
  0x8c   : > { %4793 = vmatpush3.bf16.msra.mxu1 %v2465_v59  ;;  %4794 = vmatprep.mubr.msk.bf16.mxu1 %vm5068_vm2, %v5067_v2  ;;  %v3059_v59 = vrot.slane %v3052_v0, %v5169_v14 }
  0x8d   : > { %4804 = vmatprep.subr.bf16.mxu1 %v5067_v2 }
  0x8e   : > { %v3066_v63 = vrot.slane %v3059_v59, %v5169_v14 }
  0x91   : > { %4777 = vmatmul.mubr.msk.bf16.vlgmr.msra.gmra.mxu0 %vm388_vm4, %v2236_v60  ;;  %v3142_v60 = vshrl.u32 %v5672_v53, 16 }
  0x92   : > { %4787 = vmatpush3.bf16.msra.mxu0 %v2395_v50  ;;  %4788 = vmatprep.mubr.msk.bf16.mxu0 %vm5068_vm2, %v5067_v2  ;;  %v5013_v50 = vld [vmem:[%s5139_s5 + $0x128] sm:$0x1f]  }
  0x93   : > { %4798 = vmatprep.subr.bf16.mxu0 %v5067_v2  ;;  %4795 = vmatmul.mubr.msk.bf16.vlgmr.msra.gmra.mxu1 %vm388_vm4, %v2455_v4  ;;  %v5699_v45 = vsel %vm5190_vm3, %v3142_v60, %v3147_v61  ;;  %v3290_v4 = vcombine.high %v5672_v53, %v5672_v53  ;;  %v3247_v5 = vsel %vm392_vm1, %v5013_v50, 0  ;;  %v3592_v50 = vcombine.low %v5638_v33, %v5709_v6  ;;  %v5022_v33 = vld [vmem:[%s5139_s5 + $0x168] sm:$0x1f]   ;;  %v5021_v6 = vld [vmem:[%s5139_s5 + $0x160] sm:$0x1f]  }
  0x94   : > { %4805 = vmatpush3.bf16.msra.mxu1 %v2637_v9  ;;  %4806 = vmatprep.mubr.msk.bf16.mxu1 %vm5068_vm2, %v5067_v2  ;;  %v3153_v9 = vcombine.low %v5582_v10, %v5699_v45  ;;  %v5015_v10 = vld [vmem:[%s5139_s5 + $0x138] sm:$0x1f]   ;;  %v3787_v17 = vsel %vm392_vm1, %v5021_v6, 0 }
  0x95   : > { %4816 = vmatprep.subr.bf16.mxu1 %v5067_v2  ;;  %v3296_v12 = vshll.u32 %v3290_v4, 16  ;;  %v3396_v48 = vsel %vm392_vm1, %v5015_v10, 0  ;;  %v3440_v32 = vshrl.u32 %v3290_v4, 16  ;;  %v3599_v4 = vrot.slane %v3592_v50, %v5169_v14 }
  0x96   : > { %v3160_v46 = vrot.slane %v3153_v9, %v5169_v14 }
  0x97   : > { %v5733_v20 = vsel %vm5190_vm3, %v3291_v24, %v3296_v12  ;;  %v3606_v24 = vrot.slane %v3599_v4, %v5169_v14 }
  0x99   : > { %4789 = vmatmul.mubr.msk.bf16.vlgmr.msra.gmra.mxu0 %vm388_vm4, %v2385_v13  ;;  %v3230_v13 = vrot.slane %v3223_v3, %v5169_v14 }
  0x9a   : > { %4799 = vmatpush3.bf16.msra.mxu0 %v2536_v16  ;;  %4800 = vmatprep.mubr.msk.bf16.mxu0 %vm5068_vm2, %v5067_v2  ;;  %v3177_v16 = vsel %vm392_vm1, %v5012_v30, 0 }
  0x9b   : > { %4810 = vmatprep.subr.bf16.mxu0 %v5067_v2  ;;  %4807 = vmatmul.mubr.msk.bf16.vlgmr.msra.gmra.mxu1 %vm388_vm4, %v2627_v19  ;;  %v3237_v19 = vrot.slane %v3230_v13, %v5169_v14  ;;  %v3866_v13 = vsel %vm392_vm1, %v5022_v33, 0 }
  0x9c   : > { %4817 = vmatpush3.bf16.msra.mxu1 %v2786_v28  ;;  %4818 = vmatprep.mubr.msk.bf16.mxu1 %vm5068_vm2, %v5067_v2  ;;  %v3167_v28 = vrot.slane %v3160_v46, %v5169_v14  ;;  %v5024_v46 = vld [vmem:[%s5139_s5 + $0x178] sm:$0x1f]  }
  0x9d   : > { %4828 = vmatprep.subr.bf16.mxu1 %v5067_v2 }
  0xa1   : > { %4801 = vmatmul.mubr.msk.bf16.vlgmr.msra.gmra.mxu0 %vm388_vm4, %v2526_v29  ;;  %v3302_v29 = vcombine.low %v5609_v62, %v5733_v20  ;;  %v5017_v62 = vld [vmem:[%s5139_s5 + $0x148] sm:$0x1f]  }
  0xa2   : > { %4811 = vmatpush3.bf16.msra.mxu0 %v2707_v15  ;;  %4812 = vmatprep.mubr.msk.bf16.mxu0 %vm5068_vm2, %v5067_v2  ;;  %v3445_v15 = vshll.u32 %v3439_v25, 16  ;;  %v3545_v35 = vsel %vm392_vm1, %v5017_v62, 0  ;;  %v4015_v25 = vsel %vm392_vm1, %v5024_v46, 0 }
  0xa3   : > { %4822 = vmatprep.subr.bf16.mxu0 %v5067_v2  ;;  %4819 = vmatmul.mubr.msk.bf16.vlgmr.msra.gmra.mxu1 %vm388_vm4, %v2776_v37  ;;  %v5752_v37 = vrot.slane %v3666_v11, %v5169_v14  ;;  %v3309_v38 = vrot.slane %v3302_v29, %v5169_v14  ;;  %v4512_v11 = vcombine.high %v5672_v53, %v5749_v36 }
  0xa4   : > { %4829 = vmatpush3.bf16.msra.mxu1 %v2935_v40  ;;  %4830 = vmatprep.mubr.msk.bf16.mxu1 %vm5068_vm2, %v5067_v2  ;;  %v5763_v22 = vsel %vm5190_vm3, %v3440_v32, %v3445_v15  ;;  %v4489_v40 = vcombine.high %v5552_v49, %v5675_v54 }
  0xa5   : > { %4840 = vmatprep.subr.bf16.mxu1 %v5067_v2  ;;  %v3687_v44 = vshll.u32 %v5752_v37, 16  ;;  %v3451_v31 = vcombine.low %v5635_v41, %v5763_v22  ;;  %v5019_v41 = vld [vmem:[%s5139_s5 + $0x158] sm:$0x1f]   ;;  %v3831_v59 = vshrl.u32 %v5752_v37, 16  ;;  %v3979_v3 = vcombine.high %v5752_v37, %v5752_v37 }
  0xa6   : > { %v3528_v49 = vrot.slane %v4489_v40, %v5169_v14  ;;  %v3717_v61 = vsel %vm392_vm1, %v5019_v41, 0  ;;  %v3763_v12 = vcombine.low %v5675_v54, %v5752_v37  ;;  %v3919_v29 = vrot.slane %v4512_v11, %v5169_v14 }
  0xa7   : > { %v3689_v0 = vsel %vm5190_vm3, %v3682_v43, %v3687_v44  ;;  %v3458_v55 = vrot.slane %v3451_v31, %v5169_v14  ;;  %v3985_v9 = vshll.u32 %v3979_v3, 16  ;;  %v4522_v15 = vcombine.high %v5675_v54, %v5752_v37 }
  0xa8   : > { %v3770_v18 = vrot.slane %v3763_v12, %v5169_v14  ;;  %v3926_v32 = vrot.slane %v3919_v29, %v5169_v14 }
  0xa9   : > { %4813 = vmatmul.mubr.msk.bf16.vlgmr.msra.gmra.mxu0 %vm388_vm4, %v2697_v42  ;;  %v5016_v42 = vld [vmem:[%s5139_s5 + $0x140] sm:$0x1f]  }
  0xaa   : > { %4823 = vmatpush3.bf16.msra.mxu0 %v2856_v47  ;;  %4824 = vmatprep.mubr.msk.bf16.mxu0 %vm5068_vm2, %v5067_v2  ;;  %v3316_v47 = vrot.slane %v3309_v38, %v5169_v14  ;;  %v3475_v51 = vsel %vm392_vm1, %v5016_v42, 0  ;;  %v3777_v26 = vrot.slane %v3770_v18, %v5169_v14 }
  0xab   : > { %4834 = vmatprep.subr.bf16.mxu0 %v5067_v2  ;;  %4831 = vmatmul.mubr.msk.bf16.vlgmr.msra.gmra.mxu1 %vm388_vm4, %v2925_v52  ;;  %v3830_v52 = vcombine.high %v5749_v36, %v5749_v36  ;;  %v4068_v36 = vrot.slane %v4522_v15, %v5169_v14 }
  0xac   : > { %4841 = vmatpush3.bf16.msra.mxu1 %v3076_v57  ;;  %4842 = vmatprep.mubr.msk.bf16.mxu1 %vm5068_vm2, %v5067_v2  ;;  %v3535_v57 = vrot.slane %v3528_v49, %v5169_v14 }
  0xad   : > { %4852 = vmatprep.subr.bf16.mxu1 %v5067_v2  ;;  %v3836_v60 = vshll.u32 %v3830_v52, 16 }
  0xb1   : > { %4825 = vmatmul.mubr.msk.bf16.vlgmr.msra.gmra.mxu0 %vm388_vm4, %v2846_v21  ;;  %v3693_v21 = vcombine.low %v5699_v45, %v3689_v0  ;;  %v3838_v45 = vsel %vm5190_vm3, %v3831_v59, %v3836_v60 }
  0xb2   : > { %4835 = vmatpush3.bf16.msra.mxu0 %v3005_v56  ;;  %4836 = vmatprep.mubr.msk.bf16.mxu0 %vm5068_vm2, %v5067_v2  ;;  %v3465_v56 = vrot.slane %v3458_v55, %v5169_v14 }
  0xb3   : > { %4846 = vmatprep.subr.bf16.mxu0 %v5067_v2  ;;  %4843 = vmatmul.mubr.msk.bf16.vlgmr.msra.gmra.mxu1 %vm388_vm4, %v3066_v63  ;;  %v3700_v1 = vrot.slane %v3693_v21, %v5169_v14  ;;  %v3616_v63 = vsel %vm392_vm1, %v5018_v58, 0 }
  0xb4   : > { %4853 = vmatpush3.bf16.msra.mxu1 %v3247_v5  ;;  %4854 = vmatprep.mubr.msk.bf16.mxu1 %vm5068_vm2, %v5067_v2  ;;  %v3842_v5 = vcombine.low %v5733_v20, %v3838_v45 }
  0xb5   : > { %4864 = vmatprep.subr.bf16.mxu1 %v5067_v2  ;;  %v3707_v30 = vrot.slane %v3700_v1, %v5169_v14 }
  0xb9   : > { %4837 = vmatmul.mubr.msk.bf16.vlgmr.msra.gmra.mxu0 %vm388_vm4, %v2995_v8  ;;  %v3980_v8 = vshrl.u32 %v3830_v52, 16 }
  0xba   : > { %4847 = vmatpush3.bf16.msra.mxu0 %v3177_v16  ;;  %4848 = vmatprep.mubr.msk.bf16.mxu0 %vm5068_vm2, %v5067_v2  ;;  %v3849_v16 = vrot.slane %v3842_v5, %v5169_v14 }
  0xbb   : > { %4858 = vmatprep.subr.bf16.mxu0 %v5067_v2  ;;  %4855 = vmatmul.mubr.msk.bf16.vlgmr.msra.gmra.mxu1 %vm388_vm4, %v3237_v19  ;;  %v3987_v10 = vsel %vm5190_vm3, %v3980_v8, %v3985_v9 }
  0xbc   : > { %4865 = vmatpush3.bf16.msra.mxu1 %v3396_v48  ;;  %4866 = vmatprep.mubr.msk.bf16.mxu1 %vm5068_vm2, %v5067_v2  ;;  %v3856_v19 = vrot.slane %v3849_v16, %v5169_v14  ;;  %v3991_v20 = vcombine.low %v5763_v22, %v3987_v10 }
  0xbd   : > { %4876 = vmatprep.subr.bf16.mxu1 %v5067_v2 }
  0xbe   : > { %v3998_v48 = vrot.slane %v3991_v20, %v5169_v14 }
  0xc0   : > { %v4005_v53 = vrot.slane %v3998_v48, %v5169_v14 }
  0xc1   : > { %4849 = vmatmul.mubr.msk.bf16.vlgmr.msra.gmra.mxu0 %vm388_vm4, %v3167_v28  ;;  %v3936_v28 = vsel %vm392_vm1, %v5023_v27, 0 }
  0xc2   : > { %4859 = vmatpush3.bf16.msra.mxu0 %v3326_v34  ;;  %4860 = vmatprep.mubr.msk.bf16.mxu0 %vm5068_vm2, %v5067_v2  ;;  %v4085_v34 = vsel %vm392_vm1, %v5025_v23, 0  ;;  %vm4143_vm1 = vcmask 74752  }
  0xc3   : > { %4870 = vmatprep.subr.bf16.mxu0 %v5067_v2  ;;  %4867 = vmatmul.mubr.msk.bf16.vlgmr.msra.gmra.mxu1 %vm388_vm4, %v3386_v39  ;;  %v4075_v39 = vrot.slane %v4068_v36, %v5169_v14 }
  0xc4   : > { %4877 = vmatpush3.bf16.msra.mxu1 %v3545_v35  ;;  %4878 = vmatprep.mubr.msk.bf16.mxu1 %vm5068_vm2, %v5067_v2 }
  0xc5   : > { %4888 = vmatprep.subr.bf16.mxu1 %v5067_v2 }
  0xc9   : > { %4861 = vmatmul.mubr.msk.bf16.vlgmr.msra.gmra.mxu0 %vm388_vm4, %v3316_v47 }
  0xca   : > { %4871 = vmatpush3.bf16.msra.mxu0 %v3475_v51  ;;  %4872 = vmatprep.mubr.msk.bf16.mxu0 %vm5068_vm2, %v5067_v2 }
  0xcb   : > { %4882 = vmatprep.subr.bf16.mxu0 %v5067_v2  ;;  %4879 = vmatmul.mubr.msk.bf16.vlgmr.msra.gmra.mxu1 %vm388_vm4, %v3535_v57 }
  0xcc   : > { %4889 = vmatpush3.bf16.msra.mxu1 %v3717_v61  ;;  %4890 = vmatprep.mubr.msk.bf16.mxu1 %vm5068_vm2, %v5067_v2 }
  0xcd   : > { %4900 = vmatprep.subr.bf16.mxu1 %v5067_v2 }
  0xd1   : > { %4873 = vmatmul.mubr.msk.bf16.vlgmr.msra.gmra.mxu0 %vm388_vm4, %v3465_v56 }
  0xd2   : > { %4883 = vmatpush3.bf16.msra.mxu0 %v3616_v63  ;;  %4884 = vmatprep.mubr.msk.bf16.mxu0 %vm5068_vm2, %v5067_v2 }
  0xd3   : > { %4894 = vmatprep.subr.bf16.mxu0 %v5067_v2  ;;  %4891 = vmatmul.mubr.msk.bf16.vlgmr.msra.gmra.mxu1 %vm388_vm4, %v3707_v30 }
  0xd4   : > { %4901 = vmatpush3.bf16.msra.mxu1 %v3866_v13  ;;  %4902 = vmatprep.mubr.msk.bf16.mxu1 %vm5068_vm2, %v5067_v2 }
  0xd5   : > { %4912 = vmatprep.subr.bf16.mxu1 %v5067_v2 }
  0xd9   : > { %4885 = vmatmul.mubr.msk.bf16.vlgmr.msra.gmra.mxu0 %vm388_vm4, %v3606_v24 }
  0xda   : > { %4895 = vmatpush3.bf16.msra.mxu0 %v3787_v17  ;;  %4896 = vmatprep.mubr.msk.bf16.mxu0 %vm5068_vm2, %v5067_v2 }
  0xdb   : > { %4906 = vmatprep.subr.bf16.mxu0 %v5067_v2  ;;  %4903 = vmatmul.mubr.msk.bf16.vlgmr.msra.gmra.mxu1 %vm388_vm4, %v3856_v19 }
  0xdc   : > { %4913 = vmatpush3.bf16.msra.mxu1 %v4015_v25  ;;  %4914 = vmatprep.mubr.msk.bf16.mxu1 %vm5068_vm2, %v5067_v2 }
  0xe1   : > { %4897 = vmatmul.mubr.msk.bf16.vlgmr.msra.gmra.mxu0 %vm388_vm4, %v3777_v26 }
  0xe2   : > { %4907 = vmatpush3.bf16.msra.mxu0 %v3936_v28  ;;  %4908 = vmatprep.mubr.msk.bf16.mxu0 %vm5068_vm2, %v5067_v2 }
  0xe3   : > { %4918 = vmatprep.subr.bf16.mxu0 %v5067_v2  ;;  %4915 = vmatmul.mubr.msk.bf16.vlgmr.msra.gmra.mxu1 %vm388_vm4, %v4005_v53 }
  0xe7   : > { %v496_v62 = vpop.f32.mrf.mxu1 }
  0xe9   : > { %4909 = vmatmul.mubr.msk.bf16.vlgmr.msra.gmra.mxu0 %vm388_vm4, %v3926_v32  ;;  %v4640_v38 = vpop.f32.mrf.mxu1 }
  0xea   : > { %4919 = vmatpush3.bf16.msra.mxu0 %v4085_v34  ;;  %4920 = vmatprep.mubr.msk.bf16.mxu0 %vm5068_vm2, %v5067_v2 }
  0xeb   : > { %v499_v22 = vpop.f32.mrf.mxu1 }
  0xed   : > { %v4641_v40 = vpop.f32.mrf.mxu1 }
  0xf1   : > { %v430_v42 = vpop.f32.mrf.mxu0  ;;  %4921 = vmatmul.mubr.msk.bf16.vlgmr.msra.gmra.mxu0 %vm388_vm4, %v4075_v39 }
  0xf2   : > { %v497_v54 = vadd.f32 %v496_v62, %v430_v42 }
  0xf3   : > { %v4634_v37 = vpop.f32.mrf.mxu0  ;;  %v653_v44 = vpop.f32.mrf.mxu1 }
  0xf5   : > { %v433_v43 = vpop.f32.mrf.mxu0  ;;  %v4652_v47 = vpop.f32.mrf.mxu1 }
  0xf7   : > { %v4635_v35 = vpop.f32.mrf.mxu0  ;;  %v656_v51 = vpop.f32.mrf.mxu1 }
  0xf9   : > { %v565_v31 = vpop.f32.mrf.mxu0  ;;  %v4653_v52 = vpop.f32.mrf.mxu1 }
  0xfa   : > { %v571_v49 = vadd.f32 %v565_v31, %v497_v54 }
  0xfb   : > { %v4646_v0 = vpop.f32.mrf.mxu0  ;;  %v811_v55 = vpop.f32.mrf.mxu1 }
  0xfc   : > { %v659_v2 = vadd.f32 %v653_v44, %v571_v49 }
  0xfd   : > { %v568_v41 = vpop.f32.mrf.mxu0  ;;  %v4664_v57 = vpop.f32.mrf.mxu1 }
  0xff   : > { %v4647_v14 = vpop.f32.mrf.mxu0  ;;  %v814_v59 = vpop.f32.mrf.mxu1 }
 0x101   : > { %v723_v21 = vpop.f32.mrf.mxu0  ;;  %v4665_v56 = vpop.f32.mrf.mxu1 }
 0x102   : > { %v729_v58 = vadd.f32 %v723_v21, %v659_v2 }
 0x103   : > { %v4658_v60 = vpop.f32.mrf.mxu0  ;;  %v952_v1 = vpop.f32.mrf.mxu1 }
 0x104   : > { %v817_v61 = vadd.f32 %v811_v55, %v729_v58 }
 0x105   : > { %v726_v50 = vpop.f32.mrf.mxu0  ;;  %v4676_v45 = vpop.f32.mrf.mxu1 }
 0x107   : > { %v4659_v63 = vpop.f32.mrf.mxu0  ;;  %v955_v4 = vpop.f32.mrf.mxu1 }
 0x109   : > { %v881_v3 = vpop.f32.mrf.mxu0  ;;  %v4677_v6 = vpop.f32.mrf.mxu1 }
 0x10a   : > { %v887_v33 = vadd.f32 %v881_v3, %v817_v61 }
 0x10b   : > { %v4670_v30 = vpop.f32.mrf.mxu0  ;;  %v1123_v9 = vpop.f32.mrf.mxu1 }
 0x10c   : > { %v958_v5 = vadd.f32 %v952_v1, %v887_v33 }
 0x10d   : > { %v884_v8 = vpop.f32.mrf.mxu0  ;;  %v4688_v24 = vpop.f32.mrf.mxu1 }
 0x10f   : > { %v4671_v13 = vpop.f32.mrf.mxu0  ;;  %v1126_v17 = vpop.f32.mrf.mxu1 }
 0x111   : > { %v1053_v12 = vpop.f32.mrf.mxu0  ;;  %v4689_v18 = vpop.f32.mrf.mxu1 }
 0x112   : > { %v1059_v16 = vadd.f32 %v1053_v12, %v958_v5 }
 0x113   : > { %v4682_v10 = vpop.f32.mrf.mxu0  ;;  %v1272_v20 = vpop.f32.mrf.mxu1 }
 0x114   : > { %v1129_v46 = vadd.f32 %v1123_v9, %v1059_v16 }
 0x115   : > { %v1056_v19 = vpop.f32.mrf.mxu0  ;;  %v4700_v25 = vpop.f32.mrf.mxu1 }
 0x117   : > { %v4683_v27 = vpop.f32.mrf.mxu0  ;;  %v1275_v48 = vpop.f32.mrf.mxu1 }
 0x119   : > { %v1202_v26 = vpop.f32.mrf.mxu0  ;;  %v4701_v53 = vpop.f32.mrf.mxu1 }
 0x11a   : > { %v1208_v11 = vadd.f32 %v1202_v26, %v1129_v46 }
 0x11b   : > { %v4694_v28 = vpop.f32.mrf.mxu0  ;;  %v1421_v32 = vpop.f32.mrf.mxu1 }
 0x11c   : > { %v1278_v29 = vadd.f32 %v1272_v20, %v1208_v11 }
 0x11d   : > { %v1205_v23 = vpop.f32.mrf.mxu0  ;;  %v4712_v34 = vpop.f32.mrf.mxu1 }
 0x11f   : > { %v4695_v15 = vpop.f32.mrf.mxu0  ;;  %v1424_v38 = vpop.f32.mrf.mxu1 }
 0x121   : > { %v1351_v36 = vpop.f32.mrf.mxu0  ;;  %v4713_v40 = vpop.f32.mrf.mxu1 }
 0x122   : > { %v1357_v62 = vadd.f32 %v1351_v36, %v1278_v29 }
 0x123   : > { %v4706_v39 = vpop.f32.mrf.mxu0  ;;  %v1593_v54 = vpop.f32.mrf.mxu1 }
 0x124   : > { %v1427_v22 = vadd.f32 %v1421_v32, %v1357_v62 }
 0x125   : > { %v1354_v42 = vpop.f32.mrf.mxu0  ;;  %v4724_v43 = vpop.f32.mrf.mxu1 }
 0x127   : > { %v4707_v37 = vpop.f32.mrf.mxu0  ;;  %v1596_v47 = vpop.f32.mrf.mxu1 }
 0x129   : > { %v1492_v44 = vpop.f32.mrf.mxu0  ;;  %v4725_v51 = vpop.f32.mrf.mxu1 }
 0x12a   : > { %v1498_v35 = vadd.f32 %v1492_v44, %v1427_v22 }
 0x12b   : > { %v4718_v31 = vpop.f32.mrf.mxu0  ;;  %v1742_v2 = vpop.f32.mrf.mxu1 }
 0x12c   : > { %v1599_v49 = vadd.f32 %v1593_v54, %v1498_v35 }
 0x12d   : > { %v1495_v0 = vpop.f32.mrf.mxu0  ;;  %v4736_v41 = vpop.f32.mrf.mxu1 }
 0x12f   : > { %v4719_v52 = vpop.f32.mrf.mxu0  ;;  %v1745_v57 = vpop.f32.mrf.mxu1 }
 0x131   : > { %v1663_v55 = vpop.f32.mrf.mxu0  ;;  %v4737_v59 = vpop.f32.mrf.mxu1 }
 0x132   : > { %v1669_v14 = vadd.f32 %v1663_v55, %v1599_v49 }
 0x133   : > { %v4730_v21 = vpop.f32.mrf.mxu0  ;;  %v1891_v61 = vpop.f32.mrf.mxu1 }
 0x134   : > { %v1748_v58 = vadd.f32 %v1742_v2, %v1669_v14 }
 0x135   : > { %v1666_v60 = vpop.f32.mrf.mxu0  ;;  %v4748_v50 = vpop.f32.mrf.mxu1 }
 0x137   : > { %v4731_v56 = vpop.f32.mrf.mxu0  ;;  %v1894_v45 = vpop.f32.mrf.mxu1 }
 0x139   : > { %v1812_v1 = vpop.f32.mrf.mxu0  ;;  %v4749_v4 = vpop.f32.mrf.mxu1 }
 0x13a   : > { %v1818_v63 = vadd.f32 %v1812_v1, %v1748_v58 }
 0x13b   : > { %v4742_v3 = vpop.f32.mrf.mxu0  ;;  %v2032_v5 = vpop.f32.mrf.mxu1 }
 0x13c   : > { %v1897_v33 = vadd.f32 %v1891_v61, %v1818_v63 }
 0x13d   : > { %v1815_v30 = vpop.f32.mrf.mxu0  ;;  %v4760_v8 = vpop.f32.mrf.mxu1 }
 0x13f   : > { %v4743_v6 = vpop.f32.mrf.mxu0  ;;  %v2035_v13 = vpop.f32.mrf.mxu1 }
 0x141   : > { %v1961_v9 = vpop.f32.mrf.mxu0  ;;  %v4761_v12 = vpop.f32.mrf.mxu1 }
 0x142   : > { %v1967_v42 = vadd.f32 %v1961_v9, %v1897_v33 }
 0x143   : > { %v4754_v24 = vpop.f32.mrf.mxu0  ;;  %v2203_v17 = vpop.f32.mrf.mxu1 }
 0x144   : > { %v2038_v35 = vadd.f32 %v2032_v5, %v1967_v42 }
 0x145   : > { %v1964_v16 = vpop.f32.mrf.mxu0  ;;  %v4772_v46 = vpop.f32.mrf.mxu1 }
 0x147   : > { %v4755_v10 = vpop.f32.mrf.mxu0  ;;  %v2206_v19 = vpop.f32.mrf.mxu1 }
 0x149   : > { %v2133_v18 = vpop.f32.mrf.mxu0  ;;  %v4773_v27 = vpop.f32.mrf.mxu1 }
 0x14a   : > { %v2139_v49 = vadd.f32 %v2133_v18, %v2038_v35 }
 0x14b   : > { %v4766_v20 = vpop.f32.mrf.mxu0  ;;  %v2352_v26 = vpop.f32.mrf.mxu1 }
 0x14c   : > { %v2209_v41 = vadd.f32 %v2203_v17, %v2139_v49 }
 0x14d   : > { %v2136_v25 = vpop.f32.mrf.mxu0  ;;  %v4784_v48 = vpop.f32.mrf.mxu1 }
 0x14f   : > { %v4767_v11 = vpop.f32.mrf.mxu0  ;;  %v2355_v29 = vpop.f32.mrf.mxu1 }
 0x151   : > { %v2282_v28 = vpop.f32.mrf.mxu0  ;;  %v4785_v23 = vpop.f32.mrf.mxu1 }
 0x152   : > { %v2288_v57 = vadd.f32 %v2282_v28, %v2209_v41 }
 0x153   : > { %v4778_v53 = vpop.f32.mrf.mxu0  ;;  %v2501_v15 = vpop.f32.mrf.mxu1 }
 0x154   : > { %v2358_v61 = vadd.f32 %v2352_v26, %v2288_v57 }
 0x155   : > { %v2285_v32 = vpop.f32.mrf.mxu0  ;;  %v4796_v36 = vpop.f32.mrf.mxu1 }
 0x157   : > { %v4779_v34 = vpop.f32.mrf.mxu0  ;;  %v2504_v38 = vpop.f32.mrf.mxu1 }
 0x159   : > { %v2431_v62 = vpop.f32.mrf.mxu0  ;;  %v4797_v22 = vpop.f32.mrf.mxu1 }
 0x15a   : > { %v2437_v1 = vadd.f32 %v2431_v62, %v2358_v61 }
 0x15b   : > { %v4790_v39 = vpop.f32.mrf.mxu0  ;;  %v2673_v54 = vpop.f32.mrf.mxu1 }
 0x15c   : > { %v2507_v4 = vadd.f32 %v2501_v15, %v2437_v1 }
 0x15d   : > { %v2434_v40 = vpop.f32.mrf.mxu0  ;;  %v4808_v43 = vpop.f32.mrf.mxu1 }
 0x15f   : > { %v4791_v37 = vpop.f32.mrf.mxu0  ;;  %v2676_v47 = vpop.f32.mrf.mxu1 }
 0x161   : > { %v2572_v44 = vpop.f32.mrf.mxu0  ;;  %v4809_v51 = vpop.f32.mrf.mxu1 }
 0x162   : > { %v2578_v6 = vadd.f32 %v2572_v44, %v2507_v4 }
 0x163   : > { %v4802_v31 = vpop.f32.mrf.mxu0  ;;  %v2822_v2 = vpop.f32.mrf.mxu1 }
 0x164   : > { %v2679_v12 = vadd.f32 %v2673_v54, %v2578_v6 }
 0x165   : > { %v2575_v0 = vpop.f32.mrf.mxu0  ;;  %v4820_v55 = vpop.f32.mrf.mxu1 }
 0x167   : > { %v4803_v52 = vpop.f32.mrf.mxu0  ;;  %v2825_v21 = vpop.f32.mrf.mxu1 }
 0x169   : > { %v2743_v14 = vpop.f32.mrf.mxu0  ;;  %v4821_v59 = vpop.f32.mrf.mxu1 }
 0x16a   : > { %v2749_v10 = vadd.f32 %v2743_v14, %v2679_v12  ;;  %v5070_v12 = vmov 1983009808  }
 0x16b   : > { %v4814_v58 = vpop.f32.mrf.mxu0  ;;  %v2971_v56 = vpop.f32.mrf.mxu1 }
 0x16c   : > { %v2828_v27 = vadd.f32 %v2822_v2, %v2749_v10 }
 0x16d   : > { %v2746_v60 = vpop.f32.mrf.mxu0  ;;  %v4832_v63 = vpop.f32.mrf.mxu1 }
 0x16f   : > { %v4815_v50 = vpop.f32.mrf.mxu0  ;;  %v2974_v3 = vpop.f32.mrf.mxu1 }
 0x171   : > { %v2892_v45 = vpop.f32.mrf.mxu0  ;;  %v4833_v30 = vpop.f32.mrf.mxu1 }
 0x172   : > { %v2898_v11 = vadd.f32 %v2892_v45, %v2828_v27 }
 0x173   : > { %v4826_v33 = vpop.f32.mrf.mxu0  ;;  %v3112_v8 = vpop.f32.mrf.mxu1 }
 0x174   : > { %v2977_v23 = vadd.f32 %v2971_v56, %v2898_v11 }
 0x175   : > { %v2895_v5 = vpop.f32.mrf.mxu0  ;;  %v4844_v13 = vpop.f32.mrf.mxu1 }
 0x177   : > { %v4827_v9 = vpop.f32.mrf.mxu0  ;;  %v3115_v16 = vpop.f32.mrf.mxu1 }
 0x178   : > { %v4132_v16 = vunpack.c.l.s4 %v5070_v12 }
 0x179   : > { %v3041_v24 = vpop.f32.mrf.mxu0  ;;  %v4845_v46 = vpop.f32.mrf.mxu1 }
 0x17a   : > { %v3047_v34 = vadd.f32 %v3041_v24, %v2977_v23  ;;  %v4133_v27 = vunpack.c.0.s8 %v4132_v16 }
 0x17b   : > { %v4838_v17 = vpop.f32.mrf.mxu0  ;;  %v3283_v19 = vpop.f32.mrf.mxu1 }
 0x17c   : > { %v3118_v22 = vadd.f32 %v3112_v8, %v3047_v34 }
 0x17d   : > { %v3044_v18 = vpop.f32.mrf.mxu0  ;;  %v4856_v25 = vpop.f32.mrf.mxu1 }
 0x17f   : > { %v4839_v20 = vpop.f32.mrf.mxu0  ;;  %v3286_v48 = vpop.f32.mrf.mxu1 }
 0x180   : > { %v4136_v48 = vsub.s32 %v4133_v27, %v5159_v7 }
 0x181   : > { %v3213_v26 = vpop.f32.mrf.mxu0  ;;  %v4857_v29 = vpop.f32.mrf.mxu1 }
 0x182   : > { %v3219_v54 = vadd.f32 %v3213_v26, %v3118_v22 }
 0x183   : > { %v4850_v28 = vpop.f32.mrf.mxu0  ;;  %v3432_v32 = vpop.f32.mrf.mxu1 }
 0x184   : > { %v3289_v47 = vadd.f32 %v3283_v19, %v3219_v54 }
 0x185   : > { %v3216_v53 = vpop.f32.mrf.mxu0  ;;  %v4868_v36 = vpop.f32.mrf.mxu1 }
 0x186   : > { %v4128_v53 = vld [vmem:[%s5144_s9] sm:$0x3] }
 0x187   : > { %v4851_v15 = vpop.f32.mrf.mxu0  ;;  %v3435_v38 = vpop.f32.mrf.mxu1 }
 0x188   : > { %v4129_v15 = vld [vmem:[%s5144_s9 + $0x2] sm:$0x3] }
 0x189   : > { %v3362_v62 = vpop.f32.mrf.mxu0  ;;  %v4869_v40 = vpop.f32.mrf.mxu1 }
 0x18a   : > { %v3368_v51 = vadd.f32 %v3362_v62, %v3289_v47 }
 0x18b   : > { %v4862_v39 = vpop.f32.mrf.mxu0  ;;  %v3581_v37 = vpop.f32.mrf.mxu1 }
 0x18c   : > { %v3438_v55 = vadd.f32 %v3432_v32, %v3368_v51 }
 0x18d   : > { %v3365_v42 = vpop.f32.mrf.mxu0  ;;  %v4880_v44 = vpop.f32.mrf.mxu1 }
 0x18f   : > { %v4863_v43 = vpop.f32.mrf.mxu0  ;;  %v3584_v31 = vpop.f32.mrf.mxu1 }
 0x191   : > { %v3511_v35 = vpop.f32.mrf.mxu0  ;;  %v4881_v0 = vpop.f32.mrf.mxu1 }
 0x192   : > { %v3517_v21 = vadd.f32 %v3511_v35, %v3438_v55 }
 0x193   : > { %v4874_v49 = vpop.f32.mrf.mxu0  ;;  %v3753_v52 = vpop.f32.mrf.mxu1 }
 0x194   : > { %v3587_v56 = vadd.f32 %v3581_v37, %v3517_v21 }
 0x195   : > { %v3514_v2 = vpop.f32.mrf.mxu0  ;;  %v4892_v14 = vpop.f32.mrf.mxu1 }
 0x197   : > { %v4875_v41 = vpop.f32.mrf.mxu0  ;;  %v3756_v58 = vpop.f32.mrf.mxu1 }
 0x199   : > { %v3652_v57 = vpop.f32.mrf.mxu0  ;;  %v4893_v60 = vpop.f32.mrf.mxu1 }
 0x19a   : > { %v3658_v63 = vadd.f32 %v3652_v57, %v3587_v56 }
 0x19b   : > { %v4886_v59 = vpop.f32.mrf.mxu0  ;;  %v3902_v50 = vpop.f32.mrf.mxu1 }
 0x19c   : > { %v3759_v30 = vadd.f32 %v3753_v52, %v3658_v63 }
 0x19d   : > { %v3655_v61 = vpop.f32.mrf.mxu0  ;;  %v4904_v45 = vpop.f32.mrf.mxu1 }
 0x19f   : > { %v4887_v1 = vpop.f32.mrf.mxu0  ;;  %v3905_v33 = vpop.f32.mrf.mxu1 }
 0x1a1   : > { %v3823_v3 = vpop.f32.mrf.mxu0  ;;  %v4905_v5 = vpop.f32.mrf.mxu1 }
 0x1a2   : > { %v3829_v8 = vadd.f32 %v3823_v3, %v3759_v30 }
 0x1a3   : > { %v4898_v4 = vpop.f32.mrf.mxu0  ;;  %v4051_v9 = vpop.f32.mrf.mxu1 }
 0x1a4   : > { %v3908_v10 = vadd.f32 %v3902_v50, %v3829_v8 }
 0x1a5   : > { %v3826_v6 = vpop.f32.mrf.mxu0  ;;  %v4916_v24 = vpop.f32.mrf.mxu1 }
 0x1a7   : > { %v4899_v13 = vpop.f32.mrf.mxu0  ;;  %v4054_v46 = vpop.f32.mrf.mxu1 }
 0x1a9   : > { %v3972_v17 = vpop.f32.mrf.mxu0  ;;  %v4917_v20 = vpop.f32.mrf.mxu1 }
 0x1aa   : > { %v3978_v19 = vadd.f32 %v3972_v17, %v3908_v10 }
 0x1ab   : > { %v4910_v18 = vpop.f32.mrf.mxu0 }
 0x1ac   : > { %v4057_v11 = vadd.f32 %v4051_v9, %v3978_v19 }
 0x1ad   : > { %v3975_v25 = vpop.f32.mrf.mxu0 }
 0x1af   : > { %v4911_v26 = vpop.f32.mrf.mxu0 }
 0x1b1   : > { %v4121_v28 = vpop.f32.mrf.mxu0 }
 0x1b2   : > { %v4127_v29 = vadd.f32 %v4121_v28, %v4057_v11 }
 0x1b3   : > { %v4922_v23 = vpop.f32.mrf.mxu0 }
 0x1b4   : > { %v4137_v32 = vrot.slane %v4127_v29, %v4136_v48 }
 0x1b5   : > { %v4124_v34 = vpop.f32.mrf.mxu0 }
 0x1b6   : > { %v4138_v36 = vcombine.high %v4137_v32, %v4137_v32  ;;  %v4141_v62 = vadd.f32 %v4137_v32, %v4128_v53  ;;  %4149 = sbr.rel (%p4525_p9) target bundleno = 455 (0x1c7), region = 44 }
 0x1b7   : > { %v4923_v38 = vpop.f32.mrf.mxu0 }
 0x1b8   : > { %v4142_v39 = vadd.f32 %v4138_v36, %v4129_v15  ;;  %4144 = vst.msk [vmem:[%s5144_s9] sm:$0x3] %vm4143_vm1, %v4141_v62 }
 0x1ba   : > { %4145 = vst.msk [vmem:[%s5144_s9 + $0x2] sm:$0x3] %vm4143_vm1, %v4142_v39 }
 0x1bb   : > { %v4526_v22 = vld [vmem:[%s5903_s2] ss:$0 sm:$0xff] }
 0x1bc   : > { %v4527_v40 = vld [vmem:[%s5904_s3] ss:$0 sm:$0xff] }
 0x1bf   : > { %v4150_v7 = vld [vmem:[%s5144_s9] sm:$0x3] }
 0x1c0   : > { %v4159_v42 = vmul.f32 %v4526_v22, %v4150_v7 }
 0x1c1   : > { %v4151_v54 = vld [vmem:[%s5144_s9 + $0x2] sm:$0x3] }
 0x1c2   : > { %v4160_v37 = vmul.f32 %v4526_v22, %v4151_v54  ;;  %v4168_v43 = vadd.f32 %v4527_v40, %v4159_v42 }
 0x1c4   : > { %v4169_v44 = vadd.f32 %v4527_v40, %v4160_v37  ;;  %4170 = vst.msk [vmem:[%s5144_s9] sm:$0x3] %vm4143_vm1, %v4168_v43 }
 0x1c6   : > { %4171 = vst.msk [vmem:[%s5144_s9 + $0x2] sm:$0x3] %vm4143_vm1, %v4169_v44 }
 0x1c7 PF: > { %s14_s19 = sadd.s32 1, %s5064_s19   ;;  %s5908_s15 = smov %s5056_s17 }
 0x1c8   : > { %p11_p10 = scmp.ge.s32.totalorder %s14_s19, 58   ;;  %s5909_s16 = smov %s5060_s18 }
 0x1c9   : > { %s5910_s17 = smov %s5913_s20  ;;  %s5911_s18 = smov %s5917_s21 }
 0x1ca   :  { %13 = sbr.rel (!%p11_p10) target bundleno = 3 (0x3), region = 125 }

</bundles_post_ra>
